<compile_context>
chip_gen: v5e
topology: v5e:2x2
jax: 0.10.0
libtpu: 0.0.40
codegen_flags: <defaults>
</compile_context>

<pallas_src>
import jax
import jax.numpy as jnp
from jax.experimental import pallas as pl
from jax.experimental.pallas import tpu as pltpu

_BN_EPS = 1e-5


def _round_up(x, mult):
    return ((x + mult - 1) // mult) * mult


# ----------------------------------------------------------------------------
# In-kernel helpers
# ----------------------------------------------------------------------------
def _conv3x3_from_scratch(src_ref, w9_ref, marg, wp, m):
    """3x3 / stride-1 / pad-1 conv over a VMEM-resident padded-flat feature map.

    src_ref : (Cin, marg + m + marg) bf16 scratch; data at [marg, marg+m), margins zero.
    w9_ref  : (9, Cout, Cin) bf16, BN scale already folded in; tap index t = kh*3 + kw.
    Returns an f32 (Cout, m) accumulator (borders of the padded grid are garbage and must
    be masked by the caller).
    """
    acc = None
    for t in range(9):
        kh, kw = t // 3, t % 3
        off = (kh - 1) * wp + (kw - 1)
        win = src_ref[:, pl.ds(marg + off, m)]                       # (Cin, m) bf16
        part = jnp.dot(w9_ref[t], win, preferred_element_type=jnp.float32)
        acc = part if acc is None else acc + part
    return acc


def _make_stem_kernel(hp, wp, marg):
    """conv1+BN+ReLU  ->  layer1 BasicBlock (identity shortcut), one image per grid step."""
    m = hp * wp

    def kernel(p_ref, wc_ref, bc_ref, w1_ref, b1_ref, w2_ref, b2_ref, mask_ref,
               o_ref, sa_ref, sb_ref):
        mask = mask_ref[...]                                          # (1, m) f32
        sa_ref[...] = jnp.zeros(sa_ref.shape, sa_ref.dtype)
        sb_ref[...] = jnp.zeros(sb_ref.shape, sb_ref.dtype)

        # network conv1 (im2col patches precomputed, K = 27) + folded BN + ReLU
        h0 = jnp.dot(wc_ref[...], p_ref[0], preferred_element_type=jnp.float32)
        h0 = jnp.maximum(h0 + bc_ref[...], 0.0) * mask
        sa_ref[:, pl.ds(marg, m)] = h0.astype(sa_ref.dtype)

        # layer1 block conv1 (in-kernel 9-tap im2col) + BN + ReLU
        h1 = _conv3x3_from_scratch(sa_ref, w1_ref, marg, wp, m)
        h1 = jnp.maximum(h1 + b1_ref[...], 0.0) * mask
        sb_ref[:, pl.ds(marg, m)] = h1.astype(sb_ref.dtype)

        # layer1 block conv2 + BN + identity residual + ReLU
        acc = _conv3x3_from_scratch(sb_ref, w2_ref, marg, wp, m)
        res = sa_ref[:, pl.ds(marg, m)].astype(jnp.float32)
        y = jnp.maximum(acc + b2_ref[...] + res, 0.0) * mask
        o_ref[0] = y.astype(o_ref.dtype)

    return kernel


def _make_block_kernel(hp, wp, marg, cin, has_head, pool_div):
    """BasicBlock with a strided first conv (patches precomputed) and a 1x1-conv shortcut
    taken from the centre tap of the same patches; optionally fuses avg-pool + FC head."""
    m = hp * wp

    def kernel(*refs):
        if has_head:
            (p_ref, w1_ref, b1_ref, w2_ref, b2_ref, wsc_ref, mask_ref,
             fcw_ref, fcb_ref, o_ref, s_ref) = refs
        else:
            (p_ref, w1_ref, b1_ref, w2_ref, b2_ref, wsc_ref, mask_ref,
             o_ref, s_ref) = refs

        mask = mask_ref[...]
        s_ref[...] = jnp.zeros(s_ref.shape, s_ref.dtype)

        patches = p_ref[0]                                            # (9*cin, m) bf16
        # block conv1 (stride handled by the precomputed patches) + folded BN + ReLU
        h1 = jnp.dot(w1_ref[...], patches, preferred_element_type=jnp.float32)
        h1 = jnp.maximum(h1 + b1_ref[...], 0.0) * mask
        # 1x1 stride-2 shortcut: its input is exactly the centre tap (kh=kw=1) of `patches`
        sc = jnp.dot(wsc_ref[...], patches[4 * cin:5 * cin, :],
                     preferred_element_type=jnp.float32)
        s_ref[:, pl.ds(marg, m)] = h1.astype(s_ref.dtype)

        # block conv2 via 9 shifted-window matmuls on the VMEM-resident h1
        acc = _conv3x3_from_scratch(s_ref, w2_ref, marg, wp, m)
        y = jnp.maximum(acc + sc + b2_ref[...], 0.0) * mask           # (Cout, m) f32

        if has_head:
            # global avg-pool (masked borders are zero -> plain lane-sum / pool_div)
            pooled = jnp.sum(y, axis=1, keepdims=True) * (1.0 / pool_div)   # (Cout, 1)
            logits = jnp.dot(fcw_ref[...], pooled,
                             preferred_element_type=jnp.float32) + fcb_ref[...]
            o_ref[0] = logits                                         # (num_classes, 1)
        else:
            o_ref[0] = y.astype(o_ref.dtype)

    return kernel


# ----------------------------------------------------------------------------
# pallas_call wrappers (grid over the batch; weights use constant index maps)
# ----------------------------------------------------------------------------
def _stem_call(patches, wc, bc, w1, b1, w2, b2, mask, hp, wp):
    n, k, m = patches.shape
    cout = wc.shape[0]
    marg = _round_up(wp + 1, 128)
    nt = m + 2 * marg
    return pl.pallas_call(
        _make_stem_kernel(hp, wp, marg),
        out_shape=jax.ShapeDtypeStruct((n, cout, m), jnp.bfloat16),
        grid=(n,),
        in_specs=[
            pl.BlockSpec((1, k, m), lambda i: (i, 0, 0)),
            pl.BlockSpec(wc.shape, lambda i: (0, 0)),
            pl.BlockSpec(bc.shape, lambda i: (0, 0)),
            pl.BlockSpec(w1.shape, lambda i: (0, 0, 0)),
            pl.BlockSpec(b1.shape, lambda i: (0, 0)),
            pl.BlockSpec(w2.shape, lambda i: (0, 0, 0)),
            pl.BlockSpec(b2.shape, lambda i: (0, 0)),
            pl.BlockSpec(mask.shape, lambda i: (0, 0)),
        ],
        out_specs=pl.BlockSpec((1, cout, m), lambda i: (i, 0, 0)),
        scratch_shapes=[pltpu.VMEM((cout, nt), jnp.bfloat16),
                        pltpu.VMEM((cout, nt), jnp.bfloat16)],
        compiler_params=pltpu.CompilerParams(dimension_semantics=("parallel",)),
    )(patches, wc, bc, w1, b1, w2, b2, mask)


def _block_call(patches, w1, b1, w2, b2, wsc, mask, hp, wp, head=None):
    n, k, m = patches.shape
    cout = w1.shape[0]
    cin = wsc.shape[1]
    marg = _round_up(wp + 1, 128)
    nt = m + 2 * marg
    has_head = head is not None
    pool_div = float((hp - 2) * (wp - 2))

    in_specs = [
        pl.BlockSpec((1, k, m), lambda i: (i, 0, 0)),
        pl.BlockSpec(w1.shape, lambda i: (0, 0)),
        pl.BlockSpec(b1.shape, lambda i: (0, 0)),
        pl.BlockSpec(w2.shape, lambda i: (0, 0, 0)),
        pl.BlockSpec(b2.shape, lambda i: (0, 0)),
        pl.BlockSpec(wsc.shape, lambda i: (0, 0)),
        pl.BlockSpec(mask.shape, lambda i: (0, 0)),
    ]
    args = [patches, w1, b1, w2, b2, wsc, mask]
    if has_head:
        fcw, fcb = head
        nc = fcw.shape[0]
        in_specs += [pl.BlockSpec(fcw.shape, lambda i: (0, 0)),
                     pl.BlockSpec(fcb.shape, lambda i: (0, 0))]
        args += [fcw, fcb]
        out_shape = jax.ShapeDtypeStruct((n, nc, 1), jnp.float32)
        out_spec = pl.BlockSpec((1, nc, 1), lambda i: (i, 0, 0))
    else:
        out_shape = jax.ShapeDtypeStruct((n, cout, m), jnp.bfloat16)
        out_spec = pl.BlockSpec((1, cout, m), lambda i: (i, 0, 0))

    return pl.pallas_call(
        _make_block_kernel(hp, wp, marg, cin, has_head, pool_div),
        out_shape=out_shape,
        grid=(n,),
        in_specs=in_specs,
        out_specs=out_spec,
        scratch_shapes=[pltpu.VMEM((cout, nt), jnp.bfloat16)],
        compiler_params=pltpu.CompilerParams(dimension_semantics=("parallel",)),
    )(*args)


# ----------------------------------------------------------------------------
# Tiny XLA glue: first-conv patches, stride-2 tap slabs, interior masks
# ----------------------------------------------------------------------------
def _interior_mask(hp, wp):
    m = jnp.pad(jnp.ones((hp - 2, wp - 2), jnp.float32), ((1, 1), (1, 1)))
    return m.reshape(1, hp * wp)


def _first_conv_patches(x):
    """x: (N, 3, H, W) bf16 -> (N, 27, (H+2)*(W+2)) patches on the padded output grid."""
    n, c, h, w = x.shape
    hp, wp = h + 2, w + 2
    xp2 = jnp.pad(x, ((0, 0), (0, 0), (2, 2), (2, 2)))
    slabs = [xp2[:, :, kh:kh + hp, kw:kw + wp] for kh in range(3) for kw in range(3)]
    p = jnp.stack(slabs, axis=1)                                      # (N, 9, C, hp, wp)
    return p.reshape(n, 9 * c, hp * wp), hp, wp


def _strided_patches(ypad_flat, hp_in, wp_in):
    """ypad_flat: (N, C, hp_in*wp_in) bf16 padded-flat (zero borders) -> 3x3/stride-2
    patches (N, 9C, hp*wp) on the next stage's padded output grid."""
    n, c, _ = ypad_flat.shape
    y = ypad_flat.reshape(n, c, hp_in, wp_in)
    ho, wo = (hp_in - 2) // 2, (wp_in - 2) // 2
    hp, wp = ho + 2, wo + 2
    slabs = [y[:, :, kh:kh + 2 * ho:2, kw:kw + 2 * wo:2]
             for kh in range(3) for kw in range(3)]
    p = jnp.stack(slabs, axis=1)                                      # (N, 9, C, ho, wo)
    p = jnp.pad(p, ((0, 0), (0, 0), (0, 0), (1, 1), (1, 1)))
    return p.reshape(n, 9 * c, hp * wp), hp, wp


# ----------------------------------------------------------------------------
# Parameters: synthetic eval-mode BN folded INTO the bf16 weights (review item)
# ----------------------------------------------------------------------------
def _fold_bn(key, c):
    k1, k2, k3, k4 = jax.random.split(key, 4)
    gamma = 1.0 + 0.1 * jax.random.normal(k1, (c,), jnp.float32)
    beta = 0.1 * jax.random.normal(k2, (c,), jnp.float32)
    mean = 0.1 * jax.random.normal(k3, (c,), jnp.float32)
    var = 1.0 + 0.1 * jax.random.uniform(k4, (c,), jnp.float32)
    scale = gamma / jnp.sqrt(var + _BN_EPS)
    bias = beta - mean * scale
    return scale, bias


def _conv_init(key, cin, cout, k):
    fan = k * k * cin
    return jax.random.normal(key, (cout, cin, k, k), jnp.float32) * (2.0 / fan) ** 0.5


def _pack_gemm(w, scale):
    """(cout, cin, 3, 3) -> (cout, 9*cin) bf16, K index = (kh*3+kw)*cin + ci, BN folded."""
    cout = w.shape[0]
    wf = w * scale[:, None, None, None]
    return jnp.transpose(wf, (0, 2, 3, 1)).reshape(cout, -1).astype(jnp.bfloat16)


def _pack_taps(w, scale):
    """(cout, cin, 3, 3) -> (9, cout, cin) bf16, tap t = kh*3+kw, BN folded."""
    cout, cin = w.shape[0], w.shape[1]
    wf = w * scale[:, None, None, None]
    return jnp.transpose(wf, (2, 3, 0, 1)).reshape(9, cout, cin).astype(jnp.bfloat16)


def init_resnet_params(key, num_classes=10):
    ki = iter(jax.random.split(key, 24))
    p = {}
    # stem: conv1 3->16 + BN1
    w = _conv_init(next(ki), 3, 16, 3)
    s, b = _fold_bn(next(ki), 16)
    p["c1_w"], p["c1_b"] = _pack_gemm(w, s), b.reshape(-1, 1)
    # layer1 block (16->16, stride 1, identity shortcut)
    w = _conv_init(next(ki), 16, 16, 3)
    s, b = _fold_bn(next(ki), 16)
    p["l1_w1"], p["l1_b1"] = _pack_taps(w, s), b.reshape(-1, 1)
    w = _conv_init(next(ki), 16, 16, 3)
    s, b = _fold_bn(next(ki), 16)
    p["l1_w2"], p["l1_b2"] = _pack_taps(w, s), b.reshape(-1, 1)
    # layer2 block (16->32, stride 2, 1x1 conv shortcut)
    w = _conv_init(next(ki), 16, 32, 3)
    s, b = _fold_bn(next(ki), 32)
    p["l2_w1"], p["l2_b1"] = _pack_gemm(w, s), b.reshape(-1, 1)
    w = _conv_init(next(ki), 32, 32, 3)
    s, b2 = _fold_bn(next(ki), 32)
    p["l2_w2"] = _pack_taps(w, s)
    w = _conv_init(next(ki), 16, 32, 1)
    s, bsc = _fold_bn(next(ki), 32)
    p["l2_wsc"] = (w[:, :, 0, 0] * s[:, None]).astype(jnp.bfloat16)
    p["l2_b2"] = (b2 + bsc).reshape(-1, 1)          # merged conv2-BN + shortcut-BN biases
    # layer3 block (32->64, stride 2, 1x1 conv shortcut)
    w = _conv_init(next(ki), 32, 64, 3)
    s, b = _fold_bn(next(ki), 64)
    p["l3_w1"], p["l3_b1"] = _pack_gemm(w, s), b.reshape(-1, 1)
    w = _conv_init(next(ki), 64, 64, 3)
    s, b2 = _fold_bn(next(ki), 64)
    p["l3_w2"] = _pack_taps(w, s)
    w = _conv_init(next(ki), 32, 64, 1)
    s, bsc = _fold_bn(next(ki), 64)
    p["l3_wsc"] = (w[:, :, 0, 0] * s[:, None]).astype(jnp.bfloat16)
    p["l3_b2"] = (b2 + bsc).reshape(-1, 1)
    # head: Linear(64 -> num_classes)
    p["fc_w"] = 0.1 * jax.random.normal(next(ki), (num_classes, 64), jnp.float32)
    p["fc_b"] = (0.1 * jax.random.normal(next(ki), (num_classes,), jnp.float32)
                 ).reshape(-1, 1)
    return p


# ----------------------------------------------------------------------------
# Forward pass: 3 fused pallas_calls
# ----------------------------------------------------------------------------
def _resnet_forward(x, params):
    n = x.shape[0]
    xb = x.astype(jnp.bfloat16)

    # stage 1: conv1 + BN + ReLU and layer1 BasicBlock, fused (32x32, 16 ch)
    p1, hp1, wp1 = _first_conv_patches(xb)
    y1 = _stem_call(p1, params["c1_w"], params["c1_b"],
                    params["l1_w1"], params["l1_b1"],
                    params["l1_w2"], params["l1_b2"],
                    _interior_mask(hp1, wp1), hp1, wp1)

    # stage 2: layer2 BasicBlock (stride-2 first conv + 1x1 shortcut), fused (16x16, 32 ch)
    p2, hp2, wp2 = _strided_patches(y1, hp1, wp1)
    y2 = _block_call(p2, params["l2_w1"], params["l2_b1"],
                     params["l2_w2"], params["l2_b2"], params["l2_wsc"],
                     _interior_mask(hp2, wp2), hp2, wp2)

    # stage 3: layer3 BasicBlock + global avg-pool + FC head, fused (8x8, 64 ch -> logits)
    p3, hp3, wp3 = _strided_patches(y2, hp2, wp2)
    out = _block_call(p3, params["l3_w1"], params["l3_b1"],
                      params["l3_w2"], params["l3_b2"], params["l3_wsc"],
                      _interior_mask(hp3, wp3), hp3, wp3,
                      head=(params["fc_w"], params["fc_b"]))
    return out.reshape(n, -1)                                          # (N, num_classes)


resnet_forward = jax.jit(_resnet_forward)


# ----------------------------------------------------------------------------
if __name__ == "__main__":
    key = jax.random.PRNGKey(0)
    k_params, k_x = jax.random.split(key)
    params = init_resnet_params(k_params, num_classes=10)
    # CIFAR-shaped input (F.avg_pool2d(out, 8) after two stride-2 stages implies 32x32).
    x = jax.random.normal(k_x, (2, 3, 32, 32), jnp.float32)
    logits = resnet_forward(x, params)
    jax.block_until_ready(logits)
    assert logits.shape == (2, 10), logits.shape
    print("KERNEL_OK")
</pallas_src>

<mosaic_0001>
module attributes {stable_mosaic.version = 11 : i64} {
  func.func @kernel(%arg0: i32, %arg1: memref<1x27x1156xbf16, #tpu.memory_space<vmem>>, %arg2: memref<16x27xbf16, #tpu.memory_space<vmem>>, %arg3: memref<16x1xf32, #tpu.memory_space<vmem>>, %arg4: memref<9x16x16xbf16, #tpu.memory_space<vmem>>, %arg5: memref<16x1xf32, #tpu.memory_space<vmem>>, %arg6: memref<9x16x16xbf16, #tpu.memory_space<vmem>>, %arg7: memref<16x1xf32, #tpu.memory_space<vmem>>, %arg8: memref<1x1156xf32, #tpu.memory_space<vmem>>, %arg9: memref<1x16x1156xbf16, #tpu.memory_space<vmem>>, %arg10: memref<16x1412xbf16, #tpu.memory_space<vmem>>, %arg11: memref<16x1412xbf16, #tpu.memory_space<vmem>>) attributes {dimension_semantics = [#tpu.dimension_semantics<parallel>], iteration_bounds = array<i64: 2>, scalar_prefetch = 0 : i64, scratch_operands = 2 : i64, tpu.core_type = #tpu.core_type<tc>, window_params = [{transform_indices = @transform_0, window_bounds = array<i64: 1, 27, 1156>}, {pipeline_mode = #tpu.pipeline_mode<synchronous>, transform_indices = @transform_1, window_bounds = array<i64: 16, 27>}, {pipeline_mode = #tpu.pipeline_mode<synchronous>, transform_indices = @transform_2, window_bounds = array<i64: 16, 1>}, {pipeline_mode = #tpu.pipeline_mode<synchronous>, transform_indices = @transform_3, window_bounds = array<i64: 9, 16, 16>}, {pipeline_mode = #tpu.pipeline_mode<synchronous>, transform_indices = @transform_4, window_bounds = array<i64: 16, 1>}, {pipeline_mode = #tpu.pipeline_mode<synchronous>, transform_indices = @transform_5, window_bounds = array<i64: 9, 16, 16>}, {pipeline_mode = #tpu.pipeline_mode<synchronous>, transform_indices = @transform_6, window_bounds = array<i64: 16, 1>}, {pipeline_mode = #tpu.pipeline_mode<synchronous>, transform_indices = @transform_7, window_bounds = array<i64: 1, 1156>}, {transform_indices = @transform_8, window_bounds = array<i64: 1, 16, 1156>}]} {
    %c0 = arith.constant 0 : index
    %c0_0 = arith.constant 0 : index
    %0 = vector.load %arg8[%c0, %c0_0] : memref<1x1156xf32, #tpu.memory_space<vmem>>, vector<1x1156xf32>
    %cst = arith.constant 0.000000e+00 : bf16
    %1 = vector.broadcast %cst : bf16 to vector<16x1412xbf16>
    %c0_1 = arith.constant 0 : index
    %c0_2 = arith.constant 0 : index
    %2 = vector.load %arg10[%c0_1, %c0_2] : memref<16x1412xbf16, #tpu.memory_space<vmem>>, vector<16x1412xbf16>
    tpu.vector_store %arg10[%c0_1, %c0_2], %1 {strides = array<i32>} : memref<16x1412xbf16, #tpu.memory_space<vmem>>, vector<16x1412xbf16>,
    %cst_3 = arith.constant 0.000000e+00 : bf16
    %3 = vector.broadcast %cst_3 : bf16 to vector<16x1412xbf16>
    %c0_4 = arith.constant 0 : index
    %c0_5 = arith.constant 0 : index
    %4 = vector.load %arg11[%c0_4, %c0_5] : memref<16x1412xbf16, #tpu.memory_space<vmem>>, vector<16x1412xbf16>
    tpu.vector_store %arg11[%c0_4, %c0_5], %3 {strides = array<i32>} : memref<16x1412xbf16, #tpu.memory_space<vmem>>, vector<16x1412xbf16>,
    %c0_6 = arith.constant 0 : index
    %c0_7 = arith.constant 0 : index
    %5 = vector.load %arg2[%c0_6, %c0_7] : memref<16x27xbf16, #tpu.memory_space<vmem>>, vector<16x27xbf16>
    %c0_8 = arith.constant 0 : index
    %c0_9 = arith.constant 0 : index
    %c0_10 = arith.constant 0 : index
    %6 = vector.load %arg1[%c0_8, %c0_9, %c0_10] : memref<1x27x1156xbf16, #tpu.memory_space<vmem>>, vector<1x27x1156xbf16>
    %7 = vector.shape_cast %6 : vector<1x27x1156xbf16> to vector<27x1156xbf16>
    %cst_11 = arith.constant dense<0.000000e+00> : vector<16x1156xf32>
    %8 = tpu.matmul %5, %7, %cst_11 {dimension_numbers = #tpu.dot_dimension_numbers<[1], [0], [0], [1], [0, 0, 1, 1], [], []>} : vector<16x27xbf16>, vector<27x1156xbf16>, vector<16x1156xf32> -> vector<16x1156xf32>
    %c0_12 = arith.constant 0 : index
    %c0_13 = arith.constant 0 : index
    %9 = vector.load %arg3[%c0_12, %c0_13] : memref<16x1xf32, #tpu.memory_space<vmem>>, vector<16x1xf32>
    %10 = vector.broadcast %9 : vector<16x1xf32> to vector<16x1156xf32>
    %11 = arith.addf %8, %10 : vector<16x1156xf32>
    %cst_14 = arith.constant 0.000000e+00 : f32
    %12 = vector.broadcast %cst_14 : f32 to vector<16x1156xf32>
    %13 = arith.maximumf %11, %12 : vector<16x1156xf32>
    %14 = vector.broadcast %0 : vector<1x1156xf32> to vector<16x1156xf32>
    %15 = arith.mulf %13, %14 : vector<16x1156xf32>
    %16 = arith.truncf %15 : vector<16x1156xf32> to vector<16x1156xbf16>
    %c0_15 = arith.constant 0 : index
    %c128 = arith.constant 128 : index
    %17 = vector.load %arg10[%c0_15, %c128] : memref<16x1412xbf16, #tpu.memory_space<vmem>>, vector<16x1156xbf16>
    tpu.vector_store %arg10[%c0_15, %c128], %16 {strides = array<i32>} : memref<16x1412xbf16, #tpu.memory_space<vmem>>, vector<16x1156xbf16>,
    %c0_16 = arith.constant 0 : index
    %c93 = arith.constant 93 : index
    %18 = vector.load %arg10[%c0_16, %c93] : memref<16x1412xbf16, #tpu.memory_space<vmem>>, vector<16x1156xbf16>
    %c0_17 = arith.constant 0 : index
    %c0_18 = arith.constant 0 : index
    %c0_19 = arith.constant 0 : index
    %19 = vector.load %arg4[%c0_17, %c0_18, %c0_19] : memref<9x16x16xbf16, #tpu.memory_space<vmem>>, vector<1x16x16xbf16>
    %20 = vector.shape_cast %19 : vector<1x16x16xbf16> to vector<16x16xbf16>
    %cst_20 = arith.constant dense<0.000000e+00> : vector<16x1156xf32>
    %21 = tpu.matmul %20, %18, %cst_20 {dimension_numbers = #tpu.dot_dimension_numbers<[1], [0], [0], [1], [0, 0, 1, 1], [], []>} : vector<16x16xbf16>, vector<16x1156xbf16>, vector<16x1156xf32> -> vector<16x1156xf32>
    %c0_21 = arith.constant 0 : index
    %c94 = arith.constant 94 : index
    %22 = vector.load %arg10[%c0_21, %c94] : memref<16x1412xbf16, #tpu.memory_space<vmem>>, vector<16x1156xbf16>
    %c1 = arith.constant 1 : index
    %c0_22 = arith.constant 0 : index
    %c0_23 = arith.constant 0 : index
    %23 = vector.load %arg4[%c1, %c0_22, %c0_23] : memref<9x16x16xbf16, #tpu.memory_space<vmem>>, vector<1x16x16xbf16>
    %24 = vector.shape_cast %23 : vector<1x16x16xbf16> to vector<16x16xbf16>
    %cst_24 = arith.constant dense<0.000000e+00> : vector<16x1156xf32>
    %25 = tpu.matmul %24, %22, %cst_24 {dimension_numbers = #tpu.dot_dimension_numbers<[1], [0], [0], [1], [0, 0, 1, 1], [], []>} : vector<16x16xbf16>, vector<16x1156xbf16>, vector<16x1156xf32> -> vector<16x1156xf32>
    %26 = arith.addf %21, %25 : vector<16x1156xf32>
    %c0_25 = arith.constant 0 : index
    %c95 = arith.constant 95 : index
    %27 = vector.load %arg10[%c0_25, %c95] : memref<16x1412xbf16, #tpu.memory_space<vmem>>, vector<16x1156xbf16>
    %c2 = arith.constant 2 : index
    %c0_26 = arith.constant 0 : index
    %c0_27 = arith.constant 0 : index
    %28 = vector.load %arg4[%c2, %c0_26, %c0_27] : memref<9x16x16xbf16, #tpu.memory_space<vmem>>, vector<1x16x16xbf16>
    %29 = vector.shape_cast %28 : vector<1x16x16xbf16> to vector<16x16xbf16>
    %cst_28 = arith.constant dense<0.000000e+00> : vector<16x1156xf32>
    %30 = tpu.matmul %29, %27, %cst_28 {dimension_numbers = #tpu.dot_dimension_numbers<[1], [0], [0], [1], [0, 0, 1, 1], [], []>} : vector<16x16xbf16>, vector<16x1156xbf16>, vector<16x1156xf32> -> vector<16x1156xf32>
    %31 = arith.addf %26, %30 : vector<16x1156xf32>
    %c0_29 = arith.constant 0 : index
    %c127 = arith.constant 127 : index
    %32 = vector.load %arg10[%c0_29, %c127] : memref<16x1412xbf16, #tpu.memory_space<vmem>>, vector<16x1156xbf16>
    %c3 = arith.constant 3 : index
    %c0_30 = arith.constant 0 : index
    %c0_31 = arith.constant 0 : index
    %33 = vector.load %arg4[%c3, %c0_30, %c0_31] : memref<9x16x16xbf16, #tpu.memory_space<vmem>>, vector<1x16x16xbf16>
    %34 = vector.shape_cast %33 : vector<1x16x16xbf16> to vector<16x16xbf16>
    %cst_32 = arith.constant dense<0.000000e+00> : vector<16x1156xf32>
    %35 = tpu.matmul %34, %32, %cst_32 {dimension_numbers = #tpu.dot_dimension_numbers<[1], [0], [0], [1], [0, 0, 1, 1], [], []>} : vector<16x16xbf16>, vector<16x1156xbf16>, vector<16x1156xf32> -> vector<16x1156xf32>
    %36 = arith.addf %31, %35 : vector<16x1156xf32>
    %c0_33 = arith.constant 0 : index
    %c128_34 = arith.constant 128 : index
    %37 = vector.load %arg10[%c0_33, %c128_34] : memref<16x1412xbf16, #tpu.memory_space<vmem>>, vector<16x1156xbf16>
    %c4 = arith.constant 4 : index
    %c0_35 = arith.constant 0 : index
    %c0_36 = arith.constant 0 : index
    %38 = vector.load %arg4[%c4, %c0_35, %c0_36] : memref<9x16x16xbf16, #tpu.memory_space<vmem>>, vector<1x16x16xbf16>
    %39 = vector.shape_cast %38 : vector<1x16x16xbf16> to vector<16x16xbf16>
    %cst_37 = arith.constant dense<0.000000e+00> : vector<16x1156xf32>
    %40 = tpu.matmul %39, %37, %cst_37 {dimension_numbers = #tpu.dot_dimension_numbers<[1], [0], [0], [1], [0, 0, 1, 1], [], []>} : vector<16x16xbf16>, vector<16x1156xbf16>, vector<16x1156xf32> -> vector<16x1156xf32>
    %41 = arith.addf %36, %40 : vector<16x1156xf32>
    %c0_38 = arith.constant 0 : index
    %c129 = arith.constant 129 : index
    %42 = vector.load %arg10[%c0_38, %c129] : memref<16x1412xbf16, #tpu.memory_space<vmem>>, vector<16x1156xbf16>
    %c5 = arith.constant 5 : index
    %c0_39 = arith.constant 0 : index
    %c0_40 = arith.constant 0 : index
    %43 = vector.load %arg4[%c5, %c0_39, %c0_40] : memref<9x16x16xbf16, #tpu.memory_space<vmem>>, vector<1x16x16xbf16>
    %44 = vector.shape_cast %43 : vector<1x16x16xbf16> to vector<16x16xbf16>
    %cst_41 = arith.constant dense<0.000000e+00> : vector<16x1156xf32>
    %45 = tpu.matmul %44, %42, %cst_41 {dimension_numbers = #tpu.dot_dimension_numbers<[1], [0], [0], [1], [0, 0, 1, 1], [], []>} : vector<16x16xbf16>, vector<16x1156xbf16>, vector<16x1156xf32> -> vector<16x1156xf32>
    %46 = arith.addf %41, %45 : vector<16x1156xf32>
    %c0_42 = arith.constant 0 : index
    %c161 = arith.constant 161 : index
    %47 = vector.load %arg10[%c0_42, %c161] : memref<16x1412xbf16, #tpu.memory_space<vmem>>, vector<16x1156xbf16>
    %c6 = arith.constant 6 : index
    %c0_43 = arith.constant 0 : index
    %c0_44 = arith.constant 0 : index
    %48 = vector.load %arg4[%c6, %c0_43, %c0_44] : memref<9x16x16xbf16, #tpu.memory_space<vmem>>, vector<1x16x16xbf16>
    %49 = vector.shape_cast %48 : vector<1x16x16xbf16> to vector<16x16xbf16>
    %cst_45 = arith.constant dense<0.000000e+00> : vector<16x1156xf32>
    %50 = tpu.matmul %49, %47, %cst_45 {dimension_numbers = #tpu.dot_dimension_numbers<[1], [0], [0], [1], [0, 0, 1, 1], [], []>} : vector<16x16xbf16>, vector<16x1156xbf16>, vector<16x1156xf32> -> vector<16x1156xf32>
    %51 = arith.addf %46, %50 : vector<16x1156xf32>
    %c0_46 = arith.constant 0 : index
    %c162 = arith.constant 162 : index
    %52 = vector.load %arg10[%c0_46, %c162] : memref<16x1412xbf16, #tpu.memory_space<vmem>>, vector<16x1156xbf16>
    %c7 = arith.constant 7 : index
    %c0_47 = arith.constant 0 : index
    %c0_48 = arith.constant 0 : index
    %53 = vector.load %arg4[%c7, %c0_47, %c0_48] : memref<9x16x16xbf16, #tpu.memory_space<vmem>>, vector<1x16x16xbf16>
    %54 = vector.shape_cast %53 : vector<1x16x16xbf16> to vector<16x16xbf16>
    %cst_49 = arith.constant dense<0.000000e+00> : vector<16x1156xf32>
    %55 = tpu.matmul %54, %52, %cst_49 {dimension_numbers = #tpu.dot_dimension_numbers<[1], [0], [0], [1], [0, 0, 1, 1], [], []>} : vector<16x16xbf16>, vector<16x1156xbf16>, vector<16x1156xf32> -> vector<16x1156xf32>
    %56 = arith.addf %51, %55 : vector<16x1156xf32>
    %c0_50 = arith.constant 0 : index
    %c163 = arith.constant 163 : index
    %57 = vector.load %arg10[%c0_50, %c163] : memref<16x1412xbf16, #tpu.memory_space<vmem>>, vector<16x1156xbf16>
    %c8 = arith.constant 8 : index
    %c0_51 = arith.constant 0 : index
    %c0_52 = arith.constant 0 : index
    %58 = vector.load %arg4[%c8, %c0_51, %c0_52] : memref<9x16x16xbf16, #tpu.memory_space<vmem>>, vector<1x16x16xbf16>
    %59 = vector.shape_cast %58 : vector<1x16x16xbf16> to vector<16x16xbf16>
    %cst_53 = arith.constant dense<0.000000e+00> : vector<16x1156xf32>
    %60 = tpu.matmul %59, %57, %cst_53 {dimension_numbers = #tpu.dot_dimension_numbers<[1], [0], [0], [1], [0, 0, 1, 1], [], []>} : vector<16x16xbf16>, vector<16x1156xbf16>, vector<16x1156xf32> -> vector<16x1156xf32>
    %61 = arith.addf %56, %60 : vector<16x1156xf32>
    %c0_54 = arith.constant 0 : index
    %c0_55 = arith.constant 0 : index
    %62 = vector.load %arg5[%c0_54, %c0_55] : memref<16x1xf32, #tpu.memory_space<vmem>>, vector<16x1xf32>
    %63 = vector.broadcast %62 : vector<16x1xf32> to vector<16x1156xf32>
    %64 = arith.addf %61, %63 : vector<16x1156xf32>
    %cst_56 = arith.constant 0.000000e+00 : f32
    %65 = vector.broadcast %cst_56 : f32 to vector<16x1156xf32>
    %66 = arith.maximumf %64, %65 : vector<16x1156xf32>
    %67 = vector.broadcast %0 : vector<1x1156xf32> to vector<16x1156xf32>
    %68 = arith.mulf %66, %67 : vector<16x1156xf32>
    %69 = arith.truncf %68 : vector<16x1156xf32> to vector<16x1156xbf16>
    %c0_57 = arith.constant 0 : index
    %c128_58 = arith.constant 128 : index
    %70 = vector.load %arg11[%c0_57, %c128_58] : memref<16x1412xbf16, #tpu.memory_space<vmem>>, vector<16x1156xbf16>
    tpu.vector_store %arg11[%c0_57, %c128_58], %69 {strides = array<i32>} : memref<16x1412xbf16, #tpu.memory_space<vmem>>, vector<16x1156xbf16>,
    %c0_59 = arith.constant 0 : index
    %c93_60 = arith.constant 93 : index
    %71 = vector.load %arg11[%c0_59, %c93_60] : memref<16x1412xbf16, #tpu.memory_space<vmem>>, vector<16x1156xbf16>
    %c0_61 = arith.constant 0 : index
    %c0_62 = arith.constant 0 : index
    %c0_63 = arith.constant 0 : index
    %72 = vector.load %arg6[%c0_61, %c0_62, %c0_63] : memref<9x16x16xbf16, #tpu.memory_space<vmem>>, vector<1x16x16xbf16>
    %73 = vector.shape_cast %72 : vector<1x16x16xbf16> to vector<16x16xbf16>
    %cst_64 = arith.constant dense<0.000000e+00> : vector<16x1156xf32>
    %74 = tpu.matmul %73, %71, %cst_64 {dimension_numbers = #tpu.dot_dimension_numbers<[1], [0], [0], [1], [0, 0, 1, 1], [], []>} : vector<16x16xbf16>, vector<16x1156xbf16>, vector<16x1156xf32> -> vector<16x1156xf32>
    %c0_65 = arith.constant 0 : index
    %c94_66 = arith.constant 94 : index
    %75 = vector.load %arg11[%c0_65, %c94_66] : memref<16x1412xbf16, #tpu.memory_space<vmem>>, vector<16x1156xbf16>
    %c1_67 = arith.constant 1 : index
    %c0_68 = arith.constant 0 : index
    %c0_69 = arith.constant 0 : index
    %76 = vector.load %arg6[%c1_67, %c0_68, %c0_69] : memref<9x16x16xbf16, #tpu.memory_space<vmem>>, vector<1x16x16xbf16>
    %77 = vector.shape_cast %76 : vector<1x16x16xbf16> to vector<16x16xbf16>
    %cst_70 = arith.constant dense<0.000000e+00> : vector<16x1156xf32>
    %78 = tpu.matmul %77, %75, %cst_70 {dimension_numbers = #tpu.dot_dimension_numbers<[1], [0], [0], [1], [0, 0, 1, 1], [], []>} : vector<16x16xbf16>, vector<16x1156xbf16>, vector<16x1156xf32> -> vector<16x1156xf32>
    %79 = arith.addf %74, %78 : vector<16x1156xf32>
    %c0_71 = arith.constant 0 : index
    %c95_72 = arith.constant 95 : index
    %80 = vector.load %arg11[%c0_71, %c95_72] : memref<16x1412xbf16, #tpu.memory_space<vmem>>, vector<16x1156xbf16>
    %c2_73 = arith.constant 2 : index
    %c0_74 = arith.constant 0 : index
    %c0_75 = arith.constant 0 : index
    %81 = vector.load %arg6[%c2_73, %c0_74, %c0_75] : memref<9x16x16xbf16, #tpu.memory_space<vmem>>, vector<1x16x16xbf16>
    %82 = vector.shape_cast %81 : vector<1x16x16xbf16> to vector<16x16xbf16>
    %cst_76 = arith.constant dense<0.000000e+00> : vector<16x1156xf32>
    %83 = tpu.matmul %82, %80, %cst_76 {dimension_numbers = #tpu.dot_dimension_numbers<[1], [0], [0], [1], [0, 0, 1, 1], [], []>} : vector<16x16xbf16>, vector<16x1156xbf16>, vector<16x1156xf32> -> vector<16x1156xf32>
    %84 = arith.addf %79, %83 : vector<16x1156xf32>
    %c0_77 = arith.constant 0 : index
    %c127_78 = arith.constant 127 : index
    %85 = vector.load %arg11[%c0_77, %c127_78] : memref<16x1412xbf16, #tpu.memory_space<vmem>>, vector<16x1156xbf16>
    %c3_79 = arith.constant 3 : index
    %c0_80 = arith.constant 0 : index
    %c0_81 = arith.constant 0 : index
    %86 = vector.load %arg6[%c3_79, %c0_80, %c0_81] : memref<9x16x16xbf16, #tpu.memory_space<vmem>>, vector<1x16x16xbf16>
    %87 = vector.shape_cast %86 : vector<1x16x16xbf16> to vector<16x16xbf16>
    %cst_82 = arith.constant dense<0.000000e+00> : vector<16x1156xf32>
    %88 = tpu.matmul %87, %85, %cst_82 {dimension_numbers = #tpu.dot_dimension_numbers<[1], [0], [0], [1], [0, 0, 1, 1], [], []>} : vector<16x16xbf16>, vector<16x1156xbf16>, vector<16x1156xf32> -> vector<16x1156xf32>
    %89 = arith.addf %84, %88 : vector<16x1156xf32>
    %c0_83 = arith.constant 0 : index
    %c128_84 = arith.constant 128 : index
    %90 = vector.load %arg11[%c0_83, %c128_84] : memref<16x1412xbf16, #tpu.memory_space<vmem>>, vector<16x1156xbf16>
    %c4_85 = arith.constant 4 : index
    %c0_86 = arith.constant 0 : index
    %c0_87 = arith.constant 0 : index
    %91 = vector.load %arg6[%c4_85, %c0_86, %c0_87] : memref<9x16x16xbf16, #tpu.memory_space<vmem>>, vector<1x16x16xbf16>
    %92 = vector.shape_cast %91 : vector<1x16x16xbf16> to vector<16x16xbf16>
    %cst_88 = arith.constant dense<0.000000e+00> : vector<16x1156xf32>
    %93 = tpu.matmul %92, %90, %cst_88 {dimension_numbers = #tpu.dot_dimension_numbers<[1], [0], [0], [1], [0, 0, 1, 1], [], []>} : vector<16x16xbf16>, vector<16x1156xbf16>, vector<16x1156xf32> -> vector<16x1156xf32>
    %94 = arith.addf %89, %93 : vector<16x1156xf32>
    %c0_89 = arith.constant 0 : index
    %c129_90 = arith.constant 129 : index
    %95 = vector.load %arg11[%c0_89, %c129_90] : memref<16x1412xbf16, #tpu.memory_space<vmem>>, vector<16x1156xbf16>
    %c5_91 = arith.constant 5 : index
    %c0_92 = arith.constant 0 : index
    %c0_93 = arith.constant 0 : index
    %96 = vector.load %arg6[%c5_91, %c0_92, %c0_93] : memref<9x16x16xbf16, #tpu.memory_space<vmem>>, vector<1x16x16xbf16>
    %97 = vector.shape_cast %96 : vector<1x16x16xbf16> to vector<16x16xbf16>
    %cst_94 = arith.constant dense<0.000000e+00> : vector<16x1156xf32>
    %98 = tpu.matmul %97, %95, %cst_94 {dimension_numbers = #tpu.dot_dimension_numbers<[1], [0], [0], [1], [0, 0, 1, 1], [], []>} : vector<16x16xbf16>, vector<16x1156xbf16>, vector<16x1156xf32> -> vector<16x1156xf32>
    %99 = arith.addf %94, %98 : vector<16x1156xf32>
    %c0_95 = arith.constant 0 : index
    %c161_96 = arith.constant 161 : index
    %100 = vector.load %arg11[%c0_95, %c161_96] : memref<16x1412xbf16, #tpu.memory_space<vmem>>, vector<16x1156xbf16>
    %c6_97 = arith.constant 6 : index
    %c0_98 = arith.constant 0 : index
    %c0_99 = arith.constant 0 : index
    %101 = vector.load %arg6[%c6_97, %c0_98, %c0_99] : memref<9x16x16xbf16, #tpu.memory_space<vmem>>, vector<1x16x16xbf16>
    %102 = vector.shape_cast %101 : vector<1x16x16xbf16> to vector<16x16xbf16>
    %cst_100 = arith.constant dense<0.000000e+00> : vector<16x1156xf32>
    %103 = tpu.matmul %102, %100, %cst_100 {dimension_numbers = #tpu.dot_dimension_numbers<[1], [0], [0], [1], [0, 0, 1, 1], [], []>} : vector<16x16xbf16>, vector<16x1156xbf16>, vector<16x1156xf32> -> vector<16x1156xf32>
    %104 = arith.addf %99, %103 : vector<16x1156xf32>
    %c0_101 = arith.constant 0 : index
    %c162_102 = arith.constant 162 : index
    %105 = vector.load %arg11[%c0_101, %c162_102] : memref<16x1412xbf16, #tpu.memory_space<vmem>>, vector<16x1156xbf16>
    %c7_103 = arith.constant 7 : index
    %c0_104 = arith.constant 0 : index
    %c0_105 = arith.constant 0 : index
    %106 = vector.load %arg6[%c7_103, %c0_104, %c0_105] : memref<9x16x16xbf16, #tpu.memory_space<vmem>>, vector<1x16x16xbf16>
    %107 = vector.shape_cast %106 : vector<1x16x16xbf16> to vector<16x16xbf16>
    %cst_106 = arith.constant dense<0.000000e+00> : vector<16x1156xf32>
    %108 = tpu.matmul %107, %105, %cst_106 {dimension_numbers = #tpu.dot_dimension_numbers<[1], [0], [0], [1], [0, 0, 1, 1], [], []>} : vector<16x16xbf16>, vector<16x1156xbf16>, vector<16x1156xf32> -> vector<16x1156xf32>
    %109 = arith.addf %104, %108 : vector<16x1156xf32>
    %c0_107 = arith.constant 0 : index
    %c163_108 = arith.constant 163 : index
    %110 = vector.load %arg11[%c0_107, %c163_108] : memref<16x1412xbf16, #tpu.memory_space<vmem>>, vector<16x1156xbf16>
    %c8_109 = arith.constant 8 : index
    %c0_110 = arith.constant 0 : index
    %c0_111 = arith.constant 0 : index
    %111 = vector.load %arg6[%c8_109, %c0_110, %c0_111] : memref<9x16x16xbf16, #tpu.memory_space<vmem>>, vector<1x16x16xbf16>
    %112 = vector.shape_cast %111 : vector<1x16x16xbf16> to vector<16x16xbf16>
    %cst_112 = arith.constant dense<0.000000e+00> : vector<16x1156xf32>
    %113 = tpu.matmul %112, %110, %cst_112 {dimension_numbers = #tpu.dot_dimension_numbers<[1], [0], [0], [1], [0, 0, 1, 1], [], []>} : vector<16x16xbf16>, vector<16x1156xbf16>, vector<16x1156xf32> -> vector<16x1156xf32>
    %114 = arith.addf %109, %113 : vector<16x1156xf32>
    %c0_113 = arith.constant 0 : index
    %c128_114 = arith.constant 128 : index
    %115 = vector.load %arg10[%c0_113, %c128_114] : memref<16x1412xbf16, #tpu.memory_space<vmem>>, vector<16x1156xbf16>
    %116 = arith.extf %115 : vector<16x1156xbf16> to vector<16x1156xf32>
    %c0_115 = arith.constant 0 : index
    %c0_116 = arith.constant 0 : index
    %117 = vector.load %arg7[%c0_115, %c0_116] : memref<16x1xf32, #tpu.memory_space<vmem>>, vector<16x1xf32>
    %118 = vector.broadcast %117 : vector<16x1xf32> to vector<16x1156xf32>
    %119 = arith.addf %114, %118 : vector<16x1156xf32>
    %120 = arith.addf %119, %116 : vector<16x1156xf32>
    %cst_117 = arith.constant 0.000000e+00 : f32
    %121 = vector.broadcast %cst_117 : f32 to vector<16x1156xf32>
    %122 = arith.maximumf %120, %121 : vector<16x1156xf32>
    %123 = vector.broadcast %0 : vector<1x1156xf32> to vector<16x1156xf32>
    %124 = arith.mulf %122, %123 : vector<16x1156xf32>
    %125 = arith.truncf %124 : vector<16x1156xf32> to vector<16x1156xbf16>
    %c0_118 = arith.constant 0 : index
    %c0_119 = arith.constant 0 : index
    %c0_120 = arith.constant 0 : index
    %126 = vector.load %arg9[%c0_118, %c0_119, %c0_120] : memref<1x16x1156xbf16, #tpu.memory_space<vmem>>, vector<1x16x1156xbf16>
    %127 = vector.shape_cast %126 : vector<1x16x1156xbf16> to vector<16x1156xbf16>
    %128 = vector.shape_cast %125 : vector<16x1156xbf16> to vector<1x16x1156xbf16>
    tpu.vector_store %arg9[%c0_118, %c0_119, %c0_120], %128 {strides = array<i32>} : memref<1x16x1156xbf16, #tpu.memory_space<vmem>>, vector<1x16x1156xbf16>,
    return
  }
  func.func @transform_0(%arg0: i32) -> (i32, i32, i32) {
    %c0_i32 = arith.constant 0 : i32
    %c0_i32_0 = arith.constant 0 : i32
    %c0_i32_1 = arith.constant 0 : i32
    return %arg0, %c0_i32, %c0_i32_0 : i32, i32, i32
  }
  func.func @transform_1(%arg0: i32) -> (i32, i32) {
    %c0_i32 = arith.constant 0 : i32
    %c0_i32_0 = arith.constant 0 : i32
    %c0_i32_1 = arith.constant 0 : i32
    return %c0_i32, %c0_i32_0 : i32, i32
  }
  func.func @transform_2(%arg0: i32) -> (i32, i32) {
    %c0_i32 = arith.constant 0 : i32
    %c0_i32_0 = arith.constant 0 : i32
    %c0_i32_1 = arith.constant 0 : i32
    return %c0_i32, %c0_i32_0 : i32, i32
  }
  func.func @transform_3(%arg0: i32) -> (i32, i32, i32) {
    %c0_i32 = arith.constant 0 : i32
    %c0_i32_0 = arith.constant 0 : i32
    %c0_i32_1 = arith.constant 0 : i32
    %c0_i32_2 = arith.constant 0 : i32
    return %c0_i32, %c0_i32_0, %c0_i32_1 : i32, i32, i32
  }
  func.func @transform_4(%arg0: i32) -> (i32, i32) {
    %c0_i32 = arith.constant 0 : i32
    %c0_i32_0 = arith.constant 0 : i32
    %c0_i32_1 = arith.constant 0 : i32
    return %c0_i32, %c0_i32_0 : i32, i32
  }
  func.func @transform_5(%arg0: i32) -> (i32, i32, i32) {
    %c0_i32 = arith.constant 0 : i32
    %c0_i32_0 = arith.constant 0 : i32
    %c0_i32_1 = arith.constant 0 : i32
    %c0_i32_2 = arith.constant 0 : i32
    return %c0_i32, %c0_i32_0, %c0_i32_1 : i32, i32, i32
  }
  func.func @transform_6(%arg0: i32) -> (i32, i32) {
    %c0_i32 = arith.constant 0 : i32
    %c0_i32_0 = arith.constant 0 : i32
    %c0_i32_1 = arith.constant 0 : i32
    return %c0_i32, %c0_i32_0 : i32, i32
  }
  func.func @transform_7(%arg0: i32) -> (i32, i32) {
    %c0_i32 = arith.constant 0 : i32
    %c0_i32_0 = arith.constant 0 : i32
    %c0_i32_1 = arith.constant 0 : i32
    return %c0_i32, %c0_i32_0 : i32, i32
  }
  func.func @transform_8(%arg0: i32) -> (i32, i32, i32) {
    %c0_i32 = arith.constant 0 : i32
    %c0_i32_0 = arith.constant 0 : i32
    %c0_i32_1 = arith.constant 0 : i32
    return %arg0, %c0_i32, %c0_i32_0 : i32, i32, i32
  }
}

module attributes {stable_mosaic.version = 11 : i64} {
  func.func @kernel(%arg0: i32, %arg1: memref<1x144x324xbf16, #tpu.memory_space<vmem>>, %arg2: memref<32x144xbf16, #tpu.memory_space<vmem>>, %arg3: memref<32x1xf32, #tpu.memory_space<vmem>>, %arg4: memref<9x32x32xbf16, #tpu.memory_space<vmem>>, %arg5: memref<32x1xf32, #tpu.memory_space<vmem>>, %arg6: memref<32x16xbf16, #tpu.memory_space<vmem>>, %arg7: memref<1x324xf32, #tpu.memory_space<vmem>>, %arg8: memref<1x32x324xbf16, #tpu.memory_space<vmem>>, %arg9: memref<32x580xbf16, #tpu.memory_space<vmem>>) attributes {dimension_semantics = [#tpu.dimension_semantics<parallel>], iteration_bounds = array<i64: 2>, scalar_prefetch = 0 : i64, scratch_operands = 1 : i64, tpu.core_type = #tpu.core_type<tc>, window_params = [{transform_indices = @transform_0, window_bounds = array<i64: 1, 144, 324>}, {pipeline_mode = #tpu.pipeline_mode<synchronous>, transform_indices = @transform_1, window_bounds = array<i64: 32, 144>}, {pipeline_mode = #tpu.pipeline_mode<synchronous>, transform_indices = @transform_2, window_bounds = array<i64: 32, 1>}, {pipeline_mode = #tpu.pipeline_mode<synchronous>, transform_indices = @transform_3, window_bounds = array<i64: 9, 32, 32>}, {pipeline_mode = #tpu.pipeline_mode<synchronous>, transform_indices = @transform_4, window_bounds = array<i64: 32, 1>}, {pipeline_mode = #tpu.pipeline_mode<synchronous>, transform_indices = @transform_5, window_bounds = array<i64: 32, 16>}, {pipeline_mode = #tpu.pipeline_mode<synchronous>, transform_indices = @transform_6, window_bounds = array<i64: 1, 324>}, {transform_indices = @transform_7, window_bounds = array<i64: 1, 32, 324>}]} {
    %c0 = arith.constant 0 : index
    %c0_0 = arith.constant 0 : index
    %0 = vector.load %arg7[%c0, %c0_0] : memref<1x324xf32, #tpu.memory_space<vmem>>, vector<1x324xf32>
    %cst = arith.constant 0.000000e+00 : bf16
    %1 = vector.broadcast %cst : bf16 to vector<32x580xbf16>
    %c0_1 = arith.constant 0 : index
    %c0_2 = arith.constant 0 : index
    %2 = vector.load %arg9[%c0_1, %c0_2] : memref<32x580xbf16, #tpu.memory_space<vmem>>, vector<32x580xbf16>
    tpu.vector_store %arg9[%c0_1, %c0_2], %1 {strides = array<i32>} : memref<32x580xbf16, #tpu.memory_space<vmem>>, vector<32x580xbf16>,
    %c0_3 = arith.constant 0 : index
    %c0_4 = arith.constant 0 : index
    %c0_5 = arith.constant 0 : index
    %3 = vector.load %arg1[%c0_3, %c0_4, %c0_5] : memref<1x144x324xbf16, #tpu.memory_space<vmem>>, vector<1x144x324xbf16>
    %4 = vector.shape_cast %3 : vector<1x144x324xbf16> to vector<144x324xbf16>
    %c0_6 = arith.constant 0 : index
    %c0_7 = arith.constant 0 : index
    %5 = vector.load %arg2[%c0_6, %c0_7] : memref<32x144xbf16, #tpu.memory_space<vmem>>, vector<32x144xbf16>
    %cst_8 = arith.constant dense<0.000000e+00> : vector<32x324xf32>
    %6 = tpu.matmul %5, %4, %cst_8 {dimension_numbers = #tpu.dot_dimension_numbers<[1], [0], [0], [1], [0, 0, 1, 1], [], []>} : vector<32x144xbf16>, vector<144x324xbf16>, vector<32x324xf32> -> vector<32x324xf32>
    %c0_9 = arith.constant 0 : index
    %c0_10 = arith.constant 0 : index
    %7 = vector.load %arg3[%c0_9, %c0_10] : memref<32x1xf32, #tpu.memory_space<vmem>>, vector<32x1xf32>
    %8 = vector.broadcast %7 : vector<32x1xf32> to vector<32x324xf32>
    %9 = arith.addf %6, %8 : vector<32x324xf32>
    %cst_11 = arith.constant 0.000000e+00 : f32
    %10 = vector.broadcast %cst_11 : f32 to vector<32x324xf32>
    %11 = arith.maximumf %9, %10 : vector<32x324xf32>
    %12 = vector.broadcast %0 : vector<1x324xf32> to vector<32x324xf32>
    %13 = arith.mulf %11, %12 : vector<32x324xf32>
    %c0_12 = arith.constant 0 : index
    %c0_13 = arith.constant 0 : index
    %14 = vector.load %arg6[%c0_12, %c0_13] : memref<32x16xbf16, #tpu.memory_space<vmem>>, vector<32x16xbf16>
    %15 = vector.extract_strided_slice %4 {offsets = [64, 0], sizes = [16, 324], strides = [1, 1]} : vector<144x324xbf16> to vector<16x324xbf16>
    %cst_14 = arith.constant dense<0.000000e+00> : vector<32x324xf32>
    %16 = tpu.matmul %14, %15, %cst_14 {dimension_numbers = #tpu.dot_dimension_numbers<[1], [0], [0], [1], [0, 0, 1, 1], [], []>} : vector<32x16xbf16>, vector<16x324xbf16>, vector<32x324xf32> -> vector<32x324xf32>
    %17 = arith.truncf %13 : vector<32x324xf32> to vector<32x324xbf16>
    %c0_15 = arith.constant 0 : index
    %c128 = arith.constant 128 : index
    %18 = vector.load %arg9[%c0_15, %c128] : memref<32x580xbf16, #tpu.memory_space<vmem>>, vector<32x324xbf16>
    tpu.vector_store %arg9[%c0_15, %c128], %17 {strides = array<i32>} : memref<32x580xbf16, #tpu.memory_space<vmem>>, vector<32x324xbf16>,
    %c0_16 = arith.constant 0 : index
    %c109 = arith.constant 109 : index
    %19 = vector.load %arg9[%c0_16, %c109] : memref<32x580xbf16, #tpu.memory_space<vmem>>, vector<32x324xbf16>
    %c0_17 = arith.constant 0 : index
    %c0_18 = arith.constant 0 : index
    %c0_19 = arith.constant 0 : index
    %20 = vector.load %arg4[%c0_17, %c0_18, %c0_19] : memref<9x32x32xbf16, #tpu.memory_space<vmem>>, vector<1x32x32xbf16>
    %21 = vector.shape_cast %20 : vector<1x32x32xbf16> to vector<32x32xbf16>
    %cst_20 = arith.constant dense<0.000000e+00> : vector<32x324xf32>
    %22 = tpu.matmul %21, %19, %cst_20 {dimension_numbers = #tpu.dot_dimension_numbers<[1], [0], [0], [1], [0, 0, 1, 1], [], []>} : vector<32x32xbf16>, vector<32x324xbf16>, vector<32x324xf32> -> vector<32x324xf32>
    %c0_21 = arith.constant 0 : index
    %c110 = arith.constant 110 : index
    %23 = vector.load %arg9[%c0_21, %c110] : memref<32x580xbf16, #tpu.memory_space<vmem>>, vector<32x324xbf16>
    %c1 = arith.constant 1 : index
    %c0_22 = arith.constant 0 : index
    %c0_23 = arith.constant 0 : index
    %24 = vector.load %arg4[%c1, %c0_22, %c0_23] : memref<9x32x32xbf16, #tpu.memory_space<vmem>>, vector<1x32x32xbf16>
    %25 = vector.shape_cast %24 : vector<1x32x32xbf16> to vector<32x32xbf16>
    %cst_24 = arith.constant dense<0.000000e+00> : vector<32x324xf32>
    %26 = tpu.matmul %25, %23, %cst_24 {dimension_numbers = #tpu.dot_dimension_numbers<[1], [0], [0], [1], [0, 0, 1, 1], [], []>} : vector<32x32xbf16>, vector<32x324xbf16>, vector<32x324xf32> -> vector<32x324xf32>
    %27 = arith.addf %22, %26 : vector<32x324xf32>
    %c0_25 = arith.constant 0 : index
    %c111 = arith.constant 111 : index
    %28 = vector.load %arg9[%c0_25, %c111] : memref<32x580xbf16, #tpu.memory_space<vmem>>, vector<32x324xbf16>
    %c2 = arith.constant 2 : index
    %c0_26 = arith.constant 0 : index
    %c0_27 = arith.constant 0 : index
    %29 = vector.load %arg4[%c2, %c0_26, %c0_27] : memref<9x32x32xbf16, #tpu.memory_space<vmem>>, vector<1x32x32xbf16>
    %30 = vector.shape_cast %29 : vector<1x32x32xbf16> to vector<32x32xbf16>
    %cst_28 = arith.constant dense<0.000000e+00> : vector<32x324xf32>
    %31 = tpu.matmul %30, %28, %cst_28 {dimension_numbers = #tpu.dot_dimension_numbers<[1], [0], [0], [1], [0, 0, 1, 1], [], []>} : vector<32x32xbf16>, vector<32x324xbf16>, vector<32x324xf32> -> vector<32x324xf32>
    %32 = arith.addf %27, %31 : vector<32x324xf32>
    %c0_29 = arith.constant 0 : index
    %c127 = arith.constant 127 : index
    %33 = vector.load %arg9[%c0_29, %c127] : memref<32x580xbf16, #tpu.memory_space<vmem>>, vector<32x324xbf16>
    %c3 = arith.constant 3 : index
    %c0_30 = arith.constant 0 : index
    %c0_31 = arith.constant 0 : index
    %34 = vector.load %arg4[%c3, %c0_30, %c0_31] : memref<9x32x32xbf16, #tpu.memory_space<vmem>>, vector<1x32x32xbf16>
    %35 = vector.shape_cast %34 : vector<1x32x32xbf16> to vector<32x32xbf16>
    %cst_32 = arith.constant dense<0.000000e+00> : vector<32x324xf32>
    %36 = tpu.matmul %35, %33, %cst_32 {dimension_numbers = #tpu.dot_dimension_numbers<[1], [0], [0], [1], [0, 0, 1, 1], [], []>} : vector<32x32xbf16>, vector<32x324xbf16>, vector<32x324xf32> -> vector<32x324xf32>
    %37 = arith.addf %32, %36 : vector<32x324xf32>
    %c0_33 = arith.constant 0 : index
    %c128_34 = arith.constant 128 : index
    %38 = vector.load %arg9[%c0_33, %c128_34] : memref<32x580xbf16, #tpu.memory_space<vmem>>, vector<32x324xbf16>
    %c4 = arith.constant 4 : index
    %c0_35 = arith.constant 0 : index
    %c0_36 = arith.constant 0 : index
    %39 = vector.load %arg4[%c4, %c0_35, %c0_36] : memref<9x32x32xbf16, #tpu.memory_space<vmem>>, vector<1x32x32xbf16>
    %40 = vector.shape_cast %39 : vector<1x32x32xbf16> to vector<32x32xbf16>
    %cst_37 = arith.constant dense<0.000000e+00> : vector<32x324xf32>
    %41 = tpu.matmul %40, %38, %cst_37 {dimension_numbers = #tpu.dot_dimension_numbers<[1], [0], [0], [1], [0, 0, 1, 1], [], []>} : vector<32x32xbf16>, vector<32x324xbf16>, vector<32x324xf32> -> vector<32x324xf32>
    %42 = arith.addf %37, %41 : vector<32x324xf32>
    %c0_38 = arith.constant 0 : index
    %c129 = arith.constant 129 : index
    %43 = vector.load %arg9[%c0_38, %c129] : memref<32x580xbf16, #tpu.memory_space<vmem>>, vector<32x324xbf16>
    %c5 = arith.constant 5 : index
    %c0_39 = arith.constant 0 : index
    %c0_40 = arith.constant 0 : index
    %44 = vector.load %arg4[%c5, %c0_39, %c0_40] : memref<9x32x32xbf16, #tpu.memory_space<vmem>>, vector<1x32x32xbf16>
    %45 = vector.shape_cast %44 : vector<1x32x32xbf16> to vector<32x32xbf16>
    %cst_41 = arith.constant dense<0.000000e+00> : vector<32x324xf32>
    %46 = tpu.matmul %45, %43, %cst_41 {dimension_numbers = #tpu.dot_dimension_numbers<[1], [0], [0], [1], [0, 0, 1, 1], [], []>} : vector<32x32xbf16>, vector<32x324xbf16>, vector<32x324xf32> -> vector<32x324xf32>
    %47 = arith.addf %42, %46 : vector<32x324xf32>
    %c0_42 = arith.constant 0 : index
    %c145 = arith.constant 145 : index
    %48 = vector.load %arg9[%c0_42, %c145] : memref<32x580xbf16, #tpu.memory_space<vmem>>, vector<32x324xbf16>
    %c6 = arith.constant 6 : index
    %c0_43 = arith.constant 0 : index
    %c0_44 = arith.constant 0 : index
    %49 = vector.load %arg4[%c6, %c0_43, %c0_44] : memref<9x32x32xbf16, #tpu.memory_space<vmem>>, vector<1x32x32xbf16>
    %50 = vector.shape_cast %49 : vector<1x32x32xbf16> to vector<32x32xbf16>
    %cst_45 = arith.constant dense<0.000000e+00> : vector<32x324xf32>
    %51 = tpu.matmul %50, %48, %cst_45 {dimension_numbers = #tpu.dot_dimension_numbers<[1], [0], [0], [1], [0, 0, 1, 1], [], []>} : vector<32x32xbf16>, vector<32x324xbf16>, vector<32x324xf32> -> vector<32x324xf32>
    %52 = arith.addf %47, %51 : vector<32x324xf32>
    %c0_46 = arith.constant 0 : index
    %c146 = arith.constant 146 : index
    %53 = vector.load %arg9[%c0_46, %c146] : memref<32x580xbf16, #tpu.memory_space<vmem>>, vector<32x324xbf16>
    %c7 = arith.constant 7 : index
    %c0_47 = arith.constant 0 : index
    %c0_48 = arith.constant 0 : index
    %54 = vector.load %arg4[%c7, %c0_47, %c0_48] : memref<9x32x32xbf16, #tpu.memory_space<vmem>>, vector<1x32x32xbf16>
    %55 = vector.shape_cast %54 : vector<1x32x32xbf16> to vector<32x32xbf16>
    %cst_49 = arith.constant dense<0.000000e+00> : vector<32x324xf32>
    %56 = tpu.matmul %55, %53, %cst_49 {dimension_numbers = #tpu.dot_dimension_numbers<[1], [0], [0], [1], [0, 0, 1, 1], [], []>} : vector<32x32xbf16>, vector<32x324xbf16>, vector<32x324xf32> -> vector<32x324xf32>
    %57 = arith.addf %52, %56 : vector<32x324xf32>
    %c0_50 = arith.constant 0 : index
    %c147 = arith.constant 147 : index
    %58 = vector.load %arg9[%c0_50, %c147] : memref<32x580xbf16, #tpu.memory_space<vmem>>, vector<32x324xbf16>
    %c8 = arith.constant 8 : index
    %c0_51 = arith.constant 0 : index
    %c0_52 = arith.constant 0 : index
    %59 = vector.load %arg4[%c8, %c0_51, %c0_52] : memref<9x32x32xbf16, #tpu.memory_space<vmem>>, vector<1x32x32xbf16>
    %60 = vector.shape_cast %59 : vector<1x32x32xbf16> to vector<32x32xbf16>
    %cst_53 = arith.constant dense<0.000000e+00> : vector<32x324xf32>
    %61 = tpu.matmul %60, %58, %cst_53 {dimension_numbers = #tpu.dot_dimension_numbers<[1], [0], [0], [1], [0, 0, 1, 1], [], []>} : vector<32x32xbf16>, vector<32x324xbf16>, vector<32x324xf32> -> vector<32x324xf32>
    %62 = arith.addf %57, %61 : vector<32x324xf32>
    %63 = arith.addf %62, %16 : vector<32x324xf32>
    %c0_54 = arith.constant 0 : index
    %c0_55 = arith.constant 0 : index
    %64 = vector.load %arg5[%c0_54, %c0_55] : memref<32x1xf32, #tpu.memory_space<vmem>>, vector<32x1xf32>
    %65 = vector.broadcast %64 : vector<32x1xf32> to vector<32x324xf32>
    %66 = arith.addf %63, %65 : vector<32x324xf32>
    %cst_56 = arith.constant 0.000000e+00 : f32
    %67 = vector.broadcast %cst_56 : f32 to vector<32x324xf32>
    %68 = arith.maximumf %66, %67 : vector<32x324xf32>
    %69 = vector.broadcast %0 : vector<1x324xf32> to vector<32x324xf32>
    %70 = arith.mulf %68, %69 : vector<32x324xf32>
    %71 = arith.truncf %70 : vector<32x324xf32> to vector<32x324xbf16>
    %c0_57 = arith.constant 0 : index
    %c0_58 = arith.constant 0 : index
    %c0_59 = arith.constant 0 : index
    %72 = vector.load %arg8[%c0_57, %c0_58, %c0_59] : memref<1x32x324xbf16, #tpu.memory_space<vmem>>, vector<1x32x324xbf16>
    %73 = vector.shape_cast %72 : vector<1x32x324xbf16> to vector<32x324xbf16>
    %74 = vector.shape_cast %71 : vector<32x324xbf16> to vector<1x32x324xbf16>
    tpu.vector_store %arg8[%c0_57, %c0_58, %c0_59], %74 {strides = array<i32>} : memref<1x32x324xbf16, #tpu.memory_space<vmem>>, vector<1x32x324xbf16>,
    return
  }
  func.func @transform_0(%arg0: i32) -> (i32, i32, i32) {
    %c0_i32 = arith.constant 0 : i32
    %c0_i32_0 = arith.constant 0 : i32
    %c0_i32_1 = arith.constant 0 : i32
    return %arg0, %c0_i32, %c0_i32_0 : i32, i32, i32
  }
  func.func @transform_1(%arg0: i32) -> (i32, i32) {
    %c0_i32 = arith.constant 0 : i32
    %c0_i32_0 = arith.constant 0 : i32
    %c0_i32_1 = arith.constant 0 : i32
    return %c0_i32, %c0_i32_0 : i32, i32
  }
  func.func @transform_2(%arg0: i32) -> (i32, i32) {
    %c0_i32 = arith.constant 0 : i32
    %c0_i32_0 = arith.constant 0 : i32
    %c0_i32_1 = arith.constant 0 : i32
    return %c0_i32, %c0_i32_0 : i32, i32
  }
  func.func @transform_3(%arg0: i32) -> (i32, i32, i32) {
    %c0_i32 = arith.constant 0 : i32
    %c0_i32_0 = arith.constant 0 : i32
    %c0_i32_1 = arith.constant 0 : i32
    %c0_i32_2 = arith.constant 0 : i32
    return %c0_i32, %c0_i32_0, %c0_i32_1 : i32, i32, i32
  }
  func.func @transform_4(%arg0: i32) -> (i32, i32) {
    %c0_i32 = arith.constant 0 : i32
    %c0_i32_0 = arith.constant 0 : i32
    %c0_i32_1 = arith.constant 0 : i32
    return %c0_i32, %c0_i32_0 : i32, i32
  }
  func.func @transform_5(%arg0: i32) -> (i32, i32) {
    %c0_i32 = arith.constant 0 : i32
    %c0_i32_0 = arith.constant 0 : i32
    %c0_i32_1 = arith.constant 0 : i32
    return %c0_i32, %c0_i32_0 : i32, i32
  }
  func.func @transform_6(%arg0: i32) -> (i32, i32) {
    %c0_i32 = arith.constant 0 : i32
    %c0_i32_0 = arith.constant 0 : i32
    %c0_i32_1 = arith.constant 0 : i32
    return %c0_i32, %c0_i32_0 : i32, i32
  }
  func.func @transform_7(%arg0: i32) -> (i32, i32, i32) {
    %c0_i32 = arith.constant 0 : i32
    %c0_i32_0 = arith.constant 0 : i32
    %c0_i32_1 = arith.constant 0 : i32
    return %arg0, %c0_i32, %c0_i32_0 : i32, i32, i32
  }
}

module attributes {stable_mosaic.version = 11 : i64} {
  func.func @kernel(%arg0: i32, %arg1: memref<1x288x100xbf16, #tpu.memory_space<vmem>>, %arg2: memref<64x288xbf16, #tpu.memory_space<vmem>>, %arg3: memref<64x1xf32, #tpu.memory_space<vmem>>, %arg4: memref<9x64x64xbf16, #tpu.memory_space<vmem>>, %arg5: memref<64x1xf32, #tpu.memory_space<vmem>>, %arg6: memref<64x32xbf16, #tpu.memory_space<vmem>>, %arg7: memref<1x100xf32, #tpu.memory_space<vmem>>, %arg8: memref<10x64xf32, #tpu.memory_space<vmem>>, %arg9: memref<10x1xf32, #tpu.memory_space<vmem>>, %arg10: memref<1x10x1xf32, #tpu.memory_space<vmem>>, %arg11: memref<64x356xbf16, #tpu.memory_space<vmem>>) attributes {dimension_semantics = [#tpu.dimension_semantics<parallel>], iteration_bounds = array<i64: 2>, scalar_prefetch = 0 : i64, scratch_operands = 1 : i64, tpu.core_type = #tpu.core_type<tc>, window_params = [{transform_indices = @transform_0, window_bounds = array<i64: 1, 288, 100>}, {pipeline_mode = #tpu.pipeline_mode<synchronous>, transform_indices = @transform_1, window_bounds = array<i64: 64, 288>}, {pipeline_mode = #tpu.pipeline_mode<synchronous>, transform_indices = @transform_2, window_bounds = array<i64: 64, 1>}, {pipeline_mode = #tpu.pipeline_mode<synchronous>, transform_indices = @transform_3, window_bounds = array<i64: 9, 64, 64>}, {pipeline_mode = #tpu.pipeline_mode<synchronous>, transform_indices = @transform_4, window_bounds = array<i64: 64, 1>}, {pipeline_mode = #tpu.pipeline_mode<synchronous>, transform_indices = @transform_5, window_bounds = array<i64: 64, 32>}, {pipeline_mode = #tpu.pipeline_mode<synchronous>, transform_indices = @transform_6, window_bounds = array<i64: 1, 100>}, {pipeline_mode = #tpu.pipeline_mode<synchronous>, transform_indices = @transform_7, window_bounds = array<i64: 10, 64>}, {pipeline_mode = #tpu.pipeline_mode<synchronous>, transform_indices = @transform_8, window_bounds = array<i64: 10, 1>}, {transform_indices = @transform_9, window_bounds = array<i64: 1, 10, 1>}]} {
    %c0 = arith.constant 0 : index
    %c0_0 = arith.constant 0 : index
    %0 = vector.load %arg7[%c0, %c0_0] : memref<1x100xf32, #tpu.memory_space<vmem>>, vector<1x100xf32>
    %cst = arith.constant 0.000000e+00 : bf16
    %1 = vector.broadcast %cst : bf16 to vector<64x356xbf16>
    %c0_1 = arith.constant 0 : index
    %c0_2 = arith.constant 0 : index
    %2 = vector.load %arg11[%c0_1, %c0_2] : memref<64x356xbf16, #tpu.memory_space<vmem>>, vector<64x356xbf16>
    tpu.vector_store %arg11[%c0_1, %c0_2], %1 {strides = array<i32>} : memref<64x356xbf16, #tpu.memory_space<vmem>>, vector<64x356xbf16>,
    %c0_3 = arith.constant 0 : index
    %c0_4 = arith.constant 0 : index
    %c0_5 = arith.constant 0 : index
    %3 = vector.load %arg1[%c0_3, %c0_4, %c0_5] : memref<1x288x100xbf16, #tpu.memory_space<vmem>>, vector<1x288x100xbf16>
    %4 = vector.shape_cast %3 : vector<1x288x100xbf16> to vector<288x100xbf16>
    %c0_6 = arith.constant 0 : index
    %c0_7 = arith.constant 0 : index
    %5 = vector.load %arg2[%c0_6, %c0_7] : memref<64x288xbf16, #tpu.memory_space<vmem>>, vector<64x288xbf16>
    %cst_8 = arith.constant dense<0.000000e+00> : vector<64x100xf32>
    %6 = tpu.matmul %5, %4, %cst_8 {dimension_numbers = #tpu.dot_dimension_numbers<[1], [0], [0], [1], [0, 0, 1, 1], [], []>} : vector<64x288xbf16>, vector<288x100xbf16>, vector<64x100xf32> -> vector<64x100xf32>
    %c0_9 = arith.constant 0 : index
    %c0_10 = arith.constant 0 : index
    %7 = vector.load %arg3[%c0_9, %c0_10] : memref<64x1xf32, #tpu.memory_space<vmem>>, vector<64x1xf32>
    %8 = vector.broadcast %7 : vector<64x1xf32> to vector<64x100xf32>
    %9 = arith.addf %6, %8 : vector<64x100xf32>
    %cst_11 = arith.constant 0.000000e+00 : f32
    %10 = vector.broadcast %cst_11 : f32 to vector<64x100xf32>
    %11 = arith.maximumf %9, %10 : vector<64x100xf32>
    %12 = vector.broadcast %0 : vector<1x100xf32> to vector<64x100xf32>
    %13 = arith.mulf %11, %12 : vector<64x100xf32>
    %c0_12 = arith.constant 0 : index
    %c0_13 = arith.constant 0 : index
    %14 = vector.load %arg6[%c0_12, %c0_13] : memref<64x32xbf16, #tpu.memory_space<vmem>>, vector<64x32xbf16>
    %15 = vector.extract_strided_slice %4 {offsets = [128, 0], sizes = [32, 100], strides = [1, 1]} : vector<288x100xbf16> to vector<32x100xbf16>
    %cst_14 = arith.constant dense<0.000000e+00> : vector<64x100xf32>
    %16 = tpu.matmul %14, %15, %cst_14 {dimension_numbers = #tpu.dot_dimension_numbers<[1], [0], [0], [1], [0, 0, 1, 1], [], []>} : vector<64x32xbf16>, vector<32x100xbf16>, vector<64x100xf32> -> vector<64x100xf32>
    %17 = arith.truncf %13 : vector<64x100xf32> to vector<64x100xbf16>
    %c0_15 = arith.constant 0 : index
    %c128 = arith.constant 128 : index
    %18 = vector.load %arg11[%c0_15, %c128] : memref<64x356xbf16, #tpu.memory_space<vmem>>, vector<64x100xbf16>
    tpu.vector_store %arg11[%c0_15, %c128], %17 {strides = array<i32>} : memref<64x356xbf16, #tpu.memory_space<vmem>>, vector<64x100xbf16>,
    %c0_16 = arith.constant 0 : index
    %c117 = arith.constant 117 : index
    %19 = vector.load %arg11[%c0_16, %c117] : memref<64x356xbf16, #tpu.memory_space<vmem>>, vector<64x100xbf16>
    %c0_17 = arith.constant 0 : index
    %c0_18 = arith.constant 0 : index
    %c0_19 = arith.constant 0 : index
    %20 = vector.load %arg4[%c0_17, %c0_18, %c0_19] : memref<9x64x64xbf16, #tpu.memory_space<vmem>>, vector<1x64x64xbf16>
    %21 = vector.shape_cast %20 : vector<1x64x64xbf16> to vector<64x64xbf16>
    %cst_20 = arith.constant dense<0.000000e+00> : vector<64x100xf32>
    %22 = tpu.matmul %21, %19, %cst_20 {dimension_numbers = #tpu.dot_dimension_numbers<[1], [0], [0], [1], [0, 0, 1, 1], [], []>} : vector<64x64xbf16>, vector<64x100xbf16>, vector<64x100xf32> -> vector<64x100xf32>
    %c0_21 = arith.constant 0 : index
    %c118 = arith.constant 118 : index
    %23 = vector.load %arg11[%c0_21, %c118] : memref<64x356xbf16, #tpu.memory_space<vmem>>, vector<64x100xbf16>
    %c1 = arith.constant 1 : index
    %c0_22 = arith.constant 0 : index
    %c0_23 = arith.constant 0 : index
    %24 = vector.load %arg4[%c1, %c0_22, %c0_23] : memref<9x64x64xbf16, #tpu.memory_space<vmem>>, vector<1x64x64xbf16>
    %25 = vector.shape_cast %24 : vector<1x64x64xbf16> to vector<64x64xbf16>
    %cst_24 = arith.constant dense<0.000000e+00> : vector<64x100xf32>
    %26 = tpu.matmul %25, %23, %cst_24 {dimension_numbers = #tpu.dot_dimension_numbers<[1], [0], [0], [1], [0, 0, 1, 1], [], []>} : vector<64x64xbf16>, vector<64x100xbf16>, vector<64x100xf32> -> vector<64x100xf32>
    %27 = arith.addf %22, %26 : vector<64x100xf32>
    %c0_25 = arith.constant 0 : index
    %c119 = arith.constant 119 : index
    %28 = vector.load %arg11[%c0_25, %c119] : memref<64x356xbf16, #tpu.memory_space<vmem>>, vector<64x100xbf16>
    %c2 = arith.constant 2 : index
    %c0_26 = arith.constant 0 : index
    %c0_27 = arith.constant 0 : index
    %29 = vector.load %arg4[%c2, %c0_26, %c0_27] : memref<9x64x64xbf16, #tpu.memory_space<vmem>>, vector<1x64x64xbf16>
    %30 = vector.shape_cast %29 : vector<1x64x64xbf16> to vector<64x64xbf16>
    %cst_28 = arith.constant dense<0.000000e+00> : vector<64x100xf32>
    %31 = tpu.matmul %30, %28, %cst_28 {dimension_numbers = #tpu.dot_dimension_numbers<[1], [0], [0], [1], [0, 0, 1, 1], [], []>} : vector<64x64xbf16>, vector<64x100xbf16>, vector<64x100xf32> -> vector<64x100xf32>
    %32 = arith.addf %27, %31 : vector<64x100xf32>
    %c0_29 = arith.constant 0 : index
    %c127 = arith.constant 127 : index
    %33 = vector.load %arg11[%c0_29, %c127] : memref<64x356xbf16, #tpu.memory_space<vmem>>, vector<64x100xbf16>
    %c3 = arith.constant 3 : index
    %c0_30 = arith.constant 0 : index
    %c0_31 = arith.constant 0 : index
    %34 = vector.load %arg4[%c3, %c0_30, %c0_31] : memref<9x64x64xbf16, #tpu.memory_space<vmem>>, vector<1x64x64xbf16>
    %35 = vector.shape_cast %34 : vector<1x64x64xbf16> to vector<64x64xbf16>
    %cst_32 = arith.constant dense<0.000000e+00> : vector<64x100xf32>
    %36 = tpu.matmul %35, %33, %cst_32 {dimension_numbers = #tpu.dot_dimension_numbers<[1], [0], [0], [1], [0, 0, 1, 1], [], []>} : vector<64x64xbf16>, vector<64x100xbf16>, vector<64x100xf32> -> vector<64x100xf32>
    %37 = arith.addf %32, %36 : vector<64x100xf32>
    %c0_33 = arith.constant 0 : index
    %c128_34 = arith.constant 128 : index
    %38 = vector.load %arg11[%c0_33, %c128_34] : memref<64x356xbf16, #tpu.memory_space<vmem>>, vector<64x100xbf16>
    %c4 = arith.constant 4 : index
    %c0_35 = arith.constant 0 : index
    %c0_36 = arith.constant 0 : index
    %39 = vector.load %arg4[%c4, %c0_35, %c0_36] : memref<9x64x64xbf16, #tpu.memory_space<vmem>>, vector<1x64x64xbf16>
    %40 = vector.shape_cast %39 : vector<1x64x64xbf16> to vector<64x64xbf16>
    %cst_37 = arith.constant dense<0.000000e+00> : vector<64x100xf32>
    %41 = tpu.matmul %40, %38, %cst_37 {dimension_numbers = #tpu.dot_dimension_numbers<[1], [0], [0], [1], [0, 0, 1, 1], [], []>} : vector<64x64xbf16>, vector<64x100xbf16>, vector<64x100xf32> -> vector<64x100xf32>
    %42 = arith.addf %37, %41 : vector<64x100xf32>
    %c0_38 = arith.constant 0 : index
    %c129 = arith.constant 129 : index
    %43 = vector.load %arg11[%c0_38, %c129] : memref<64x356xbf16, #tpu.memory_space<vmem>>, vector<64x100xbf16>
    %c5 = arith.constant 5 : index
    %c0_39 = arith.constant 0 : index
    %c0_40 = arith.constant 0 : index
    %44 = vector.load %arg4[%c5, %c0_39, %c0_40] : memref<9x64x64xbf16, #tpu.memory_space<vmem>>, vector<1x64x64xbf16>
    %45 = vector.shape_cast %44 : vector<1x64x64xbf16> to vector<64x64xbf16>
    %cst_41 = arith.constant dense<0.000000e+00> : vector<64x100xf32>
    %46 = tpu.matmul %45, %43, %cst_41 {dimension_numbers = #tpu.dot_dimension_numbers<[1], [0], [0], [1], [0, 0, 1, 1], [], []>} : vector<64x64xbf16>, vector<64x100xbf16>, vector<64x100xf32> -> vector<64x100xf32>
    %47 = arith.addf %42, %46 : vector<64x100xf32>
    %c0_42 = arith.constant 0 : index
    %c137 = arith.constant 137 : index
    %48 = vector.load %arg11[%c0_42, %c137] : memref<64x356xbf16, #tpu.memory_space<vmem>>, vector<64x100xbf16>
    %c6 = arith.constant 6 : index
    %c0_43 = arith.constant 0 : index
    %c0_44 = arith.constant 0 : index
    %49 = vector.load %arg4[%c6, %c0_43, %c0_44] : memref<9x64x64xbf16, #tpu.memory_space<vmem>>, vector<1x64x64xbf16>
    %50 = vector.shape_cast %49 : vector<1x64x64xbf16> to vector<64x64xbf16>
    %cst_45 = arith.constant dense<0.000000e+00> : vector<64x100xf32>
    %51 = tpu.matmul %50, %48, %cst_45 {dimension_numbers = #tpu.dot_dimension_numbers<[1], [0], [0], [1], [0, 0, 1, 1], [], []>} : vector<64x64xbf16>, vector<64x100xbf16>, vector<64x100xf32> -> vector<64x100xf32>
    %52 = arith.addf %47, %51 : vector<64x100xf32>
    %c0_46 = arith.constant 0 : index
    %c138 = arith.constant 138 : index
    %53 = vector.load %arg11[%c0_46, %c138] : memref<64x356xbf16, #tpu.memory_space<vmem>>, vector<64x100xbf16>
    %c7 = arith.constant 7 : index
    %c0_47 = arith.constant 0 : index
    %c0_48 = arith.constant 0 : index
    %54 = vector.load %arg4[%c7, %c0_47, %c0_48] : memref<9x64x64xbf16, #tpu.memory_space<vmem>>, vector<1x64x64xbf16>
    %55 = vector.shape_cast %54 : vector<1x64x64xbf16> to vector<64x64xbf16>
    %cst_49 = arith.constant dense<0.000000e+00> : vector<64x100xf32>
    %56 = tpu.matmul %55, %53, %cst_49 {dimension_numbers = #tpu.dot_dimension_numbers<[1], [0], [0], [1], [0, 0, 1, 1], [], []>} : vector<64x64xbf16>, vector<64x100xbf16>, vector<64x100xf32> -> vector<64x100xf32>
    %57 = arith.addf %52, %56 : vector<64x100xf32>
    %c0_50 = arith.constant 0 : index
    %c139 = arith.constant 139 : index
    %58 = vector.load %arg11[%c0_50, %c139] : memref<64x356xbf16, #tpu.memory_space<vmem>>, vector<64x100xbf16>
    %c8 = arith.constant 8 : index
    %c0_51 = arith.constant 0 : index
    %c0_52 = arith.constant 0 : index
    %59 = vector.load %arg4[%c8, %c0_51, %c0_52] : memref<9x64x64xbf16, #tpu.memory_space<vmem>>, vector<1x64x64xbf16>
    %60 = vector.shape_cast %59 : vector<1x64x64xbf16> to vector<64x64xbf16>
    %cst_53 = arith.constant dense<0.000000e+00> : vector<64x100xf32>
    %61 = tpu.matmul %60, %58, %cst_53 {dimension_numbers = #tpu.dot_dimension_numbers<[1], [0], [0], [1], [0, 0, 1, 1], [], []>} : vector<64x64xbf16>, vector<64x100xbf16>, vector<64x100xf32> -> vector<64x100xf32>
    %62 = arith.addf %57, %61 : vector<64x100xf32>
    %63 = arith.addf %62, %16 : vector<64x100xf32>
    %c0_54 = arith.constant 0 : index
    %c0_55 = arith.constant 0 : index
    %64 = vector.load %arg5[%c0_54, %c0_55] : memref<64x1xf32, #tpu.memory_space<vmem>>, vector<64x1xf32>
    %65 = vector.broadcast %64 : vector<64x1xf32> to vector<64x100xf32>
    %66 = arith.addf %63, %65 : vector<64x100xf32>
    %cst_56 = arith.constant 0.000000e+00 : f32
    %67 = vector.broadcast %cst_56 : f32 to vector<64x100xf32>
    %68 = arith.maximumf %66, %67 : vector<64x100xf32>
    %69 = vector.broadcast %0 : vector<1x100xf32> to vector<64x100xf32>
    %70 = arith.mulf %68, %69 : vector<64x100xf32>
    %cst_57 = arith.constant dense<0.000000e+00> : vector<64xf32>
    %71 = vector.multi_reduction <add>, %70, %cst_57 [1] : vector<64x100xf32> to vector<64xf32>
    %72 = vector.shape_cast %71 : vector<64xf32> to vector<64x1xf32>
    %cst_58 = arith.constant 1.562500e-02 : f32
    %73 = vector.broadcast %cst_58 : f32 to vector<64x1xf32>
    %74 = arith.mulf %72, %73 : vector<64x1xf32>
    %c0_59 = arith.constant 0 : index
    %c0_60 = arith.constant 0 : index
    %75 = vector.load %arg8[%c0_59, %c0_60] : memref<10x64xf32, #tpu.memory_space<vmem>>, vector<10x64xf32>
    %cst_61 = arith.constant dense<0.000000e+00> : vector<10x1xf32>
    %76 = tpu.matmul %75, %74, %cst_61 {dimension_numbers = #tpu.dot_dimension_numbers<[1], [0], [0], [1], [0, 0, 1, 1], [], []>} : vector<10x64xf32>, vector<64x1xf32>, vector<10x1xf32> -> vector<10x1xf32>
    %c0_62 = arith.constant 0 : index
    %c0_63 = arith.constant 0 : index
    %77 = vector.load %arg9[%c0_62, %c0_63] : memref<10x1xf32, #tpu.memory_space<vmem>>, vector<10x1xf32>
    %78 = arith.addf %76, %77 : vector<10x1xf32>
    %c0_64 = arith.constant 0 : index
    %c0_65 = arith.constant 0 : index
    %c0_66 = arith.constant 0 : index
    %79 = vector.load %arg10[%c0_64, %c0_65, %c0_66] : memref<1x10x1xf32, #tpu.memory_space<vmem>>, vector<1x10x1xf32>
    %80 = vector.shape_cast %79 : vector<1x10x1xf32> to vector<10x1xf32>
    %81 = vector.shape_cast %78 : vector<10x1xf32> to vector<1x10x1xf32>
    tpu.vector_store %arg10[%c0_64, %c0_65, %c0_66], %81 {strides = array<i32>} : memref<1x10x1xf32, #tpu.memory_space<vmem>>, vector<1x10x1xf32>,
    return
  }
  func.func @transform_0(%arg0: i32) -> (i32, i32, i32) {
    %c0_i32 = arith.constant 0 : i32
    %c0_i32_0 = arith.constant 0 : i32
    %c0_i32_1 = arith.constant 0 : i32
    return %arg0, %c0_i32, %c0_i32_0 : i32, i32, i32
  }
  func.func @transform_1(%arg0: i32) -> (i32, i32) {
    %c0_i32 = arith.constant 0 : i32
    %c0_i32_0 = arith.constant 0 : i32
    %c0_i32_1 = arith.constant 0 : i32
    return %c0_i32, %c0_i32_0 : i32, i32
  }
  func.func @transform_2(%arg0: i32) -> (i32, i32) {
    %c0_i32 = arith.constant 0 : i32
    %c0_i32_0 = arith.constant 0 : i32
    %c0_i32_1 = arith.constant 0 : i32
    return %c0_i32, %c0_i32_0 : i32, i32
  }
  func.func @transform_3(%arg0: i32) -> (i32, i32, i32) {
    %c0_i32 = arith.constant 0 : i32
    %c0_i32_0 = arith.constant 0 : i32
    %c0_i32_1 = arith.constant 0 : i32
    %c0_i32_2 = arith.constant 0 : i32
    return %c0_i32, %c0_i32_0, %c0_i32_1 : i32, i32, i32
  }
  func.func @transform_4(%arg0: i32) -> (i32, i32) {
    %c0_i32 = arith.constant 0 : i32
    %c0_i32_0 = arith.constant 0 : i32
    %c0_i32_1 = arith.constant 0 : i32
    return %c0_i32, %c0_i32_0 : i32, i32
  }
  func.func @transform_5(%arg0: i32) -> (i32, i32) {
    %c0_i32 = arith.constant 0 : i32
    %c0_i32_0 = arith.constant 0 : i32
    %c0_i32_1 = arith.constant 0 : i32
    return %c0_i32, %c0_i32_0 : i32, i32
  }
  func.func @transform_6(%arg0: i32) -> (i32, i32) {
    %c0_i32 = arith.constant 0 : i32
    %c0_i32_0 = arith.constant 0 : i32
    %c0_i32_1 = arith.constant 0 : i32
    return %c0_i32, %c0_i32_0 : i32, i32
  }
  func.func @transform_7(%arg0: i32) -> (i32, i32) {
    %c0_i32 = arith.constant 0 : i32
    %c0_i32_0 = arith.constant 0 : i32
    %c0_i32_1 = arith.constant 0 : i32
    return %c0_i32, %c0_i32_0 : i32, i32
  }
  func.func @transform_8(%arg0: i32) -> (i32, i32) {
    %c0_i32 = arith.constant 0 : i32
    %c0_i32_0 = arith.constant 0 : i32
    %c0_i32_1 = arith.constant 0 : i32
    return %c0_i32, %c0_i32_0 : i32, i32
  }
  func.func @transform_9(%arg0: i32) -> (i32, i32, i32) {
    %c0_i32 = arith.constant 0 : i32
    %c0_i32_0 = arith.constant 0 : i32
    %c0_i32_1 = arith.constant 0 : i32
    return %arg0, %c0_i32, %c0_i32_0 : i32, i32, i32
  }
}

</mosaic_0001>

<bundles_post_ra>
// kernel: _resnet_forward.3
= control target key start
LH: loop header
LB: loop body
LE: loop exit
PB: predicated region body
PF: predicated region fallthrough
CT: control target
= control target key end

     0   :  { %s5805_s27 = smov 0   ;;  %s7719_s0 = inlined_call_operand.vmem [shape: bf16[2,27,1156], index: 0, kind: input, shape index: {}]   ;;  %s7720_s1 = inlined_call_operand.vmem [shape: bf16[16,27], index: 1, kind: input, shape index: {}]   ;;  %s7721_s2 = inlined_call_operand.vmem [shape: f32[16,1], index: 2, kind: input, shape index: {}]   ;;  %s7722_s3 = inlined_call_operand.vmem [shape: bf16[9,16,16], index: 3, kind: input, shape index: {}]   ;;  %s7723_s4 = inlined_call_operand.vmem [shape: f32[16,1], index: 4, kind: input, shape index: {}]   ;;  %s7724_s5 = inlined_call_operand.vmem [shape: bf16[9,16,16], index: 5, kind: input, shape index: {}]   ;;  %s7725_s6 = inlined_call_operand.vmem [shape: f32[16,1], index: 6, kind: input, shape index: {}]   ;;  %s7726_s7 = inlined_call_operand.vmem [shape: f32[1,1156], index: 7, kind: input, shape index: {}]   ;;  %s7727_s8 = inlined_call_operand.vmem [shape: bf16[2,16,1156], index: 8, kind: output, shape index: {}]  }
   0x1 LB: > { %s4983_s28 = sadd.s32 4294967295, %s5748_s27   ;;  %p4987_p0 = scmp.ge.s32.totalorder %s5748_s27, 1  ;;  %s5748_s27 = sphi %s5805_s27, %s18_s27  }
   0x2   : > { %p262_p1 = scmp.lt.s32.totalorder %s5748_s27, 3 }
   0x4   : > { %p263_p2 = pnand %p4987_p0, %p262_p1 }
   0x6   : > { %266 = sbr.rel (%p263_p2) target bundleno = 1403 (0x57b), region = 52 }
   0xb   : > { %p296_p3 = scmp.lt.s32.totalorder %s4983_s28, 1  ;;  %vm469_vm0 = vcmask 1044480   ;;  %v358_v0 = vld [vmem:[%s7721_s2] sm:$0xff]  ;;  %v5750_v1 = vmov 0   ;;  %vm470_vm1 = vcmask 1045504   ;;  %v5751_v2 = vmov 65535  }
   0xc   : > { %5739 = vset.pattern.permute.xlu0 %v5750_v1  ;;  %309 = vst [vmem:[#allocation2] sm:$0xff] %v5750_v1  ;;  %5740 = vset.pattern.permute.xlu2 %v5750_v1  ;;  %v471_v3 = vsel %vm469_vm0, 4294967295, %v5751_v2  ;;  %v359_v5 = vld [vmem:[%s7721_s2 + $0x8] sm:$0xff]  ;;  %v5868_v40 = vld [vmem:[%s7720_s1] sm:$0xff]  ;;  %vm465_vm2 = vcmask 220160   ;;  %s5752_s17 = smov 34  }
   0xd   : > { %s7809_s28 = smov (!%p296_p3, %s4983_s28), 1  ;;  %310 = vst [vmem:[#allocation2 + $0x8] sm:$0xff] %v5750_v1  ;;  %362 = vperm.xlu0 %5739, %v358_v0   ;;  %5741 = vset.pattern.permute.xlu1 %v5750_v1  ;;  %v5831_v4 = vsel %vm470_vm1, %v471_v3, 0  ;;  %vm314_vm3 = vcmask 1043456   ;;  %vm315_vm4 = vcmask 31748   ;;  %s5753_s22 = smov 35  }
   0xe   : > { %s5719_s9 = smul.u32 160, %s7809_s28  ;;  %311 = vst [vmem:[#allocation2 + $0x10] sm:$0xff] %v5750_v1  ;;  %vm5959_vm5 = vmor %vm315_vm4, %vm314_vm3  ;;  %s5754_s23 = smov 33   ;;  %vm805_vm6 = vcmask 277504   ;;  %vm825_vm7 = vcmask 130048   ;;  %vm994_vm8 = vcmask 285696  }
   0xf   : > { %312 = vst [vmem:[#allocation2 + $0x18] sm:$0xff] %v5750_v1  ;;  %s5755_s24 = smov 1   ;;  %s5756_s29 = smov 127   ;;  %vm1185_vm9 = vcmask 269312   ;;  %vm1455_vm10 = vcmask 7168   ;;  %vm1898_vm11 = vcmask 1039360  }
  0x10   : > { %s5829_s12 = scalar_lea.vmem %s7719_s0, %s5719_s9  ;;  %313 = vst [vmem:[#allocation2 + $0x20] sm:$0xff] %v5750_v1  ;;  %s5757_s30 = smov 95   ;;  %vm2109_vm12 = vcmask 777216   ;;  %vm2320_vm13 = vcmask 769024   ;;  %vm2531_vm14 = vcmask 760832  }
  0x11   : > { %v5036_v6 = vld [vmem:[%s5829_s12 + $0x50] sm:$0xf]  ;;  %v5634_v7 = vld [vmem:[%s5829_s12 + $0x74] sm:$0x30]  ;;  %v5629_v8 = vld [vmem:[%s5829_s12 + $0x54] sm:$0xf] }
  0x12   : > { %v5037_v9 = vor.u32 %v5634_v7, %v5036_v6  ;;  %v5038_v10 = vld [vmem:[%s5829_s12 + $0x78] sm:$0x30]  ;;  %v5044_v11 = vld [vmem:[%s5829_s12 + $0x58] sm:$0xf]  ;;  %v5635_v12 = vld [vmem:[%s5829_s12 + $0x7c] sm:$0x30] }
  0x13   : > { %v5041_v13 = vor.u32 %v5629_v8, %v5038_v10  ;;  %v5045_v14 = vor.u32 %v5635_v12, %v5044_v11  ;;  %v5630_v15 = vld [vmem:[%s5829_s12 + $0x5c] sm:$0xf]  ;;  %v5046_v16 = vld [vmem:[%s5829_s12 + $0x80] sm:$0x30]  ;;  %v4996_v17 = vld [vmem:[%s5829_s12] sm:$0xf] }
  0x14   : > { %v474_v18 = vand.u32 %v5037_v9, %v5831_v4  ;;  %v5049_v19 = vor.u32 %v5630_v15, %v5046_v16  ;;  %v5624_v20 = vld [vmem:[%s5829_s12 + $0x24] sm:$0xf0]  ;;  %v5619_v21 = vld [vmem:[%s5829_s12 + $0x4] sm:$0xf]  ;;  %v4998_v22 = vld [vmem:[%s5829_s12 + $0x28] sm:$0xf0] }
  0x15   : > { %v477_v23 = vand.u32 %v5041_v13, %v5831_v4  ;;  %v480_v24 = vand.u32 %v5045_v14, %v5831_v4  ;;  %v5004_v25 = vld [vmem:[%s5829_s12 + $0x8] sm:$0xf]  ;;  %v5625_v26 = vld [vmem:[%s5829_s12 + $0x2c] sm:$0xf0]  ;;  %v5620_v27 = vld [vmem:[%s5829_s12 + $0xc] sm:$0xf]  ;;  %367 = vperm.xlu0 %5739, %v359_v5   ;;  %v4997_v29 = vor.u32 %v5624_v20, %v4996_v17  ;;  %v5001_v32 = vor.u32 %v5619_v21, %v4998_v22 }
  0x16   : > { %509 = vmatpush.bf16.msra.mxu0 %v474_v18  ;;  %v483_v28 = vand.u32 %v5049_v19, %v5831_v4  ;;  %v5006_v30 = vld [vmem:[%s5829_s12 + $0x30] sm:$0xf0]  ;;  %318 = vst [vmem:[#allocation2 + $0x30] sm:$0xff] %v5750_v1  ;;  %v5052_v31 = vld [vmem:[%s5829_s12 + $0x60] sm:$0xf]  ;;  %v5005_v33 = vor.u32 %v5625_v26, %v5004_v25  ;;  %s5758_s11 = smov 94  }
  0x17   : > { %523 = vmatpush.bf16.msra.mxu1 %v477_v23  ;;  %537 = vmatpush.bf16.msra.mxu2 %v480_v24  ;;  %319 = vst [vmem:[#allocation2 + $0x38] sm:$0xff] %v5750_v1  ;;  %v5636_v34 = vld [vmem:[%s5829_s12 + $0x84] sm:$0x30]  ;;  %v5631_v35 = vld [vmem:[%s5829_s12 + $0x64] sm:$0xf]  ;;  %v5009_v36 = vor.u32 %v5620_v27, %v5006_v30 }
  0x18   : > { %551 = vmatpush.bf16.msra.mxu3 %v483_v28  ;;  %320 = vst [vmem:[#allocation2 + $0x40] sm:$0xff] %v5750_v1  ;;  %v5053_v37 = vor.u32 %v5636_v34, %v5052_v31  ;;  %v5054_v38 = vld [vmem:[%s5829_s12 + $0x88] sm:$0x30]  ;;  %v5060_v39 = vld [vmem:[%s5829_s12 + $0x68] sm:$0xf]  ;;  %v5936_v18 = vld [vmem:[%s7726_s7] sm:$0xff] }
  0x19   : > { %321 = vst [vmem:[#allocation2 + $0x48] sm:$0xff] %v5750_v1  ;;  %v5057_v41 = vor.u32 %v5631_v35, %v5054_v38  ;;  %v5637_v42 = vld [vmem:[%s5829_s12 + $0x8c] sm:$0x30]  ;;  %v5632_v43 = vld [vmem:[%s5829_s12 + $0x6c] sm:$0xf]  ;;  %v5940_v21 = vperm.slane %v5936_v18, 0 }
  0x1a   : > { %510 = vmatpush.bf16.msra.mxu0 %v4997_v29  ;;  %322 = vst [vmem:[#allocation2 + $0x50] sm:$0xff] %v5750_v1  ;;  %v486_v44 = vand.u32 %v5053_v37, %v5831_v4  ;;  %v5061_v45 = vor.u32 %v5637_v42, %v5060_v39  ;;  %v5062_v46 = vld [vmem:[%s5829_s12 + $0x90] sm:$0x30]  ;;  %v5012_v47 = vld [vmem:[%s5829_s12 + $0x10] sm:$0xf]  ;;  %v5944_v24 = vperm.slane %v5936_v18, 1 }
  0x1b   : > { %524 = vmatpush.bf16.msra.mxu1 %v5001_v32  ;;  %538 = vmatpush.bf16.msra.mxu2 %v5005_v33  ;;  %324 = vst [vmem:[#allocation3] sm:$0xff] %v5750_v1  ;;  %v489_v48 = vand.u32 %v5057_v41, %v5831_v4  ;;  %v5065_v49 = vor.u32 %v5632_v43, %v5062_v46  ;;  %v5626_v50 = vld [vmem:[%s5829_s12 + $0x34] sm:$0xf0]  ;;  %v5621_v51 = vld [vmem:[%s5829_s12 + $0x14] sm:$0xf]  ;;  %v5951_v31 = vperm.slane %v5936_v18, 2 }
  0x1c   : > { %552 = vmatpush.bf16.msra.mxu3 %v5009_v36  ;;  %325 = vst [vmem:[#allocation3 + $0x8] sm:$0xff] %v5750_v1  ;;  %v492_v52 = vand.u32 %v5061_v45, %v5831_v4  ;;  %v5013_v53 = vor.u32 %v5626_v50, %v5012_v47  ;;  %v5014_v54 = vld [vmem:[%s5829_s12 + $0x38] sm:$0xf0]  ;;  %v5020_v55 = vld [vmem:[%s5829_s12 + $0x18] sm:$0xf]  ;;  %v5956_v37 = vperm.slane %v5936_v18, 3 }
  0x1d   : > { %5074 = vmatmul.msk.bf16.vlgmr.msra.gmra.mxu0 %vm465_vm2, %v5868_v40  ;;  %326 = vst [vmem:[#allocation3 + $0x10] sm:$0xff] %v5750_v1  ;;  %v495_v56 = vand.u32 %v5065_v49, %v5831_v4  ;;  %v5017_v57 = vor.u32 %v5621_v51, %v5014_v54  ;;  %v5627_v58 = vld [vmem:[%s5829_s12 + $0x3c] sm:$0xf0]  ;;  %v5622_v59 = vld [vmem:[%s5829_s12 + $0x1c] sm:$0xf] }
  0x1e   : > { %565 = vmatpush.bf16.msrb.mxu0 %v486_v44  ;;  %5075 = vmatmul.msk.bf16.vlgmr.msra.gmra.mxu1 %vm465_vm2, %v5868_v40  ;;  %327 = vst [vmem:[#allocation3 + $0x18] sm:$0xff] %v5750_v1  ;;  %v5022_v60 = vld [vmem:[%s5829_s12 + $0x40] sm:$0xf0]  ;;  %v5068_v61 = vld [vmem:[%s5829_s12 + $0x70] sm:$0xf]  ;;  %v5021_v62 = vor.u32 %v5627_v58, %v5020_v55  ;;  %v5984_v58 = vperm.slane %v5936_v18, 4 }
  0x1f   : > { %579 = vmatpush.bf16.msrb.mxu1 %v489_v48  ;;  %5076 = vmatmul.msk.bf16.vlgmr.msra.gmra.mxu2 %vm465_vm2, %v5868_v40  ;;  %328 = vst [vmem:[#allocation3 + $0x20] sm:$0xff] %v5750_v1  ;;  %v5638_v63 = vld [vmem:[%s5829_s12 + $0x94] sm:$0x30]  ;;  %v5633_v0 = vld [vmem:[%s5829_s12 + $0x74] sm:$0xf]  ;;  %v5025_v2 = vor.u32 %v5622_v59, %v5022_v60 }
  0x20   : > { %5077 = vmatmul.msk.bf16.vlgmr.msra.gmra.mxu3 %vm465_vm2, %v5868_v40  ;;  %593 = vmatpush.bf16.msrb.mxu2 %v492_v52  ;;  %330 = vst [vmem:[#allocation3 + $0x30] sm:$0xff] %v5750_v1  ;;  %v5069_v3 = vor.u32 %v5638_v63, %v5068_v61  ;;  %v5070_v5 = vld [vmem:[%s5829_s12 + $0x98] sm:$0x30]  ;;  %v5028_v7 = vld [vmem:[%s5829_s12 + $0x20] sm:$0xf]  ;;  %v5988_v61 = vperm.slane %v5936_v18, 5 }
  0x21   : > { %607 = vmatpush.bf16.msrb.mxu3 %v495_v56  ;;  %331 = vst [vmem:[#allocation3 + $0x38] sm:$0xff] %v5750_v1  ;;  %v5073_v6 = vor.u32 %v5633_v0, %v5070_v5  ;;  %v5628_v8 = vld [vmem:[%s5829_s12 + $0x44] sm:$0xf0]  ;;  %v5623_v10 = vld [vmem:[%s5829_s12 + $0x24] sm:$0xf] }
  0x22   : > { %566 = vmatpush.bf16.msrb.mxu0 %v5013_v53  ;;  %332 = vst [vmem:[#allocation3 + $0x40] sm:$0xff] %v5750_v1  ;;  %v498_v9 = vand.u32 %v5069_v3, %v5831_v4  ;;  %v5030_v11 = vld [vmem:[%s5829_s12 + $0x48] sm:$0xf0]  ;;  %v5029_v13 = vor.u32 %v5628_v8, %v5028_v7  ;;  %v5644_v15 = vld [vmem:[#allocation2 + $0x2c] sm:$0xf0]  ;;  %s5759_s12 = smov 93  }
  0x23   : > { %580 = vmatpush.bf16.msrb.mxu1 %v5017_v57  ;;  %333 = vst [vmem:[#allocation3 + $0x48] sm:$0xff] %v5750_v1  ;;  %v501_v12 = vand.u32 %v5073_v6, %v5831_v4  ;;  %v5033_v14 = vor.u32 %v5623_v10, %v5030_v11  ;;  %v5092_v4 = vld [vmem:[#allocation2] sm:$0xf]  ;;  %v5996_v11 = vperm.slane %v5936_v18, 6 }
  0x24   : > { %594 = vmatpush.bf16.msrb.mxu2 %v5021_v62  ;;  %334 = vst [vmem:[#allocation3 + $0x50] sm:$0xff] %v5750_v1  ;;  %v5927_v16 = vor.u32 %v5644_v15, %v5092_v4 }
  0x25   : > { %608 = vmatpush.bf16.msrb.mxu3 %v5025_v2  ;;  %317 = vst.msk [vmem:[#allocation2 + $0x28] sm:$0xff] %vm5959_vm5, %v5750_v1 }
  0x26   : > { %621 = vmatpush.bf16.msra.mxu0 %v498_v9  ;;  %785 = vrot.lane.b32.xlu1 %v5927_v16, %s5752_s17  ;;  %323 = vst.msk [vmem:[#allocation2 + $0x58] sm:$0xff] %vm5959_vm5, %v5750_v1 }
  0x27   : > { %635 = vmatpush.bf16.msra.mxu1 %v501_v12  ;;  %329 = vst.msk [vmem:[#allocation3 + $0x28] sm:$0xff] %vm5959_vm5, %v5750_v1 }
  0x28   : > { %335 = vst.msk [vmem:[#allocation3 + $0x58] sm:$0xff] %vm5959_vm5, %v5750_v1 }
  0x29   : > { %7749 = vst [vmem:[#allocation5_spill] sm:$0xff] %v5984_v58 }
  0x2a   : > { %622 = vmatpush.bf16.msra.mxu0 %v5029_v13  ;;  %7750 = vst [vmem:[#allocation6_spill] sm:$0xff] %v5988_v61 }
  0x2b   : > { %636 = vmatpush.bf16.msra.mxu1 %v5033_v14  ;;  %7751 = vst [vmem:[#allocation7_spill] sm:$0xff] %v5996_v11 }
  0x2d   : > { %5078 = vmatmul.msk.bf16.vlgmr.msrb.gmra.mxu0 %vm465_vm2, %v5868_v40 }
  0x2e   : > { %5079 = vmatmul.msk.bf16.vlgmr.msrb.gmra.mxu1 %vm465_vm2, %v5868_v40 }
  0x2f   : > { %5080 = vmatmul.msk.bf16.vlgmr.msrb.gmra.mxu2 %vm465_vm2, %v5868_v40 }
  0x30   : > { %5081 = vmatmul.msk.bf16.vlgmr.msrb.gmra.mxu3 %vm465_vm2, %v5868_v40 }
  0x3d   : > { %5082 = vmatmul.msk.bf16.vlgmr.msra.gmra.mxu0 %vm465_vm2, %v5868_v40 }
  0x3e   : > { %5083 = vmatmul.msk.bf16.vlgmr.msra.gmra.mxu1 %vm465_vm2, %v5868_v40  ;;  %v7746_v40 = vmov 0 }
  0x3f   : > { %v7747_v40 = vsel %vm5959_vm5, 4294967295, %v7746_v40 }
  0x40   : > { %7748 = vst [vmem:[#allocation4_spill] sm:$0xff] %v7747_v40 }
  0x7f   : > { %v5931_v17 = vpop.permute.xlu0 %362 }
  0x87   : > { %v5948_v29 = vpop.permute.xlu0 %367 }
  0x9a   : > { %v512_v19 = vpop.f32.mrf.mxu0 }
  0x9b   : > { %v513_v20 = vadd.f32 %v512_v19, %v5931_v17  ;;  %v526_v22 = vpop.f32.mrf.mxu1  ;;  %v6000_v19 = vperm.slane %v5936_v18, 7 }
  0x9c   : > { %v527_v23 = vadd.f32 %v526_v22, %v5931_v17 }
  0x9d   : > { %v643_v25 = vmax.f32 %v513_v20, 0.0  ;;  %7752 = vst [vmem:[#allocation8_spill] sm:$0xff] %v6000_v19 }
  0x9e   : > { %v644_v26 = vmax.f32 %v527_v23, 0.0 }
  0x9f   : > { %v685_v27 = vmul.f32 %v5940_v21, %v643_v25 }
  0xa0   : > { %v686_v28 = vmul.f32 %v5944_v24, %v644_v26 }
  0xa2   : > { %v540_v30 = vpop.f32.mrf.mxu2  ;;  %v705_v32 = vpack.c.bf16 %v686_v28, %v685_v27  ;;  %v514_v35 = vpop.f32.mrf.mxu0 }
  0xa3   : > { %v541_v33 = vadd.f32 %v540_v30, %v5931_v17  ;;  %v554_v34 = vpop.f32.mrf.mxu3  ;;  %v515_v38 = vadd.f32 %v514_v35, %v5948_v29  ;;  %v528_v39 = vpop.f32.mrf.mxu1 }
  0xa4   : > { %v555_v36 = vadd.f32 %v554_v34, %v5931_v17  ;;  %715 = vst [vmem:[#allocation2 + $0x4] sm:$0xff] %v705_v32  ;;  %v529_v42 = vadd.f32 %v528_v39, %v5948_v29  ;;  %v308_v39 = vld [vmem:[%s7726_s7 + $0x8] sm:$0x3] }
  0xa5   : > { %v645_v41 = vmax.f32 %v541_v33, 0.0  ;;  %v653_v44 = vmax.f32 %v515_v38, 0.0 }
  0xa6   : > { %v646_v43 = vmax.f32 %v555_v36, 0.0  ;;  %v654_v46 = vmax.f32 %v529_v42, 0.0 }
  0xa7   : > { %v687_v45 = vmul.f32 %v5951_v31, %v645_v41  ;;  %v695_v48 = vmul.f32 %v5940_v21, %v653_v44 }
  0xa8   : > { %v688_v47 = vmul.f32 %v5956_v37, %v646_v43  ;;  %v696_v49 = vmul.f32 %v5944_v24, %v654_v46 }
  0xaa   : > { %v706_v50 = vpack.c.bf16 %v688_v47, %v687_v45  ;;  %v542_v51 = vpop.f32.mrf.mxu2  ;;  %v710_v52 = vpack.c.bf16 %v696_v49, %v695_v48  ;;  %v568_v55 = vpop.f32.mrf.mxu0 }
  0xab   : > { %v543_v53 = vadd.f32 %v542_v51, %v5948_v29  ;;  %v556_v54 = vpop.f32.mrf.mxu3  ;;  %v569_v57 = vadd.f32 %v568_v55, %v5931_v17  ;;  %v582_v59 = vpop.f32.mrf.mxu1  ;;  %v5100_v14 = vld [vmem:[#allocation2 + $0x8] sm:$0xf]  ;;  %v5639_v4 = vld [vmem:[#allocation2 + $0x4] sm:$0xf] }
  0xac   : > { %716 = vst [vmem:[#allocation2 + $0xc] sm:$0xff] %v706_v50  ;;  %v557_v56 = vadd.f32 %v556_v54, %v5948_v29  ;;  %v583_v1 = vadd.f32 %v582_v59, %v5931_v17  ;;  %v6027_v59 = vperm.slane %v308_v39, 1 }
  0xad   : > { %720 = vst [vmem:[#allocation2 + $0x34] sm:$0xff] %v710_v52  ;;  %v655_v60 = vmax.f32 %v543_v53, 0.0  ;;  %v647_v63 = vmax.f32 %v569_v57, 0.0  ;;  %v6022_v52 = vperm.slane %v308_v39, 0 }
  0xae   : > { %v656_v62 = vmax.f32 %v557_v56, 0.0  ;;  %v648_v2 = vmax.f32 %v583_v1, 0.0  ;;  %7754 = vst [vmem:[#allocation10_spill] sm:$0xff] %v6027_v59 }
  0xaf   : > { %v697_v0 = vmul.f32 %v5951_v31, %v655_v60  ;;  %v689_v5 = vmul.f32 %v5984_v58, %v647_v63  ;;  %7753 = vst [vmem:[#allocation9_spill] sm:$0xff] %v6022_v52 }
  0xb0   : > { %v698_v3 = vmul.f32 %v5956_v37, %v656_v62  ;;  %v690_v6 = vmul.f32 %v5988_v61, %v648_v2 }
  0xb2   : > { %v711_v7 = vpack.c.bf16 %v698_v3, %v697_v0  ;;  %v596_v8 = vpop.f32.mrf.mxu2  ;;  %v707_v9 = vpack.c.bf16 %v690_v6, %v689_v5  ;;  %v570_v13 = vpop.f32.mrf.mxu0 }
  0xb3   : > { %v597_v10 = vadd.f32 %v596_v8, %v5931_v17  ;;  %v610_v12 = vpop.f32.mrf.mxu3  ;;  %v571_v20 = vadd.f32 %v570_v13, %v5948_v29  ;;  %v584_v22 = vpop.f32.mrf.mxu1  ;;  %v5108_v47 = vld [vmem:[#allocation2 + $0x10] sm:$0xf]  ;;  %v5640_v55 = vld [vmem:[#allocation2 + $0xc] sm:$0xf] }
  0xb4   : > { %721 = vst [vmem:[#allocation2 + $0x3c] sm:$0xff] %v711_v7  ;;  %v611_v15 = vadd.f32 %v610_v12, %v5931_v17  ;;  %v5645_v23 = vld [vmem:[#allocation2 + $0x34] sm:$0xf0]  ;;  %v5094_v25 = vld [vmem:[#allocation2 + $0x30] sm:$0xf0]  ;;  %v585_v27 = vadd.f32 %v584_v22, %v5948_v29 }
  0xb5   : > { %717 = vst [vmem:[#allocation2 + $0x14] sm:$0xff] %v707_v9  ;;  %v649_v26 = vmax.f32 %v597_v10, 0.0  ;;  %v6004_v28 = vor.u32 %v5645_v23, %v5100_v14  ;;  %v6006_v30 = vor.u32 %v5639_v4, %v5094_v25  ;;  %v657_v33 = vmax.f32 %v571_v20, 0.0 }
  0xb6   : > { %v650_v32 = vmax.f32 %v611_v15, 0.0  ;;  %v658_v35 = vmax.f32 %v585_v27, 0.0 }
  0xb7   : > { %v691_v34 = vmul.f32 %v5996_v11, %v649_v26  ;;  %789 = vrot.lane.b32.xlu2 %v6004_v28, %s5752_s17  ;;  %787 = vrot.lane.b32.xlu1 %v6006_v30, %s5752_s17  ;;  %v699_v36 = vmul.f32 %v5984_v58, %v657_v33 }
  0xb8   : > { %v692_v18 = vmul.f32 %v6000_v19, %v650_v32  ;;  %v700_v38 = vmul.f32 %v5988_v61, %v658_v35 }
  0xba   : > { %v708_v41 = vpack.c.bf16 %v692_v18, %v691_v34  ;;  %v598_v42 = vpop.f32.mrf.mxu2  ;;  %v712_v43 = vpack.c.bf16 %v700_v38, %v699_v36  ;;  %v624_v46 = vpop.f32.mrf.mxu0 }
  0xbb   : > { %v599_v44 = vadd.f32 %v598_v42, %v5948_v29  ;;  %v612_v45 = vpop.f32.mrf.mxu3  ;;  %v5646_v48 = vld [vmem:[#allocation2 + $0x3c] sm:$0xf0]  ;;  %v5102_v49 = vld [vmem:[#allocation2 + $0x38] sm:$0xf0]  ;;  %v625_v51 = vadd.f32 %v624_v46, %v5931_v17  ;;  %v638_v53 = vpop.f32.mrf.mxu1  ;;  %v5658_v42 = vld [vmem:[#allocation2 + $0x34] sm:$0xf0] }
  0xbc   : > { %718 = vst [vmem:[#allocation2 + $0x1c] sm:$0xff] %v708_v41  ;;  %v613_v50 = vadd.f32 %v612_v45, %v5948_v29  ;;  %v6024_v54 = vor.u32 %v5646_v48, %v5108_v47  ;;  %v639_v57 = vadd.f32 %v638_v53, %v5931_v17  ;;  %v5105_v60 = vor.u32 %v5640_v55, %v5102_v49  ;;  %v5116_v8 = vld [vmem:[#allocation2 + $0x18] sm:$0xf]  ;;  %v5641_v9 = vld [vmem:[#allocation2 + $0x14] sm:$0xf] }
  0xbd   : > { %722 = vst [vmem:[#allocation2 + $0x44] sm:$0xff] %v712_v43  ;;  %v659_v56 = vmax.f32 %v599_v44, 0.0  ;;  %v651_v62 = vmax.f32 %v625_v51, 0.0  ;;  %v5180_v41 = vld [vmem:[#allocation2 + $0x30] sm:$0xf0] }
  0xbe   : > { %v660_v1 = vmax.f32 %v613_v50, 0.0  ;;  %793 = vrot.lane.b32.xlu0 %v6024_v54, %s5752_s17  ;;  %v652_v0 = vmax.f32 %v639_v57, 0.0  ;;  %v5186_v45 = vld [vmem:[#allocation2 + $0x8] sm:$0xf]  ;;  %v5659_v48 = vld [vmem:[#allocation2 + $0x3c] sm:$0xf0] }
  0xbf   : > { %v701_v63 = vmul.f32 %v5996_v11, %v659_v56  ;;  %791 = vrot.lane.b32.xlu2 %v5105_v60, %s5752_s17  ;;  %v693_v3 = vmul.f32 %v6022_v52, %v651_v62  ;;  %v5187_v46 = vor.u32 %v5658_v42, %v5186_v45  ;;  %v5188_v49 = vld [vmem:[#allocation2 + $0x38] sm:$0xf0]  ;;  %v5194_v51 = vld [vmem:[#allocation2 + $0x10] sm:$0xf]  ;;  %v5654_v55 = vld [vmem:[#allocation2 + $0x14] sm:$0xf] }
  0xc0   : > { %v702_v2 = vmul.f32 %v6000_v19, %v660_v1  ;;  %v694_v5 = vmul.f32 %v6027_v59, %v652_v0  ;;  %v5195_v53 = vor.u32 %v5659_v48, %v5194_v51 }
  0xc2   : > { %v713_v17 = vpack.c.bf16 %v702_v2, %v701_v63  ;;  %v709_v6 = vpack.c.bf16 %v694_v5, %v693_v3  ;;  %v626_v7 = vpop.f32.mrf.mxu0  ;;  %v5202_v5 = vld [vmem:[#allocation2 + $0x18] sm:$0xf] }
  0xc3   : > { %v627_v10 = vadd.f32 %v626_v7, %v5948_v29  ;;  %v640_v12 = vpop.f32.mrf.mxu1  ;;  %v5642_v32 = vld [vmem:[#allocation2 + $0x1c] sm:$0xf]  ;;  %v5124_v18 = vld [vmem:[#allocation2 + $0x20] sm:$0xf] }
  0xc4   : > { %723 = vst [vmem:[#allocation2 + $0x4c] sm:$0xff] %v713_v17  ;;  %v5647_v13 = vld [vmem:[#allocation2 + $0x44] sm:$0xf0]  ;;  %v5110_v14 = vld [vmem:[#allocation2 + $0x40] sm:$0xf0]  ;;  %v641_v4 = vadd.f32 %v640_v12, %v5948_v29 }
  0xc5   : > { %719 = vst.msk [vmem:[#allocation2 + $0x24] sm:$0xff] %vm5959_vm5, %v709_v6  ;;  %v5117_v15 = vor.u32 %v5647_v13, %v5116_v8  ;;  %v5113_v20 = vor.u32 %v5641_v9, %v5110_v14  ;;  %v661_v22 = vmax.f32 %v627_v10, 0.0  ;;  %v5196_v50 = vld [vmem:[#allocation2 + $0x40] sm:$0xf0]  ;;  %v5660_v63 = vld [vmem:[#allocation2 + $0x44] sm:$0xf0]  ;;  %v786_v9 = vpop.permute.xlu1 %785 }
  0xc6   : > { %v662_v23 = vmax.f32 %v641_v4, 0.0  ;;  %v5199_v57 = vor.u32 %v5654_v55, %v5196_v50  ;;  %v5655_v2 = vld [vmem:[#allocation2 + $0x1c] sm:$0xf]  ;;  %v5210_v17 = vld [vmem:[#allocation2 + $0x20] sm:$0xf]  ;;  %v6087_v6 = vld [vmem:[%s7722_s3 + $0x8] sm:$0xff]  ;;  %v5203_v7 = vor.u32 %v5660_v63, %v5202_v5 }
  0xc7   : > { %797 = vrot.lane.b32.xlu2 %v5117_v15, %s5752_s17  ;;  %795 = vrot.lane.b32.xlu1 %v5113_v20, %s5752_s17  ;;  %v703_v25 = vmul.f32 %v6022_v52, %v661_v22  ;;  %v5669_v13 = vld [vmem:[#allocation2 + $0x30] sm:$0xf0]  ;;  %v5256_v42 = vld [vmem:[#allocation2 + $0x44] sm:$0xf0]  ;;  %v5262_v48 = vld [vmem:[#allocation2 + $0x1c] sm:$0xf] }
  0xc8   : > { %v704_v26 = vmul.f32 %v6027_v59, %v662_v23 }
  0xca   : > { %v714_v27 = vpack.c.bf16 %v704_v26, %v703_v25  ;;  %v5670_v26 = vld [vmem:[#allocation2 + $0x38] sm:$0xf0] }
  0xcb   : > { %v5118_v33 = vld [vmem:[#allocation2 + $0x48] sm:$0xf0]  ;;  %v5648_v34 = vld [vmem:[#allocation2 + $0x4c] sm:$0xf0] }
  0xcc   : > { %v5121_v35 = vor.u32 %v5642_v32, %v5118_v33  ;;  %724 = vst.msk [vmem:[#allocation2 + $0x54] sm:$0xff] %vm5959_vm5, %v714_v27  ;;  %v5125_v29 = vor.u32 %v5648_v34, %v5124_v18  ;;  %v5643_v36 = vld [vmem:[#allocation2 + $0x24] sm:$0xf]  ;;  %v5204_v1 = vld [vmem:[#allocation2 + $0x48] sm:$0xf0] }
  0xcd   : > { %v5661_v0 = vld [vmem:[#allocation2 + $0x4c] sm:$0xf0]  ;;  %v5207_v3 = vor.u32 %v5655_v2, %v5204_v1  ;;  %v5218_v14 = vld [vmem:[#allocation2 + $0x28] sm:$0xf]  ;;  %v5240_v33 = vld [vmem:[#allocation2 + $0x34] sm:$0xf0] }
  0xce   : > { %799 = vrot.lane.b32.xlu0 %v5121_v35, %s5752_s17  ;;  %v5211_v8 = vor.u32 %v5661_v0, %v5210_v17  ;;  %v5246_v34 = vld [vmem:[#allocation2 + $0xc] sm:$0xf]  ;;  %v5668_v0 = vld [vmem:[#allocation2 + $0x28] sm:$0xf] }
  0xcf   : > { %801 = vrot.lane.b32.xlu1 %v5125_v29, %s5752_s17  ;;  %v6102_v18 = vor.u32 %v5670_v26, %v5246_v34 }
  0xd3   : > { %v5126_v38 = vld [vmem:[#allocation2 + $0x50] sm:$0xf0]  ;;  %v5662_v10 = vld [vmem:[#allocation2 + $0x54] sm:$0xf0] }
  0xd4   : > { %v5129_v39 = vor.u32 %v5643_v36, %v5126_v38  ;;  %v5212_v12 = vld [vmem:[#allocation2 + $0x50] sm:$0xf0]  ;;  %v5219_v4 = vor.u32 %v5662_v10, %v5218_v14  ;;  %v5665_v38 = vld [vmem:[#allocation2 + $0x10] sm:$0xf] }
  0xd6   : > { %974 = vrot.lane.b32.xlu0 %v5927_v16, %s5753_s22  ;;  %803 = vrot.lane.b32.xlu2 %v5129_v39, %s5752_s17 }
  0xd7   : > { %976 = vrot.lane.b32.xlu1 %v6006_v30, %s5753_s22 }
  0xde   : > { %980 = vrot.lane.b32.xlu0 %v5105_v60, %s5753_s22  ;;  %978 = vrot.lane.b32.xlu2 %v6004_v28, %s5753_s22 }
  0xdf   : > { %982 = vrot.lane.b32.xlu1 %v6024_v54, %s5753_s22 }
  0xe6   : > { %986 = vrot.lane.b32.xlu0 %v5117_v15, %s5753_s22  ;;  %984 = vrot.lane.b32.xlu2 %v5113_v20, %s5753_s22 }
  0xe7   : > { %988 = vrot.lane.b32.xlu1 %v5121_v35, %s5753_s22 }
  0xee   : > { %992 = vrot.lane.b32.xlu0 %v5129_v39, %s5753_s22  ;;  %990 = vrot.lane.b32.xlu2 %v5125_v29, %s5753_s22 }
  0xef   : > { %1165 = vrot.lane.b32.xlu1 %v5927_v16, %s5754_s23  ;;  %v5178_v16 = vld [vmem:[#allocation2] sm:$0xf] }
  0xf6   : > { %1169 = vrot.lane.b32.xlu0 %v6004_v28, %s5754_s23  ;;  %1167 = vrot.lane.b32.xlu2 %v6006_v30, %s5754_s23  ;;  %v5657_v28 = vld [vmem:[#allocation2 + $0x2c] sm:$0xf0]  ;;  %v5652_v30 = vld [vmem:[#allocation2 + $0x4] sm:$0xf] }
  0xf7   : > { %1171 = vrot.lane.b32.xlu1 %v5105_v60, %s5754_s23  ;;  %v5179_v43 = vor.u32 %v5657_v28, %v5178_v16  ;;  %v5183_v44 = vor.u32 %v5652_v30, %v5180_v41  ;;  %v5671_v30 = vld [vmem:[#allocation2 + $0x40] sm:$0xf0] }
  0xfe   : > { %1175 = vrot.lane.b32.xlu0 %v5113_v20, %s5754_s23  ;;  %1173 = vrot.lane.b32.xlu2 %v6024_v54, %s5754_s23  ;;  %v5653_v54 = vld [vmem:[#allocation2 + $0xc] sm:$0xf]  ;;  %v5238_v20 = vld [vmem:[#allocation2 + $0x4] sm:$0xf] }
  0xff   : > { %1177 = vrot.lane.b32.xlu1 %v5117_v15, %s5754_s23  ;;  %v5191_v56 = vor.u32 %v5653_v54, %v5188_v49  ;;  %v5656_v15 = vld [vmem:[#allocation2 + $0x24] sm:$0xf]  ;;  %v6094_v23 = vor.u32 %v5669_v13, %v5238_v20 }
 0x100   : > { %v5215_v22 = vor.u32 %v5656_v15, %v5212_v12 }
 0x106   : > { %1181 = vrot.lane.b32.xlu0 %v5125_v29, %s5754_s23  ;;  %1179 = vrot.lane.b32.xlu2 %v5121_v35, %s5754_s23  ;;  %v5248_v35 = vld [vmem:[#allocation2 + $0x3c] sm:$0xf0]  ;;  %v5664_v29 = vld [vmem:[#allocation2 + $0x8] sm:$0xf] }
 0x107   : > { %1183 = vrot.lane.b32.xlu1 %v5129_v39, %s5754_s23  ;;  %v6104_v36 = vor.u32 %v5664_v29, %v5240_v33  ;;  %v6110_v16 = vor.u32 %v5665_v38, %v5248_v35 }
 0x10e   : > { %1435 = vrot.lane.b32.xlu0 %v5183_v44, %s5755_s24  ;;  %1433 = vrot.lane.b32.xlu2 %v5179_v43, %s5755_s24  ;;  %v5666_v43 = vld [vmem:[#allocation2 + $0x18] sm:$0xf]  ;;  %v5672_v44 = vld [vmem:[#allocation2 + $0x48] sm:$0xf0] }
 0x10f   : > { %1437 = vrot.lane.b32.xlu1 %v5187_v46, %s5755_s24  ;;  %v6119_v45 = vor.u32 %v5666_v43, %v5256_v42  ;;  %v5254_v46 = vld [vmem:[#allocation2 + $0x14] sm:$0xf]  ;;  %v6127_v50 = vor.u32 %v5672_v44, %v5262_v48 }
 0x111   : > { %v790_v47 = vpop.permute.xlu2 %789 }
 0x116   : > { %1441 = vrot.lane.b32.xlu0 %v5195_v53, %s5755_s24  ;;  %1439 = vrot.lane.b32.xlu2 %v5191_v56, %s5755_s24  ;;  %v5673_v53 = vld [vmem:[#allocation2 + $0x50] sm:$0xf0]  ;;  %v5264_v56 = vld [vmem:[#allocation2 + $0x4c] sm:$0xf0] }
 0x117   : > { %1443 = vrot.lane.b32.xlu1 %v5199_v57, %s5755_s24  ;;  %v5270_v57 = vld [vmem:[#allocation2 + $0x24] sm:$0xf] }
 0x118   : > { %v6135_v1 = vor.u32 %v5673_v53, %v5270_v57 }
 0x119   : > { %v792_v60 = vpop.permute.xlu2 %791 }
 0x11a   : > { %v808_v62 = vsel %vm805_vm6, %v790_v47, %v792_v60 }
 0x11b   : > { %864 = vmatpush.bf16.msrb.mxu0 %v808_v62  ;;  %v5667_v62 = vld [vmem:[#allocation2 + $0x20] sm:$0xf] }
 0x11c   : > { %v6137_v63 = vor.u32 %v5667_v62, %v5264_v56 }
 0x11e   : > { %1447 = vrot.lane.b32.xlu0 %v5207_v3, %s5755_s24  ;;  %5132 = vmatmul.msk.bf16.vlgmr.msrb.gmra.mxu0 %vm825_vm7, %v6087_v6 }
 0x11f   : > { %1445 = vrot.lane.b32.xlu2 %v5203_v7, %s5755_s24  ;;  %1449 = vrot.lane.b32.xlu1 %v5211_v8, %s5755_s24 }
 0x121   : > { %v798_v39 = vpop.permute.xlu2 %797 }
 0x126   : > { %1453 = vrot.lane.b32.xlu0 %v5219_v4, %s5755_s24 }
 0x127   : > { %1451 = vrot.lane.b32.xlu2 %v5215_v22, %s5755_s24  ;;  %1878 = vrot.lane.b32.xlu1 %v6094_v23, %s5756_s29 }
 0x129   : > { %v788_v25 = vpop.permute.xlu1 %787 }
 0x12a   : > { %v806_v27 = vsel %vm805_vm6, %v786_v9, %v788_v25  ;;  %v807_v32 = vsel %vm805_vm6, %v788_v25, %v790_v47  ;;  %v6123_v47 = vor.u32 %v5671_v30, %v5254_v46  ;;  %v6180_v25 = vld [vmem:[%s7722_s3] sm:$0xff] }
 0x12b   : > { %836 = vmatpush.bf16.msra.mxu2 %v806_v27  ;;  %850 = vmatpush.bf16.msra.mxu3 %v807_v32 }
 0x12e   : > { %1882 = vrot.lane.b32.xlu0 %v6102_v18, %s5756_s29  ;;  %5130 = vmatmul.msk.bf16.vlgmr.msra.gmra.mxu2 %vm825_vm7, %v6087_v6 }
 0x12f   : > { %5131 = vmatmul.msk.bf16.vlgmr.msra.gmra.mxu3 %vm825_vm7, %v6087_v6  ;;  %1880 = vrot.lane.b32.xlu2 %v6104_v36, %s5756_s29 }
 0x130   : > { %v794_v28 = vpop.permute.xlu0 %793  ;;  %1884 = vrot.lane.b32.xlu1 %v6110_v16, %s5756_s29  ;;  %v804_v49 = vpop.permute.xlu2 %803 }
 0x131   : > { %v809_v41 = vsel %vm805_vm6, %v792_v60, %v794_v28  ;;  %v5272_v60 = vld [vmem:[#allocation2 + $0x54] sm:$0xf0] }
 0x132   : > { %878 = vmatpush.bf16.msrb.mxu1 %v809_v41  ;;  %v6143_v2 = vor.u32 %v5668_v0, %v5272_v60 }
 0x135   : > { %5133 = vmatmul.msk.bf16.vlgmr.msrb.gmra.mxu1 %vm825_vm7, %v6087_v6 }
 0x136   : > { %1888 = vrot.lane.b32.xlu0 %v6119_v45, %s5756_s29 }
 0x137   : > { %1886 = vrot.lane.b32.xlu2 %v6123_v47, %s5756_s29 }
 0x138   : > { %1890 = vrot.lane.b32.xlu1 %v6127_v50, %s5756_s29  ;;  %v979_v3 = vpop.permute.xlu2 %978 }
 0x139   : > { %v796_v51 = vpop.permute.xlu1 %795 }
 0x13a   : > { %v810_v54 = vsel %vm805_vm6, %v794_v28, %v796_v51  ;;  %v811_v55 = vsel %vm805_vm6, %v796_v51, %v798_v39 }
 0x13b   : > { %892 = vmatpush.bf16.msrb.mxu2 %v810_v54  ;;  %906 = vmatpush.bf16.msrb.mxu3 %v811_v55 }
 0x13e   : > { %1894 = vrot.lane.b32.xlu0 %v6135_v1, %s5756_s29  ;;  %5134 = vmatmul.msk.bf16.vlgmr.msrb.gmra.mxu2 %vm825_vm7, %v6087_v6 }
 0x13f   : > { %962 = vmatpush.bf16.msra.mxu3 %v804_v49  ;;  %1892 = vrot.lane.b32.xlu2 %v6137_v63, %s5756_s29 }
 0x140   : > { %5135 = vmatmul.msk.bf16.vlgmr.msrb.gmra.mxu3 %vm825_vm7, %v6087_v6  ;;  %v800_v5 = vpop.permute.xlu0 %799  ;;  %1896 = vrot.lane.b32.xlu1 %v6143_v2, %s5756_s29  ;;  %v985_v13 = vpop.permute.xlu2 %984 }
 0x141   : > { %v812_v17 = vsel %vm805_vm6, %v798_v39, %v800_v5  ;;  %v802_v7 = vpop.permute.xlu1 %801 }
 0x142   : > { %920 = vmatpush.bf16.msra.mxu0 %v812_v17  ;;  %v813_v8 = vsel %vm805_vm6, %v800_v5, %v802_v7  ;;  %v814_v9 = vsel %vm805_vm6, %v802_v7, %v804_v49 }
 0x143   : > { %934 = vmatpush.bf16.msra.mxu1 %v813_v8  ;;  %948 = vmatpush.bf16.msra.mxu2 %v814_v9 }
 0x145   : > { %5136 = vmatmul.msk.bf16.vlgmr.msra.gmra.mxu0 %vm825_vm7, %v6087_v6 }
 0x146   : > { %2091 = vrot.lane.b32.xlu0 %v6104_v36, %s5757_s30  ;;  %5137 = vmatmul.msk.bf16.vlgmr.msra.gmra.mxu1 %vm825_vm7, %v6087_v6 }
 0x147   : > { %2089 = vrot.lane.b32.xlu2 %v6094_v23, %s5757_s30 }
 0x148   : > { %v975_v10 = vpop.permute.xlu0 %974  ;;  %2093 = vrot.lane.b32.xlu1 %v6102_v18, %s5757_s30  ;;  %v991_v27 = vpop.permute.xlu2 %990 }
 0x149   : > { %v977_v12 = vpop.permute.xlu1 %976 }
 0x14a   : > { %v995_v14 = vsel %vm994_vm8, %v975_v10, %v977_v12  ;;  %v996_v4 = vsel %vm994_vm8, %v977_v12, %v979_v3 }
 0x14b   : > { %1024 = vmatpush.bf16.msrb.mxu0 %v995_v14  ;;  %1038 = vmatpush.bf16.msrb.mxu1 %v996_v4 }
 0x14e   : > { %2097 = vrot.lane.b32.xlu0 %v6123_v47, %s5757_s30  ;;  %5138 = vmatmul.msk.bf16.vlgmr.msra.gmra.mxu2 %vm825_vm7, %v6087_v6 }
 0x14f   : > { %2095 = vrot.lane.b32.xlu2 %v6110_v16, %s5757_s30 }
 0x150   : > { %5139 = vmatmul.msk.bf16.vlgmr.msra.gmra.mxu3 %vm825_vm7, %v6087_v6  ;;  %v981_v15 = vpop.permute.xlu0 %980  ;;  %2099 = vrot.lane.b32.xlu1 %v6119_v45, %s5757_s30  ;;  %v1168_v38 = vpop.permute.xlu2 %1167 }
 0x151   : > { %v997_v20 = vsel %vm994_vm8, %v979_v3, %v981_v15  ;;  %v983_v22 = vpop.permute.xlu1 %982  ;;  %v5651_v3 = vld [vmem:[%s7722_s3 + $0x10] sm:$0xff] }
 0x152   : > { %1052 = vmatpush.bf16.msrb.mxu2 %v997_v20  ;;  %v998_v26 = vsel %vm994_vm8, %v981_v15, %v983_v22  ;;  %v999_v6 = vsel %vm994_vm8, %v983_v22, %v985_v13  ;;  %v2715_v20 = vld [vmem:[%s7723_s4 + $0x8] sm:$0xff] }
 0x153   : > { %1066 = vmatpush.bf16.msrb.mxu3 %v998_v26  ;;  %1080 = vmatpush.bf16.msra.mxu0 %v999_v6 }
 0x155   : > { %5144 = vmatmul.msk.bf16.vlgmr.msrb.gmra.mxu0 %vm825_vm7, %v6180_v25 }
 0x156   : > { %2103 = vrot.lane.b32.xlu0 %v6137_v63, %s5757_s30  ;;  %5145 = vmatmul.msk.bf16.vlgmr.msrb.gmra.mxu1 %vm825_vm7, %v6180_v25 }
 0x157   : > { %2101 = vrot.lane.b32.xlu2 %v6127_v50, %s5757_s30 }
 0x158   : > { %v987_v32 = vpop.permute.xlu0 %986  ;;  %2105 = vrot.lane.b32.xlu1 %v6135_v1, %s5757_s30  ;;  %v1174_v30 = vpop.permute.xlu2 %1173 }
 0x159   : > { %v1000_v33 = vsel %vm994_vm8, %v985_v13, %v987_v32  ;;  %v989_v34 = vpop.permute.xlu1 %988 }
 0x15a   : > { %1094 = vmatpush.bf16.msra.mxu1 %v1000_v33  ;;  %v1001_v35 = vsel %vm994_vm8, %v987_v32, %v989_v34  ;;  %v1002_v29 = vsel %vm994_vm8, %v989_v34, %v991_v27  ;;  %v5663_v34 = vld [vmem:[%s7722_s3 + $0x18] sm:$0xff] }
 0x15b   : > { %1108 = vmatpush.bf16.msra.mxu2 %v1001_v35  ;;  %1122 = vmatpush.bf16.msra.mxu3 %v1002_v29 }
 0x15e   : > { %2300 = vrot.lane.b32.xlu0 %v6094_v23, %s5758_s11  ;;  %5146 = vmatmul.msk.bf16.vlgmr.msrb.gmra.mxu2 %vm825_vm7, %v6180_v25 }
 0x15f   : > { %2107 = vrot.lane.b32.xlu2 %v6143_v2, %s5757_s30 }
 0x160   : > { %5147 = vmatmul.msk.bf16.vlgmr.msrb.gmra.mxu3 %vm825_vm7, %v6180_v25  ;;  %v993_v39 = vpop.permute.xlu0 %992  ;;  %2302 = vrot.lane.b32.xlu1 %v6104_v36, %s5758_s11  ;;  %v1180_v55 = vpop.permute.xlu2 %1179 }
 0x161   : > { %v1003_v28 = vsel %vm994_vm8, %v991_v27, %v993_v39  ;;  %1150 = vmatpush.bf16.msrb.mxu1 %v993_v39  ;;  %v1166_v41 = vpop.permute.xlu1 %1165 }
 0x162   : > { %1136 = vmatpush.bf16.msrb.mxu0 %v1003_v28  ;;  %v1186_v42 = vsel %vm1185_vm9, %v1166_v41, %v1168_v38 }
 0x163   : > { %1215 = vmatpush.bf16.msrb.mxu2 %v1186_v42 }
 0x165   : > { %5148 = vmatmul.msk.bf16.vlgmr.msra.gmra.mxu0 %vm825_vm7, %v6180_v25 }
 0x166   : > { %2306 = vrot.lane.b32.xlu0 %v6110_v16, %s5758_s11  ;;  %5149 = vmatmul.msk.bf16.vlgmr.msra.gmra.mxu1 %vm825_vm7, %v6180_v25 }
 0x167   : > { %2304 = vrot.lane.b32.xlu2 %v6102_v18, %s5758_s11 }
 0x168   : > { %v1170_v43 = vpop.permute.xlu0 %1169  ;;  %2308 = vrot.lane.b32.xlu1 %v6123_v47, %s5758_s11  ;;  %v1434_v17 = vpop.permute.xlu2 %1433 }
 0x169   : > { %v1187_v44 = vsel %vm1185_vm9, %v1168_v38, %v1170_v43  ;;  %v1172_v46 = vpop.permute.xlu1 %1171 }
 0x16a   : > { %1229 = vmatpush.bf16.msrb.mxu3 %v1187_v44  ;;  %v1188_v48 = vsel %vm1185_vm9, %v1170_v43, %v1172_v46  ;;  %v1189_v49 = vsel %vm1185_vm9, %v1172_v46, %v1174_v30 }
 0x16b   : > { %1243 = vmatpush.bf16.msra.mxu0 %v1188_v48  ;;  %1257 = vmatpush.bf16.msra.mxu1 %v1189_v49 }
 0x16e   : > { %2312 = vrot.lane.b32.xlu0 %v6127_v50, %s5758_s11  ;;  %5150 = vmatmul.msk.bf16.vlgmr.msra.gmra.mxu2 %vm825_vm7, %v6180_v25 }
 0x16f   : > { %2310 = vrot.lane.b32.xlu2 %v6119_v45, %s5758_s11 }
 0x170   : > { %5151 = vmatmul.msk.bf16.vlgmr.msra.gmra.mxu3 %vm825_vm7, %v6180_v25  ;;  %v1176_v51 = vpop.permute.xlu0 %1175  ;;  %2314 = vrot.lane.b32.xlu1 %v6137_v63, %s5758_s11  ;;  %v1440_v12 = vpop.permute.xlu2 %1439 }
 0x171   : > { %v1190_v53 = vsel %vm1185_vm9, %v1174_v30, %v1176_v51  ;;  %v1178_v54 = vpop.permute.xlu1 %1177 }
 0x172   : > { %1271 = vmatpush.bf16.msra.mxu2 %v1190_v53  ;;  %v1191_v56 = vsel %vm1185_vm9, %v1176_v51, %v1178_v54  ;;  %v1192_v57 = vsel %vm1185_vm9, %v1178_v54, %v1180_v55 }
 0x173   : > { %1285 = vmatpush.bf16.msra.mxu3 %v1191_v56 }
 0x175   : > { %5152 = vmatmul.msk.bf16.vlgmr.msrb.gmra.mxu0 %vm825_vm7, %v6180_v25 }
 0x176   : > { %1299 = vmatpush.bf16.msrb.mxu0 %v1192_v57  ;;  %2318 = vrot.lane.b32.xlu0 %v6143_v2, %s5758_s11 }
 0x177   : > { %5153 = vmatmul.msk.bf16.vlgmr.msrb.gmra.mxu1 %vm825_vm7, %v6180_v25  ;;  %2316 = vrot.lane.b32.xlu2 %v6135_v1, %s5758_s11 }
 0x178   : > { %v1182_v60 = vpop.permute.xlu0 %1181  ;;  %2511 = vrot.lane.b32.xlu1 %v6094_v23, %s5759_s12 }
 0x179   : > { %v1193_v62 = vsel %vm1185_vm9, %v1180_v55, %v1182_v60  ;;  %v1184_v0 = vpop.permute.xlu1 %1183  ;;  %v1446_v25 = vpop.permute.xlu2 %1445 }
 0x17a   : > { %1313 = vmatpush.bf16.msrb.mxu1 %v1193_v62  ;;  %v1194_v5 = vsel %vm1185_vm9, %v1182_v60, %v1184_v0 }
 0x17e   : > { %2515 = vrot.lane.b32.xlu0 %v6102_v18, %s5759_s12  ;;  %5160 = vmatmul.msk.bf16.vlgmr.msrb.gmra.mxu2 %vm825_vm7, %v5651_v3 }
 0x17f   : > { %1327 = vmatpush.bf16.msrb.mxu2 %v1194_v5  ;;  %2513 = vrot.lane.b32.xlu2 %v6104_v36, %s5759_s12 }
 0x180   : > { %5161 = vmatmul.msk.bf16.vlgmr.msrb.gmra.mxu3 %vm825_vm7, %v5651_v3  ;;  %2517 = vrot.lane.b32.xlu1 %v6110_v16, %s5759_s12  ;;  %v1436_v7 = vpop.permute.xlu0 %1435 }
 0x181   : > { %1341 = vmatpush.bf16.msrb.mxu3 %v1184_v0  ;;  %v1438_v8 = vpop.permute.xlu1 %1437  ;;  %v1456_v9 = vsel %vm1455_vm10, %v1434_v17, %v1436_v7  ;;  %v1452_v35 = vpop.permute.xlu2 %1451 }
 0x182   : > { %v1457_v10 = vsel %vm1455_vm10, %v1436_v7, %v1438_v8  ;;  %v1458_v14 = vsel %vm1455_vm10, %v1438_v8, %v1440_v12 }
 0x185   : > { %5162 = vmatmul.msk.bf16.vlgmr.msra.gmra.mxu0 %vm825_vm7, %v5651_v3 }
 0x186   : > { %1486 = vmatpush.bf16.msra.mxu0 %v1456_v9  ;;  %2521 = vrot.lane.b32.xlu0 %v6119_v45, %s5759_s12 }
 0x187   : > { %5163 = vmatmul.msk.bf16.vlgmr.msra.gmra.mxu1 %vm825_vm7, %v5651_v3  ;;  %2519 = vrot.lane.b32.xlu2 %v6123_v47, %s5759_s12 }
 0x188   : > { %1500 = vmatpush.bf16.msra.mxu1 %v1457_v10  ;;  %2523 = vrot.lane.b32.xlu1 %v6127_v50, %s5759_s12  ;;  %v1442_v13 = vpop.permute.xlu0 %1441 }
 0x189   : > { %v1459_v4 = vsel %vm1455_vm10, %v1440_v12, %v1442_v13  ;;  %v1444_v15 = vpop.permute.xlu1 %1443  ;;  %v1881_v60 = vpop.permute.xlu2 %1880 }
 0x18a   : > { %v1460_v22 = vsel %vm1455_vm10, %v1442_v13, %v1444_v15  ;;  %v1461_v26 = vsel %vm1455_vm10, %v1444_v15, %v1446_v25 }
 0x18e   : > { %2527 = vrot.lane.b32.xlu0 %v6135_v1, %s5759_s12  ;;  %5164 = vmatmul.msk.bf16.vlgmr.msra.gmra.mxu2 %vm825_vm7, %v5651_v3 }
 0x18f   : > { %1514 = vmatpush.bf16.msra.mxu2 %v1458_v14  ;;  %2525 = vrot.lane.b32.xlu2 %v6137_v63, %s5759_s12 }
 0x190   : > { %5165 = vmatmul.msk.bf16.vlgmr.msra.gmra.mxu3 %vm825_vm7, %v5651_v3  ;;  %2529 = vrot.lane.b32.xlu1 %v6143_v2, %s5759_s12  ;;  %v1448_v6 = vpop.permute.xlu0 %1447 }
 0x191   : > { %1528 = vmatpush.bf16.msra.mxu3 %v1459_v4  ;;  %v1450_v27 = vpop.permute.xlu1 %1449  ;;  %v1462_v32 = vsel %vm1455_vm10, %v1446_v25, %v1448_v6  ;;  %v1887_v12 = vpop.permute.xlu2 %1886 }
 0x192   : > { %v1463_v33 = vsel %vm1455_vm10, %v1448_v6, %v1450_v27  ;;  %v1464_v38 = vsel %vm1455_vm10, %v1450_v27, %v1452_v35 }
 0x195   : > { %5166 = vmatmul.msk.bf16.vlgmr.msrb.gmra.mxu0 %vm825_vm7, %v5651_v3 }
 0x196   : > { %1542 = vmatpush.bf16.msrb.mxu0 %v1460_v22  ;;  %2723 = vperm.xlu0 %5739, %v2715_v20  }
 0x197   : > { %5167 = vmatmul.msk.bf16.vlgmr.msrb.gmra.mxu1 %vm825_vm7, %v5651_v3 }
 0x198   : > { %1556 = vmatpush.bf16.msrb.mxu1 %v1461_v26  ;;  %v1454_v29 = vpop.permute.xlu0 %1453 }
 0x199   : > { %v1465_v39 = vsel %vm1455_vm10, %v1452_v35, %v1454_v29 }
 0x19b   : > { %v6297_v28 = vpop.f32.mrf.mxu0 }
 0x19e   : > { %5168 = vmatmul.msk.bf16.vlgmr.msrb.gmra.mxu2 %vm825_vm7, %v5651_v3 }
 0x19f   : > { %1570 = vmatpush.bf16.msrb.mxu2 %v1462_v32 }
 0x1a0   : > { %5169 = vmatmul.msk.bf16.vlgmr.msrb.gmra.mxu3 %vm825_vm7, %v5651_v3  ;;  %v1883_v62 = vpop.permute.xlu0 %1882 }
 0x1a1   : > { %1584 = vmatpush.bf16.msrb.mxu3 %v1463_v33 }
 0x1a3   : > { %v6308_v43 = vpop.f32.mrf.mxu0 }
 0x1a5   : > { %5220 = vmatmul.msk.bf16.vlgmr.msra.gmra.mxu0 %vm825_vm7, %v5663_v34 }
 0x1a6   : > { %1598 = vmatpush.bf16.msra.mxu0 %v1464_v38 }
 0x1a7   : > { %5221 = vmatmul.msk.bf16.vlgmr.msra.gmra.mxu1 %vm825_vm7, %v5663_v34 }
 0x1a8   : > { %1612 = vmatpush.bf16.msra.mxu1 %v1465_v39  ;;  %v1889_v15 = vpop.permute.xlu0 %1888 }
 0x1a9   : > { %v1903_v33 = vsel %vm1898_vm11, %v1887_v12, %v1889_v15 }
 0x1ae   : > { %5222 = vmatmul.msk.bf16.vlgmr.msra.gmra.mxu2 %vm825_vm7, %v5663_v34 }
 0x1af   : > { %1717 = vmatpush.bf16.msra.mxu2 %v6094_v23 }
 0x1b0   : > { %5223 = vmatmul.msk.bf16.vlgmr.msra.gmra.mxu3 %vm825_vm7, %v5663_v34 }
 0x1b1   : > { %1731 = vmatpush.bf16.msra.mxu3 %v6104_v36  ;;  %v838_v41 = vpop.f32.mrf.mxu2 }
 0x1b2   : > { %v6302_v42 = vpop.f32.mrf.mxu1  ;;  %v852_v30 = vpop.f32.mrf.mxu3 }
 0x1b5   : > { %5224 = vmatmul.msk.bf16.vlgmr.msrb.gmra.mxu0 %vm825_vm7, %v5663_v34 }
 0x1b6   : > { %1745 = vmatpush.bf16.msrb.mxu0 %v6102_v18 }
 0x1b7   : > { %5225 = vmatmul.msk.bf16.vlgmr.msrb.gmra.mxu1 %vm825_vm7, %v5663_v34 }
 0x1b8   : > { %1759 = vmatpush.bf16.msrb.mxu1 %v6110_v16 }
 0x1b9   : > { %v840_v44 = vpop.f32.mrf.mxu2 }
 0x1ba   : > { %v854_v46 = vpop.f32.mrf.mxu3  ;;  %v6310_v48 = vpop.f32.mrf.mxu1 }
 0x1be   : > { %5226 = vmatmul.msk.bf16.vlgmr.msrb.gmra.mxu2 %vm825_vm7, %v5663_v34 }
 0x1bf   : > { %1773 = vmatpush.bf16.msrb.mxu2 %v6123_v47 }
 0x1c0   : > { %5227 = vmatmul.msk.bf16.vlgmr.msrb.gmra.mxu3 %vm825_vm7, %v5663_v34 }
 0x1c1   : > { %1787 = vmatpush.bf16.msrb.mxu3 %v6119_v45  ;;  %v894_v23 = vpop.f32.mrf.mxu2  ;;  %v6329_v45 = vld [vmem:[%s7722_s3 + $0x20] sm:$0xff] }
 0x1c2   : > { %v6316_v18 = vpop.f32.mrf.mxu0 }
 0x1c3   : > { %v908_v36 = vpop.f32.mrf.mxu3  ;;  %v6318_v49 = vpop.f32.mrf.mxu1 }
 0x1c5   : > { %5228 = vmatmul.msk.bf16.vlgmr.msra.gmra.mxu0 %vm825_vm7, %v5663_v34 }
 0x1c6   : > { %1801 = vmatpush.bf16.msra.mxu0 %v6127_v50  ;;  %v1879_v50 = vpop.permute.xlu1 %1878 }
 0x1c7   : > { %5229 = vmatmul.msk.bf16.vlgmr.msra.gmra.mxu1 %vm825_vm7, %v5663_v34  ;;  %v1899_v3 = vsel %vm1898_vm11, %v1879_v50, %v1881_v60 }
 0x1c8   : > { %1815 = vmatpush.bf16.msra.mxu1 %v6137_v63 }
 0x1c9   : > { %v896_v16 = vpop.f32.mrf.mxu2 }
 0x1ca   : > { %v6324_v51 = vpop.f32.mrf.mxu0 }
 0x1cb   : > { %v910_v47 = vpop.f32.mrf.mxu3  ;;  %v6331_v53 = vpop.f32.mrf.mxu1 }
 0x1ce   : > { %5276 = vmatmul.msk.bf16.vlgmr.msra.gmra.mxu2 %vm825_vm7, %v6329_v45  ;;  %v1885_v5 = vpop.permute.xlu1 %1884 }
 0x1cf   : > { %1829 = vmatpush.bf16.msra.mxu2 %v6135_v1  ;;  %v1900_v1 = vsel %vm1898_vm11, %v1881_v60, %v1883_v62  ;;  %v1901_v13 = vsel %vm1898_vm11, %v1883_v62, %v1885_v5  ;;  %v1902_v14 = vsel %vm1898_vm11, %v1885_v5, %v1887_v12 }
 0x1d0   : > { %5277 = vmatmul.msk.bf16.vlgmr.msra.gmra.mxu3 %vm825_vm7, %v6329_v45 }
 0x1d1   : > { %1843 = vmatpush.bf16.msra.mxu3 %v6143_v2  ;;  %v6339_v63 = vpop.f32.mrf.mxu2 }
 0x1d2   : > { %v1026_v55 = vpop.f32.mrf.mxu0 }
 0x1d3   : > { %v6341_v54 = vpop.f32.mrf.mxu3  ;;  %v6343_v56 = vadd.f32 %v1026_v55, %v838_v41  ;;  %v1040_v57 = vpop.f32.mrf.mxu1 }
 0x1d4   : > { %v6345_v0 = vadd.f32 %v1040_v57, %v852_v30 }
 0x1d5   : > { %5278 = vmatmul.msk.bf16.vlgmr.msrb.gmra.mxu0 %vm825_vm7, %v6329_v45 }
 0x1d6   : > { %1928 = vmatpush.bf16.msrb.mxu0 %v1899_v3  ;;  %v1891_v6 = vpop.permute.xlu1 %1890 }
 0x1d7   : > { %5279 = vmatmul.msk.bf16.vlgmr.msrb.gmra.mxu1 %vm825_vm7, %v6329_v45  ;;  %v1904_v35 = vsel %vm1898_vm11, %v1889_v15, %v1891_v6 }
 0x1d8   : > { %1942 = vmatpush.bf16.msrb.mxu1 %v1900_v1 }
 0x1d9   : > { %v6353_v2 = vpop.f32.mrf.mxu2 }
 0x1da   : > { %v1028_v7 = vpop.f32.mrf.mxu0 }
 0x1db   : > { %v6355_v17 = vpop.f32.mrf.mxu3  ;;  %v6357_v8 = vadd.f32 %v1028_v7, %v840_v44  ;;  %v1042_v9 = vpop.f32.mrf.mxu1 }
 0x1dc   : > { %v6359_v10 = vadd.f32 %v1042_v9, %v854_v46  ;;  %v1893_v46 = vpop.permute.xlu2 %1892 }
 0x1de   : > { %5280 = vmatmul.msk.bf16.vlgmr.msrb.gmra.mxu2 %vm825_vm7, %v6329_v45 }
 0x1df   : > { %1956 = vmatpush.bf16.msrb.mxu2 %v1901_v13 }
 0x1e0   : > { %5281 = vmatmul.msk.bf16.vlgmr.msrb.gmra.mxu3 %vm825_vm7, %v6329_v45 }
 0x1e1   : > { %1970 = vmatpush.bf16.msrb.mxu3 %v1902_v14  ;;  %v1054_v4 = vpop.f32.mrf.mxu2 }
 0x1e2   : > { %v6368_v20 = vadd.f32 %v1054_v4, %v6297_v28  ;;  %v1082_v26 = vpop.f32.mrf.mxu0 }
 0x1e3   : > { %v1068_v22 = vpop.f32.mrf.mxu3  ;;  %v6373_v27 = vadd.f32 %v1082_v26, %v894_v23  ;;  %v1096_v32 = vpop.f32.mrf.mxu1 }
 0x1e4   : > { %v6371_v25 = vadd.f32 %v1068_v22, %v6302_v42  ;;  %v6376_v34 = vadd.f32 %v1096_v32, %v908_v36  ;;  %v1895_v42 = vpop.permute.xlu0 %1894  ;;  %v1905_v36 = vsel %vm1898_vm11, %v1891_v6, %v1893_v46 }
 0x1e5   : > { %5282 = vmatmul.msk.bf16.vlgmr.msra.gmra.mxu0 %vm825_vm7, %v6329_v45 }
 0x1e6   : > { %1984 = vmatpush.bf16.msra.mxu0 %v1903_v33 }
 0x1e7   : > { %5283 = vmatmul.msk.bf16.vlgmr.msra.gmra.mxu1 %vm825_vm7, %v6329_v45 }
 0x1e8   : > { %1998 = vmatpush.bf16.msra.mxu1 %v1904_v35 }
 0x1e9   : > { %v1056_v29 = vpop.f32.mrf.mxu2 }
 0x1ea   : > { %v6384_v38 = vadd.f32 %v1056_v29, %v6308_v43  ;;  %v1084_v41 = vpop.f32.mrf.mxu0  ;;  %v1906_v43 = vsel %vm1898_vm11, %v1893_v46, %v1895_v42 }
 0x1eb   : > { %v1070_v39 = vpop.f32.mrf.mxu3  ;;  %v6389_v30 = vadd.f32 %v1084_v41, %v896_v16  ;;  %v1098_v44 = vpop.f32.mrf.mxu1  ;;  %v6402_v16 = vld [vmem:[%s7722_s3 + $0x28] sm:$0xff] }
 0x1ec   : > { %v6387_v28 = vadd.f32 %v1070_v39, %v6310_v48  ;;  %v6391_v23 = vadd.f32 %v1098_v44, %v910_v47  ;;  %v1897_v47 = vpop.permute.xlu1 %1896  ;;  %v2092_v5 = vpop.permute.xlu0 %2091 }
 0x1ed   : > { %v1907_v3 = vsel %vm1898_vm11, %v1895_v42, %v1897_v47 }
 0x1ee   : > { %5284 = vmatmul.msk.bf16.vlgmr.msra.gmra.mxu2 %vm825_vm7, %v6329_v45 }
 0x1ef   : > { %2012 = vmatpush.bf16.msra.mxu2 %v1905_v36 }
 0x1f0   : > { %5285 = vmatmul.msk.bf16.vlgmr.msra.gmra.mxu3 %vm825_vm7, %v6329_v45 }
 0x1f1   : > { %2026 = vmatpush.bf16.msra.mxu3 %v1906_v43  ;;  %v1110_v48 = vpop.f32.mrf.mxu2 }
 0x1f2   : > { %v6405_v50 = vadd.f32 %v1110_v48, %v6316_v18  ;;  %v1138_v60 = vpop.f32.mrf.mxu0  ;;  %v2090_v18 = vpop.permute.xlu2 %2089 }
 0x1f3   : > { %v1124_v55 = vpop.f32.mrf.mxu3  ;;  %v6411_v62 = vadd.f32 %v1138_v60, %v6339_v63  ;;  %v2110_v15 = vsel %vm2109_vm12, %v2090_v18, %v2092_v5 }
 0x1f4   : > { %v6408_v57 = vadd.f32 %v1124_v55, %v6318_v49  ;;  %v1152_v45 = vpop.f32.mrf.mxu1  ;;  %v2094_v12 = vpop.permute.xlu1 %2093 }
 0x1f5   : > { %v6415_v1 = vadd.f32 %v1152_v45, %v6341_v54  ;;  %5292 = vmatmul.msk.bf16.vlgmr.msrb.gmra.mxu0 %vm825_vm7, %v6402_v16  ;;  %v2098_v32 = vpop.permute.xlu0 %2097 }
 0x1f6   : > { %2040 = vmatpush.bf16.msrb.mxu0 %v1907_v3 }
 0x1f7   : > { %5293 = vmatmul.msk.bf16.vlgmr.msrb.gmra.mxu1 %vm825_vm7, %v6402_v16 }
 0x1f8   : > { %2054 = vmatpush.bf16.msrb.mxu1 %v1897_v47 }
 0x1f9   : > { %v1112_v49 = vpop.f32.mrf.mxu2 }
 0x1fa   : > { %v6422_v63 = vadd.f32 %v1112_v49, %v6324_v51  ;;  %v1140_v54 = vpop.f32.mrf.mxu0  ;;  %v2111_v51 = vsel %vm2109_vm12, %v2092_v5, %v2094_v12  ;;  %v2096_v26 = vpop.permute.xlu2 %2095 }
 0x1fb   : > { %v1126_v7 = vpop.f32.mrf.mxu3  ;;  %v6428_v13 = vadd.f32 %v1140_v54, %v6353_v2  ;;  %v2112_v29 = vsel %vm2109_vm12, %v2094_v12, %v2096_v26 }
 0x1fc   : > { %v6425_v9 = vadd.f32 %v1126_v7, %v6331_v53  ;;  %v1154_v14 = vpop.f32.mrf.mxu1  ;;  %v2100_v41 = vpop.permute.xlu1 %2099 }
 0x1fd   : > { %v6431_v4 = vadd.f32 %v1154_v14, %v6355_v17  ;;  %v2114_v47 = vsel %vm2109_vm12, %v2098_v32, %v2100_v41 }
 0x1fe   : > { %5294 = vmatmul.msk.bf16.vlgmr.msrb.gmra.mxu2 %vm825_vm7, %v6402_v16 }
 0x1ff   : > { %2139 = vmatpush.bf16.msrb.mxu2 %v2110_v15 }
 0x200   : > { %5295 = vmatmul.msk.bf16.vlgmr.msrb.gmra.mxu3 %vm825_vm7, %v6402_v16 }
 0x201   : > { %2153 = vmatpush.bf16.msrb.mxu3 %v2111_v51  ;;  %v1217_v53 = vpop.f32.mrf.mxu2 }
 0x202   : > { %v6440_v2 = vadd.f32 %v1217_v53, %v6343_v56  ;;  %v1245_v6 = vpop.f32.mrf.mxu0  ;;  %v2113_v56 = vsel %vm2109_vm12, %v2096_v26, %v2098_v32  ;;  %v2102_v48 = vpop.permute.xlu2 %2101 }
 0x203   : > { %v1231_v22 = vpop.f32.mrf.mxu3  ;;  %v6446_v33 = vadd.f32 %v1245_v6, %v6368_v20 }
 0x204   : > { %v6443_v17 = vadd.f32 %v1231_v22, %v6345_v0  ;;  %v1259_v35 = vpop.f32.mrf.mxu1  ;;  %v2106_v3 = vpop.permute.xlu1 %2105 }
 0x205   : > { %v6450_v39 = vadd.f32 %v1259_v35, %v6371_v25  ;;  %5296 = vmatmul.msk.bf16.vlgmr.msra.gmra.mxu0 %vm825_vm7, %v6402_v16 }
 0x206   : > { %2167 = vmatpush.bf16.msra.mxu0 %v2112_v29 }
 0x207   : > { %5297 = vmatmul.msk.bf16.vlgmr.msra.gmra.mxu1 %vm825_vm7, %v6402_v16 }
 0x208   : > { %2181 = vmatpush.bf16.msra.mxu1 %v2113_v56 }
 0x209   : > { %v1219_v0 = vpop.f32.mrf.mxu2 }
 0x20a   : > { %v6458_v20 = vadd.f32 %v1219_v0, %v6357_v8  ;;  %v1247_v25 = vpop.f32.mrf.mxu0  ;;  %v2115_v8 = vsel %vm2109_vm12, %v2100_v41, %v2102_v48  ;;  %v2108_v15 = vpop.permute.xlu2 %2107 }
 0x20b   : > { %v1233_v42 = vpop.f32.mrf.mxu3  ;;  %v6464_v46 = vadd.f32 %v1247_v25, %v6384_v38  ;;  %v2104_v38 = vpop.permute.xlu0 %2103 }
 0x20c   : > { %v6461_v44 = vadd.f32 %v1233_v42, %v6359_v10  ;;  %v1261_v36 = vpop.f32.mrf.mxu1  ;;  %v2116_v5 = vsel %vm2109_vm12, %v2102_v48, %v2104_v38  ;;  %v2303_v26 = vpop.permute.xlu1 %2302 }
 0x20d   : > { %v6467_v43 = vadd.f32 %v1261_v36, %v6387_v28 }
 0x20e   : > { %5298 = vmatmul.msk.bf16.vlgmr.msra.gmra.mxu2 %vm825_vm7, %v6402_v16 }
 0x20f   : > { %2195 = vmatpush.bf16.msra.mxu2 %v2114_v47 }
 0x210   : > { %5299 = vmatmul.msk.bf16.vlgmr.msra.gmra.mxu3 %vm825_vm7, %v6402_v16 }
 0x211   : > { %2209 = vmatpush.bf16.msra.mxu3 %v2115_v8  ;;  %v1273_v10 = vpop.f32.mrf.mxu2 }
 0x212   : > { %v6476_v55 = vadd.f32 %v1273_v10, %v6373_v27  ;;  %v1301_v45 = vpop.f32.mrf.mxu0  ;;  %v2117_v27 = vsel %vm2109_vm12, %v2104_v38, %v2106_v3  ;;  %v2305_v41 = vpop.permute.xlu2 %2304 }
 0x213   : > { %v1287_v28 = vpop.f32.mrf.mxu3  ;;  %v6482_v18 = vadd.f32 %v1301_v45, %v6405_v50 }
 0x214   : > { %v6479_v60 = vadd.f32 %v1287_v28, %v6376_v34  ;;  %v1315_v49 = vpop.f32.mrf.mxu1  ;;  %v2309_v48 = vpop.permute.xlu1 %2308 }
 0x215   : > { %v6486_v7 = vadd.f32 %v1315_v49, %v6408_v57  ;;  %5300 = vmatmul.msk.bf16.vlgmr.msrb.gmra.mxu0 %vm825_vm7, %v6402_v16  ;;  %v6499_v57 = vld [vmem:[%s7722_s3 + $0x30] sm:$0xff] }
 0x216   : > { %2223 = vmatpush.bf16.msrb.mxu0 %v2116_v5 }
 0x217   : > { %5301 = vmatmul.msk.bf16.vlgmr.msrb.gmra.mxu1 %vm825_vm7, %v6402_v16 }
 0x218   : > { %2237 = vmatpush.bf16.msrb.mxu1 %v2117_v27 }
 0x219   : > { %v1275_v34 = vpop.f32.mrf.mxu2 }
 0x21a   : > { %v6494_v50 = vadd.f32 %v1275_v34, %v6389_v30  ;;  %v1303_v14 = vpop.f32.mrf.mxu0  ;;  %v2118_v30 = vsel %vm2109_vm12, %v2106_v3, %v2108_v15  ;;  %v2311_v45 = vpop.permute.xlu2 %2310 }
 0x21b   : > { %v1289_v54 = vpop.f32.mrf.mxu3  ;;  %v6505_v51 = vadd.f32 %v1303_v14, %v6422_v63  ;;  %v2325_v34 = vsel %vm2320_vm13, %v2309_v48, %v2311_v45 }
 0x21c   : > { %v6502_v12 = vadd.f32 %v1289_v54, %v6391_v23  ;;  %v1317_v16 = vpop.f32.mrf.mxu1  ;;  %v2301_v23 = vpop.permute.xlu0 %2300 }
 0x21d   : > { %v6508_v53 = vadd.f32 %v1317_v16, %v6425_v9  ;;  %v2321_v56 = vsel %vm2320_vm13, %v2301_v23, %v2303_v26 }
 0x21e   : > { %5308 = vmatmul.msk.bf16.vlgmr.msrb.gmra.mxu2 %vm825_vm7, %v6499_v57 }
 0x21f   : > { %2251 = vmatpush.bf16.msrb.mxu2 %v2118_v30 }
 0x220   : > { %5309 = vmatmul.msk.bf16.vlgmr.msrb.gmra.mxu3 %vm825_vm7, %v6499_v57 }
 0x221   : > { %2265 = vmatpush.bf16.msrb.mxu3 %v2108_v15  ;;  %v1329_v22 = vpop.f32.mrf.mxu2  ;;  %v2315_v15 = vpop.permute.xlu1 %2314 }
 0x222   : > { %v6516_v63 = vadd.f32 %v1329_v22, %v6411_v62  ;;  %v1488_v32 = vpop.f32.mrf.mxu0  ;;  %v2322_v62 = vsel %vm2320_vm13, %v2303_v26, %v2305_v41  ;;  %v2317_v26 = vpop.permute.xlu2 %2316 }
 0x223   : > { %v1343_v6 = vpop.f32.mrf.mxu3  ;;  %v6522_v35 = vadd.f32 %v1488_v32, %v6440_v2 }
 0x224   : > { %v6519_v9 = vadd.f32 %v1343_v6, %v6415_v1  ;;  %v1502_v29 = vpop.f32.mrf.mxu1  ;;  %v2307_v2 = vpop.permute.xlu0 %2306 }
 0x225   : > { %v6526_v0 = vadd.f32 %v1502_v29, %v6443_v17  ;;  %5310 = vmatmul.msk.bf16.vlgmr.msra.gmra.mxu0 %vm825_vm7, %v6499_v57  ;;  %v2323_v38 = vsel %vm2320_vm13, %v2305_v41, %v2307_v2 }
 0x226   : > { %2350 = vmatpush.bf16.msra.mxu0 %v2321_v56 }
 0x227   : > { %5311 = vmatmul.msk.bf16.vlgmr.msra.gmra.mxu1 %vm825_vm7, %v6499_v57 }
 0x228   : > { %2364 = vmatpush.bf16.msra.mxu1 %v2322_v62 }
 0x229   : > { %v1331_v1 = vpop.f32.mrf.mxu2 }
 0x22a   : > { %v6534_v42 = vadd.f32 %v1331_v1, %v6428_v13  ;;  %v1490_v36 = vpop.f32.mrf.mxu0  ;;  %v2324_v13 = vsel %vm2320_vm13, %v2307_v2, %v2309_v48 }
 0x22b   : > { %v1345_v25 = vpop.f32.mrf.mxu3  ;;  %v6540_v47 = vadd.f32 %v1490_v36, %v6458_v20  ;;  %v2514_v36 = vpop.permute.xlu2 %2513 }
 0x22c   : > { %v6537_v17 = vadd.f32 %v1345_v25, %v6431_v4  ;;  %v1504_v8 = vpop.f32.mrf.mxu1  ;;  %v2313_v49 = vpop.permute.xlu0 %2312 }
 0x22d   : > { %v6543_v10 = vadd.f32 %v1504_v8, %v6461_v44  ;;  %v2327_v6 = vsel %vm2320_vm13, %v2313_v49, %v2315_v15 }
 0x22e   : > { %5312 = vmatmul.msk.bf16.vlgmr.msra.gmra.mxu2 %vm825_vm7, %v6499_v57 }
 0x22f   : > { %2378 = vmatpush.bf16.msra.mxu2 %v2323_v38 }
 0x230   : > { %5313 = vmatmul.msk.bf16.vlgmr.msra.gmra.mxu3 %vm825_vm7, %v6499_v57 }
 0x231   : > { %2392 = vmatpush.bf16.msra.mxu3 %v2324_v13  ;;  %v1516_v4 = vpop.f32.mrf.mxu2 }
 0x232   : > { %v6552_v20 = vadd.f32 %v1516_v4, %v6446_v33  ;;  %v1544_v3 = vpop.f32.mrf.mxu0  ;;  %v2326_v33 = vsel %vm2320_vm13, %v2311_v45, %v2313_v49 }
 0x233   : > { %v1530_v28 = vpop.f32.mrf.mxu3  ;;  %v6558_v5 = vadd.f32 %v1544_v3, %v6476_v55 }
 0x234   : > { %v6555_v44 = vadd.f32 %v1530_v28, %v6450_v39  ;;  %v1558_v27 = vpop.f32.mrf.mxu1 }
 0x235   : > { %v6562_v54 = vadd.f32 %v1558_v27, %v6479_v60  ;;  %5314 = vmatmul.msk.bf16.vlgmr.msrb.gmra.mxu0 %vm825_vm7, %v6499_v57 }
 0x236   : > { %2406 = vmatpush.bf16.msrb.mxu0 %v2325_v34 }
 0x237   : > { %5315 = vmatmul.msk.bf16.vlgmr.msrb.gmra.mxu1 %vm825_vm7, %v6499_v57 }
 0x238   : > { %2420 = vmatpush.bf16.msrb.mxu1 %v2326_v33 }
 0x239   : > { %v1518_v39 = vpop.f32.mrf.mxu2 }
 0x23a   : > { %v6570_v55 = vadd.f32 %v1518_v39, %v6464_v46  ;;  %v1546_v60 = vpop.f32.mrf.mxu0  ;;  %v2328_v46 = vsel %vm2320_vm13, %v2315_v15, %v2317_v26 }
 0x23b   : > { %v1532_v14 = vpop.f32.mrf.mxu3  ;;  %v6576_v30 = vadd.f32 %v1546_v60, %v6494_v50  ;;  %v6590_v50 = vld [vmem:[%s7722_s3 + $0x38] sm:$0xff] }
 0x23c   : > { %v6573_v16 = vadd.f32 %v1532_v14, %v6467_v43  ;;  %v1560_v23 = vpop.f32.mrf.mxu1  ;;  %v2520_v14 = vpop.permute.xlu2 %2519 }
 0x23d   : > { %v6579_v22 = vadd.f32 %v1560_v23, %v6502_v12  ;;  %v2319_v12 = vpop.permute.xlu0 %2318 }
 0x23e   : > { %5316 = vmatmul.msk.bf16.vlgmr.msrb.gmra.mxu2 %vm825_vm7, %v6499_v57  ;;  %v2329_v1 = vsel %vm2320_vm13, %v2317_v26, %v2319_v12 }
 0x23f   : > { %2434 = vmatpush.bf16.msrb.mxu2 %v2327_v6 }
 0x240   : > { %5317 = vmatmul.msk.bf16.vlgmr.msrb.gmra.mxu3 %vm825_vm7, %v6499_v57 }
 0x241   : > { %2448 = vmatpush.bf16.msrb.mxu3 %v2328_v46  ;;  %v1572_v43 = vpop.f32.mrf.mxu2 }
 0x242   : > { %v6593_v32 = vadd.f32 %v1572_v43, %v6482_v18  ;;  %v1600_v41 = vpop.f32.mrf.mxu0  ;;  %v2512_v18 = vpop.permute.xlu1 %2511 }
 0x243   : > { %v1586_v29 = vpop.f32.mrf.mxu3  ;;  %v6599_v62 = vadd.f32 %v1600_v41, %v6516_v63  ;;  %v2532_v28 = vsel %vm2531_vm14, %v2512_v18, %v2514_v36 }
 0x244   : > { %v6596_v56 = vadd.f32 %v1586_v29, %v6486_v7  ;;  %v1614_v57 = vpop.f32.mrf.mxu1  ;;  %v2526_v29 = vpop.permute.xlu2 %2525 }
 0x245   : > { %v6603_v2 = vadd.f32 %v1614_v57, %v6519_v9  ;;  %5324 = vmatmul.msk.bf16.vlgmr.msra.gmra.mxu0 %vm825_vm7, %v6590_v50  ;;  %v2516_v8 = vpop.permute.xlu0 %2515 }
 0x246   : > { %2462 = vmatpush.bf16.msra.mxu0 %v2329_v1 }
 0x247   : > { %5325 = vmatmul.msk.bf16.vlgmr.msra.gmra.mxu1 %vm825_vm7, %v6590_v50 }
 0x248   : > { %2476 = vmatpush.bf16.msra.mxu1 %v2319_v12 }
 0x249   : > { %v1574_v7 = vpop.f32.mrf.mxu2 }
 0x24a   : > { %v6610_v25 = vadd.f32 %v1574_v7, %v6505_v51  ;;  %v1602_v9 = vpop.f32.mrf.mxu0  ;;  %v2533_v51 = vsel %vm2531_vm14, %v2514_v36, %v2516_v8  ;;  %v2518_v45 = vpop.permute.xlu1 %2517 }
 0x24b   : > { %v1588_v63 = vpop.f32.mrf.mxu3  ;;  %v6616_v38 = vadd.f32 %v1602_v9, %v6534_v42  ;;  %v2534_v33 = vsel %vm2531_vm14, %v2516_v8, %v2518_v45 }
 0x24c   : > { %v6613_v48 = vadd.f32 %v1588_v63, %v6508_v53  ;;  %v1616_v13 = vpop.f32.mrf.mxu1 }
 0x24d   : > { %7755 = vst [vmem:[#allocation11_spill] sm:$0xff] %v6616_v38  ;;  %v6619_v4 = vadd.f32 %v1616_v13, %v6537_v17 }
 0x24e   : > { %5326 = vmatmul.msk.bf16.vlgmr.msra.gmra.mxu2 %vm825_vm7, %v6590_v50 }
 0x24f   : > { %7756 = vst [vmem:[#allocation12_spill] sm:$0xff] %v6619_v4  ;;  %2561 = vmatpush.bf16.msra.mxu2 %v2532_v28 }
 0x250   : > { %5327 = vmatmul.msk.bf16.vlgmr.msra.gmra.mxu3 %vm825_vm7, %v6590_v50 }
 0x251   : > { %2575 = vmatpush.bf16.msra.mxu3 %v2533_v51  ;;  %v1719_v53 = vpop.f32.mrf.mxu2 }
 0x252   : > { %v1850_v42 = vadd.f32 %v1719_v53, %v6522_v35  ;;  %v1747_v49 = vpop.f32.mrf.mxu0  ;;  %v2535_v35 = vsel %vm2531_vm14, %v2518_v45, %v2520_v14  ;;  %v2524_v26 = vpop.permute.xlu1 %2523 }
 0x253   : > { %v1733_v3 = vpop.f32.mrf.mxu3  ;;  %v6630_v27 = vadd.f32 %v1747_v49, %v6552_v20  ;;  %v2522_v20 = vpop.permute.xlu0 %2521  ;;  %v2538_v63 = vsel %vm2531_vm14, %v2524_v26, %v2526_v29 }
 0x254   : > { %v1851_v17 = vadd.f32 %v1733_v3, %v6526_v0  ;;  %v1761_v34 = vpop.f32.mrf.mxu1  ;;  %v2536_v46 = vsel %vm2531_vm14, %v2520_v14, %v2522_v20  ;;  %v2537_v43 = vsel %vm2531_vm14, %v2522_v20, %v2524_v26  ;;  %v2714_v14 = vld [vmem:[%s7723_s4] sm:$0xff] }
 0x255   : > { %v6634_v39 = vadd.f32 %v1761_v34, %v6555_v44  ;;  %5328 = vmatmul.msk.bf16.vlgmr.msrb.gmra.mxu0 %vm825_vm7, %v6590_v50  ;;  %2718 = vperm.xlu2 %5740, %v2714_v14  }
 0x256   : > { %2589 = vmatpush.bf16.msrb.mxu0 %v2534_v33 }
 0x257   : > { %5329 = vmatmul.msk.bf16.vlgmr.msrb.gmra.mxu1 %vm825_vm7, %v6590_v50 }
 0x258   : > { %2603 = vmatpush.bf16.msrb.mxu1 %v2535_v35 }
 0x259   : > { %v1721_v0 = vpop.f32.mrf.mxu2 }
 0x25a   : > { %v6642_v15 = vadd.f32 %v1721_v0, %v6540_v47  ;;  %v6647_v23 = vpop.f32.mrf.mxu0  ;;  %v2530_v8 = vpop.permute.xlu1 %2529 }
 0x25b   : > { %v1735_v60 = vpop.f32.mrf.mxu3  ;;  %v2528_v1 = vpop.permute.xlu0 %2527 }
 0x25c   : > { %v6645_v44 = vadd.f32 %v1735_v60, %v6543_v10  ;;  %v6649_v6 = vpop.f32.mrf.mxu1  ;;  %v2539_v9 = vsel %vm2531_vm14, %v2526_v29, %v2528_v1  ;;  %v2540_v28 = vsel %vm2531_vm14, %v2528_v1, %v2530_v8 }
 0x25e   : > { %5330 = vmatmul.msk.bf16.vlgmr.msrb.gmra.mxu2 %vm825_vm7, %v6590_v50 }
 0x25f   : > { %2617 = vmatpush.bf16.msrb.mxu2 %v2536_v46 }
 0x260   : > { %5331 = vmatmul.msk.bf16.vlgmr.msrb.gmra.mxu3 %vm825_vm7, %v6590_v50 }
 0x261   : > { %2631 = vmatpush.bf16.msrb.mxu3 %v2537_v43  ;;  %v1775_v47 = vpop.f32.mrf.mxu2 }
 0x262   : > { %v1854_v10 = vadd.f32 %v1775_v47, %v6558_v5  ;;  %v1803_v57 = vpop.f32.mrf.mxu0 }
 0x263   : > { %v1789_v12 = vpop.f32.mrf.mxu3  ;;  %v1856_v18 = vadd.f32 %v1803_v57, %v6593_v32  ;;  %v5678_v32 = vld [vmem:[%s7722_s3 + $0x40] sm:$0xff] }
 0x264   : > { %v1855_v41 = vadd.f32 %v1789_v12, %v6562_v54  ;;  %v1817_v7 = vpop.f32.mrf.mxu1 }
 0x265   : > { %v1857_v36 = vadd.f32 %v1817_v7, %v6596_v56  ;;  %5332 = vmatmul.msk.bf16.vlgmr.msra.gmra.mxu0 %vm825_vm7, %v6590_v50 }
 0x266   : > { %2645 = vmatpush.bf16.msra.mxu0 %v2538_v63 }
 0x267   : > { %5333 = vmatmul.msk.bf16.vlgmr.msra.gmra.mxu1 %vm825_vm7, %v6590_v50 }
 0x268   : > { %2659 = vmatpush.bf16.msra.mxu1 %v2539_v9 }
 0x269   : > { %v6667_v5 = vpop.f32.mrf.mxu2 }
 0x26a   : > { %v6674_v56 = vpop.f32.mrf.mxu0 }
 0x26b   : > { %v6669_v54 = vpop.f32.mrf.mxu3 }
 0x26c   : > { %v6676_v13 = vpop.f32.mrf.mxu1 }
 0x26e   : > { %5340 = vmatmul.msk.bf16.vlgmr.msra.gmra.mxu2 %vm825_vm7, %v5678_v32 }
 0x26f   : > { %2673 = vmatpush.bf16.msra.mxu2 %v2540_v28 }
 0x270   : > { %5341 = vmatmul.msk.bf16.vlgmr.msra.gmra.mxu3 %vm825_vm7, %v5678_v32 }
 0x271   : > { %2687 = vmatpush.bf16.msra.mxu3 %v2530_v8  ;;  %v1831_v50 = vpop.f32.mrf.mxu2 }
 0x272   : > { %v1858_v51 = vadd.f32 %v1831_v50, %v6599_v62  ;;  %v1930_v3 = vpop.f32.mrf.mxu0 }
 0x273   : > { %v1845_v53 = vpop.f32.mrf.mxu3  ;;  %v2061_v49 = vadd.f32 %v1930_v3, %v1850_v42 }
 0x274   : > { %v1859_v45 = vadd.f32 %v1845_v53, %v6603_v2  ;;  %v1944_v34 = vpop.f32.mrf.mxu1 }
 0x275   : > { %v2062_v33 = vadd.f32 %v1944_v34, %v1851_v17  ;;  %5342 = vmatmul.msk.bf16.vlgmr.msrb.gmra.mxu0 %vm825_vm7, %v5678_v32 }
 0x277   : > { %5343 = vmatmul.msk.bf16.vlgmr.msrb.gmra.mxu1 %vm825_vm7, %v5678_v32 }
 0x279   : > { %v6688_v35 = vpop.f32.mrf.mxu2 }
 0x27a   : > { %7757 = vst [vmem:[#allocation13_spill] sm:$0xff] %v6688_v35  ;;  %v6692_v62 = vpop.f32.mrf.mxu0 }
 0x27b   : > { %v6690_v0 = vpop.f32.mrf.mxu3 }
 0x27c   : > { %7758 = vst [vmem:[#allocation14_spill] sm:$0xff] %v6690_v0  ;;  %v6694_v2 = vpop.f32.mrf.mxu1 }
 0x27e   : > { %5344 = vmatmul.msk.bf16.vlgmr.msrb.gmra.mxu2 %vm825_vm7, %v5678_v32 }
 0x280   : > { %5345 = vmatmul.msk.bf16.vlgmr.msrb.gmra.mxu3 %vm825_vm7, %v5678_v32 }
 0x281   : > { %v1958_v42 = vpop.f32.mrf.mxu2 }
 0x282   : > { %v2063_v17 = vadd.f32 %v1958_v42, %v6630_v27  ;;  %v1986_v26 = vpop.f32.mrf.mxu0 }
 0x283   : > { %v1972_v20 = vpop.f32.mrf.mxu3  ;;  %v2065_v46 = vadd.f32 %v1986_v26, %v1854_v10 }
 0x284   : > { %v2064_v60 = vadd.f32 %v1972_v20, %v6634_v39  ;;  %v2000_v43 = vpop.f32.mrf.mxu1 }
 0x285   : > { %v2066_v47 = vadd.f32 %v2000_v43, %v1855_v41  ;;  %5346 = vmatmul.msk.bf16.vlgmr.msra.gmra.mxu0 %vm825_vm7, %v5678_v32 }
 0x287   : > { %5347 = vmatmul.msk.bf16.vlgmr.msra.gmra.mxu1 %vm825_vm7, %v5678_v32 }
 0x289   : > { %v6702_v12 = vpop.f32.mrf.mxu2 }
 0x28a   : > { %v6706_v57 = vpop.f32.mrf.mxu0 }
 0x28b   : > { %v6704_v29 = vpop.f32.mrf.mxu3 }
 0x28c   : > { %v6708_v1 = vpop.f32.mrf.mxu1 }
 0x28e   : > { %5348 = vmatmul.msk.bf16.vlgmr.msra.gmra.mxu2 %vm825_vm7, %v5678_v32 }
 0x290   : > { %5349 = vmatmul.msk.bf16.vlgmr.msra.gmra.mxu3 %vm825_vm7, %v5678_v32 }
 0x291   : > { %v2014_v27 = vpop.f32.mrf.mxu2 }
 0x292   : > { %v2067_v39 = vadd.f32 %v2014_v27, %v1856_v18  ;;  %v2042_v7 = vpop.f32.mrf.mxu0 }
 0x293   : > { %v2028_v10 = vpop.f32.mrf.mxu3  ;;  %v2069_v63 = vadd.f32 %v2042_v7, %v1858_v51 }
 0x294   : > { %v2068_v41 = vadd.f32 %v2028_v10, %v1857_v36  ;;  %v2056_v9 = vpop.f32.mrf.mxu1 }
 0x295   : > { %v2070_v8 = vadd.f32 %v2056_v9, %v1859_v45 }
 0x299   : > { %v6712_v28 = vpop.f32.mrf.mxu2 }
 0x29a   : > { %v6716_v53 = vpop.f32.mrf.mxu0 }
 0x29b   : > { %v6714_v50 = vpop.f32.mrf.mxu3  ;;  %7759 = vst [vmem:[#allocation15_spill] sm:$0xff] %v6716_v53 }
 0x29c   : > { %v6718_v3 = vpop.f32.mrf.mxu1 }
 0x29d   : > { %7760 = vst [vmem:[#allocation16_spill] sm:$0xff] %v6718_v3 }
 0x2a1   : > { %v2141_v34 = vpop.f32.mrf.mxu2 }
 0x2a2   : > { %v2272_v14 = vadd.f32 %v2141_v34, %v2061_v49  ;;  %v2169_v20 = vpop.f32.mrf.mxu0 }
 0x2a3   : > { %v2155_v42 = vpop.f32.mrf.mxu3  ;;  %v2274_v18 = vadd.f32 %v2169_v20, %v2063_v17 }
 0x2a4   : > { %v2273_v32 = vadd.f32 %v2155_v42, %v2062_v33  ;;  %v2183_v26 = vpop.f32.mrf.mxu1 }
 0x2a5   : > { %v2275_v36 = vadd.f32 %v2183_v26, %v2064_v60 }
 0x2a9   : > { %v6720_v43 = vpop.f32.mrf.mxu2 }
 0x2aa   : > { %v6724_v45 = vpop.f32.mrf.mxu0 }
 0x2ab   : > { %v6722_v51 = vpop.f32.mrf.mxu3 }
 0x2ac   : > { %v6726_v27 = vpop.f32.mrf.mxu1 }
 0x2b1   : > { %v2197_v10 = vpop.f32.mrf.mxu2 }
 0x2b2   : > { %v6728_v7 = vadd.f32 %v2197_v10, %v2065_v46  ;;  %v2225_v49 = vpop.f32.mrf.mxu0 }
 0x2b3   : > { %v2211_v9 = vpop.f32.mrf.mxu3  ;;  %v6732_v33 = vadd.f32 %v2225_v49, %v2067_v39 }
 0x2b4   : > { %v6730_v40 = vadd.f32 %v2211_v9, %v2066_v47  ;;  %v2239_v17 = vpop.f32.mrf.mxu1 }
 0x2b5   : > { %v6734_v34 = vadd.f32 %v2239_v17, %v2068_v41 }
 0x2b9   : > { %v6736_v60 = vpop.f32.mrf.mxu2 }
 0x2ba   : > { %7761 = vst [vmem:[#allocation17_spill] sm:$0xff] %v6736_v60  ;;  %v6740_v20 = vpop.f32.mrf.mxu0 }
 0x2bb   : > { %v6738_v42 = vpop.f32.mrf.mxu3  ;;  %7763 = vst [vmem:[#allocation19_spill] sm:$0xff] %v6740_v20 }
 0x2bc   : > { %7762 = vst [vmem:[#allocation18_spill] sm:$0xff] %v6738_v42  ;;  %v6742_v26 = vpop.f32.mrf.mxu1 }
 0x2bd   : > { %7764 = vst [vmem:[#allocation20_spill] sm:$0xff] %v6742_v26 }
 0x2c1   : > { %v2253_v59 = vpop.f32.mrf.mxu2 }
 0x2c2   : > { %v6744_v46 = vadd.f32 %v2253_v59, %v2069_v63  ;;  %v2352_v9 = vpop.f32.mrf.mxu0  ;;  %v5358_v59 = vld [vmem:[#allocation3] sm:$0xf]  ;;  %v5684_v63 = vld [vmem:[#allocation3 + $0x2c] sm:$0xf0] }
 0x2c3   : > { %v2267_v10 = vpop.f32.mrf.mxu3 }
 0x2c4   : > { %7765 = vst [vmem:[#allocation21_spill] sm:$0xff] %v6744_v46  ;;  %v6746_v47 = vadd.f32 %v2267_v10, %v2070_v8  ;;  %v2366_v39 = vpop.f32.mrf.mxu1  ;;  %v6756_v8 = vor.u32 %v5684_v63, %v5358_v59 }
 0x2c5   : > { %v2484_v58 = vadd.f32 %v2366_v39, %v2273_v32 }
 0x2c6   : > { %7766 = vst [vmem:[#allocation22_spill] sm:$0xff] %v6746_v47  ;;  %2866 = vrot.lane.b32.xlu1 %v6756_v8, %s5752_s17 }
 0x2c7   : > { %7769 = vst [vmem:[#allocation25_spill] sm:$0xff] %v6756_v8  ;;  %v6780_v8 = vpop.permute.xlu2 %2718 }
 0x2c9   : > { %v6748_v49 = vpop.f32.mrf.mxu2 }
 0x2ca   : > { %7767 = vst [vmem:[#allocation23_spill] sm:$0xff] %v6748_v49  ;;  %v2354_v17 = vpop.f32.mrf.mxu0 }
 0x2cb   : > { %v6750_v41 = vpop.f32.mrf.mxu3 }
 0x2cc   : > { %7768 = vst [vmem:[#allocation24_spill] sm:$0xff] %v6750_v41  ;;  %v2368_v52 = vpop.f32.mrf.mxu1 }
 0x2d1   : > { %v2380_v3 = vpop.f32.mrf.mxu2 }
 0x2d2   : > { %v6752_v0 = vpop.f32.mrf.mxu0  ;;  %v2485_v26 = vadd.f32 %v2380_v3, %v2274_v18  ;;  %v2072_v3 = vadd.f32 %v6694_v2, %v6645_v44 }
 0x2d3   : > { %v2394_v53 = vpop.f32.mrf.mxu3 }
 0x2d4   : > { %v6754_v4 = vpop.f32.mrf.mxu1 }
 0x2d9   : > { %v2382_v35 = vpop.f32.mrf.mxu2 }
 0x2da   : > { %v6758_v10 = vpop.f32.mrf.mxu0 }
 0x2db   : > { %v2396_v38 = vpop.f32.mrf.mxu3  ;;  %7770 = vst [vmem:[#allocation26_spill] sm:$0xff] %v6758_v10 }
 0x2dc   : > { %v6760_v47 = vpop.f32.mrf.mxu1 }
 0x2dd   : > { %7771 = vst [vmem:[#allocation27_spill] sm:$0xff] %v6760_v47  ;;  %v2483_v47 = vadd.f32 %v2352_v9, %v2272_v14 }
 0x2e1   : > { %v6764_v41 = vpop.f32.mrf.mxu2 }
 0x2e2   : > { %v6768_v46 = vpop.f32.mrf.mxu0 }
 0x2e3   : > { %v6766_v49 = vpop.f32.mrf.mxu3  ;;  %7772 = vst [vmem:[#allocation28_spill] sm:$0xff] %v6768_v46  ;;  %v1862_v46 = vadd.f32 %v6647_v23, %v6570_v55 }
 0x2e4   : > { %v6770_v19 = vpop.f32.mrf.mxu1 }
 0x2e5   : > { %7773 = vst [vmem:[#allocation29_spill] sm:$0xff] %v6770_v19  ;;  %v2486_v19 = vadd.f32 %v2394_v53, %v2275_v36  ;;  %v2073_v18 = vadd.f32 %v6702_v12, %v1862_v46 }
 0x2e9   : > { %v6772_v11 = vpop.f32.mrf.mxu2 }
 0x2ea   : > { %7774 = vst [vmem:[#allocation30_spill] sm:$0xff] %v6772_v11  ;;  %v6776_v59 = vpop.f32.mrf.mxu0 }
 0x2eb   : > { %v6774_v61 = vpop.f32.mrf.mxu3 }
 0x2ec   : > { %7775 = vst [vmem:[#allocation31_spill] sm:$0xff] %v6774_v61  ;;  %v6778_v63 = vpop.f32.mrf.mxu1  ;;  %v1863_v61 = vadd.f32 %v6649_v6, %v6573_v16 }
 0x2ed   : > { %7776 = vst [vmem:[#allocation32_spill] sm:$0xff] %v6778_v63  ;;  %v2071_v63 = vadd.f32 %v6692_v62, %v6642_v15  ;;  %v2284_v15 = vadd.f32 %v6724_v45, %v2073_v18 }
 0x2ef   : > { %v2282_v23 = vadd.f32 %v6720_v43, %v2071_v63 }
 0x2f1   : > { %v2563_v10 = vpop.f32.mrf.mxu2  ;;  %v2493_v2 = vadd.f32 %v2354_v17, %v2282_v23 }
 0x2f2   : > { %v2694_v20 = vadd.f32 %v2563_v10, %v2483_v47  ;;  %v2591_v11 = vpop.f32.mrf.mxu0 }
 0x2f3   : > { %v2577_v42 = vpop.f32.mrf.mxu3  ;;  %v2696_v14 = vadd.f32 %v2591_v11, %v2485_v26  ;;  %v2283_v11 = vadd.f32 %v6722_v51, %v2072_v3  ;;  %v6802_v26 = vpop.permute.xlu0 %2723  ;;  %v1864_v3 = vadd.f32 %v6667_v5, %v6576_v30 }
 0x2f4   : > { %v2695_v60 = vadd.f32 %v2577_v42, %v2484_v58  ;;  %v2605_v32 = vpop.f32.mrf.mxu1  ;;  %v2726_v9 = vadd.f32 %v6780_v8, %v2694_v20  ;;  %v2074_v58 = vadd.f32 %v6704_v29, %v1863_v61 }
 0x2f5   : > { %v2697_v47 = vadd.f32 %v2605_v32, %v2486_v19  ;;  %v2728_v16 = vadd.f32 %v6780_v8, %v2696_v14  ;;  %v2494_v36 = vadd.f32 %v2368_v52, %v2283_v11  ;;  %v2488_v11 = vadd.f32 %v6754_v4, %v6730_v40 }
 0x2f6   : > { %v2727_v55 = vadd.f32 %v6780_v8, %v2695_v60  ;;  %v2746_v6 = vmax.f32 %v2726_v9, 0.0  ;;  %v2285_v44 = vadd.f32 %v6726_v27, %v2074_v58  ;;  %v2495_v60 = vadd.f32 %v2382_v35, %v2284_v15 }
 0x2f7   : > { %v2729_v62 = vadd.f32 %v6780_v8, %v2697_v47  ;;  %v2748_v19 = vmax.f32 %v2728_v16, 0.0  ;;  %v2487_v58 = vadd.f32 %v6752_v0, %v6728_v7 }
 0x2f8   : > { %v2747_v53 = vmax.f32 %v2727_v55, 0.0  ;;  %v2766_v12 = vmul.f32 %v2746_v6, %v5940_v21  ;;  %v2496_v42 = vadd.f32 %v2396_v38, %v2285_v44  ;;  %v1865_v55 = vadd.f32 %v6669_v54, %v6579_v22 }
 0x2f9   : > { %v2749_v61 = vmax.f32 %v2729_v62, 0.0  ;;  %v2565_v43 = vpop.f32.mrf.mxu2  ;;  %v2768_v45 = vmul.f32 %v2748_v19, %v5951_v31  ;;  %v1866_v6 = vadd.f32 %v6674_v56, %v6610_v25  ;;  %v1867_v62 = vadd.f32 %v6676_v13, %v6613_v48 }
 0x2fa   : > { %v2767_v29 = vmul.f32 %v2747_v53, %v5944_v24  ;;  %v2704_v20 = vadd.f32 %v2565_v43, %v2493_v2  ;;  %v2593_v17 = vpop.f32.mrf.mxu0  ;;  %v2489_v22 = vadd.f32 %v6764_v41, %v6732_v33  ;;  %v2490_v54 = vadd.f32 %v6766_v49, %v6734_v34  ;;  %v7778_v43 = vld [vmem:[#allocation18_spill] sm:$0xff] }
 0x2fb   : > { %v2579_v51 = vpop.f32.mrf.mxu3  ;;  %v2769_v46 = vmul.f32 %v2749_v61, %v5956_v37  ;;  %v2706_v52 = vadd.f32 %v2593_v17, %v2495_v60  ;;  %v2075_v44 = vadd.f32 %v6706_v57, %v1864_v3  ;;  %v2076_v2 = vadd.f32 %v6708_v1, %v1865_v55  ;;  %v7779_v60 = vld [vmem:[#allocation19_spill] sm:$0xff] }
 0x2fc   : > { %v2786_v27 = vpack.c.bf16 %v2767_v29, %v2766_v12  ;;  %v2705_v39 = vadd.f32 %v2579_v51, %v2494_v36  ;;  %v2736_v10 = vadd.f32 %v6802_v26, %v2704_v20  ;;  %v2607_v63 = vpop.f32.mrf.mxu1  ;;  %v2077_v41 = vadd.f32 %v6712_v28, %v1866_v6  ;;  %v7777_v36 = vld [vmem:[#allocation17_spill] sm:$0xff]  ;;  %v7780_v51 = vld [vmem:[#allocation20_spill] sm:$0xff]  ;;  %v7786_v3 = vld [vmem:[#allocation31_spill] sm:$0xff] }
 0x2fd   : > { %v2787_v14 = vpack.c.bf16 %v2769_v46, %v2768_v45  ;;  %v2707_v38 = vadd.f32 %v2607_v63, %v2496_v42  ;;  %v2738_v9 = vadd.f32 %v6802_v26, %v2706_v52  ;;  %v2078_v12 = vadd.f32 %v6714_v50, %v1867_v62  ;;  %v7781_v46 = vld [vmem:[#allocation26_spill] sm:$0xff]  ;;  %v7788_v6 = vld [vmem:[#allocation8_spill] sm:$0xff] }
 0x2fe   : > { %2796 = vst [vmem:[#allocation3 + $0x4] sm:$0xff] %v2786_v27  ;;  %v2737_v35 = vadd.f32 %v6802_v26, %v2705_v39  ;;  %v2756_v32 = vmax.f32 %v2736_v10, 0.0  ;;  %v2286_v61 = vadd.f32 %v7777_v36, %v2075_v44  ;;  %v2287_v1 = vadd.f32 %v7778_v43, %v2076_v2  ;;  %v7782_v39 = vld [vmem:[#allocation5_spill] sm:$0xff]  ;;  %v7783_v10 = vld [vmem:[#allocation27_spill] sm:$0xff]  ;;  %v7784_v63 = vld [vmem:[#allocation6_spill] sm:$0xff] }
 0x2ff   : > { %2797 = vst [vmem:[#allocation3 + $0xc] sm:$0xff] %v2787_v14  ;;  %v2739_v47 = vadd.f32 %v6802_v26, %v2707_v38  ;;  %v2758_v16 = vmax.f32 %v2738_v9, 0.0  ;;  %v2288_v42 = vadd.f32 %v7779_v60, %v2077_v41  ;;  %v2289_v45 = vadd.f32 %v7780_v51, %v2078_v12  ;;  %v7790_v12 = vld [vmem:[#allocation28_spill] sm:$0xff]  ;;  %v7792_v43 = vld [vmem:[#allocation29_spill] sm:$0xff] }
 0x300   : > { %v2757_v18 = vmax.f32 %v2737_v35, 0.0  ;;  %v2776_v23 = vmul.f32 %v2756_v32, %v5940_v21  ;;  %v2497_v27 = vadd.f32 %v7781_v46, %v2286_v61  ;;  %v2498_v52 = vadd.f32 %v7783_v10, %v2287_v1  ;;  %v7785_v32 = vld [vmem:[#allocation30_spill] sm:$0xff]  ;;  %v7794_v51 = vld [vmem:[#allocation13_spill] sm:$0xff]  ;;  %v7795_v46 = vld [vmem:[#allocation12_spill] sm:$0xff] }
 0x301   : > { %v2759_v5 = vmax.f32 %v2739_v47, 0.0  ;;  %v2619_v15 = vpop.f32.mrf.mxu2  ;;  %v2778_v25 = vmul.f32 %v2758_v16, %v5951_v31  ;;  %v2499_v9 = vadd.f32 %v7785_v32, %v2288_v42 }
 0x302   : > { %v2777_v30 = vmul.f32 %v2757_v18, %v5944_v24  ;;  %v2698_v0 = vadd.f32 %v2619_v15, %v2487_v58  ;;  %v2647_v56 = vpop.f32.mrf.mxu0  ;;  %v2500_v18 = vadd.f32 %v7786_v3, %v2289_v45 }
 0x303   : > { %v2633_v7 = vpop.f32.mrf.mxu3  ;;  %v2779_v40 = vmul.f32 %v2759_v5, %v5956_v37  ;;  %v2700_v13 = vadd.f32 %v2647_v56, %v2489_v22 }
 0x304   : > { %v2791_v53 = vpack.c.bf16 %v2777_v30, %v2776_v23  ;;  %v2699_v4 = vadd.f32 %v2633_v7, %v2488_v11  ;;  %v2730_v48 = vadd.f32 %v6780_v8, %v2698_v0  ;;  %v2661_v33 = vpop.f32.mrf.mxu1  ;;  %v7787_v23 = vld [vmem:[#allocation7_spill] sm:$0xff] }
 0x305   : > { %v2792_v34 = vpack.c.bf16 %v2779_v40, %v2778_v25  ;;  %v2701_v19 = vadd.f32 %v2661_v33, %v2490_v54  ;;  %v2732_v57 = vadd.f32 %v6780_v8, %v2700_v13  ;;  %v5366_v54 = vld [vmem:[#allocation3 + $0x8] sm:$0xf]  ;;  %v5679_v56 = vld [vmem:[#allocation3 + $0x4] sm:$0xf] }
 0x306   : > { %2801 = vst [vmem:[#allocation3 + $0x34] sm:$0xff] %v2791_v53  ;;  %v2731_v49 = vadd.f32 %v6780_v8, %v2699_v4  ;;  %v2750_v29 = vmax.f32 %v2730_v48, 0.0  ;;  %v5680_v13 = vld [vmem:[#allocation3 + $0xc] sm:$0xf] }
 0x307   : > { %2802 = vst [vmem:[#allocation3 + $0x3c] sm:$0xff] %v2792_v34  ;;  %v2733_v28 = vadd.f32 %v6780_v8, %v2701_v19  ;;  %v2752_v50 = vmax.f32 %v2732_v57, 0.0  ;;  %v7789_v19 = vld [vmem:[#allocation21_spill] sm:$0xff]  ;;  %v7791_v57 = vld [vmem:[#allocation22_spill] sm:$0xff] }
 0x308   : > { %v2751_v20 = vmax.f32 %v2731_v49, 0.0  ;;  %v2770_v17 = vmul.f32 %v2750_v29, %v7782_v39  ;;  %v2491_v36 = vadd.f32 %v7790_v12, %v7789_v19  ;;  %v2492_v1 = vadd.f32 %v7792_v43, %v7791_v57 }
 0x309   : > { %v2753_v35 = vmax.f32 %v2733_v28, 0.0  ;;  %v2621_v38 = vpop.f32.mrf.mxu2  ;;  %v2772_v16 = vmul.f32 %v2752_v50, %v7787_v23  ;;  %v7793_v28 = vld [vmem:[#allocation11_spill] sm:$0xff] }
 0x30a   : > { %v2771_v14 = vmul.f32 %v2751_v20, %v7784_v63  ;;  %v2708_v47 = vadd.f32 %v2621_v38, %v2497_v27  ;;  %v2649_v5 = vpop.f32.mrf.mxu0  ;;  %v1868_v45 = vadd.f32 %v7794_v51, %v7793_v28  ;;  %v7796_v27 = vld [vmem:[#allocation14_spill] sm:$0xff] }
 0x30b   : > { %v2635_v55 = vpop.f32.mrf.mxu3  ;;  %v2773_v11 = vmul.f32 %v2753_v35, %v7788_v6  ;;  %v2710_v62 = vadd.f32 %v2649_v5, %v2499_v9  ;;  %v7797_v9 = vld [vmem:[#allocation15_spill] sm:$0xff] }
 0x30c   : > { %v2788_v58 = vpack.c.bf16 %v2771_v14, %v2770_v17  ;;  %v2709_v30 = vadd.f32 %v2635_v55, %v2498_v52  ;;  %v2740_v15 = vadd.f32 %v6802_v26, %v2708_v47  ;;  %v2663_v22 = vpop.f32.mrf.mxu1  ;;  %v1869_v17 = vadd.f32 %v7796_v27, %v7795_v46  ;;  %v7798_v47 = vld [vmem:[#allocation16_spill] sm:$0xff] }
 0x30d   : > { %v5685_v0 = vld [vmem:[#allocation3 + $0x34] sm:$0xf0]  ;;  %v5360_v7 = vld [vmem:[#allocation3 + $0x30] sm:$0xf0]  ;;  %v2789_v53 = vpack.c.bf16 %v2773_v11, %v2772_v16  ;;  %v2711_v40 = vadd.f32 %v2663_v22, %v2500_v18  ;;  %v2742_v2 = vadd.f32 %v6802_v26, %v2710_v62  ;;  %v2079_v3 = vadd.f32 %v7797_v9, %v1868_v45  ;;  %v5374_v11 = vld [vmem:[#allocation3 + $0x10] sm:$0xf] }
 0x30e   : > { %2798 = vst [vmem:[#allocation3 + $0x14] sm:$0xff] %v2788_v58  ;;  %v2741_v25 = vadd.f32 %v6802_v26, %v2709_v30  ;;  %v6852_v4 = vor.u32 %v5685_v0, %v5366_v54  ;;  %v2760_v44 = vmax.f32 %v2740_v15, 0.0  ;;  %v6855_v48 = vor.u32 %v5679_v56, %v5360_v7  ;;  %v5368_v33 = vld [vmem:[#allocation3 + $0x38] sm:$0xf0]  ;;  %v5686_v32 = vld [vmem:[#allocation3 + $0x3c] sm:$0xf0] }
 0x30f   : > { %2799 = vst [vmem:[#allocation3 + $0x1c] sm:$0xff] %v2789_v53  ;;  %v2743_v34 = vadd.f32 %v6802_v26, %v2711_v40  ;;  %v6860_v49 = vor.u32 %v5680_v13, %v5368_v33  ;;  %v2762_v29 = vmax.f32 %v2742_v2, 0.0  ;;  %v2080_v55 = vadd.f32 %v7798_v47, %v1869_v17  ;;  %v7799_v30 = vld [vmem:[#allocation23_spill] sm:$0xff]  ;;  %v7800_v22 = vld [vmem:[#allocation24_spill] sm:$0xff]  ;;  %v7801_v53 = vld [vmem:[#allocation9_spill] sm:$0xff] }
 0x310   : > { %v2761_v41 = vmax.f32 %v2741_v25, 0.0  ;;  %2870 = vrot.lane.b32.xlu0 %v6852_v4, %s5752_s17  ;;  %v2780_v61 = vmul.f32 %v2760_v44, %v7782_v39  ;;  %2868 = vrot.lane.b32.xlu2 %v6855_v48, %s5752_s17  ;;  %v2290_v5 = vadd.f32 %v7799_v30, %v2079_v3  ;;  %v5375_v62 = vor.u32 %v5686_v32, %v5374_v11  ;;  %v7802_v40 = vld [vmem:[#allocation32_spill] sm:$0xff]  ;;  %v7803_v44 = vld [vmem:[#allocation10_spill] sm:$0xff] }
 0x311   : > { %v2763_v42 = vmax.f32 %v2743_v34, 0.0  ;;  %2872 = vrot.lane.b32.xlu1 %v6860_v49, %s5752_s17  ;;  %v2675_v20 = vpop.f32.mrf.mxu2  ;;  %v2782_v14 = vmul.f32 %v2762_v29, %v7787_v23  ;;  %v2291_v54 = vadd.f32 %v7800_v22, %v2080_v55  ;;  %v5692_v32 = vld [vmem:[#allocation3 + $0x4] sm:$0xf]  ;;  %v5444_v9 = vld [vmem:[#allocation3] sm:$0xf] }
 0x312   : > { %v2781_v60 = vmul.f32 %v2761_v41, %v7784_v63  ;;  %v2702_v50 = vadd.f32 %v2675_v20, %v2491_v36  ;;  %v2501_v7 = vadd.f32 %v6776_v59, %v2290_v5  ;;  %v5699_v47 = vld [vmem:[#allocation3 + $0x3c] sm:$0xf0]  ;;  %v5693_v22 = vld [vmem:[#allocation3 + $0xc] sm:$0xf] }
 0x313   : > { %v2689_v10 = vpop.f32.mrf.mxu3  ;;  %v2783_v35 = vmul.f32 %v2763_v42, %v7788_v6  ;;  %v2502_v56 = vadd.f32 %v7802_v40, %v2291_v54 }
 0x314   : > { %v2793_v52 = vpack.c.bf16 %v2781_v60, %v2780_v61  ;;  %v2703_v38 = vadd.f32 %v2689_v10, %v2492_v1  ;;  %v2734_v18 = vadd.f32 %v6780_v8, %v2702_v50  ;;  %v7805_v10 = vld [vmem:[#allocation25_spill] sm:$0xff] }
 0x315   : > { %v2794_v58 = vpack.c.bf16 %v2783_v35, %v2782_v14  ;;  %v5382_v19 = vld [vmem:[#allocation3 + $0x18] sm:$0xf]  ;;  %v5681_v61 = vld [vmem:[#allocation3 + $0x14] sm:$0xf] }
 0x316   : > { %2803 = vst [vmem:[#allocation3 + $0x44] sm:$0xff] %v2793_v52  ;;  %v2735_v16 = vadd.f32 %v6780_v8, %v2703_v38  ;;  %v2754_v15 = vmax.f32 %v2734_v18, 0.0  ;;  %v5682_v42 = vld [vmem:[#allocation3 + $0x1c] sm:$0xf]  ;;  %v5446_v38 = vld [vmem:[#allocation3 + $0x30] sm:$0xf0] }
 0x317   : > { %2804 = vst [vmem:[#allocation3 + $0x4c] sm:$0xff] %v2794_v58  ;;  %v5452_v18 = vld [vmem:[#allocation3 + $0x8] sm:$0xf]  ;;  %v5460_v58 = vld [vmem:[#allocation3 + $0x10] sm:$0xf] }
 0x318   : > { %v2755_v0 = vmax.f32 %v2735_v16, 0.0  ;;  %v2774_v25 = vmul.f32 %v2754_v15, %v7801_v53  ;;  %2874 = vrot.lane.b32.xlu2 %v5375_v62, %s5752_s17  ;;  %v5461_v16 = vor.u32 %v5699_v47, %v5460_v58  ;;  %v5454_v15 = vld [vmem:[#allocation3 + $0x38] sm:$0xf0]  ;;  %v5694_v54 = vld [vmem:[#allocation3 + $0x14] sm:$0xf] }
 0x319   : > { %v2677_v8 = vpop.f32.mrf.mxu2  ;;  %v5457_v40 = vor.u32 %v5693_v22, %v5454_v15  ;;  %v5528_v47 = vld [vmem:[#allocation3 + $0x1c] sm:$0xf] }
 0x31a   : > { %v2775_v2 = vmul.f32 %v2755_v0, %v7803_v44  ;;  %v2712_v13 = vadd.f32 %v2677_v8, %v2501_v7  ;;  %v6938_v7 = vld [vmem:[%s7724_s5 + $0x8] sm:$0xff] }
 0x31b   : > { %v2691_v33 = vpop.f32.mrf.mxu3 }
 0x31c   : > { %v2790_v41 = vpack.c.bf16 %v2775_v2, %v2774_v25  ;;  %v2713_v34 = vadd.f32 %v2691_v33, %v2502_v56  ;;  %v2744_v12 = vadd.f32 %v6802_v26, %v2712_v13  ;;  %v5695_v56 = vld [vmem:[#allocation3 + $0x1c] sm:$0xf]  ;;  %v5476_v33 = vld [vmem:[#allocation3 + $0x20] sm:$0xf] }
 0x31d   : > { %v5687_v36 = vld [vmem:[#allocation3 + $0x44] sm:$0xf0]  ;;  %v5376_v29 = vld [vmem:[#allocation3 + $0x40] sm:$0xf0] }
 0x31e   : > { %2800 = vst.msk [vmem:[#allocation3 + $0x24] sm:$0xff] %vm5959_vm5, %v2790_v41  ;;  %v2745_v57 = vadd.f32 %v6802_v26, %v2713_v34  ;;  %v5383_v43 = vor.u32 %v5687_v36, %v5382_v19  ;;  %v5379_v1 = vor.u32 %v5681_v61, %v5376_v29  ;;  %v2764_v60 = vmax.f32 %v2744_v12, 0.0  ;;  %v5384_v20 = vld [vmem:[#allocation3 + $0x48] sm:$0xf0]  ;;  %v5688_v27 = vld [vmem:[#allocation3 + $0x4c] sm:$0xf0] }
 0x31f   : > { %v5387_v51 = vor.u32 %v5682_v42, %v5384_v20  ;;  %v5390_v26 = vld [vmem:[#allocation3 + $0x20] sm:$0xf]  ;;  %v5462_v5 = vld [vmem:[#allocation3 + $0x40] sm:$0xf0]  ;;  %v5470_v0 = vld [vmem:[#allocation3 + $0x48] sm:$0xf0] }
 0x320   : > { %v2765_v28 = vmax.f32 %v2745_v57, 0.0  ;;  %2878 = vrot.lane.b32.xlu1 %v5383_v43, %s5752_s17  ;;  %2876 = vrot.lane.b32.xlu0 %v5379_v1, %s5752_s17  ;;  %v2784_v45 = vmul.f32 %v2764_v60, %v7801_v53  ;;  %v5391_v50 = vor.u32 %v5688_v27, %v5390_v26  ;;  %v5465_v25 = vor.u32 %v5694_v54, %v5462_v5  ;;  %v5701_v8 = vld [vmem:[#allocation3 + $0x4c] sm:$0xf0]  ;;  %v5700_v13 = vld [vmem:[#allocation3 + $0x44] sm:$0xf0] }
 0x321   : > { %2880 = vrot.lane.b32.xlu2 %v5387_v51, %s5752_s17  ;;  %v5473_v2 = vor.u32 %v5695_v56, %v5470_v0  ;;  %v5468_v41 = vld [vmem:[#allocation3 + $0x18] sm:$0xf]  ;;  %v5477_v19 = vor.u32 %v5701_v8, %v5476_v33  ;;  %v5709_v29 = vld [vmem:[#allocation3 + $0x30] sm:$0xf0]  ;;  %v5710_v60 = vld [vmem:[#allocation3 + $0x38] sm:$0xf0] }
 0x322   : > { %v2785_v46 = vmul.f32 %v2765_v28, %v7803_v44  ;;  %v5469_v12 = vor.u32 %v5700_v13, %v5468_v41  ;;  %v5512_v28 = vld [vmem:[#allocation3 + $0xc] sm:$0xf]  ;;  %v5506_v26 = vld [vmem:[#allocation3 + $0x34] sm:$0xf0]  ;;  %v5530_v56 = vld [vmem:[#allocation3 + $0x4c] sm:$0xf0] }
 0x323   : > { %v5707_v8 = vld [vmem:[#allocation3 + $0x20] sm:$0xf] }
 0x324   : > { %v2795_v17 = vpack.c.bf16 %v2785_v46, %v2784_v45  ;;  %v6995_v33 = vor.u32 %v5707_v8, %v5530_v56 }
 0x325   : > { %v5683_v52 = vld [vmem:[#allocation3 + $0x24] sm:$0xf]  ;;  %v5484_v36 = vld [vmem:[#allocation3 + $0x28] sm:$0xf] }
 0x326   : > { %2805 = vst.msk [vmem:[#allocation3 + $0x54] sm:$0xff] %vm5959_vm5, %v2795_v17  ;;  %v5514_v17 = vld [vmem:[#allocation3 + $0x3c] sm:$0xf0] }
 0x328   : > { %2882 = vrot.lane.b32.xlu0 %v5391_v50, %s5752_s17 }
 0x329   : > { %3053 = vrot.lane.b32.xlu2 %v7805_v10, %s5753_s22 }
 0x32d   : > { %v5392_v14 = vld [vmem:[#allocation3 + $0x50] sm:$0xf0]  ;;  %v5702_v34 = vld [vmem:[#allocation3 + $0x54] sm:$0xf0] }
 0x32e   : > { %v5395_v35 = vor.u32 %v5683_v52, %v5392_v14  ;;  %v5485_v61 = vor.u32 %v5702_v34, %v5484_v36  ;;  %v5478_v57 = vld [vmem:[#allocation3 + $0x50] sm:$0xf0]  ;;  %v5705_v14 = vld [vmem:[#allocation3 + $0x10] sm:$0xf] }
 0x32f   : > { %v5713_v58 = vld [vmem:[#allocation3 + $0x50] sm:$0xf0] }
 0x330   : > { %3055 = vrot.lane.b32.xlu0 %v6855_v48, %s5753_s22  ;;  %2884 = vrot.lane.b32.xlu1 %v5395_v35, %s5752_s17 }
 0x331   : > { %3059 = vrot.lane.b32.xlu2 %v6860_v49, %s5753_s22 }
 0x338   : > { %3061 = vrot.lane.b32.xlu0 %v5375_v62, %s5753_s22  ;;  %3057 = vrot.lane.b32.xlu1 %v6852_v4, %s5753_s22  ;;  %v2867_v11 = vpop.permute.xlu1 %2866 }
 0x339   : > { %3065 = vrot.lane.b32.xlu2 %v5383_v43, %s5753_s22 }
 0x340   : > { %3067 = vrot.lane.b32.xlu0 %v5387_v51, %s5753_s22  ;;  %3063 = vrot.lane.b32.xlu1 %v5379_v1, %s5753_s22 }
 0x341   : > { %3071 = vrot.lane.b32.xlu2 %v5395_v35, %s5753_s22 }
 0x348   : > { %3243 = vrot.lane.b32.xlu0 %v7805_v10, %s5754_s23  ;;  %3069 = vrot.lane.b32.xlu1 %v5391_v50, %s5753_s22 }
 0x349   : > { %3247 = vrot.lane.b32.xlu2 %v6852_v4, %s5754_s23  ;;  %v5449_v4 = vor.u32 %v5692_v32, %v5446_v38  ;;  %v5522_v38 = vld [vmem:[#allocation3 + $0x44] sm:$0xf0]  ;;  %v6960_v32 = vor.u32 %v5705_v14, %v5514_v17 }
 0x350   : > { %3249 = vrot.lane.b32.xlu0 %v6860_v49, %s5754_s23  ;;  %3245 = vrot.lane.b32.xlu1 %v6855_v48, %s5754_s23  ;;  %v5697_v49 = vld [vmem:[#allocation3 + $0x2c] sm:$0xf0]  ;;  %v5698_v48 = vld [vmem:[#allocation3 + $0x34] sm:$0xf0] }
 0x351   : > { %3253 = vrot.lane.b32.xlu2 %v5379_v1, %s5754_s23  ;;  %v5445_v3 = vor.u32 %v5697_v49, %v5444_v9  ;;  %v5453_v55 = vor.u32 %v5698_v48, %v5452_v18  ;;  %v5696_v1 = vld [vmem:[#allocation3 + $0x24] sm:$0xf]  ;;  %v5706_v9 = vld [vmem:[#allocation3 + $0x18] sm:$0xf] }
 0x352   : > { %v5481_v20 = vor.u32 %v5696_v1, %v5478_v57  ;;  %v6970_v49 = vor.u32 %v5706_v9, %v5522_v38  ;;  %v5711_v18 = vld [vmem:[#allocation3 + $0x40] sm:$0xf0] }
 0x353   : > { %v7023_v57 = vld [vmem:[%s7724_s5] sm:$0xff] }
 0x358   : > { %3255 = vrot.lane.b32.xlu0 %v5383_v43, %s5754_s23  ;;  %3251 = vrot.lane.b32.xlu1 %v5375_v62, %s5754_s23  ;;  %v5504_v43 = vld [vmem:[#allocation3 + $0x4] sm:$0xf] }
 0x359   : > { %3259 = vrot.lane.b32.xlu2 %v5391_v50, %s5754_s23  ;;  %v6948_v42 = vor.u32 %v5709_v29, %v5504_v43 }
 0x360   : > { %3261 = vrot.lane.b32.xlu0 %v5395_v35, %s5754_s23  ;;  %3257 = vrot.lane.b32.xlu1 %v5387_v51, %s5754_s23  ;;  %v6953_v51 = vor.u32 %v5710_v60, %v5512_v28  ;;  %v5704_v35 = vld [vmem:[#allocation3 + $0x8] sm:$0xf]  ;;  %s5720_s23 = smul.u32 80, %s7809_s28 }
 0x361   : > { %3512 = vrot.lane.b32.xlu2 %v5449_v4, %s5755_s24  ;;  %v6962_v4 = vor.u32 %v5704_v35, %v5506_v26 }
 0x368   : > { %3514 = vrot.lane.b32.xlu0 %v5453_v55, %s5755_s24  ;;  %3510 = vrot.lane.b32.xlu1 %v5445_v3, %s5755_s24  ;;  %v5712_v3 = vld [vmem:[#allocation3 + $0x48] sm:$0xf0]  ;;  %v5520_v55 = vld [vmem:[#allocation3 + $0x14] sm:$0xf] }
 0x369   : > { %3518 = vrot.lane.b32.xlu2 %v5461_v16, %s5755_s24  ;;  %v6978_v16 = vor.u32 %v5712_v3, %v5528_v47 }
 0x36a   : > { %v2869_v30 = vpop.permute.xlu2 %2868 }
 0x36b   : > { %v2886_v62 = vsel %vm805_vm6, %v2867_v11, %v2869_v30  ;;  %v6980_v11 = vor.u32 %v5711_v18, %v5520_v55 }
 0x36c   : > { %2915 = vmatpush.bf16.msrb.mxu0 %v2886_v62 }
 0x36f   : > { %5396 = vmatmul.msk.bf16.vlgmr.msrb.gmra.mxu0 %vm825_vm7, %v6938_v7 }
 0x370   : > { %3520 = vrot.lane.b32.xlu0 %v5465_v25, %s5755_s24  ;;  %3516 = vrot.lane.b32.xlu1 %v5457_v40, %s5755_s24  ;;  %v5538_v40 = vld [vmem:[#allocation3 + $0x54] sm:$0xf0] }
 0x371   : > { %3524 = vrot.lane.b32.xlu2 %v5473_v2, %s5755_s24  ;;  %v5708_v2 = vld [vmem:[#allocation3 + $0x28] sm:$0xf] }
 0x372   : > { %v2875_v45 = vpop.permute.xlu2 %2874  ;;  %v6993_v13 = vor.u32 %v5708_v2, %v5538_v40  ;;  %v5691_v2 = vld [vmem:[%s7724_s5 + $0x10] sm:$0xff] }
 0x378   : > { %3526 = vrot.lane.b32.xlu0 %v5477_v19, %s5755_s24  ;;  %3522 = vrot.lane.b32.xlu1 %v5469_v12, %s5755_s24 }
 0x379   : > { %3530 = vrot.lane.b32.xlu2 %v5485_v61, %s5755_s24 }
 0x37b   : > { %v2881_v48 = vpop.permute.xlu2 %2880 }
 0x380   : > { %3954 = vrot.lane.b32.xlu0 %v6948_v42, %s5756_s29  ;;  %3528 = vrot.lane.b32.xlu1 %v5481_v20, %s5755_s24 }
 0x381   : > { %3958 = vrot.lane.b32.xlu2 %v6953_v51, %s5756_s29 }
 0x382   : > { %v2871_v46 = vpop.permute.xlu0 %2870 }
 0x383   : > { %v2887_v27 = vsel %vm805_vm6, %v2869_v30, %v2871_v46  ;;  %v2873_v50 = vpop.permute.xlu1 %2872  ;;  %v5536_v30 = vld [vmem:[#allocation3 + $0x24] sm:$0xf]  ;;  %v3054_v22 = vpop.permute.xlu2 %3053 }
 0x384   : > { %2929 = vmatpush.bf16.msrb.mxu1 %v2887_v27  ;;  %v2888_v10 = vsel %vm805_vm6, %v2871_v46, %v2873_v50  ;;  %v2889_v52 = vsel %vm805_vm6, %v2873_v50, %v2875_v45  ;;  %v6986_v5 = vor.u32 %v5713_v58, %v5536_v30 }
 0x385   : > { %2943 = vmatpush.bf16.msrb.mxu2 %v2888_v10  ;;  %2957 = vmatpush.bf16.msrb.mxu3 %v2889_v52 }
 0x387   : > { %5397 = vmatmul.msk.bf16.vlgmr.msrb.gmra.mxu1 %vm825_vm7, %v6938_v7 }
 0x388   : > { %3960 = vrot.lane.b32.xlu0 %v6960_v32, %s5756_s29  ;;  %3956 = vrot.lane.b32.xlu1 %v6962_v4, %s5756_s29 }
 0x389   : > { %5398 = vmatmul.msk.bf16.vlgmr.msrb.gmra.mxu2 %vm825_vm7, %v6938_v7  ;;  %5399 = vmatmul.msk.bf16.vlgmr.msrb.gmra.mxu3 %vm825_vm7, %v6938_v7 }
 0x38a   : > { %3964 = vrot.lane.b32.xlu2 %v6970_v49, %s5756_s29 }
 0x38b   : > { %v3060_v19 = vpop.permute.xlu2 %3059 }
 0x390   : > { %3966 = vrot.lane.b32.xlu0 %v6978_v16, %s5756_s29  ;;  %3962 = vrot.lane.b32.xlu1 %v6980_v11, %s5756_s29 }
 0x392   : > { %v2877_v15 = vpop.permute.xlu0 %2876  ;;  %3970 = vrot.lane.b32.xlu2 %v6986_v5, %s5756_s29  ;;  %v2879_v62 = vpop.permute.xlu1 %2878 }
 0x393   : > { %v2890_v54 = vsel %vm805_vm6, %v2875_v45, %v2877_v15  ;;  %v2891_v0 = vsel %vm805_vm6, %v2877_v15, %v2879_v62  ;;  %v2892_v25 = vsel %vm805_vm6, %v2879_v62, %v2881_v48  ;;  %v3066_v43 = vpop.permute.xlu2 %3065 }
 0x394   : > { %2971 = vmatpush.bf16.msra.mxu0 %v2890_v54  ;;  %2985 = vmatpush.bf16.msra.mxu1 %v2891_v0 }
 0x395   : > { %2999 = vmatpush.bf16.msra.mxu2 %v2892_v25 }
 0x397   : > { %5400 = vmatmul.msk.bf16.vlgmr.msra.gmra.mxu0 %vm825_vm7, %v6938_v7  ;;  %5401 = vmatmul.msk.bf16.vlgmr.msra.gmra.mxu1 %vm825_vm7, %v6938_v7 }
 0x398   : > { %3972 = vrot.lane.b32.xlu0 %v6993_v13, %s5756_s29  ;;  %3968 = vrot.lane.b32.xlu1 %v6995_v33, %s5756_s29  ;;  %s7638_s29 = scalar_lea.vmem %s7727_s8, %s5720_s23 }
 0x399   : > { %5402 = vmatmul.msk.bf16.vlgmr.msra.gmra.mxu2 %vm825_vm7, %v6938_v7 }
 0x39a   : > { %v2883_v41 = vpop.permute.xlu0 %2882  ;;  %4166 = vrot.lane.b32.xlu2 %v6962_v4, %s5757_s30 }
 0x39b   : > { %v2893_v34 = vsel %vm805_vm6, %v2881_v48, %v2883_v41  ;;  %v3072_v45 = vpop.permute.xlu2 %3071 }
 0x39c   : > { %3013 = vmatpush.bf16.msra.mxu3 %v2893_v34 }
 0x39f   : > { %5403 = vmatmul.msk.bf16.vlgmr.msra.gmra.mxu3 %vm825_vm7, %v6938_v7 }
 0x3a0   : > { %4168 = vrot.lane.b32.xlu0 %v6953_v51, %s5757_s30  ;;  %4164 = vrot.lane.b32.xlu1 %v6948_v42, %s5757_s30 }
 0x3a2   : > { %v3056_v12 = vpop.permute.xlu0 %3055  ;;  %4172 = vrot.lane.b32.xlu2 %v6980_v11, %s5757_s30  ;;  %v2885_v36 = vpop.permute.xlu1 %2884 }
 0x3a3   : > { %v3073_v61 = vsel %vm994_vm8, %v3054_v22, %v3056_v12  ;;  %v2894_v29 = vsel %vm805_vm6, %v2883_v41, %v2885_v36  ;;  %3041 = vmatpush.bf16.msrb.mxu1 %v2885_v36  ;;  %v3248_v38 = vpop.permute.xlu2 %3247 }
 0x3a4   : > { %3027 = vmatpush.bf16.msrb.mxu0 %v2894_v29  ;;  %3102 = vmatpush.bf16.msrb.mxu2 %v3073_v61 }
 0x3a7   : > { %5404 = vmatmul.msk.bf16.vlgmr.msrb.gmra.mxu0 %vm825_vm7, %v6938_v7  ;;  %5405 = vmatmul.msk.bf16.vlgmr.msrb.gmra.mxu1 %vm825_vm7, %v6938_v7 }
 0x3a8   : > { %4174 = vrot.lane.b32.xlu0 %v6970_v49, %s5757_s30  ;;  %4170 = vrot.lane.b32.xlu1 %v6960_v32, %s5757_s30 }
 0x3a9   : > { %5410 = vmatmul.msk.bf16.vlgmr.msrb.gmra.mxu2 %vm825_vm7, %v7023_v57 }
 0x3aa   : > { %v3062_v1 = vpop.permute.xlu0 %3061  ;;  %4178 = vrot.lane.b32.xlu2 %v6995_v33, %s5757_s30  ;;  %v3058_v60 = vpop.permute.xlu1 %3057 }
 0x3ab   : > { %v3076_v20 = vsel %vm994_vm8, %v3060_v19, %v3062_v1  ;;  %v3074_v28 = vsel %vm994_vm8, %v3056_v12, %v3058_v60  ;;  %v3075_v7 = vsel %vm994_vm8, %v3058_v60, %v3060_v19  ;;  %v3254_v55 = vpop.permute.xlu2 %3253  ;;  %v4817_v60 = vld [vmem:[%s7725_s6 + $0x8] sm:$0xff] }
 0x3ac   : > { %3116 = vmatpush.bf16.msrb.mxu3 %v3074_v28  ;;  %3130 = vmatpush.bf16.msra.mxu0 %v3075_v7 }
 0x3ad   : > { %3144 = vmatpush.bf16.msra.mxu1 %v3076_v20 }
 0x3af   : > { %5411 = vmatmul.msk.bf16.vlgmr.msrb.gmra.mxu3 %vm825_vm7, %v7023_v57 }
 0x3b0   : > { %4180 = vrot.lane.b32.xlu0 %v6986_v5, %s5757_s30  ;;  %4176 = vrot.lane.b32.xlu1 %v6978_v16, %s5757_s30 }
 0x3b2   : > { %v3068_v46 = vpop.permute.xlu0 %3067  ;;  %4374 = vrot.lane.b32.xlu2 %v6948_v42, %s5758_s11  ;;  %v3064_v27 = vpop.permute.xlu1 %3063 }
 0x3b3   : > { %v3079_v17 = vsel %vm994_vm8, %v3066_v43, %v3068_v46  ;;  %v3077_v26 = vsel %vm994_vm8, %v3062_v1, %v3064_v27  ;;  %v3078_v50 = vsel %vm994_vm8, %v3064_v27, %v3066_v43  ;;  %v3260_v54 = vpop.permute.xlu2 %3259  ;;  %v5703_v27 = vld [vmem:[%s7724_s5 + $0x18] sm:$0xff] }
 0x3b4   : > { %3158 = vmatpush.bf16.msra.mxu2 %v3077_v26  ;;  %3172 = vmatpush.bf16.msra.mxu3 %v3078_v50 }
 0x3b5   : > { %3186 = vmatpush.bf16.msrb.mxu0 %v3079_v17 }
 0x3b7   : > { %5412 = vmatmul.msk.bf16.vlgmr.msra.gmra.mxu0 %vm825_vm7, %v7023_v57  ;;  %5413 = vmatmul.msk.bf16.vlgmr.msra.gmra.mxu1 %vm825_vm7, %v7023_v57 }
 0x3b8   : > { %3228 = vmatpush.bf16.msrb.mxu3 %v3072_v45  ;;  %4376 = vrot.lane.b32.xlu0 %v6962_v4, %s5758_s11 }
 0x3b9   : > { %4182 = vrot.lane.b32.xlu1 %v6993_v13, %s5757_s30  ;;  %5414 = vmatmul.msk.bf16.vlgmr.msra.gmra.mxu2 %vm825_vm7, %v7023_v57 }
 0x3ba   : > { %v3244_v10 = vpop.permute.xlu0 %3243  ;;  %4380 = vrot.lane.b32.xlu2 %v6960_v32, %s5758_s11  ;;  %v3070_v52 = vpop.permute.xlu1 %3069 }
 0x3bb   : > { %v3080_v14 = vsel %vm994_vm8, %v3068_v46, %v3070_v52  ;;  %v3081_v35 = vsel %vm994_vm8, %v3070_v52, %v3072_v45  ;;  %v3513_v41 = vpop.permute.xlu2 %3512 }
 0x3bc   : > { %3200 = vmatpush.bf16.msrb.mxu1 %v3080_v14  ;;  %3214 = vmatpush.bf16.msrb.mxu2 %v3081_v35 }
 0x3bf   : > { %5415 = vmatmul.msk.bf16.vlgmr.msra.gmra.mxu3 %vm825_vm7, %v7023_v57 }
 0x3c0   : > { %4382 = vrot.lane.b32.xlu0 %v6980_v11, %s5758_s11 }
 0x3c1   : > { %4378 = vrot.lane.b32.xlu1 %v6953_v51, %s5758_s11 }
 0x3c2   : > { %v3250_v9 = vpop.permute.xlu0 %3249  ;;  %4386 = vrot.lane.b32.xlu2 %v6978_v16, %s5758_s11  ;;  %v3246_v48 = vpop.permute.xlu1 %3245 }
 0x3c3   : > { %v3265_v3 = vsel %vm1185_vm9, %v3248_v38, %v3250_v9  ;;  %v3263_v18 = vsel %vm1185_vm9, %v3244_v10, %v3246_v48  ;;  %v3264_v47 = vsel %vm1185_vm9, %v3246_v48, %v3248_v38  ;;  %v3519_v29 = vpop.permute.xlu2 %3518 }
 0x3c4   : > { %3292 = vmatpush.bf16.msra.mxu0 %v3263_v18  ;;  %3306 = vmatpush.bf16.msra.mxu1 %v3264_v47 }
 0x3c5   : > { %3320 = vmatpush.bf16.msra.mxu2 %v3265_v3 }
 0x3c7   : > { %5416 = vmatmul.msk.bf16.vlgmr.msrb.gmra.mxu0 %vm825_vm7, %v7023_v57  ;;  %5417 = vmatmul.msk.bf16.vlgmr.msrb.gmra.mxu1 %vm825_vm7, %v7023_v57 }
 0x3c8   : > { %4388 = vrot.lane.b32.xlu0 %v6995_v33, %s5758_s11 }
 0x3c9   : > { %4384 = vrot.lane.b32.xlu1 %v6970_v49, %s5758_s11  ;;  %5418 = vmatmul.msk.bf16.vlgmr.msrb.gmra.mxu2 %vm825_vm7, %v7023_v57 }
 0x3ca   : > { %v3256_v58 = vpop.permute.xlu0 %3255  ;;  %4392 = vrot.lane.b32.xlu2 %v6993_v13, %s5758_s11  ;;  %v3252_v30 = vpop.permute.xlu1 %3251 }
 0x3cb   : > { %v3268_v15 = vsel %vm1185_vm9, %v3254_v55, %v3256_v58  ;;  %v3266_v62 = vsel %vm1185_vm9, %v3250_v9, %v3252_v30  ;;  %v3267_v22 = vsel %vm1185_vm9, %v3252_v30, %v3254_v55  ;;  %v3525_v45 = vpop.permute.xlu2 %3524 }
 0x3cc   : > { %3334 = vmatpush.bf16.msra.mxu3 %v3266_v62  ;;  %3348 = vmatpush.bf16.msrb.mxu0 %v3267_v22 }
 0x3cd   : > { %3362 = vmatpush.bf16.msrb.mxu1 %v3268_v15 }
 0x3cf   : > { %5419 = vmatmul.msk.bf16.vlgmr.msrb.gmra.mxu3 %vm825_vm7, %v7023_v57 }
 0x3d0   : > { %4584 = vrot.lane.b32.xlu0 %v6948_v42, %s5759_s12 }
 0x3d1   : > { %4390 = vrot.lane.b32.xlu1 %v6986_v5, %s5758_s11 }
 0x3d2   : > { %v3262_v0 = vpop.permute.xlu0 %3261  ;;  %4588 = vrot.lane.b32.xlu2 %v6953_v51, %s5759_s12  ;;  %v3258_v25 = vpop.permute.xlu1 %3257 }
 0x3d3   : > { %v3269_v40 = vsel %vm1185_vm9, %v3256_v58, %v3258_v25  ;;  %v3270_v56 = vsel %vm1185_vm9, %v3258_v25, %v3260_v54  ;;  %v3271_v8 = vsel %vm1185_vm9, %v3260_v54, %v3262_v0  ;;  %v3531_v52 = vpop.permute.xlu2 %3530 }
 0x3d4   : > { %3376 = vmatpush.bf16.msrb.mxu2 %v3269_v40  ;;  %3390 = vmatpush.bf16.msrb.mxu3 %v3270_v56 }
 0x3d7   : > { %5426 = vmatmul.msk.bf16.vlgmr.msra.gmra.mxu0 %vm825_vm7, %v5691_v2  ;;  %5427 = vmatmul.msk.bf16.vlgmr.msra.gmra.mxu1 %vm825_vm7, %v5691_v2 }
 0x3d8   : > { %3404 = vmatpush.bf16.msra.mxu0 %v3271_v8  ;;  %3418 = vmatpush.bf16.msra.mxu1 %v3262_v0 }
 0x3d9   : > { %4590 = vrot.lane.b32.xlu0 %v6960_v32, %s5759_s12  ;;  %4586 = vrot.lane.b32.xlu1 %v6962_v4, %s5759_s12 }
 0x3da   : > { %5428 = vmatmul.msk.bf16.vlgmr.msra.gmra.mxu2 %vm825_vm7, %v5691_v2  ;;  %4594 = vrot.lane.b32.xlu2 %v6970_v49, %s5759_s12  ;;  %v3511_v34 = vpop.permute.xlu1 %3510  ;;  %v3515_v12 = vpop.permute.xlu0 %3514 }
 0x3db   : > { %v3532_v19 = vsel %vm1455_vm10, %v3511_v34, %v3513_v41  ;;  %v3533_v36 = vsel %vm1455_vm10, %v3513_v41, %v3515_v12  ;;  %v3959_v56 = vpop.permute.xlu2 %3958 }
 0x3dc   : > { %3562 = vmatpush.bf16.msra.mxu2 %v3532_v19 }
 0x3df   : > { %5429 = vmatmul.msk.bf16.vlgmr.msra.gmra.mxu3 %vm825_vm7, %v5691_v2 }
 0x3e0   : > { %3576 = vmatpush.bf16.msra.mxu3 %v3533_v36 }
 0x3e1   : > { %4596 = vrot.lane.b32.xlu0 %v6978_v16, %s5759_s12  ;;  %4592 = vrot.lane.b32.xlu1 %v6980_v11, %s5759_s12 }
 0x3e2   : > { %4600 = vrot.lane.b32.xlu2 %v6986_v5, %s5759_s12  ;;  %v3517_v61 = vpop.permute.xlu1 %3516  ;;  %v3521_v57 = vpop.permute.xlu0 %3520 }
 0x3e3   : > { %v3534_v43 = vsel %vm1455_vm10, %v3515_v12, %v3517_v61  ;;  %v3535_v1 = vsel %vm1455_vm10, %v3517_v61, %v3519_v29  ;;  %v3536_v20 = vsel %vm1455_vm10, %v3519_v29, %v3521_v57 }
 0x3e7   : > { %5430 = vmatmul.msk.bf16.vlgmr.msrb.gmra.mxu0 %vm825_vm7, %v5691_v2  ;;  %5431 = vmatmul.msk.bf16.vlgmr.msrb.gmra.mxu1 %vm825_vm7, %v5691_v2 }
 0x3e8   : > { %3590 = vmatpush.bf16.msrb.mxu0 %v3534_v43  ;;  %3604 = vmatpush.bf16.msrb.mxu1 %v3535_v1 }
 0x3e9   : > { %4602 = vrot.lane.b32.xlu0 %v6993_v13, %s5759_s12  ;;  %4598 = vrot.lane.b32.xlu1 %v6995_v33, %s5759_s12 }
 0x3ea   : > { %5432 = vmatmul.msk.bf16.vlgmr.msrb.gmra.mxu2 %vm825_vm7, %v5691_v2  ;;  %4825 = vperm.xlu2 %5740, %v4817_v60   ;;  %v3523_v28 = vpop.permute.xlu1 %3522  ;;  %v3527_v46 = vpop.permute.xlu0 %3526 }
 0x3eb   : > { %3618 = vmatpush.bf16.msrb.mxu2 %v3536_v20  ;;  %v3537_v7 = vsel %vm1455_vm10, %v3521_v57, %v3523_v28  ;;  %v3539_v17 = vsel %vm1455_vm10, %v3525_v45, %v3527_v46  ;;  %v3538_v26 = vsel %vm1455_vm10, %v3523_v28, %v3525_v45  ;;  %v3965_v60 = vpop.permute.xlu2 %3964 }
 0x3ec   : > { %v2917_v35 = vpop.f32.mrf.mxu0 }
 0x3ef   : > { %5433 = vmatmul.msk.bf16.vlgmr.msrb.gmra.mxu3 %vm825_vm7, %v5691_v2 }
 0x3f0   : > { %3632 = vmatpush.bf16.msrb.mxu3 %v3537_v7 }
 0x3f2   : > { %v3529_v50 = vpop.permute.xlu1 %3528 }
 0x3f3   : > { %v3540_v10 = vsel %vm1455_vm10, %v3527_v46, %v3529_v50  ;;  %v3541_v14 = vsel %vm1455_vm10, %v3529_v50, %v3531_v52 }
 0x3f4   : > { %v2919_v48 = vpop.f32.mrf.mxu0 }
 0x3f7   : > { %5434 = vmatmul.msk.bf16.vlgmr.msra.gmra.mxu0 %vm825_vm7, %v5691_v2  ;;  %5435 = vmatmul.msk.bf16.vlgmr.msra.gmra.mxu1 %vm825_vm7, %v5691_v2 }
 0x3f8   : > { %3646 = vmatpush.bf16.msra.mxu0 %v3538_v26  ;;  %3660 = vmatpush.bf16.msra.mxu1 %v3539_v17 }
 0x3fa   : > { %5486 = vmatmul.msk.bf16.vlgmr.msra.gmra.mxu2 %vm825_vm7, %v5703_v27  ;;  %v3957_v62 = vpop.permute.xlu1 %3956 }
 0x3fb   : > { %3674 = vmatpush.bf16.msra.mxu2 %v3540_v10 }
 0x3ff   : > { %5487 = vmatmul.msk.bf16.vlgmr.msra.gmra.mxu3 %vm825_vm7, %v5703_v27 }
 0x400   : > { %3688 = vmatpush.bf16.msra.mxu3 %v3541_v14 }
 0x402   : > { %v3963_v34 = vpop.permute.xlu1 %3962 }
 0x403   : > { %v3978_v20 = vsel %vm1898_vm11, %v3963_v34, %v3965_v60 }
 0x404   : > { %v2931_v38 = vpop.f32.mrf.mxu1 }
 0x407   : > { %5488 = vmatmul.msk.bf16.vlgmr.msrb.gmra.mxu0 %vm825_vm7, %v5703_v27  ;;  %5489 = vmatmul.msk.bf16.vlgmr.msrb.gmra.mxu1 %vm825_vm7, %v5703_v27 }
 0x408   : > { %3793 = vmatpush.bf16.msrb.mxu0 %v6948_v42  ;;  %3807 = vmatpush.bf16.msrb.mxu1 %v6962_v4 }
 0x40a   : > { %5490 = vmatmul.msk.bf16.vlgmr.msrb.gmra.mxu2 %vm825_vm7, %v5703_v27  ;;  %v3969_v14 = vpop.permute.xlu1 %3968 }
 0x40b   : > { %3821 = vmatpush.bf16.msrb.mxu2 %v6953_v51 }
 0x40c   : > { %v7155_v9 = vpop.f32.mrf.mxu1  ;;  %v2945_v3 = vpop.f32.mrf.mxu2 }
 0x40d   : > { %v2959_v18 = vpop.f32.mrf.mxu3 }
 0x40f   : > { %5491 = vmatmul.msk.bf16.vlgmr.msrb.gmra.mxu3 %vm825_vm7, %v5703_v27 }
 0x410   : > { %3835 = vmatpush.bf16.msrb.mxu3 %v6960_v32 }
 0x414   : > { %v7159_v47 = vpop.f32.mrf.mxu0  ;;  %v2947_v55 = vpop.f32.mrf.mxu2 }
 0x415   : > { %v7161_v58 = vpop.f32.mrf.mxu1  ;;  %v2961_v42 = vpop.f32.mrf.mxu3 }
 0x417   : > { %5492 = vmatmul.msk.bf16.vlgmr.msra.gmra.mxu0 %vm825_vm7, %v5703_v27  ;;  %5493 = vmatmul.msk.bf16.vlgmr.msra.gmra.mxu1 %vm825_vm7, %v5703_v27 }
 0x418   : > { %3849 = vmatpush.bf16.msra.mxu0 %v6980_v11  ;;  %3863 = vmatpush.bf16.msra.mxu1 %v6970_v49  ;;  %v7182_v49 = vld [vmem:[%s7724_s5 + $0x20] sm:$0xff] }
 0x41a   : > { %5494 = vmatmul.msk.bf16.vlgmr.msra.gmra.mxu2 %vm825_vm7, %v5703_v27 }
 0x41b   : > { %3877 = vmatpush.bf16.msra.mxu2 %v6978_v16 }
 0x41c   : > { %v7169_v51 = vpop.f32.mrf.mxu0  ;;  %v7173_v4 = vpop.f32.mrf.mxu2 }
 0x41d   : > { %v7171_v32 = vpop.f32.mrf.mxu1 }
 0x41f   : > { %5495 = vmatmul.msk.bf16.vlgmr.msra.gmra.mxu3 %vm825_vm7, %v5703_v27 }
 0x420   : > { %3891 = vmatpush.bf16.msra.mxu3 %v6995_v33  ;;  %v3955_v33 = vpop.permute.xlu0 %3954 }
 0x421   : > { %v3974_v22 = vsel %vm1898_vm11, %v3955_v33, %v3957_v62 }
 0x422   : > { %v7177_v30 = vpop.f32.mrf.mxu3 }
 0x424   : > { %v7184_v11 = vpop.f32.mrf.mxu0  ;;  %v7186_v16 = vpop.f32.mrf.mxu2 }
 0x425   : > { %v7188_v15 = vpop.f32.mrf.mxu1 }
 0x427   : > { %5542 = vmatmul.msk.bf16.vlgmr.msrb.gmra.mxu0 %vm825_vm7, %v7182_v49  ;;  %5543 = vmatmul.msk.bf16.vlgmr.msrb.gmra.mxu1 %vm825_vm7, %v7182_v49 }
 0x428   : > { %3905 = vmatpush.bf16.msrb.mxu0 %v6986_v5  ;;  %3919 = vmatpush.bf16.msrb.mxu1 %v6993_v13  ;;  %v3975_v5 = vsel %vm1898_vm11, %v3957_v62, %v3959_v56  ;;  %v3961_v13 = vpop.permute.xlu0 %3960  ;;  %v7255_v62 = vld [vmem:[%s7724_s5 + $0x28] sm:$0xff] }
 0x429   : > { %v3976_v43 = vsel %vm1898_vm11, %v3959_v56, %v3961_v13  ;;  %v3977_v1 = vsel %vm1898_vm11, %v3961_v13, %v3963_v34 }
 0x42a   : > { %5544 = vmatmul.msk.bf16.vlgmr.msrb.gmra.mxu2 %vm825_vm7, %v7182_v49  ;;  %v7199_v54 = vpop.f32.mrf.mxu3 }
 0x42b   : > { %4003 = vmatpush.bf16.msrb.mxu2 %v3974_v22 }
 0x42c   : > { %v7201_v0 = vpop.f32.mrf.mxu0  ;;  %v3104_v40 = vpop.f32.mrf.mxu2 }
 0x42d   : > { %v7203_v25 = vpop.f32.mrf.mxu1  ;;  %v7205_v2 = vadd.f32 %v3104_v40, %v2917_v35  ;;  %v4165_v40 = vpop.permute.xlu1 %4164 }
 0x42f   : > { %5545 = vmatmul.msk.bf16.vlgmr.msrb.gmra.mxu3 %vm825_vm7, %v7182_v49 }
 0x430   : > { %4017 = vmatpush.bf16.msrb.mxu3 %v3975_v5  ;;  %v3967_v45 = vpop.permute.xlu0 %3966 }
 0x431   : > { %v3979_v52 = vsel %vm1898_vm11, %v3965_v60, %v3967_v45  ;;  %v3980_v33 = vsel %vm1898_vm11, %v3967_v45, %v3969_v14 }
 0x432   : > { %v3118_v8 = vpop.f32.mrf.mxu3 }
 0x433   : > { %v7210_v41 = vadd.f32 %v3118_v8, %v2931_v38 }
 0x434   : > { %v3132_v19 = vpop.f32.mrf.mxu0  ;;  %v3106_v12 = vpop.f32.mrf.mxu2 }
 0x435   : > { %v7212_v36 = vadd.f32 %v3132_v19, %v2945_v3  ;;  %v3146_v61 = vpop.f32.mrf.mxu1  ;;  %v7214_v29 = vadd.f32 %v3106_v12, %v2919_v48  ;;  %v4171_v45 = vpop.permute.xlu1 %4170 }
 0x436   : > { %v7216_v57 = vadd.f32 %v3146_v61, %v2959_v18 }
 0x437   : > { %5546 = vmatmul.msk.bf16.vlgmr.msra.gmra.mxu0 %vm825_vm7, %v7182_v49  ;;  %5547 = vmatmul.msk.bf16.vlgmr.msra.gmra.mxu1 %vm825_vm7, %v7182_v49 }
 0x438   : > { %4031 = vmatpush.bf16.msra.mxu0 %v3976_v43  ;;  %4045 = vmatpush.bf16.msra.mxu1 %v3977_v1 }
 0x43a   : > { %5548 = vmatmul.msk.bf16.vlgmr.msra.gmra.mxu2 %vm825_vm7, %v7182_v49  ;;  %v3120_v28 = vpop.f32.mrf.mxu3 }
 0x43b   : > { %4059 = vmatpush.bf16.msra.mxu2 %v3978_v20  ;;  %v7228_v7 = vadd.f32 %v3120_v28, %v7155_v9 }
 0x43c   : > { %v3134_v46 = vpop.f32.mrf.mxu0  ;;  %v3160_v26 = vpop.f32.mrf.mxu2 }
 0x43d   : > { %v7230_v27 = vadd.f32 %v3134_v46, %v2947_v55  ;;  %v3148_v17 = vpop.f32.mrf.mxu1  ;;  %v7235_v10 = vadd.f32 %v3160_v26, %v7159_v47  ;;  %v3971_v55 = vpop.permute.xlu2 %3970 }
 0x43e   : > { %v7232_v50 = vadd.f32 %v3148_v17, %v2961_v42  ;;  %v3981_v22 = vsel %vm1898_vm11, %v3969_v14, %v3971_v55 }
 0x43f   : > { %5549 = vmatmul.msk.bf16.vlgmr.msra.gmra.mxu3 %vm825_vm7, %v7182_v49 }
 0x440   : > { %4073 = vmatpush.bf16.msra.mxu3 %v3979_v52 }
 0x442   : > { %v3174_v35 = vpop.f32.mrf.mxu3 }
 0x443   : > { %v7241_v38 = vadd.f32 %v3174_v35, %v7161_v58  ;;  %v3973_v58 = vpop.permute.xlu0 %3972 }
 0x444   : > { %v3188_v9 = vpop.f32.mrf.mxu0  ;;  %v3162_v48 = vpop.f32.mrf.mxu2 }
 0x445   : > { %v7244_v3 = vadd.f32 %v3188_v9, %v7173_v4  ;;  %v3202_v18 = vpop.f32.mrf.mxu1  ;;  %v7247_v47 = vadd.f32 %v3162_v48, %v7169_v51  ;;  %v3982_v51 = vsel %vm1898_vm11, %v3971_v55, %v3973_v58 }
 0x446   : > { %v7250_v42 = vadd.f32 %v3202_v18, %v7177_v30  ;;  %v4177_v18 = vpop.permute.xlu1 %4176 }
 0x447   : > { %5550 = vmatmul.msk.bf16.vlgmr.msrb.gmra.mxu0 %vm825_vm7, %v7182_v49  ;;  %5551 = vmatmul.msk.bf16.vlgmr.msrb.gmra.mxu1 %vm825_vm7, %v7182_v49 }
 0x448   : > { %4087 = vmatpush.bf16.msrb.mxu0 %v3980_v33  ;;  %4101 = vmatpush.bf16.msrb.mxu1 %v3981_v22 }
 0x44a   : > { %5558 = vmatmul.msk.bf16.vlgmr.msrb.gmra.mxu2 %vm825_vm7, %v7255_v62  ;;  %v3176_v4 = vpop.f32.mrf.mxu3 }
 0x44b   : > { %4115 = vmatpush.bf16.msrb.mxu2 %v3982_v51  ;;  %v7267_v30 = vadd.f32 %v3176_v4, %v7171_v32  ;;  %v4167_v32 = vpop.permute.xlu2 %4166  ;;  %v4169_v61 = vpop.permute.xlu0 %4168 }
 0x44c   : > { %v3190_v56 = vpop.f32.mrf.mxu0  ;;  %v3216_v8 = vpop.f32.mrf.mxu2  ;;  %v4185_v20 = vsel %vm2109_vm12, %v4167_v32, %v4169_v61  ;;  %v4184_v28 = vsel %vm2109_vm12, %v4165_v40, %v4167_v32 }
 0x44d   : > { %v7270_v5 = vadd.f32 %v3190_v56, %v7186_v16  ;;  %v3204_v13 = vpop.f32.mrf.mxu1  ;;  %v7276_v34 = vadd.f32 %v3216_v8, %v7184_v11 }
 0x44e   : > { %v7273_v49 = vadd.f32 %v3204_v13, %v7199_v54 }
 0x44f   : > { %5559 = vmatmul.msk.bf16.vlgmr.msrb.gmra.mxu3 %vm825_vm7, %v7255_v62 }
 0x450   : > { %4129 = vmatpush.bf16.msrb.mxu3 %v3973_v58 }
 0x452   : > { %v3230_v19 = vpop.f32.mrf.mxu3 }
 0x453   : > { %v7281_v12 = vadd.f32 %v3230_v19, %v7188_v15  ;;  %v4186_v15 = vsel %vm2109_vm12, %v4169_v61, %v4171_v45  ;;  %v4173_v52 = vpop.permute.xlu2 %4172 }
 0x454   : > { %v3294_v16 = vpop.f32.mrf.mxu0  ;;  %v3218_v43 = vpop.f32.mrf.mxu2  ;;  %v4187_v9 = vsel %vm2109_vm12, %v4171_v45, %v4173_v52 }
 0x455   : > { %v7284_v1 = vadd.f32 %v3294_v16, %v7205_v2  ;;  %v3308_v54 = vpop.f32.mrf.mxu1  ;;  %v7287_v60 = vadd.f32 %v3218_v43, %v7201_v0 }
 0x456   : > { %v7290_v11 = vadd.f32 %v3308_v54, %v7210_v41 }
 0x457   : > { %5560 = vmatmul.msk.bf16.vlgmr.msra.gmra.mxu0 %vm825_vm7, %v7255_v62  ;;  %5561 = vmatmul.msk.bf16.vlgmr.msra.gmra.mxu1 %vm825_vm7, %v7255_v62 }
 0x458   : > { %4213 = vmatpush.bf16.msra.mxu0 %v4184_v28  ;;  %4227 = vmatpush.bf16.msra.mxu1 %v4185_v20 }
 0x45a   : > { %5562 = vmatmul.msk.bf16.vlgmr.msra.gmra.mxu2 %vm825_vm7, %v7255_v62  ;;  %v3232_v0 = vpop.f32.mrf.mxu3 }
 0x45b   : > { %4241 = vmatpush.bf16.msra.mxu2 %v4186_v15  ;;  %v7302_v2 = vadd.f32 %v3232_v0, %v7203_v25  ;;  %v4175_v25 = vpop.permute.xlu0 %4174 }
 0x45c   : > { %v3296_v41 = vpop.f32.mrf.mxu0  ;;  %v4188_v51 = vsel %vm2109_vm12, %v4173_v52, %v4175_v25  ;;  %v4189_v4 = vsel %vm2109_vm12, %v4175_v25, %v4177_v18 }
 0x45d   : > { %v7305_v46 = vadd.f32 %v3296_v41, %v7214_v29  ;;  %v3310_v17 = vpop.f32.mrf.mxu1  ;;  %v3322_v26 = vpop.f32.mrf.mxu2 }
 0x45e   : > { %v7308_v14 = vadd.f32 %v3310_v17, %v7228_v7  ;;  %v7311_v35 = vadd.f32 %v3322_v26, %v7212_v36 }
 0x45f   : > { %5563 = vmatmul.msk.bf16.vlgmr.msra.gmra.mxu3 %vm825_vm7, %v7255_v62 }
 0x460   : > { %4255 = vmatpush.bf16.msra.mxu3 %v4187_v9 }
 0x462   : > { %v3336_v48 = vpop.f32.mrf.mxu3 }
 0x463   : > { %v7317_v29 = vadd.f32 %v3336_v48, %v7216_v57  ;;  %v4179_v57 = vpop.permute.xlu2 %4178  ;;  %v4181_v40 = vpop.permute.xlu0 %4180 }
 0x464   : > { %v3350_v55 = vpop.f32.mrf.mxu0  ;;  %v4191_v16 = vsel %vm2109_vm12, %v4179_v57, %v4181_v40 }
 0x465   : > { %v3324_v58 = vpop.f32.mrf.mxu2  ;;  %v7320_v7 = vadd.f32 %v3350_v55, %v7235_v10  ;;  %v3364_v33 = vpop.f32.mrf.mxu1  ;;  %v4190_v10 = vsel %vm2109_vm12, %v4177_v18, %v4179_v57 }
 0x466   : > { %v7323_v36 = vadd.f32 %v3324_v58, %v7230_v27  ;;  %v7326_v22 = vadd.f32 %v3364_v33, %v7241_v38 }
 0x467   : > { %5564 = vmatmul.msk.bf16.vlgmr.msrb.gmra.mxu0 %vm825_vm7, %v7255_v62  ;;  %5565 = vmatmul.msk.bf16.vlgmr.msrb.gmra.mxu1 %vm825_vm7, %v7255_v62 }
 0x468   : > { %4269 = vmatpush.bf16.msrb.mxu0 %v4188_v51  ;;  %4283 = vmatpush.bf16.msrb.mxu1 %v4189_v4 }
 0x46a   : > { %5566 = vmatmul.msk.bf16.vlgmr.msrb.gmra.mxu2 %vm825_vm7, %v7255_v62  ;;  %v3338_v27 = vpop.f32.mrf.mxu3 }
 0x46b   : > { %4297 = vmatpush.bf16.msrb.mxu2 %v4190_v10  ;;  %v7338_v38 = vadd.f32 %v3338_v27, %v7232_v50  ;;  %v4183_v50 = vpop.permute.xlu1 %4182  ;;  %v4377_v15 = vpop.permute.xlu0 %4376 }
 0x46c   : > { %v3352_v56 = vpop.f32.mrf.mxu0 }
 0x46d   : > { %v7341_v13 = vadd.f32 %v3352_v56, %v7247_v47  ;;  %v3366_v8 = vpop.f32.mrf.mxu1  ;;  %v3378_v19 = vpop.f32.mrf.mxu2  ;;  %v7358_v47 = vld [vmem:[%s7724_s5 + $0x30] sm:$0xff] }
 0x46e   : > { %v7344_v32 = vadd.f32 %v3366_v8, %v7267_v30  ;;  %v7347_v61 = vadd.f32 %v3378_v19, %v7244_v3 }
 0x46f   : > { %5567 = vmatmul.msk.bf16.vlgmr.msrb.gmra.mxu3 %vm825_vm7, %v7255_v62 }
 0x470   : > { %4311 = vmatpush.bf16.msrb.mxu3 %v4191_v16 }
 0x472   : > { %v3392_v43 = vpop.f32.mrf.mxu3 }
 0x473   : > { %v7353_v54 = vadd.f32 %v3392_v43, %v7250_v42  ;;  %v4192_v42 = vsel %vm2109_vm12, %v4181_v40, %v4183_v50  ;;  %v4379_v41 = vpop.permute.xlu1 %4378 }
 0x474   : > { %v3406_v30 = vpop.f32.mrf.mxu0  ;;  %v4395_v18 = vsel %vm2320_vm13, %v4377_v15, %v4379_v41 }
 0x475   : > { %v3380_v20 = vpop.f32.mrf.mxu2  ;;  %v7361_v3 = vadd.f32 %v3406_v30, %v7276_v34  ;;  %v3420_v28 = vpop.f32.mrf.mxu1 }
 0x476   : > { %v7364_v45 = vadd.f32 %v3380_v20, %v7270_v5  ;;  %v7367_v62 = vadd.f32 %v3420_v28, %v7281_v12  ;;  %v4375_v34 = vpop.permute.xlu2 %4374 }
 0x477   : > { %5574 = vmatmul.msk.bf16.vlgmr.msra.gmra.mxu0 %vm825_vm7, %v7358_v47  ;;  %5575 = vmatmul.msk.bf16.vlgmr.msra.gmra.mxu1 %vm825_vm7, %v7358_v47  ;;  %v4394_v0 = vsel %vm2320_vm13, %v4375_v34, %v4377_v15 }
 0x478   : > { %4325 = vmatpush.bf16.msra.mxu0 %v4192_v42  ;;  %4339 = vmatpush.bf16.msra.mxu1 %v4183_v50 }
 0x47a   : > { %5576 = vmatmul.msk.bf16.vlgmr.msra.gmra.mxu2 %vm825_vm7, %v7358_v47  ;;  %v3394_v5 = vpop.f32.mrf.mxu3 }
 0x47b   : > { %4423 = vmatpush.bf16.msra.mxu2 %v4394_v0  ;;  %v7378_v12 = vadd.f32 %v3394_v5, %v7273_v49  ;;  %v4385_v40 = vpop.permute.xlu1 %4384  ;;  %v7443_v5 = vld [vmem:[%s7724_s5 + $0x38] sm:$0xff] }
 0x47c   : > { %v3408_v17 = vpop.f32.mrf.mxu0 }
 0x47d   : > { %v7381_v26 = vadd.f32 %v3408_v17, %v7287_v60  ;;  %v3422_v52 = vpop.f32.mrf.mxu1  ;;  %v3564_v9 = vpop.f32.mrf.mxu2 }
 0x47e   : > { %v7384_v25 = vadd.f32 %v3422_v52, %v7302_v2  ;;  %v7387_v48 = vadd.f32 %v3564_v9, %v7284_v1  ;;  %v4381_v55 = vpop.permute.xlu2 %4380  ;;  %v4383_v60 = vpop.permute.xlu0 %4382 }
 0x47f   : > { %5577 = vmatmul.msk.bf16.vlgmr.msra.gmra.mxu3 %vm825_vm7, %v7358_v47  ;;  %v4397_v10 = vsel %vm2320_vm13, %v4381_v55, %v4383_v60  ;;  %v4396_v27 = vsel %vm2320_vm13, %v4379_v41, %v4381_v55 }
 0x480   : > { %4437 = vmatpush.bf16.msra.mxu3 %v4395_v18 }
 0x482   : > { %v3578_v49 = vpop.f32.mrf.mxu3 }
 0x483   : > { %v7393_v58 = vadd.f32 %v3578_v49, %v7290_v11  ;;  %v4398_v11 = vsel %vm2320_vm13, %v4383_v60, %v4385_v40  ;;  %v4391_v28 = vpop.permute.xlu1 %4390 }
 0x484   : > { %v3592_v33 = vpop.f32.mrf.mxu0 }
 0x485   : > { %v3566_v51 = vpop.f32.mrf.mxu2  ;;  %v7396_v2 = vadd.f32 %v3592_v33, %v7311_v35  ;;  %v3606_v4 = vpop.f32.mrf.mxu1 }
 0x486   : > { %v7399_v1 = vadd.f32 %v3566_v51, %v7305_v46  ;;  %v7402_v57 = vadd.f32 %v3606_v4, %v7317_v29  ;;  %v4387_v16 = vpop.permute.xlu2 %4386 }
 0x487   : > { %5578 = vmatmul.msk.bf16.vlgmr.msrb.gmra.mxu0 %vm825_vm7, %v7358_v47  ;;  %5579 = vmatmul.msk.bf16.vlgmr.msrb.gmra.mxu1 %vm825_vm7, %v7358_v47  ;;  %v4399_v30 = vsel %vm2320_vm13, %v4385_v40, %v4387_v16 }
 0x488   : > { %4451 = vmatpush.bf16.msrb.mxu0 %v4396_v27  ;;  %4465 = vmatpush.bf16.msrb.mxu1 %v4397_v10 }
 0x48a   : > { %5580 = vmatmul.msk.bf16.vlgmr.msrb.gmra.mxu2 %vm825_vm7, %v7358_v47  ;;  %v3580_v46 = vpop.f32.mrf.mxu3 }
 0x48b   : > { %4479 = vmatpush.bf16.msrb.mxu2 %v4398_v11  ;;  %v7414_v35 = vadd.f32 %v3580_v46, %v7308_v14  ;;  %v4389_v14 = vpop.permute.xlu0 %4388  ;;  %v4587_v33 = vpop.permute.xlu1 %4586 }
 0x48c   : > { %v3594_v29 = vpop.f32.mrf.mxu0  ;;  %v4401_v41 = vsel %vm2320_vm13, %v4389_v14, %v4391_v28 }
 0x48d   : > { %v7417_v56 = vadd.f32 %v3594_v29, %v7323_v36  ;;  %v3608_v8 = vpop.f32.mrf.mxu1  ;;  %v3620_v19 = vpop.f32.mrf.mxu2 }
 0x48e   : > { %v7420_v50 = vadd.f32 %v3608_v8, %v7338_v38  ;;  %v7423_v43 = vadd.f32 %v3620_v19, %v7320_v7 }
 0x48f   : > { %5581 = vmatmul.msk.bf16.vlgmr.msrb.gmra.mxu3 %vm825_vm7, %v7358_v47 }
 0x490   : > { %4493 = vmatpush.bf16.msrb.mxu3 %v4399_v30 }
 0x492   : > { %v3634_v20 = vpop.f32.mrf.mxu3 }
 0x493   : > { %v7429_v36 = vadd.f32 %v3634_v20, %v7326_v22  ;;  %v4400_v22 = vsel %vm2320_vm13, %v4387_v16, %v4389_v14  ;;  %v4585_v52 = vpop.permute.xlu0 %4584 }
 0x494   : > { %v3648_v15 = vpop.f32.mrf.mxu0  ;;  %v4604_v46 = vsel %vm2531_vm14, %v4585_v52, %v4587_v33 }
 0x495   : > { %v3622_v42 = vpop.f32.mrf.mxu2  ;;  %v7432_v38 = vadd.f32 %v3648_v15, %v7347_v61  ;;  %v3662_v34 = vpop.f32.mrf.mxu1 }
 0x496   : > { %v7435_v7 = vadd.f32 %v3622_v42, %v7341_v13  ;;  %v7438_v0 = vadd.f32 %v3662_v34, %v7353_v54  ;;  %v4393_v13 = vpop.permute.xlu2 %4392 }
 0x497   : > { %5582 = vmatmul.msk.bf16.vlgmr.msra.gmra.mxu0 %vm825_vm7, %v7358_v47  ;;  %5583 = vmatmul.msk.bf16.vlgmr.msra.gmra.mxu1 %vm825_vm7, %v7358_v47  ;;  %v4402_v61 = vsel %vm2320_vm13, %v4391_v28, %v4393_v13 }
 0x498   : > { %4507 = vmatpush.bf16.msra.mxu0 %v4400_v22  ;;  %4521 = vmatpush.bf16.msra.mxu1 %v4401_v41 }
 0x49a   : > { %5590 = vmatmul.msk.bf16.vlgmr.msra.gmra.mxu2 %vm825_vm7, %v7443_v5  ;;  %v3636_v54 = vpop.f32.mrf.mxu3 }
 0x49b   : > { %4535 = vmatpush.bf16.msra.mxu2 %v4402_v61  ;;  %v7455_v17 = vadd.f32 %v3636_v54, %v7344_v32  ;;  %v4591_v11 = vpop.permute.xlu0 %4590 }
 0x49c   : > { %v3650_v9 = vpop.f32.mrf.mxu0 }
 0x49d   : > { %v7458_v18 = vadd.f32 %v3650_v9, %v7364_v45  ;;  %v3664_v49 = vpop.f32.mrf.mxu1  ;;  %v3676_v47 = vpop.f32.mrf.mxu2 }
 0x49e   : > { %v7461_v55 = vadd.f32 %v3664_v49, %v7378_v12  ;;  %v7464_v60 = vadd.f32 %v3676_v47, %v7361_v3  ;;  %v4589_v12 = vpop.permute.xlu2 %4588 }
 0x49f   : > { %5591 = vmatmul.msk.bf16.vlgmr.msra.gmra.mxu3 %vm825_vm7, %v7443_v5  ;;  %v4605_v29 = vsel %vm2531_vm14, %v4587_v33, %v4589_v12 }
 0x4a0   : > { %4549 = vmatpush.bf16.msra.mxu3 %v4393_v13 }
 0x4a2   : > { %v3690_v32 = vpop.f32.mrf.mxu3 }
 0x4a3   : > { %v7469_v51 = vadd.f32 %v3690_v32, %v7367_v62  ;;  %v4606_v62 = vsel %vm2531_vm14, %v4589_v12, %v4591_v11 }
 0x4a4   : > { %v3795_v4 = vpop.f32.mrf.mxu0 }
 0x4a5   : > { %v3678_v45 = vpop.f32.mrf.mxu2  ;;  %v7472_v10 = vadd.f32 %v3795_v4, %v7387_v48  ;;  %v3809_v27 = vpop.f32.mrf.mxu1 }
 0x4a6   : > { %v7475_v40 = vadd.f32 %v3678_v45, %v7381_v26  ;;  %v7478_v3 = vadd.f32 %v3809_v27, %v7393_v58  ;;  %v4593_v58 = vpop.permute.xlu1 %4592  ;;  %v4595_v15 = vpop.permute.xlu2 %4594 }
 0x4a7   : > { %5592 = vmatmul.msk.bf16.vlgmr.msrb.gmra.mxu0 %vm825_vm7, %v7443_v5  ;;  %5593 = vmatmul.msk.bf16.vlgmr.msrb.gmra.mxu1 %vm825_vm7, %v7443_v5  ;;  %v4607_v28 = vsel %vm2531_vm14, %v4591_v11, %v4593_v58  ;;  %v4608_v54 = vsel %vm2531_vm14, %v4593_v58, %v4595_v15 }
 0x4a8   : > { %4633 = vmatpush.bf16.msrb.mxu0 %v4604_v46  ;;  %4647 = vmatpush.bf16.msrb.mxu1 %v4605_v29 }
 0x4aa   : > { %5594 = vmatmul.msk.bf16.vlgmr.msrb.gmra.mxu2 %vm825_vm7, %v7443_v5  ;;  %v3692_v26 = vpop.f32.mrf.mxu3 }
 0x4ab   : > { %4661 = vmatpush.bf16.msrb.mxu2 %v4606_v62  ;;  %v7490_v48 = vadd.f32 %v3692_v26, %v7384_v25 }
 0x4ac   : > { %v3797_v8 = vpop.f32.mrf.mxu0 }
 0x4ad   : > { %v7493_v19 = vadd.f32 %v3797_v8, %v7399_v1  ;;  %v3811_v16 = vpop.f32.mrf.mxu1  ;;  %v3823_v30 = vpop.f32.mrf.mxu2  ;;  %v4816_v1 = vld [vmem:[%s7725_s6] sm:$0xff] }
 0x4ae   : > { %v7496_v14 = vadd.f32 %v3811_v16, %v7414_v35  ;;  %v7499_v20 = vadd.f32 %v3823_v30, %v7396_v2  ;;  %v4597_v35 = vpop.permute.xlu0 %4596  ;;  %4820 = vperm.xlu1 %5741, %v4816_v1   ;;  %v4599_v52 = vpop.permute.xlu1 %4598 }
 0x4af   : > { %5595 = vmatmul.msk.bf16.vlgmr.msrb.gmra.mxu3 %vm825_vm7, %v7443_v5  ;;  %v4601_v32 = vpop.permute.xlu2 %4600 }
 0x4b0   : > { %4675 = vmatpush.bf16.msrb.mxu3 %v4607_v28  ;;  %v4611_v27 = vsel %vm2531_vm14, %v4599_v52, %v4601_v32 }
 0x4b2   : > { %v3837_v25 = vpop.f32.mrf.mxu3 }
 0x4b3   : > { %v7505_v42 = vadd.f32 %v3837_v25, %v7402_v57  ;;  %v4609_v57 = vsel %vm2531_vm14, %v4595_v15, %v4597_v35 }
 0x4b4   : > { %v3851_v34 = vpop.f32.mrf.mxu0 }
 0x4b5   : > { %v3825_v2 = vpop.f32.mrf.mxu2  ;;  %v7511_v22 = vadd.f32 %v3851_v34, %v7423_v43  ;;  %v3865_v41 = vpop.f32.mrf.mxu1  ;;  %v4610_v43 = vsel %vm2531_vm14, %v4597_v35, %v4599_v52 }
 0x4b6   : > { %v7514_v13 = vadd.f32 %v3825_v2, %v7417_v56  ;;  %v7517_v61 = vadd.f32 %v3865_v41, %v7429_v36 }
 0x4b7   : > { %5596 = vmatmul.msk.bf16.vlgmr.msra.gmra.mxu0 %vm825_vm7, %v7443_v5  ;;  %5597 = vmatmul.msk.bf16.vlgmr.msra.gmra.mxu1 %vm825_vm7, %v7443_v5 }
 0x4b8   : > { %4689 = vmatpush.bf16.msra.mxu0 %v4608_v54  ;;  %4703 = vmatpush.bf16.msra.mxu1 %v4609_v57 }
 0x4ba   : > { %5598 = vmatmul.msk.bf16.vlgmr.msra.gmra.mxu2 %vm825_vm7, %v7443_v5  ;;  %v3839_v56 = vpop.f32.mrf.mxu3 }
 0x4bb   : > { %4717 = vmatpush.bf16.msra.mxu2 %v4610_v43  ;;  %v3939_v36 = vadd.f32 %v3839_v56, %v7420_v50  ;;  %v5718_v50 = vld [vmem:[%s7724_s5 + $0x40] sm:$0xff] }
 0x4bc   : > { %v3853_v9 = vpop.f32.mrf.mxu0 }
 0x4bd   : > { %v3940_v49 = vadd.f32 %v3853_v9, %v7435_v7  ;;  %v3867_v47 = vpop.f32.mrf.mxu1  ;;  %v3879_v33 = vpop.f32.mrf.mxu2 }
 0x4be   : > { %v3941_v4 = vadd.f32 %v3867_v47, %v7455_v17  ;;  %v3932_v45 = vadd.f32 %v3879_v33, %v7432_v38  ;;  %v4603_v7 = vpop.permute.xlu0 %4602 }
 0x4bf   : > { %5599 = vmatmul.msk.bf16.vlgmr.msra.gmra.mxu3 %vm825_vm7, %v7443_v5  ;;  %v4612_v5 = vsel %vm2531_vm14, %v4601_v32, %v4603_v7 }
 0x4c0   : > { %4731 = vmatpush.bf16.msra.mxu3 %v4611_v27 }
 0x4c2   : > { %v3893_v12 = vpop.f32.mrf.mxu3 }
 0x4c3   : > { %v3933_v11 = vadd.f32 %v3893_v12, %v7438_v0 }
 0x4c4   : > { %v3907_v46 = vpop.f32.mrf.mxu0 }
 0x4c5   : > { %v3881_v29 = vpop.f32.mrf.mxu2  ;;  %v3934_v17 = vadd.f32 %v3907_v46, %v7464_v60  ;;  %v3921_v62 = vpop.f32.mrf.mxu1 }
 0x4c6   : > { %v3942_v38 = vadd.f32 %v3881_v29, %v7458_v18  ;;  %v3935_v26 = vadd.f32 %v3921_v62, %v7469_v51 }
 0x4c7   : > { %5606 = vmatmul.msk.bf16.vlgmr.msrb.gmra.mxu0 %vm825_vm7, %v5718_v50  ;;  %5607 = vmatmul.msk.bf16.vlgmr.msrb.gmra.mxu1 %vm825_vm7, %v5718_v50 }
 0x4c8   : > { %4745 = vmatpush.bf16.msrb.mxu0 %v4612_v5  ;;  %4759 = vmatpush.bf16.msrb.mxu1 %v4603_v7 }
 0x4ca   : > { %5608 = vmatmul.msk.bf16.vlgmr.msrb.gmra.mxu2 %vm825_vm7, %v5718_v50  ;;  %v3895_v0 = vpop.f32.mrf.mxu3 }
 0x4cb   : > { %v3943_v58 = vadd.f32 %v3895_v0, %v7461_v55 }
 0x4cc   : > { %v3909_v8 = vpop.f32.mrf.mxu0 }
 0x4cd   : > { %v3944_v60 = vadd.f32 %v3909_v8, %v7475_v40  ;;  %v3923_v16 = vpop.f32.mrf.mxu1  ;;  %v4005_v18 = vpop.f32.mrf.mxu2 }
 0x4ce   : > { %v3945_v51 = vadd.f32 %v3923_v16, %v7490_v48  ;;  %v4136_v30 = vadd.f32 %v4005_v18, %v7472_v10 }
 0x4cf   : > { %5609 = vmatmul.msk.bf16.vlgmr.msrb.gmra.mxu3 %vm825_vm7, %v5718_v50 }
 0x4d2   : > { %v4019_v28 = vpop.f32.mrf.mxu3 }
 0x4d3   : > { %v4137_v25 = vadd.f32 %v4019_v28, %v7478_v3 }
 0x4d4   : > { %v4033_v15 = vpop.f32.mrf.mxu0 }
 0x4d5   : > { %v4007_v1 = vpop.f32.mrf.mxu2  ;;  %v4138_v35 = vadd.f32 %v4033_v15, %v7499_v20  ;;  %v4047_v34 = vpop.f32.mrf.mxu1 }
 0x4d6   : > { %v4146_v55 = vadd.f32 %v4007_v1, %v7493_v19  ;;  %v4139_v40 = vadd.f32 %v4047_v34, %v7505_v42 }
 0x4d7   : > { %5610 = vmatmul.msk.bf16.vlgmr.msra.gmra.mxu0 %vm825_vm7, %v5718_v50  ;;  %5611 = vmatmul.msk.bf16.vlgmr.msra.gmra.mxu1 %vm825_vm7, %v5718_v50 }
 0x4da   : > { %5612 = vmatmul.msk.bf16.vlgmr.msra.gmra.mxu2 %vm825_vm7, %v5718_v50  ;;  %v4021_v10 = vpop.f32.mrf.mxu3 }
 0x4db   : > { %v4147_v48 = vadd.f32 %v4021_v10, %v7496_v14 }
 0x4dc   : > { %v4035_v2 = vpop.f32.mrf.mxu0 }
 0x4dd   : > { %v4148_v3 = vadd.f32 %v4035_v2, %v7514_v13  ;;  %v4049_v41 = vpop.f32.mrf.mxu1  ;;  %v4061_v57 = vpop.f32.mrf.mxu2 }
 0x4de   : > { %v4149_v20 = vadd.f32 %v4049_v41, %v3939_v36  ;;  %v4140_v54 = vadd.f32 %v4061_v57, %v7511_v22 }
 0x4df   : > { %5613 = vmatmul.msk.bf16.vlgmr.msra.gmra.mxu3 %vm825_vm7, %v5718_v50 }
 0x4e2   : > { %v4075_v19 = vpop.f32.mrf.mxu3 }
 0x4e3   : > { %v4141_v42 = vadd.f32 %v4075_v19, %v7517_v61 }
 0x4e4   : > { %v4089_v52 = vpop.f32.mrf.mxu0 }
 0x4e5   : > { %v4063_v43 = vpop.f32.mrf.mxu2  ;;  %v4142_v56 = vadd.f32 %v4089_v52, %v3932_v45  ;;  %v4103_v9 = vpop.f32.mrf.mxu1 }
 0x4e6   : > { %v4150_v47 = vadd.f32 %v4063_v43, %v3940_v49  ;;  %v4143_v33 = vadd.f32 %v4103_v9, %v3933_v11 }
 0x4e7   : > { %5614 = vmatmul.msk.bf16.vlgmr.msrb.gmra.mxu0 %vm825_vm7, %v5718_v50  ;;  %5615 = vmatmul.msk.bf16.vlgmr.msrb.gmra.mxu1 %vm825_vm7, %v5718_v50 }
 0x4ea   : > { %v4077_v14 = vpop.f32.mrf.mxu3 }
 0x4eb   : > { %v4151_v13 = vadd.f32 %v4077_v14, %v3941_v4 }
 0x4ec   : > { %v4091_v36 = vpop.f32.mrf.mxu0 }
 0x4ed   : > { %v4152_v32 = vadd.f32 %v4091_v36, %v3942_v38  ;;  %v4105_v22 = vpop.f32.mrf.mxu1  ;;  %v4117_v27 = vpop.f32.mrf.mxu2 }
 0x4ee   : > { %v4153_v12 = vadd.f32 %v4105_v22, %v3943_v58  ;;  %v4144_v7 = vadd.f32 %v4117_v27, %v3934_v17 }
 0x4f2   : > { %v4131_v46 = vpop.f32.mrf.mxu3 }
 0x4f3   : > { %v4145_v61 = vadd.f32 %v4131_v46, %v3935_v26 }
 0x4f4   : > { %v4215_v29 = vpop.f32.mrf.mxu0 }
 0x4f5   : > { %v4119_v62 = vpop.f32.mrf.mxu2  ;;  %v4346_v45 = vadd.f32 %v4215_v29, %v4136_v30  ;;  %v4229_v5 = vpop.f32.mrf.mxu1 }
 0x4f6   : > { %v4154_v49 = vadd.f32 %v4119_v62, %v3944_v60  ;;  %v4347_v11 = vadd.f32 %v4229_v5, %v4137_v25 }
 0x4fa   : > { %v4133_v0 = vpop.f32.mrf.mxu3 }
 0x4fb   : > { %v4155_v8 = vadd.f32 %v4133_v0, %v3945_v51 }
 0x4fc   : > { %v4217_v16 = vpop.f32.mrf.mxu0 }
 0x4fd   : > { %v7565_v50 = vadd.f32 %v4217_v16, %v4146_v55  ;;  %v4231_v4 = vpop.f32.mrf.mxu1  ;;  %v4243_v18 = vpop.f32.mrf.mxu2 }
 0x4fe   : > { %v7567_v38 = vadd.f32 %v4231_v4, %v4147_v48  ;;  %v7569_v28 = vadd.f32 %v4243_v18, %v4138_v35 }
 0x502   : > { %v4257_v17 = vpop.f32.mrf.mxu3 }
 0x503   : > { %v7571_v58 = vadd.f32 %v4257_v17, %v4139_v40 }
 0x504   : > { %v4271_v26 = vpop.f32.mrf.mxu0 }
 0x505   : > { %v4245_v15 = vpop.f32.mrf.mxu2  ;;  %v7573_v30 = vadd.f32 %v4271_v26, %v4140_v54  ;;  %v4285_v60 = vpop.f32.mrf.mxu1 }
 0x506   : > { %v7575_v25 = vadd.f32 %v4245_v15, %v4148_v3  ;;  %v7577_v51 = vadd.f32 %v4285_v60, %v4141_v42  ;;  %v4786_v60 = vld [vmem:[#allocation2 + $0x4] sm:$0xff] }
 0x50a   : > { %v4259_v1 = vpop.f32.mrf.mxu3 }
 0x50b   : > { %v7579_v34 = vadd.f32 %v4259_v1, %v4149_v20 }
 0x50c   : > { %v4273_v55 = vpop.f32.mrf.mxu0 }
 0x50d   : > { %v7581_v10 = vadd.f32 %v4273_v55, %v4150_v47  ;;  %v4287_v35 = vpop.f32.mrf.mxu1  ;;  %v4299_v48 = vpop.f32.mrf.mxu2 }
 0x50e   : > { %v7583_v2 = vadd.f32 %v4287_v35, %v4151_v13  ;;  %v7585_v40 = vadd.f32 %v4299_v48, %v4142_v56 }
 0x512   : > { %v4313_v41 = vpop.f32.mrf.mxu3 }
 0x513   : > { %v7587_v57 = vadd.f32 %v4313_v41, %v4143_v33 }
 0x514   : > { %v4327_v54 = vpop.f32.mrf.mxu0 }
 0x515   : > { %v4301_v3 = vpop.f32.mrf.mxu2  ;;  %v7589_v19 = vadd.f32 %v4327_v54, %v4144_v7  ;;  %v4341_v42 = vpop.f32.mrf.mxu1  ;;  %v4796_v54 = vunpack.c.l.bf16 %v4786_v60 }
 0x516   : > { %v7591_v52 = vadd.f32 %v4301_v3, %v4152_v32  ;;  %v7593_v20 = vadd.f32 %v4341_v42, %v4145_v61  ;;  %v4797_v42 = vunpack.c.h.bf16 %v4786_v60 }
 0x51a   : > { %v4315_v43 = vpop.f32.mrf.mxu3 }
 0x51b   : > { %v7595_v9 = vadd.f32 %v4315_v43, %v4153_v12 }
 0x51c   : > { %v4329_v47 = vpop.f32.mrf.mxu0 }
 0x51d   : > { %v7597_v14 = vadd.f32 %v4329_v47, %v4154_v49  ;;  %v4343_v56 = vpop.f32.mrf.mxu1  ;;  %v4425_v13 = vpop.f32.mrf.mxu2 }
 0x51e   : > { %v7599_v36 = vadd.f32 %v4343_v56, %v4155_v8  ;;  %v4556_v17 = vadd.f32 %v4425_v13, %v4346_v45 }
 0x520   : > { %v7619_v1 = vpop.permute.xlu1 %4820 }
 0x522   : > { %v4439_v33 = vpop.f32.mrf.mxu3 }
 0x523   : > { %v4557_v26 = vadd.f32 %v4439_v33, %v4347_v11 }
 0x524   : > { %v4453_v22 = vpop.f32.mrf.mxu0 }
 0x525   : > { %v4427_v27 = vpop.f32.mrf.mxu2  ;;  %v4467_v7 = vpop.f32.mrf.mxu1  ;;  %v4558_v33 = vadd.f32 %v4453_v22, %v7569_v28 }
 0x526   : > { %v4566_v11 = vadd.f32 %v4427_v27, %v7565_v50 }
 0x52a   : > { %v4441_v46 = vpop.f32.mrf.mxu3 }
 0x52c   : > { %v4455_v29 = vpop.f32.mrf.mxu0 }
 0x52d   : > { %v7601_v32 = vpop.f32.mrf.mxu1  ;;  %v4481_v61 = vpop.f32.mrf.mxu2 }
 0x532   : > { %v4495_v62 = vpop.f32.mrf.mxu3 }
 0x534   : > { %v7603_v5 = vpop.f32.mrf.mxu0 }
 0x535   : > { %v7605_v12 = vpop.f32.mrf.mxu2  ;;  %v7607_v49 = vpop.f32.mrf.mxu1 }
 0x53a   : > { %v7609_v0 = vpop.f32.mrf.mxu3 }
 0x53c   : > { %v7611_v8 = vpop.f32.mrf.mxu0 }
 0x53d   : > { %v7613_v16 = vpop.f32.mrf.mxu1  ;;  %v7615_v4 = vpop.f32.mrf.mxu2 }
 0x542   : > { %v7617_v18 = vpop.f32.mrf.mxu3 }
 0x544   : > { %v4635_v15 = vpop.f32.mrf.mxu0 }
 0x545   : > { %v7621_v55 = vpop.f32.mrf.mxu2  ;;  %v4766_v35 = vadd.f32 %v4635_v15, %v4556_v17  ;;  %v4649_v48 = vpop.f32.mrf.mxu1  ;;  %v4567_v17 = vadd.f32 %v4441_v46, %v7567_v38 }
 0x546   : > { %v4767_v41 = vadd.f32 %v4649_v48, %v4557_v26  ;;  %v4791_v48 = vld [vmem:[#allocation2 + $0x34] sm:$0xff] }
 0x547   : > { %v4828_v3 = vadd.f32 %v7619_v1, %v4766_v35  ;;  %v4806_v38 = vunpack.c.l.bf16 %v4791_v48  ;;  %v4807_v22 = vunpack.c.h.bf16 %v4791_v48  ;;  %v4561_v48 = vadd.f32 %v4495_v62, %v7577_v51 }
 0x548   : > { %v4829_v43 = vadd.f32 %v7619_v1, %v4767_v41 }
 0x549   : > { %v4848_v47 = vadd.f32 %v4828_v3, %v4796_v54  ;;  %v4787_v54 = vld [vmem:[#allocation2 + $0xc] sm:$0xff]  ;;  %v7632_v3 = vpop.permute.xlu2 %4825 }
 0x54a   : > { %v4849_v56 = vadd.f32 %v4829_v43, %v4797_v42  ;;  %v7625_v45 = vpop.f32.mrf.mxu3  ;;  %v4799_v44 = vunpack.c.h.bf16 %v4787_v54 }
 0x54b   : > { %v4868_v13 = vmax.f32 %v4848_v47, 0.0  ;;  %v4798_v47 = vunpack.c.l.bf16 %v4787_v54 }
 0x54c   : > { %v4869_v15 = vmax.f32 %v4849_v56, 0.0  ;;  %v4637_v26 = vpop.f32.mrf.mxu0 }
 0x54d   : > { %v4888_v35 = vmul.f32 %v4868_v13, %v5940_v21  ;;  %v4776_v60 = vadd.f32 %v4637_v26, %v4566_v11  ;;  %v4651_v59 = vpop.f32.mrf.mxu1  ;;  %v4663_v41 = vpop.f32.mrf.mxu2  ;;  %v4559_v11 = vadd.f32 %v4467_v7, %v7571_v58 }
 0x54e   : > { %v4889_v42 = vmul.f32 %v4869_v15, %v5944_v24  ;;  %v4777_v50 = vadd.f32 %v4651_v59, %v4567_v17  ;;  %v4768_v27 = vadd.f32 %v4663_v41, %v4558_v33  ;;  %v4560_v15 = vadd.f32 %v4481_v61, %v7573_v30 }
 0x54f   : > { %v4838_v28 = vadd.f32 %v7632_v3, %v4776_v60  ;;  %v4568_v60 = vadd.f32 %v4455_v29, %v7575_v25 }
 0x550   : > { %v4908_v46 = vpack.c.bf16 %v4889_v42, %v4888_v35  ;;  %v4839_v43 = vadd.f32 %v7632_v3, %v4777_v50  ;;  %v4830_v56 = vadd.f32 %v7619_v1, %v4768_v27  ;;  %v4788_v50 = vld [vmem:[#allocation2 + $0x14] sm:$0xff] }
 0x551   : > { %v4858_v59 = vadd.f32 %v4838_v28, %v4806_v38  ;;  %v4800_v51 = vunpack.c.l.bf16 %v4788_v50  ;;  %v4801_v54 = vunpack.c.h.bf16 %v4788_v50 }
 0x552   : > { %4918 = vst [vmem:[%s7638_s29] sm:$0xff] %v4908_v46  ;;  %v4859_v13 = vadd.f32 %v4839_v43, %v4807_v22  ;;  %v4850_v33 = vadd.f32 %v4830_v56, %v4798_v47  ;;  %v4677_v17 = vpop.f32.mrf.mxu3  ;;  %v4792_v46 = vld [vmem:[#allocation2 + $0x3c] sm:$0xff]  ;;  %v4569_v56 = vadd.f32 %v7601_v32, %v7579_v34  ;;  %v4562_v34 = vadd.f32 %v7603_v5, %v7585_v40 }
 0x553   : > { %v4878_v26 = vmax.f32 %v4858_v59, 0.0  ;;  %v4769_v41 = vadd.f32 %v4677_v17, %v4559_v11  ;;  %v4571_v32 = vadd.f32 %v7609_v0, %v7583_v2 }
 0x554   : > { %v4879_v35 = vmax.f32 %v4859_v13, 0.0  ;;  %v4691_v42 = vpop.f32.mrf.mxu0  ;;  %v4870_v30 = vmax.f32 %v4850_v33, 0.0  ;;  %v4570_v13 = vadd.f32 %v7605_v12, %v7581_v10  ;;  %v4809_v10 = vunpack.c.h.bf16 %v4792_v46 }
 0x555   : > { %v4898_v27 = vmul.f32 %v4878_v26, %v5940_v21  ;;  %v4831_v58 = vadd.f32 %v7619_v1, %v4769_v41  ;;  %v4665_v7 = vpop.f32.mrf.mxu2  ;;  %v4770_v38 = vadd.f32 %v4691_v42, %v4560_v15  ;;  %v4705_v28 = vpop.f32.mrf.mxu1 }
 0x556   : > { %v4899_v22 = vmul.f32 %v4879_v35, %v5944_v24  ;;  %v4778_v61 = vadd.f32 %v4665_v7, %v4568_v60  ;;  %v4771_v25 = vadd.f32 %v4705_v28, %v4561_v48  ;;  %v4808_v24 = vunpack.c.l.bf16 %v4792_v46  ;;  %v4793_v48 = vld [vmem:[#allocation2 + $0x44] sm:$0xff]  ;;  %v4789_v28 = vld [vmem:[#allocation2 + $0x1c] sm:$0xff] }
 0x557   : > { %v4851_v29 = vadd.f32 %v4831_v58, %v4799_v44  ;;  %v4832_v62 = vadd.f32 %v7619_v1, %v4770_v38  ;;  %v4890_v44 = vmul.f32 %v4870_v30, %v5951_v31  ;;  %v4810_v30 = vunpack.c.l.bf16 %v4793_v48 }
 0x558   : > { %v4913_v43 = vpack.c.bf16 %v4899_v22, %v4898_v27  ;;  %v4840_v21 = vadd.f32 %v7632_v3, %v4778_v61  ;;  %v4833_v47 = vadd.f32 %v7619_v1, %v4771_v25  ;;  %v4811_v46 = vunpack.c.h.bf16 %v4793_v48 }
 0x559   : > { %v4871_v11 = vmax.f32 %v4851_v29, 0.0  ;;  %v4852_v59 = vadd.f32 %v4832_v62, %v4800_v51  ;;  %v4802_v51 = vunpack.c.l.bf16 %v4789_v28 }
 0x55a   : > { %4923 = vst [vmem:[%s7638_s29 + $0x28] sm:$0xff] %v4913_v43  ;;  %v4853_v33 = vadd.f32 %v4833_v47, %v4801_v54  ;;  %v4679_v17 = vpop.f32.mrf.mxu3  ;;  %v4860_v26 = vadd.f32 %v4840_v21, %v4808_v24  ;;  %v4563_v43 = vadd.f32 %v7607_v49, %v7587_v57  ;;  %v4564_v47 = vadd.f32 %v7615_v4, %v7589_v19  ;;  %v4790_v4 = vld [vmem:[#allocation2 + $0x24] sm:$0xff] }
 0x55b   : > { %v4891_v15 = vmul.f32 %v4871_v11, %v5956_v37  ;;  %v4872_v41 = vmax.f32 %v4852_v59, 0.0  ;;  %v4779_v60 = vadd.f32 %v4679_v17, %v4569_v56  ;;  %v4572_v17 = vadd.f32 %v7611_v8, %v7591_v52  ;;  %v4794_v8 = vld [vmem:[#allocation2 + $0x4c] sm:$0xff] }
 0x55c   : > { %v4873_v35 = vmax.f32 %v4853_v33, 0.0  ;;  %v4693_v12 = vpop.f32.mrf.mxu0  ;;  %v4880_v2 = vmax.f32 %v4860_v26, 0.0  ;;  %v4565_v57 = vadd.f32 %v7617_v18, %v7593_v20 }
 0x55d   : > { %v4909_v42 = vpack.c.bf16 %v4891_v15, %v4890_v44  ;;  %v4892_v50 = vmul.f32 %v4872_v41, %v7782_v39  ;;  %v4841_v27 = vadd.f32 %v7632_v3, %v4779_v60  ;;  %v4780_v58 = vadd.f32 %v4693_v12, %v4570_v13  ;;  %v4707_v7 = vpop.f32.mrf.mxu1  ;;  %v4719_v38 = vpop.f32.mrf.mxu2 }
 0x55e   : > { %v4893_v22 = vmul.f32 %v4873_v35, %v7784_v63  ;;  %v4781_v40 = vadd.f32 %v4707_v7, %v4571_v32  ;;  %v4772_v5 = vadd.f32 %v4719_v38, %v4562_v34  ;;  %v4900_v59 = vmul.f32 %v4880_v2, %v5951_v31 }
 0x55f   : > { %4919 = vst [vmem:[%s7638_s29 + $0x8] sm:$0xff] %v4909_v42  ;;  %v4861_v0 = vadd.f32 %v4841_v27, %v4809_v10  ;;  %v4842_v61 = vadd.f32 %v7632_v3, %v4780_v58  ;;  %v4803_v15 = vunpack.c.h.bf16 %v4789_v28  ;;  %v4804_v35 = vunpack.c.l.bf16 %v4790_v4 }
 0x560   : > { %v4910_v25 = vpack.c.bf16 %v4893_v22, %v4892_v50  ;;  %v4843_v29 = vadd.f32 %v7632_v3, %v4781_v40  ;;  %v4834_v62 = vadd.f32 %v7619_v1, %v4772_v5  ;;  %v4805_v42 = vunpack.c.h.bf16 %v4790_v4 }
 0x561   : > { %v4881_v21 = vmax.f32 %v4861_v0, 0.0  ;;  %v4862_v54 = vadd.f32 %v4842_v61, %v4810_v30  ;;  %v4573_v27 = vadd.f32 %v7613_v16, %v7595_v9  ;;  %v4812_v58 = vunpack.c.l.bf16 %v4794_v8 }
 0x562   : > { %4920 = vst [vmem:[%s7638_s29 + $0x10] sm:$0xff] %v4910_v25  ;;  %v4863_v56 = vadd.f32 %v4843_v29, %v4811_v46  ;;  %v4854_v11 = vadd.f32 %v4834_v62, %v4802_v51  ;;  %v4733_v24 = vpop.f32.mrf.mxu3  ;;  %v4574_v38 = vadd.f32 %v7621_v55, %v7597_v14  ;;  %v4575_v9 = vadd.f32 %v7625_v45, %v7599_v36  ;;  %v4795_v46 = vld [vmem:[#allocation2 + $0x54] sm:$0xff] }
 0x563   : > { %v4901_v13 = vmul.f32 %v4881_v21, %v5956_v37  ;;  %v4882_v44 = vmax.f32 %v4862_v54, 0.0  ;;  %v4773_v33 = vadd.f32 %v4733_v24, %v4563_v43  ;;  %v4813_v0 = vunpack.c.h.bf16 %v4794_v8  ;;  %v7806_v62 = vld [vmem:[#allocation10_spill] sm:$0xff] }
 0x564   : > { %v4883_v49 = vmax.f32 %v4863_v56, 0.0  ;;  %v4747_v19 = vpop.f32.mrf.mxu0  ;;  %v4874_v32 = vmax.f32 %v4854_v11, 0.0  ;;  %v4814_v56 = vunpack.c.l.bf16 %v4795_v46  ;;  %v4815_v11 = vunpack.c.h.bf16 %v4795_v46 }
 0x565   : > { %v4914_v26 = vpack.c.bf16 %v4901_v13, %v4900_v59  ;;  %v4902_v41 = vmul.f32 %v4882_v44, %v7782_v39  ;;  %v4835_v31 = vadd.f32 %v7619_v1, %v4773_v33  ;;  %v4721_v60 = vpop.f32.mrf.mxu2  ;;  %v4774_v37 = vadd.f32 %v4747_v19, %v4564_v47  ;;  %v4761_v48 = vpop.f32.mrf.mxu1 }
 0x566   : > { %v4903_v34 = vmul.f32 %v4883_v49, %v7784_v63  ;;  %v4782_v52 = vadd.f32 %v4721_v60, %v4572_v17  ;;  %v4775_v20 = vadd.f32 %v4761_v48, %v4565_v57  ;;  %v4894_v28 = vmul.f32 %v4874_v32, %v7787_v23 }
 0x567   : > { %4924 = vst [vmem:[%s7638_s29 + $0x30] sm:$0xff] %v4914_v26  ;;  %v4855_v18 = vadd.f32 %v4835_v31, %v4803_v15  ;;  %v4836_v10 = vadd.f32 %v7619_v1, %v4774_v37 }
 0x568   : > { %v4915_v12 = vpack.c.bf16 %v4903_v34, %v4902_v41  ;;  %v4844_v39 = vadd.f32 %v7632_v3, %v4782_v52  ;;  %v4837_v50 = vadd.f32 %v7619_v1, %v4775_v20 }
 0x569   : > { %v4875_v63 = vmax.f32 %v4855_v18, 0.0  ;;  %v4856_v7 = vadd.f32 %v4836_v10, %v4804_v35 }
 0x56a   : > { %4925 = vst [vmem:[%s7638_s29 + $0x38] sm:$0xff] %v4915_v12  ;;  %v4857_v22 = vadd.f32 %v4837_v50, %v4805_v42  ;;  %v4735_v30 = vpop.f32.mrf.mxu3  ;;  %v4864_v5 = vadd.f32 %v4844_v39, %v4812_v58 }
 0x56b   : > { %v4895_v40 = vmul.f32 %v4875_v63, %v7788_v6  ;;  %v4876_v2 = vmax.f32 %v4856_v7, 0.0  ;;  %v4783_v1 = vadd.f32 %v4735_v30, %v4573_v27 }
 0x56c   : > { %v4877_v16 = vmax.f32 %v4857_v22, 0.0  ;;  %v4749_v61 = vpop.f32.mrf.mxu0  ;;  %v4884_v54 = vmax.f32 %v4864_v5, 0.0 }
 0x56d   : > { %v4911_v25 = vpack.c.bf16 %v4895_v40, %v4894_v28  ;;  %v4896_v14 = vmul.f32 %v4876_v2, %v7801_v53  ;;  %v4845_v55 = vadd.f32 %v7632_v3, %v4783_v1  ;;  %v4784_v29 = vadd.f32 %v4749_v61, %v4574_v38  ;;  %v4763_v51 = vpop.f32.mrf.mxu1 }
 0x56e   : > { %v4897_v43 = vmul.f32 %v4877_v16, %v7806_v62  ;;  %v4785_v21 = vadd.f32 %v4763_v51, %v4575_v9  ;;  %v4904_v17 = vmul.f32 %v4884_v54, %v7787_v23 }
 0x56f   : > { %4921 = vst [vmem:[%s7638_s29 + $0x18] sm:$0xff] %v4911_v25  ;;  %v4865_v47 = vadd.f32 %v4845_v55, %v4813_v0  ;;  %v4846_v36 = vadd.f32 %v7632_v3, %v4784_v29 }
 0x570   : > { %v4912_v45 = vpack.c.bf16 %v4897_v43, %v4896_v14  ;;  %v4847_v24 = vadd.f32 %v7632_v3, %v4785_v21 }
 0x571   : > { %v4885_v59 = vmax.f32 %v4865_v47, 0.0  ;;  %v4866_v13 = vadd.f32 %v4846_v36, %v4814_v56 }
 0x572   : > { %4922 = vst.msk [vmem:[%s7638_s29 + $0x20] sm:$0xff] %vm5959_vm5, %v4912_v45  ;;  %v4867_v33 = vadd.f32 %v4847_v24, %v4815_v11 }
 0x573   : > { %v4905_v57 = vmul.f32 %v4885_v59, %v7788_v6  ;;  %v4886_v49 = vmax.f32 %v4866_v13, 0.0 }
 0x574   : > { %v4887_v15 = vmax.f32 %v4867_v33, 0.0 }
 0x575   : > { %v4916_v19 = vpack.c.bf16 %v4905_v57, %v4904_v17  ;;  %v4906_v4 = vmul.f32 %v4886_v49, %v7801_v53 }
 0x576   : > { %v4907_v26 = vmul.f32 %v4887_v15, %v7806_v62 }
 0x577   : > { %4926 = vst [vmem:[%s7638_s29 + $0x40] sm:$0xff] %v4916_v19 }
 0x578   : > { %v4917_v41 = vpack.c.bf16 %v4907_v26, %v4906_v4 }
 0x57a   : > { %4927 = vst.msk [vmem:[%s7638_s29 + $0x48] sm:$0xff] %vm5959_vm5, %v4917_v41 }
 0x57b PF: > { %s18_s27 = sadd.s32 1, %s5748_s27  }
 0x57c   : > { %p15_p4 = scmp.ge.s32.totalorder %s18_s27, 4  }
 0x57e   :  { %17 = sbr.rel (!%p15_p4) target bundleno = 1 (0x1), region = 98 }

// kernel: _resnet_forward.4
= control target key start
LH: loop header
LB: loop body
LE: loop exit
PB: predicated region body
PF: predicated region fallthrough
CT: control target
= control target key end

     0   :  { %s2495_s24 = smov 0   ;;  %s3048_s0 = inlined_call_operand.vmem [shape: bf16[2,144,324], index: 0, kind: input, shape index: {}]   ;;  %s3049_s1 = inlined_call_operand.vmem [shape: bf16[32,144], index: 1, kind: input, shape index: {}]   ;;  %s3050_s2 = inlined_call_operand.vmem [shape: f32[32,1], index: 2, kind: input, shape index: {}]   ;;  %s3051_s3 = inlined_call_operand.vmem [shape: bf16[9,32,32], index: 3, kind: input, shape index: {}]   ;;  %s3052_s4 = inlined_call_operand.vmem [shape: f32[32,1], index: 4, kind: input, shape index: {}]   ;;  %s3053_s5 = inlined_call_operand.vmem [shape: bf16[32,16], index: 5, kind: input, shape index: {}]   ;;  %s3054_s6 = inlined_call_operand.vmem [shape: f32[1,324], index: 6, kind: input, shape index: {}]   ;;  %s3055_s7 = inlined_call_operand.vmem [shape: bf16[2,32,324], index: 7, kind: output, shape index: {}]  }
   0x1 LB: > { %s1982_s25 = sadd.s32 4294967295, %s2444_s24   ;;  %p1986_p0 = scmp.ge.s32.totalorder %s2444_s24, 1  ;;  %s2444_s24 = sphi %s2495_s24, %s17_s24  }
   0x2   : > { %p237_p1 = scmp.lt.s32.totalorder %s2444_s24, 3 }
   0x4   : > { %p238_p2 = pnand %p1986_p0, %p237_p1 }
   0x6   : > { %241 = sbr.rel (%p238_p2) target bundleno = 720 (0x2d0), region = 48 }
   0xb   : > { %p269_p3 = scmp.lt.s32.totalorder %s1982_s25, 1  ;;  %v2376_v0 = vld [vmem:[%s3049_s1 + $0x4] sm:$0xf]  ;;  %v1993_v1 = vld [vmem:[%s3049_s1 + $0x8] sm:$0xf0]  ;;  %vm520_vm0 = vcmask 130048  }
   0xc   : > { %v2526_v15 = vor.u32 %v2376_v0, %v1993_v1  ;;  %v2378_v50 = vld [vmem:[%s3049_s1 + $0x14] sm:$0xf]  ;;  %v2001_v53 = vld [vmem:[%s3049_s1 + $0x18] sm:$0xf0]  ;;  %v334_v62 = vld [vmem:[%s3050_s2] sm:$0xff]  ;;  %v2446_v1 = vmov 0  }
   0xd   : > { %s3077_s25 = smov (!%p269_p3, %s1982_s25), 1  ;;  %v2580_v63 = vor.u32 %v2378_v50, %v2001_v53  ;;  %2436 = vset.pattern.permute.xlu1 %v2446_v1  ;;  %281 = vst [vmem:[#allocation2] sm:$0xff] %v2446_v1  ;;  %2435 = vset.pattern.permute.xlu0 %v2446_v1  ;;  %vm283_vm1 = vcmask 551936   ;;  %s2447_s10 = smov 18   ;;  %vm840_vm2 = vcmask 146432   ;;  %vm853_vm3 = vcmask 261120  }
   0xe   : > { %s2416_s26 = smul.u32 216, %s3077_s25  ;;  %282 = vst [vmem:[#allocation2 + $0x8] sm:$0xff] %v2446_v1  ;;  %340 = vperm.xlu1 %2436, %v334_v62   ;;  %2437 = vset.pattern.permute.xlu2 %v2446_v1  ;;  %s2448_s13 = smov 17   ;;  %vm943_vm4 = vcmask 154624   ;;  %vm1050_vm5 = vcmask 138240   ;;  %vm1169_vm6 = vcmask 7168  }
   0xf   : > { %285 = vst [vmem:[#allocation2 + $0x14] sm:$0xff] %v2446_v1  ;;  %s2449_s14 = smov 19   ;;  %s2450_s15 = smov 1   ;;  %vm1527_vm7 = vcmask 908288   ;;  %vm1414_vm8 = vcmask 1039360   ;;  %vm1640_vm9 = vcmask 900096  }
  0x10   : > { %s2509_s29 = scalar_lea.vmem %s3048_s0, %s2416_s26  ;;  %286 = vst [vmem:[#allocation2 + $0x1c] sm:$0xff] %v2446_v1  ;;  %s2451_s20 = smov 111   ;;  %vm1753_vm10 = vcmask 891904  }
  0x11   : > { %v2091_v2 = vld [vmem:[%s2509_s29 + $0xa8] sm:$0xf]  ;;  %v2371_v3 = vld [vmem:[%s2509_s29 + $0xb0] sm:$0xf0]  ;;  %v2103_v4 = vld [vmem:[%s2509_s29 + $0xc0] sm:$0xf] }
  0x12   : > { %v2092_v5 = vor.u32 %v2371_v3, %v2091_v2  ;;  %v2374_v6 = vld [vmem:[%s2509_s29 + $0xc8] sm:$0xf0]  ;;  %v2093_v8 = vld [vmem:[%s2509_s29 + $0xb4] sm:$0xf0]  ;;  %v2373_v11 = vld [vmem:[%s2509_s29 + $0xc4] sm:$0xf] }
  0x13   : > { %v2370_v7 = vld [vmem:[%s2509_s29 + $0xac] sm:$0xf]  ;;  %v2104_v9 = vor.u32 %v2374_v6, %v2103_v4  ;;  %v2105_v12 = vld [vmem:[%s2509_s29 + $0xcc] sm:$0xf0]  ;;  %v2368_v16 = vld [vmem:[%s2509_s29 + $0x98] sm:$0xf0] }
  0x14   : > { %v2096_v10 = vor.u32 %v2370_v7, %v2093_v8  ;;  %v2079_v13 = vld [vmem:[%s2509_s29 + $0x90] sm:$0xf]  ;;  %527 = vmatpush.bf16.msra.mxu0 %v2092_v5  ;;  %v2108_v14 = vor.u32 %v2373_v11, %v2105_v12  ;;  %v2367_v17 = vld [vmem:[%s2509_s29 + $0x94] sm:$0xf]  ;;  %v2081_v18 = vld [vmem:[%s2509_s29 + $0x9c] sm:$0xf0] }
  0x15   : > { %553 = vmatpush.bf16.msra.mxu1 %v2104_v9  ;;  %v2080_v19 = vor.u32 %v2368_v16, %v2079_v13  ;;  %v2084_v20 = vor.u32 %v2367_v17, %v2081_v18  ;;  %v2099_v21 = vld [vmem:[%s2509_s29 + $0xb0] sm:$0xf]  ;;  %v2372_v22 = vld [vmem:[%s2509_s29 + $0xb8] sm:$0xf0]  ;;  %v2067_v23 = vld [vmem:[%s2509_s29 + $0x78] sm:$0xf] }
  0x16   : > { %565 = vmatpush.bf16.msra.mxu2 %v2096_v10  ;;  %591 = vmatpush.bf16.msra.mxu3 %v2108_v14  ;;  %v2100_v24 = vor.u32 %v2372_v22, %v2099_v21  ;;  %v2365_v25 = vld [vmem:[%s2509_s29 + $0x80] sm:$0xf0]  ;;  %v2364_v26 = vld [vmem:[%s2509_s29 + $0x7c] sm:$0xf]  ;;  %v2069_v27 = vld [vmem:[%s2509_s29 + $0x84] sm:$0xf0] }
  0x17   : > { %v2087_v28 = vld [vmem:[%s2509_s29 + $0x98] sm:$0xf]  ;;  %v2369_v29 = vld [vmem:[%s2509_s29 + $0xa0] sm:$0xf0]  ;;  %v2068_v30 = vor.u32 %v2365_v25, %v2067_v23  ;;  %v2072_v31 = vor.u32 %v2364_v26, %v2069_v27  ;;  %v2055_v32 = vld [vmem:[%s2509_s29 + $0x60] sm:$0xf] }
  0x18   : > { %2113 = vmatmul.msk.bf16.vlgmr.msra.gmra.mxu1 %vm520_vm0, %v2526_v15  ;;  %528 = vmatpush.bf16.msra.mxu0 %v2080_v19  ;;  %v2362_v33 = vld [vmem:[%s2509_s29 + $0x68] sm:$0xf0]  ;;  %v2088_v34 = vor.u32 %v2369_v29, %v2087_v28  ;;  %v2361_v35 = vld [vmem:[%s2509_s29 + $0x64] sm:$0xf]  ;;  %v2057_v36 = vld [vmem:[%s2509_s29 + $0x6c] sm:$0xf0] }
  0x19   : > { %2115 = vmatmul.msk.bf16.vlgmr.msra.gmra.mxu3 %vm520_vm0, %v2526_v15  ;;  %603 = vmatpush.bf16.msrb.mxu1 %v2100_v24  ;;  %v2075_v37 = vld [vmem:[%s2509_s29 + $0x80] sm:$0xf]  ;;  %v2366_v38 = vld [vmem:[%s2509_s29 + $0x88] sm:$0xf0]  ;;  %v2549_v39 = vor.u32 %v2362_v33, %v2055_v32  ;;  %v2551_v40 = vor.u32 %v2361_v35, %v2057_v36  ;;  %v2043_v41 = vld [vmem:[%s2509_s29 + $0x48] sm:$0xf] }
  0x1a   : > { %566 = vmatpush.bf16.msra.mxu2 %v2084_v20  ;;  %v2359_v42 = vld [vmem:[%s2509_s29 + $0x50] sm:$0xf0]  ;;  %v2076_v43 = vor.u32 %v2366_v38, %v2075_v37  ;;  %v2358_v44 = vld [vmem:[%s2509_s29 + $0x4c] sm:$0xf]  ;;  %v2045_v45 = vld [vmem:[%s2509_s29 + $0x54] sm:$0xf0] }
  0x1b   : > { %v2063_v46 = vld [vmem:[%s2509_s29 + $0x68] sm:$0xf]  ;;  %v2363_v47 = vld [vmem:[%s2509_s29 + $0x70] sm:$0xf0]  ;;  %v2044_v49 = vor.u32 %v2359_v42, %v2043_v41  ;;  %v2048_v52 = vor.u32 %v2358_v44, %v2045_v45  ;;  %v2031_v54 = vld [vmem:[%s2509_s29 + $0x30] sm:$0xf] }
  0x1c   : > { %529 = vmatpush.bf16.msra.mxu0 %v2068_v30  ;;  %v2111_v48 = vld [vmem:[%s2509_s29 + $0xc8] sm:$0xf]  ;;  %v2375_v51 = vld [vmem:[%s2509_s29 + $0xd0] sm:$0xf0]  ;;  %v2356_v55 = vld [vmem:[%s2509_s29 + $0x38] sm:$0xf0]  ;;  %v2571_v57 = vor.u32 %v2363_v47, %v2063_v46 }
  0x1d   : > { %604 = vmatpush.bf16.msrb.mxu1 %v2088_v34  ;;  %v2112_v56 = vor.u32 %v2375_v51, %v2111_v48  ;;  %v2355_v58 = vld [vmem:[%s2509_s29 + $0x34] sm:$0xf]  ;;  %v2033_v59 = vld [vmem:[%s2509_s29 + $0x3c] sm:$0xf0]  ;;  %v2051_v60 = vld [vmem:[%s2509_s29 + $0x50] sm:$0xf]  ;;  %v2032_v0 = vor.u32 %v2356_v55, %v2031_v54 }
  0x1e   : > { %567 = vmatpush.bf16.msra.mxu2 %v2072_v31  ;;  %v2360_v61 = vld [vmem:[%s2509_s29 + $0x58] sm:$0xf0]  ;;  %v2036_v2 = vor.u32 %v2355_v58, %v2033_v59  ;;  %v2019_v3 = vld [vmem:[%s2509_s29 + $0x18] sm:$0xf]  ;;  %v2353_v4 = vld [vmem:[%s2509_s29 + $0x20] sm:$0xf0] }
  0x1f   : > { %629 = vmatpush.bf16.msrb.mxu3 %v2112_v56  ;;  %v2052_v5 = vor.u32 %v2360_v61, %v2051_v60  ;;  %v2352_v6 = vld [vmem:[%s2509_s29 + $0x1c] sm:$0xf]  ;;  %v2021_v7 = vld [vmem:[%s2509_s29 + $0x24] sm:$0xf0]  ;;  %v2039_v8 = vld [vmem:[%s2509_s29 + $0x38] sm:$0xf]  ;;  %v2020_v10 = vor.u32 %v2353_v4, %v2019_v3 }
  0x20   : > { %530 = vmatpush.bf16.msra.mxu0 %v2549_v39  ;;  %v2357_v9 = vld [vmem:[%s2509_s29 + $0x40] sm:$0xf0]  ;;  %288 = vst [vmem:[#allocation2 + $0x28] sm:$0xff] %v2446_v1  ;;  %v2024_v11 = vor.u32 %v2352_v6, %v2021_v7  ;;  %v2007_v12 = vld [vmem:[%s2509_s29] sm:$0xf]  ;;  %v336_v14 = vld [vmem:[%s3050_s2 + $0x10] sm:$0xff] }
  0x21   : > { %605 = vmatpush.bf16.msrb.mxu1 %v2076_v43  ;;  %v2350_v13 = vld [vmem:[%s2509_s29 + $0x8] sm:$0xf0]  ;;  %289 = vst [vmem:[#allocation2 + $0x30] sm:$0xff] %v2446_v1  ;;  %v2040_v16 = vor.u32 %v2357_v9, %v2039_v8  ;;  %v2349_v17 = vld [vmem:[%s2509_s29 + $0x4] sm:$0xf]  ;;  %350 = vperm.xlu0 %2435, %v336_v14   ;;  %v337_v30 = vld [vmem:[%s3050_s2 + $0x18] sm:$0xff] }
  0x22   : > { %568 = vmatpush.bf16.msra.mxu2 %v2551_v40  ;;  %v2009_v18 = vld [vmem:[%s2509_s29 + $0xc] sm:$0xf0]  ;;  %291 = vst [vmem:[#allocation2 + $0x3c] sm:$0xff] %v2446_v1  ;;  %v335_v19 = vld [vmem:[%s3050_s2 + $0x8] sm:$0xff]  ;;  %v2027_v20 = vld [vmem:[%s2509_s29 + $0x20] sm:$0xf]  ;;  %v2008_v22 = vor.u32 %v2350_v13, %v2007_v12 }
  0x23   : > { %2415 = vmatpush.bf16.msra.mxu3 %v2551_v40  ;;  %v2354_v21 = vld [vmem:[%s2509_s29 + $0x28] sm:$0xf0]  ;;  %292 = vst [vmem:[#allocation2 + $0x44] sm:$0xff] %v2446_v1  ;;  %v1991_v23 = vld [vmem:[%s3049_s1] sm:$0xf]  ;;  %v2012_v25 = vor.u32 %v2349_v17, %v2009_v18  ;;  %345 = vperm.xlu1 %2436, %v335_v19   ;;  %s2452_s21 = smov 127  }
  0x24   : > { %531 = vmatpush.bf16.msra.mxu0 %v2044_v49  ;;  %v2377_v24 = vld [vmem:[%s3049_s1 + $0x4] sm:$0xf0]  ;;  %v2028_v26 = vor.u32 %v2354_v21, %v2027_v20  ;;  %v2351_v29 = vld [vmem:[%s2509_s29 + $0x10] sm:$0xf0]  ;;  %v1999_v32 = vld [vmem:[%s3049_s1 + $0x10] sm:$0xf] }
  0x25   : > { %606 = vmatpush.bf16.msrb.mxu1 %v2571_v57  ;;  %v1992_v27 = vor.u32 %v2377_v24, %v1991_v23  ;;  %v2015_v28 = vld [vmem:[%s2509_s29 + $0x8] sm:$0xf]  ;;  %v2379_v33 = vld [vmem:[%s3049_s1 + $0x14] sm:$0xf0]  ;;  %v280_v48 = vld [vmem:[%s3054_s6] sm:$0x7] }
  0x26   : > { %569 = vmatpush.bf16.msra.mxu2 %v2048_v52  ;;  %v2016_v31 = vor.u32 %v2351_v29, %v2015_v28  ;;  %v2000_v34 = vor.u32 %v2379_v33, %v1999_v32  ;;  %v2644_v55 = vperm.slane %v280_v48, 0  ;;  %v2646_v59 = vperm.slane %v280_v48, 1  ;;  %v2147_v61 = vld [vmem:[#allocation2] sm:$0xf]  ;;  %v2384_v62 = vld [vmem:[#allocation2 + $0x10] sm:$0xf0] }
  0x27   : > { %v2163_v44 = vld [vmem:[#allocation2 + $0x28] sm:$0xf]  ;;  %v2650_v3 = vperm.slane %v280_v48, 2  ;;  %s2453_s22 = smov 110   ;;  %s2454_s27 = smov 109  }
  0x28   : > { %2114 = vmatmul.msk.bf16.gmra.mxu1 %vm520_vm0, %v2580_v63  ;;  %532 = vmatpush.bf16.msra.mxu0 %v2032_v0  ;;  %s2417_s28 = smul.u32 48, %s3077_s25 }
  0x29   : > { %2116 = vmatmul.msk.bf16.gmra.mxu3 %vm520_vm0, %v2580_v63  ;;  %607 = vmatpush.bf16.msrb.mxu1 %v2052_v5  ;;  %v2388_v45 = vld [vmem:[#allocation2 + $0x38] sm:$0xf0] }
  0x2a   : > { %570 = vmatpush.bf16.msra.mxu2 %v2036_v2  ;;  %355 = vperm.xlu0 %2435, %v337_v30   ;;  %v2635_v46 = vor.u32 %v2388_v45, %v2163_v44  ;;  %s2997_s30 = scalar_lea.vmem %s3055_s7, %s2417_s28 }
  0x2c   : > { %533 = vmatpush.bf16.msra.mxu0 %v2020_v10  ;;  %832 = vrot.lane.b32.xlu2 %v2635_v46, %s2447_s10 }
  0x2d   : > { %608 = vmatpush.bf16.msrb.mxu1 %v2040_v16 }
  0x2e   : > { %571 = vmatpush.bf16.msra.mxu2 %v2024_v11 }
  0x30   : > { %534 = vmatpush.bf16.msra.mxu0 %v2008_v22 }
  0x31   : > { %609 = vmatpush.bf16.msrb.mxu1 %v2028_v26 }
  0x32   : > { %572 = vmatpush.bf16.msra.mxu2 %v2012_v25 }
  0x33   : > { %535 = vmatmul.bf16.vlgmr.msra.gmra.mxu0 %v1992_v27 }
  0x34   : > { %699 = vmatpush.bf16.msrb.mxu0 %v2549_v39 }
  0x35   : > { %573 = vmatmul.bf16.vlgmr.msra.gmra.mxu2 %v1992_v27  ;;  %610 = vmatpush.bf16.msrb.mxu1 %v2016_v31 }
  0x36   : > { %718 = vmatpush.bf16.msrb.mxu2 %v2551_v40 }
  0x38   : > { %611 = vmatmul.bf16.vlgmr.msrb.gmra.mxu1 %v1992_v27 }
  0x39   : > { %2414 = vmatpush.bf16.msra.mxu1 %v2549_v39  ;;  %2117 = vmatmul.msk.bf16.vlgmr.msrb.gmra.mxu3 %vm520_vm0, %v2526_v15 }
  0x3d   : > { %737 = vmatpush.bf16.msrb.mxu1 %v2571_v57 }
  0x43   : > { %540 = vmatmul.bf16.gmra.mxu0 %v2000_v34 }
  0x45   : > { %578 = vmatmul.bf16.gmra.mxu2 %v2000_v34 }
  0x48   : > { %616 = vmatmul.bf16.gmra.mxu1 %v2000_v34 }
  0x49   : > { %2118 = vmatmul.msk.bf16.gmra.mxu3 %vm520_vm0, %v2580_v63  ;;  %v2648_v63 = vor.u32 %v2384_v62, %v2147_v61 }
  0x4b   : > { %824 = vrot.lane.b32.xlu2 %v2648_v63, %s2447_s10 }
  0x80   : > { %v341_v41 = vpop.permute.xlu1 %340 }
  0x93   : > { %v351_v4 = vpop.permute.xlu0 %350 }
  0x95   : > { %v555_v35 = vpop.f32.mrf.mxu1  ;;  %v346_v52 = vpop.permute.xlu1 %345 }
  0x9c   : > { %v593_v36 = vpop.f32.mrf.mxu3  ;;  %v356_v29 = vpop.permute.xlu0 %355 }
  0x9d   : > { %v557_v15 = vpop.f32.mrf.mxu1 }
  0xa4   : > { %v595_v37 = vpop.f32.mrf.mxu3 }
  0xa5   : > { %v560_v38 = vpop.f32.mrf.mxu1 }
  0xac   : > { %v2631_v39 = vpop.f32.mrf.mxu3 }
  0xad   : > { %v2633_v40 = vpop.f32.mrf.mxu1 }
  0xb0   : > { %v536_v42 = vpop.f32.mrf.mxu0 }
  0xb1   : > { %v537_v43 = vadd.f32 %v536_v42, %v341_v41 }
  0xb3   : > { %v556_v49 = vadd.f32 %v555_v35, %v537_v43 }
  0xb4   : > { %v2637_v47 = vpop.f32.mrf.mxu3 }
  0xb5   : > { %v612_v50 = vpop.f32.mrf.mxu1  ;;  %v641_v57 = vmax.f32 %v556_v49, 0.0 }
  0xb6   : > { %v613_v56 = vadd.f32 %v612_v50, %v341_v41 }
  0xb7   : > { %v660_v5 = vmul.f32 %v2644_v55, %v641_v57 }
  0xb8   : > { %v574_v51 = vpop.f32.mrf.mxu2  ;;  %v538_v54 = vpop.f32.mrf.mxu0 }
  0xb9   : > { %v575_v53 = vadd.f32 %v574_v51, %v341_v41  ;;  %v539_v60 = vadd.f32 %v538_v54, %v346_v52 }
  0xbb   : > { %v594_v58 = vadd.f32 %v593_v36, %v575_v53  ;;  %v558_v7 = vadd.f32 %v557_v15, %v539_v60 }
  0xbc   : > { %v631_v1 = vpop.f32.mrf.mxu3 }
  0xbd   : > { %v642_v0 = vmax.f32 %v594_v58, 0.0  ;;  %v632_v2 = vadd.f32 %v631_v1, %v613_v56  ;;  %v614_v8 = vpop.f32.mrf.mxu1  ;;  %v644_v16 = vmax.f32 %v558_v7, 0.0 }
  0xbe   : > { %v615_v20 = vadd.f32 %v614_v8, %v346_v52 }
  0xbf   : > { %v661_v6 = vmul.f32 %v2646_v59, %v642_v0  ;;  %v643_v9 = vmax.f32 %v632_v2, 0.0  ;;  %v663_v24 = vmul.f32 %v2644_v55, %v644_v16 }
  0xc0   : > { %v576_v10 = vpop.f32.mrf.mxu2  ;;  %v541_v13 = vpop.f32.mrf.mxu0 }
  0xc1   : > { %v749_v11 = vpack.c.bf16 %v661_v6, %v660_v5  ;;  %v577_v12 = vadd.f32 %v576_v10, %v346_v52  ;;  %v662_v14 = vmul.f32 %v2650_v3, %v643_v9  ;;  %v542_v18 = vadd.f32 %v541_v13, %v351_v4 }
  0xc3   : > { %757 = vst [vmem:[#allocation2 + $0x4] sm:$0xff] %v749_v11  ;;  %v596_v17 = vadd.f32 %v595_v37, %v577_v12  ;;  %v750_v19 = vpack.c.bf16 %v662_v14, %v662_v14  ;;  %v561_v26 = vadd.f32 %v560_v38, %v542_v18 }
  0xc4   : > { %v633_v22 = vpop.f32.mrf.mxu3 }
  0xc5   : > { %v645_v21 = vmax.f32 %v596_v17, 0.0  ;;  %758 = vst.msk [vmem:[#allocation2 + $0xc] sm:$0xf] %vm283_vm1, %v750_v19  ;;  %v634_v23 = vadd.f32 %v633_v22, %v615_v20  ;;  %v617_v27 = vpop.f32.mrf.mxu1  ;;  %v647_v36 = vmax.f32 %v561_v26, 0.0  ;;  %v2380_v26 = vld [vmem:[%s3053_s5] sm:$0xff] }
  0xc6   : > { %v618_v35 = vadd.f32 %v617_v27, %v351_v4  ;;  %2129 = vmatmul.msk.bf16.vlgmr.msrb.gmra.mxu2 %vm520_vm0, %v2380_v26  ;;  %2127 = vmatmul.msk.bf16.vlgmr.msrb.gmra.mxu0 %vm520_vm0, %v2380_v26 }
  0xc7   : > { %v664_v25 = vmul.f32 %v2646_v59, %v645_v21  ;;  %v646_v28 = vmax.f32 %v634_v23, 0.0  ;;  %v666_v44 = vmul.f32 %v2644_v55, %v647_v36 }
  0xc8   : > { %v579_v30 = vpop.f32.mrf.mxu2  ;;  %v543_v33 = vpop.f32.mrf.mxu0 }
  0xc9   : > { %v751_v31 = vpack.c.bf16 %v664_v25, %v663_v24  ;;  %v580_v32 = vadd.f32 %v579_v30, %v351_v4  ;;  %v665_v34 = vmul.f32 %v2650_v3, %v646_v28  ;;  %v544_v37 = vadd.f32 %v543_v33, %v356_v29  ;;  %v833_v24 = vpop.permute.xlu2 %832  ;;  %v2381_v25 = vld [vmem:[%s3053_s5 + $0x8] sm:$0xff] }
  0xca   : > { %v2382_v18 = vld [vmem:[#allocation2 + $0x4] sm:$0xf]  ;;  %v2155_v22 = vld [vmem:[#allocation2 + $0x8] sm:$0xf]  ;;  %2130 = vmatmul.msk.bf16.vlgmr.msra.gmra.mxu3 %vm520_vm0, %v2381_v25  ;;  %2128 = vmatmul.msk.bf16.vlgmr.msra.gmra.mxu1 %vm520_vm0, %v2381_v25 }
  0xcb   : > { %759 = vst [vmem:[#allocation2 + $0x18] sm:$0xff] %v751_v31  ;;  %v599_v15 = vadd.f32 %v2631_v39, %v580_v32  ;;  %v752_v41 = vpack.c.bf16 %v665_v34, %v665_v34  ;;  %v563_v48 = vadd.f32 %v2633_v40, %v544_v37  ;;  %v2398_v33 = vld [vmem:[#allocation2 + $0x8] sm:$0xf] }
  0xcc   : > { %v636_v43 = vpop.f32.mrf.mxu3  ;;  %v2383_v17 = vld [vmem:[#allocation2 + $0xc] sm:$0xf] }
  0xcd   : > { %v648_v42 = vmax.f32 %v599_v15, 0.0  ;;  %760 = vst.msk [vmem:[#allocation2 + $0x20] sm:$0xf] %vm283_vm1, %v752_v41  ;;  %v637_v38 = vadd.f32 %v636_v43, %v618_v35  ;;  %v619_v52 = vpop.f32.mrf.mxu1  ;;  %v650_v54 = vmax.f32 %v563_v48, 0.0  ;;  %v2255_v36 = vld [vmem:[#allocation2 + $0xc] sm:$0xf] }
  0xce   : > { %v620_v58 = vadd.f32 %v619_v52, %v356_v29 }
  0xcf   : > { %v667_v45 = vmul.f32 %v2646_v59, %v648_v42  ;;  %v649_v49 = vmax.f32 %v637_v38, 0.0  ;;  %v669_v40 = vmul.f32 %v2644_v55, %v650_v54 }
  0xd0   : > { %v581_v50 = vpop.f32.mrf.mxu2 }
  0xd1   : > { %v753_v51 = vpack.c.bf16 %v667_v45, %v666_v44  ;;  %v582_v53 = vadd.f32 %v581_v50, %v356_v29  ;;  %v668_v39 = vmul.f32 %v2650_v3, %v649_v49  ;;  %v825_v32 = vpop.permute.xlu2 %824  ;;  %v2247_v45 = vld [vmem:[#allocation2 + $0x4] sm:$0xf] }
  0xd2   : > { %v2149_v16 = vld [vmem:[#allocation2 + $0x14] sm:$0xf0]  ;;  %v2385_v21 = vld [vmem:[#allocation2 + $0x18] sm:$0xf0] }
  0xd3   : > { %761 = vst [vmem:[#allocation2 + $0x2c] sm:$0xff] %v753_v51  ;;  %v601_v56 = vadd.f32 %v2637_v47, %v582_v53  ;;  %v754_v57 = vpack.c.bf16 %v668_v39, %v668_v39  ;;  %v2152_v20 = vor.u32 %v2382_v18, %v2149_v16  ;;  %v2156_v23 = vor.u32 %v2385_v21, %v2155_v22  ;;  %v2249_v31 = vld [vmem:[#allocation2 + $0x18] sm:$0xf0]  ;;  %v2399_v44 = vld [vmem:[#allocation2 + $0x14] sm:$0xf0]  ;;  %v2390_v21 = vld [vmem:[%s3051_s3] sm:$0xff] }
  0xd4   : > { %v638_v61 = vpop.f32.mrf.mxu3  ;;  %v2157_v14 = vld [vmem:[#allocation2 + $0x1c] sm:$0xf0]  ;;  %v2702_v34 = vor.u32 %v2398_v33, %v2249_v31  ;;  %v2718_v48 = vor.u32 %v2399_v44, %v2247_v45  ;;  %v1854_v18 = vld [vmem:[%s3052_s4 + $0x18] sm:$0xff] }
  0xd5   : > { %v651_v60 = vmax.f32 %v601_v56, 0.0  ;;  %762 = vst.msk [vmem:[#allocation2 + $0x34] sm:$0xf] %vm283_vm1, %v754_v57  ;;  %v639_v62 = vadd.f32 %v638_v61, %v620_v58  ;;  %v2160_v19 = vor.u32 %v2383_v17, %v2157_v14  ;;  %v2400_v35 = vld [vmem:[#allocation2 + $0x1c] sm:$0xf0] }
  0xd6   : > { %v2705_v15 = vor.u32 %v2400_v35, %v2255_v36  ;;  %v2391_v35 = vld [vmem:[%s3051_s3 + $0x8] sm:$0xff] }
  0xd7   : > { %v670_v0 = vmul.f32 %v2646_v59, %v651_v60  ;;  %v652_v1 = vmax.f32 %v639_v62, 0.0  ;;  %v2392_v60 = vld [vmem:[%s3051_s3 + $0x10] sm:$0xff] }
  0xd9   : > { %v755_v2 = vpack.c.bf16 %v670_v0, %v669_v40  ;;  %v671_v4 = vmul.f32 %v2650_v3, %v652_v1 }
  0xda   : > { %v2171_v47 = vld [vmem:[#allocation2 + $0x30] sm:$0xf]  ;;  %v2386_v7 = vld [vmem:[#allocation2 + $0x2c] sm:$0xf]  ;;  %2131 = vmatmul.msk.bf16.vlgmr.msrb.gmra.mxu1 %vm520_vm0, %v2380_v26 }
  0xdb   : > { %763 = vst [vmem:[#allocation2 + $0x40] sm:$0xff] %v755_v2  ;;  %v756_v5 = vpack.c.bf16 %v671_v4, %v671_v4  ;;  %v2401_v28 = vld [vmem:[#allocation2 + $0x30] sm:$0xf] }
  0xdc   : > { %v2387_v11 = vld [vmem:[#allocation2 + $0x34] sm:$0xf] }
  0xdd   : > { %764 = vst.msk [vmem:[#allocation2 + $0x48] sm:$0xf] %vm283_vm1, %v756_v5  ;;  %v2267_v41 = vld [vmem:[#allocation2 + $0x34] sm:$0xf] }
  0xe2   : > { %v2389_v6 = vld [vmem:[#allocation2 + $0x40] sm:$0xf0]  ;;  %v2165_v8 = vld [vmem:[#allocation2 + $0x3c] sm:$0xf0] }
  0xe3   : > { %v2172_v9 = vor.u32 %v2389_v6, %v2171_v47  ;;  %v2168_v10 = vor.u32 %v2386_v7, %v2165_v8  ;;  %v2261_v27 = vld [vmem:[#allocation2 + $0x40] sm:$0xf0]  ;;  %v2393_v7 = vld [vmem:[%s3051_s3 + $0x18] sm:$0xff] }
  0xe4   : > { %v2173_v12 = vld [vmem:[#allocation2 + $0x44] sm:$0xf0]  ;;  %v2697_v30 = vor.u32 %v2401_v28, %v2261_v27 }
  0xe5   : > { %836 = vrot.lane.b32.xlu0 %v2172_v9, %s2447_s10  ;;  %834 = vrot.lane.b32.xlu2 %v2168_v10, %s2447_s10  ;;  %v2176_v13 = vor.u32 %v2387_v11, %v2173_v12  ;;  %v2403_v37 = vld [vmem:[#allocation2 + $0x44] sm:$0xf0] }
  0xe6   : > { %v2710_v42 = vor.u32 %v2403_v37, %v2267_v41  ;;  %v1852_v11 = vld [vmem:[%s3052_s4 + $0x8] sm:$0xff] }
  0xe7   : > { %838 = vrot.lane.b32.xlu1 %v2176_v13, %s2447_s10  ;;  %v2395_v41 = vld [vmem:[%s3051_s3 + $0x28] sm:$0xff] }
  0xea   : > { %2132 = vmatmul.msk.bf16.gmra.mxu1 %vm520_vm0, %v2381_v25  ;;  %v2394_v25 = vld [vmem:[%s3051_s3 + $0x20] sm:$0xff] }
  0xed   : > { %830 = vrot.lane.b32.xlu2 %v2160_v19, %s2447_s10  ;;  %826 = vrot.lane.b32.xlu0 %v2152_v20, %s2447_s10 }
  0xef   : > { %828 = vrot.lane.b32.xlu1 %v2156_v23, %s2447_s10 }
  0xf5   : > { %1042 = vrot.lane.b32.xlu2 %v2635_v46, %s2448_s13  ;;  %937 = vrot.lane.b32.xlu0 %v2168_v10, %s2449_s14 }
  0xf7   : > { %939 = vrot.lane.b32.xlu1 %v2172_v9, %s2449_s14 }
  0xfd   : > { %931 = vrot.lane.b32.xlu2 %v2156_v23, %s2449_s14  ;;  %1044 = vrot.lane.b32.xlu0 %v2168_v10, %s2448_s13 }
  0xff   : > { %929 = vrot.lane.b32.xlu1 %v2152_v20, %s2449_s14 }
 0x105   : > { %1036 = vrot.lane.b32.xlu2 %v2152_v20, %s2448_s13  ;;  %935 = vrot.lane.b32.xlu0 %v2635_v46, %s2449_s14 }
 0x107   : > { %1034 = vrot.lane.b32.xlu1 %v2648_v63, %s2448_s13 }
 0x10d   : > { %933 = vrot.lane.b32.xlu2 %v2160_v19, %s2449_s14  ;;  %941 = vrot.lane.b32.xlu0 %v2176_v13, %s2449_s14 }
 0x10f   : > { %927 = vrot.lane.b32.xlu1 %v2648_v63, %s2449_s14 }
 0x115   : > { %1163 = vrot.lane.b32.xlu2 %v2168_v10, %s2450_s15  ;;  %1046 = vrot.lane.b32.xlu0 %v2172_v9, %s2448_s13  ;;  %v1851_v10 = vld [vmem:[%s3052_s4] sm:$0xff] }
 0x117   : > { %1038 = vrot.lane.b32.xlu1 %v2156_v23, %s2448_s13 }
 0x11d   : > { %1040 = vrot.lane.b32.xlu2 %v2160_v19, %s2448_s13  ;;  %1165 = vrot.lane.b32.xlu0 %v2172_v9, %s2450_s15 }
 0x11f   : > { %1048 = vrot.lane.b32.xlu1 %v2176_v13, %s2448_s13 }
 0x125   : > { %1161 = vrot.lane.b32.xlu2 %v2635_v46, %s2450_s15  ;;  %1155 = vrot.lane.b32.xlu0 %v2152_v20, %s2450_s15  ;;  %v2402_v46 = vld [vmem:[#allocation2 + $0x3c] sm:$0xf0] }
 0x127   : > { %1157 = vrot.lane.b32.xlu1 %v2156_v23, %s2450_s15 }
 0x12d   : > { %1159 = vrot.lane.b32.xlu2 %v2160_v19, %s2450_s15  ;;  %1153 = vrot.lane.b32.xlu0 %v2648_v63, %s2450_s15  ;;  %v2259_v63 = vld [vmem:[#allocation2 + $0x2c] sm:$0xf] }
 0x12e   : > { %v2695_v29 = vor.u32 %v2402_v46, %v2259_v63 }
 0x12f   : > { %1167 = vrot.lane.b32.xlu1 %v2176_v13, %s2450_s15 }
 0x135   : > { %1521 = vrot.lane.b32.xlu2 %v2695_v29, %s2451_s20  ;;  %1410 = vrot.lane.b32.xlu0 %v2697_v30, %s2452_s21 }
 0x137   : > { %1404 = vrot.lane.b32.xlu1 %v2702_v34, %s2452_s21 }
 0x13d   : > { %1406 = vrot.lane.b32.xlu2 %v2705_v15, %s2452_s21  ;;  %1523 = vrot.lane.b32.xlu0 %v2697_v30, %s2451_s20 }
 0x13f   : > { %v835_v43 = vpop.permute.xlu2 %834  ;;  %1412 = vrot.lane.b32.xlu1 %v2710_v42, %s2452_s21 }
 0x140   : > { %v844_v38 = vsel %vm840_vm2, %v833_v24, %v835_v43 }
 0x141   : > { %866 = vmatpush.bf16.msrb.mxu3 %v844_v38 }
 0x145   : > { %1517 = vrot.lane.b32.xlu2 %v2702_v34, %s2451_s20  ;;  %1408 = vrot.lane.b32.xlu0 %v2695_v29, %s2452_s21 }
 0x147   : > { %v831_v49 = vpop.permute.xlu2 %830  ;;  %1515 = vrot.lane.b32.xlu1 %v2718_v48, %s2451_s20 }
 0x14d   : > { %1638 = vrot.lane.b32.xlu2 %v2710_v42, %s2453_s22  ;;  %1402 = vrot.lane.b32.xlu0 %v2718_v48, %s2452_s21 }
 0x14f   : > { %v1043_v50 = vpop.permute.xlu2 %1042  ;;  %1636 = vrot.lane.b32.xlu1 %v2697_v30, %s2453_s22 }
 0x155   : > { %1632 = vrot.lane.b32.xlu2 %v2705_v15, %s2453_s22  ;;  %1525 = vrot.lane.b32.xlu0 %v2710_v42, %s2451_s20 }
 0x157   : > { %v837_v51 = vpop.permute.xlu0 %836  ;;  %v2729_v52 = vpop.permute.xlu2 %931  ;;  %1630 = vrot.lane.b32.xlu1 %v2702_v34, %s2453_s22 }
 0x158   : > { %v845_v53 = vsel %vm840_vm2, %v835_v43, %v837_v51 }
 0x159   : > { %885 = vmatpush.bf16.msra.mxu0 %v845_v53  ;;  %v839_v39 = vpop.permute.xlu1 %838 }
 0x15a   : > { %v846_v54 = vsel %vm840_vm2, %v837_v51, %v839_v39  ;;  %v2396_v39 = vld [vmem:[%s3051_s3 + $0x30] sm:$0xff] }
 0x15b   : > { %904 = vmatpush.bf16.msra.mxu2 %v846_v54 }
 0x15d   : > { %1628 = vrot.lane.b32.xlu2 %v2718_v48, %s2453_s22  ;;  %1519 = vrot.lane.b32.xlu0 %v2705_v15, %s2451_s20 }
 0x15f   : > { %v2737_v56 = vpop.permute.xlu2 %1036  ;;  %v827_v57 = vpop.permute.xlu0 %826  ;;  %1634 = vrot.lane.b32.xlu1 %v2695_v29, %s2453_s22 }
 0x160   : > { %v841_v58 = vsel %vm840_vm2, %v825_v32, %v827_v57 }
 0x161   : > { %867 = vmatpush.bf16.msrb.mxu3 %v841_v58  ;;  %v829_v61 = vpop.permute.xlu1 %828  ;;  %v2397_v58 = vld [vmem:[%s3051_s3 + $0x38] sm:$0xff] }
 0x162   : > { %v842_v62 = vsel %vm840_vm2, %v827_v57, %v829_v61  ;;  %v843_v40 = vsel %vm840_vm2, %v829_v61, %v831_v49 }
 0x163   : > { %886 = vmatpush.bf16.msra.mxu0 %v842_v62  ;;  %905 = vmatpush.bf16.msra.mxu2 %v843_v40 }
 0x164   : > { %2177 = vmatmul.msk.bf16.vlgmr.msrb.gmra.mxu3 %vm853_vm3, %v2392_v60 }
 0x165   : > { %1751 = vrot.lane.b32.xlu2 %v2710_v42, %s2454_s27  ;;  %1747 = vrot.lane.b32.xlu0 %v2695_v29, %s2454_s27 }
 0x166   : > { %2181 = vmatmul.msk.bf16.vlgmr.msra.gmra.mxu2 %vm853_vm3, %v2392_v60  ;;  %2179 = vmatmul.msk.bf16.vlgmr.msra.gmra.mxu0 %vm853_vm3, %v2392_v60 }
 0x167   : > { %v934_v0 = vpop.permute.xlu2 %933  ;;  %v938_v1 = vpop.permute.xlu0 %937  ;;  %1749 = vrot.lane.b32.xlu1 %v2697_v30, %s2454_s27 }
 0x168   : > { %v946_v26 = vsel %vm943_vm4, %v2729_v52, %v934_v0 }
 0x169   : > { %v940_v2 = vpop.permute.xlu1 %939 }
 0x16a   : > { %v948_v4 = vsel %vm943_vm4, %v938_v1, %v940_v2 }
 0x16b   : > { %987 = vmatpush.bf16.msra.mxu3 %v948_v4 }
 0x16d   : > { %1745 = vrot.lane.b32.xlu2 %v2705_v15, %s2454_s27  ;;  %1741 = vrot.lane.b32.xlu0 %v2718_v48, %s2454_s27 }
 0x16f   : > { %v1164_v5 = vpop.permute.xlu2 %1163  ;;  %v1045_v47 = vpop.permute.xlu0 %1044  ;;  %1743 = vrot.lane.b32.xlu1 %v2702_v34, %s2454_s27 }
 0x170   : > { %v1054_v6 = vsel %vm1050_vm5, %v1043_v50, %v1045_v47 }
 0x171   : > { %1075 = vmatpush.bf16.msrb.mxu2 %v1054_v6  ;;  %v930_v8 = vpop.permute.xlu1 %929 }
 0x172   : > { %v945_v9 = vsel %vm943_vm4, %v930_v8, %v2729_v52 }
 0x173   : > { %988 = vmatpush.bf16.msra.mxu3 %v945_v9 }
 0x174   : > { %2178 = vmatmul.msk.bf16.gmra.mxu3 %vm853_vm3, %v2393_v7 }
 0x175   : > { %1857 = vperm.xlu0 %2435, %v1851_v10   ;;  %v2847_v10 = vpop.f32.mrf.mxu1 }
 0x176   : > { %2182 = vmatmul.msk.bf16.gmra.mxu2 %vm853_vm3, %v2393_v7  ;;  %2180 = vmatmul.msk.bf16.gmra.mxu0 %vm853_vm3, %v2393_v7  ;;  %3056 = vst [vmem:[#allocation3_spill] sm:$0xff] %v2847_v10 }
 0x177   : > { %v936_v12 = vpop.permute.xlu0 %935  ;;  %v1041_v13 = vpop.permute.xlu2 %1040  ;;  %1862 = vperm.xlu1 %2436, %v1852_v11  }
 0x178   : > { %v947_v14 = vsel %vm943_vm4, %v936_v12, %v938_v1 }
 0x179   : > { %968 = vmatpush.bf16.msra.mxu1 %v947_v14  ;;  %v1035_v16 = vpop.permute.xlu1 %1034 }
 0x17a   : > { %v1051_v17 = vsel %vm1050_vm5, %v1035_v16, %v2737_v56 }
 0x17b   : > { %1076 = vmatpush.bf16.msrb.mxu2 %v1051_v17  ;;  %v2405_v17 = vld [vmem:[%s3051_s3 + $0x48] sm:$0xff] }
 0x17d   : > { %1872 = vperm.xlu0 %2435, %v1854_v18  }
 0x17f   : > { %v942_v19 = vpop.permute.xlu0 %941  ;;  %v1162_v22 = vpop.permute.xlu2 %1161 }
 0x180   : > { %v949_v20 = vsel %vm943_vm4, %v940_v2, %v942_v19  ;;  %v1173_v46 = vsel %vm1169_vm6, %v1162_v22, %v1164_v5  ;;  %v2854_v19 = vpop.f32.mrf.mxu0 }
 0x181   : > { %1006 = vmatpush.bf16.msrb.mxu0 %v949_v20  ;;  %v928_v23 = vpop.permute.xlu1 %927 }
 0x182   : > { %v944_v24 = vsel %vm943_vm4, %v928_v23, %v930_v8  ;;  %v2860_v23 = vpop.f32.mrf.mxu3 }
 0x183   : > { %969 = vmatpush.bf16.msra.mxu1 %v944_v24 }
 0x184   : > { %2193 = vmatmul.msk.bf16.vlgmr.msra.gmra.mxu3 %vm853_vm3, %v2390_v21 }
 0x185   : > { %1007 = vmatpush.bf16.msrb.mxu0 %v946_v26 }
 0x186   : > { %2191 = vmatmul.msk.bf16.vlgmr.msra.gmra.mxu1 %vm853_vm3, %v2390_v21  ;;  %2209 = vmatmul.msk.bf16.vlgmr.msrb.gmra.mxu2 %vm853_vm3, %v2394_v25 }
 0x187   : > { %v1047_v27 = vpop.permute.xlu0 %1046  ;;  %v1160_v44 = vpop.permute.xlu2 %1159 }
 0x188   : > { %v1055_v63 = vsel %vm1050_vm5, %v1045_v47, %v1047_v27  ;;  %2195 = vmatmul.msk.bf16.vlgmr.msrb.gmra.mxu0 %vm853_vm3, %v2390_v21  ;;  %v2404_v47 = vld [vmem:[%s3051_s3 + $0x40] sm:$0xff]  ;;  %v2857_v21 = vpop.f32.mrf.mxu1 }
 0x189   : > { %1194 = vmatpush.bf16.msra.mxu0 %v1173_v46  ;;  %1094 = vmatpush.bf16.msrb.mxu1 %v1055_v63  ;;  %v1039_v28 = vpop.permute.xlu1 %1038  ;;  %3057 = vst [vmem:[#allocation4_spill] sm:$0xff] %v2857_v21  ;;  %v2868_v46 = vpop.f32.mrf.mxu0 }
 0x18a   : > { %v1052_v31 = vsel %vm1050_vm5, %v2737_v56, %v1039_v28  ;;  %v1053_v43 = vsel %vm1050_vm5, %v1039_v28, %v1041_v13  ;;  %v2872_v28 = vpop.f32.mrf.mxu3 }
 0x18b   : > { %3058 = vst [vmem:[#allocation5_spill] sm:$0xff] %v2872_v28 }
 0x18d   : > { %1095 = vmatpush.bf16.msrb.mxu1 %v1052_v31 }
 0x18f   : > { %v1166_v32 = vpop.permute.xlu0 %1165  ;;  %v1522_v52 = vpop.permute.xlu2 %1521 }
 0x190   : > { %v1174_v33 = vsel %vm1169_vm6, %v1164_v5, %v1166_v32 }
 0x191   : > { %1213 = vmatpush.bf16.msra.mxu2 %v1174_v33  ;;  %v1049_v36 = vpop.permute.xlu1 %1048 }
 0x192   : > { %v1056_v37 = vsel %vm1050_vm5, %v1047_v27, %v1049_v36  ;;  %v2870_v27 = vpop.f32.mrf.mxu1 }
 0x193   : > { %1113 = vmatpush.bf16.msrb.mxu3 %v1056_v37 }
 0x194   : > { %2194 = vmatmul.msk.bf16.gmra.mxu3 %vm853_vm3, %v2391_v35 }
 0x196   : > { %2192 = vmatmul.msk.bf16.gmra.mxu1 %vm853_vm3, %v2391_v35  ;;  %2210 = vmatmul.msk.bf16.gmra.mxu2 %vm853_vm3, %v2395_v41 }
 0x197   : > { %v1156_v38 = vpop.permute.xlu0 %1155  ;;  %1114 = vmatpush.bf16.msrb.mxu3 %v1053_v43 }
 0x198   : > { %2196 = vmatmul.msk.bf16.gmra.mxu0 %vm853_vm3, %v2391_v35  ;;  %v2408_v35 = vld [vmem:[%s3051_s3 + $0x60] sm:$0xff] }
 0x199   : > { %v1158_v45 = vpop.permute.xlu1 %1157 }
 0x19a   : > { %v1171_v49 = vsel %vm1169_vm6, %v1156_v38, %v1158_v45  ;;  %v2886_v43 = vpop.f32.mrf.mxu1 }
 0x19b   : > { %1324 = vmatpush.bf16.msra.mxu3 %v2695_v29  ;;  %1214 = vmatpush.bf16.msra.mxu2 %v1171_v49 }
 0x19f   : > { %1325 = vmatpush.bf16.msra.mxu3 %v2718_v48  ;;  %1362 = vmatpush.bf16.msrb.mxu2 %v2710_v42  ;;  %v1154_v50 = vpop.permute.xlu0 %1153  ;;  %v1407_v48 = vpop.permute.xlu2 %1406 }
 0x1a0   : > { %v1170_v51 = vsel %vm1169_vm6, %v1154_v50, %v1156_v38 }
 0x1a1   : > { %1195 = vmatpush.bf16.msra.mxu0 %v1170_v51  ;;  %v1168_v53 = vpop.permute.xlu1 %1167 }
 0x1a2   : > { %v1175_v29 = vsel %vm1169_vm6, %v1166_v32, %v1168_v53  ;;  %v2406_v32 = vld [vmem:[%s3051_s3 + $0x50] sm:$0xff] }
 0x1a3   : > { %1363 = vmatpush.bf16.msrb.mxu2 %v2705_v15  ;;  %1232 = vmatpush.bf16.msra.mxu1 %v1175_v29  ;;  %v1172_v15 = vsel %vm1169_vm6, %v1158_v45, %v1160_v44 }
 0x1a4   : > { %2213 = vmatmul.msk.bf16.vlgmr.msrb.gmra.mxu3 %vm853_vm3, %v2394_v25 }
 0x1a5   : > { %1343 = vmatpush.bf16.msrb.mxu0 %v2697_v30 }
 0x1a6   : > { %2211 = vmatmul.msk.bf16.vlgmr.msrb.gmra.mxu1 %vm853_vm3, %v2394_v25  ;;  %2229 = vmatmul.msk.bf16.vlgmr.msra.gmra.mxu2 %vm853_vm3, %v2396_v39  ;;  %v2865_v25 = vpop.f32.mrf.mxu2 }
 0x1a7   : > { %v1411_v42 = vpop.permute.xlu0 %1410  ;;  %1233 = vmatpush.bf16.msra.mxu1 %v1172_v15  ;;  %v1518_v60 = vpop.permute.xlu2 %1517 }
 0x1a8   : > { %2227 = vmatmul.msk.bf16.vlgmr.msra.gmra.mxu0 %vm853_vm3, %v2396_v39 }
 0x1a9   : > { %1344 = vmatpush.bf16.msrb.mxu0 %v2702_v34  ;;  %v1405_v30 = vpop.permute.xlu1 %1404 }
 0x1aa   : > { %v1416_v61 = vsel %vm1414_vm8, %v1405_v30, %v1407_v48 }
 0x1ae   : > { %v2877_v33 = vpop.f32.mrf.mxu2 }
 0x1af   : > { %v1524_v54 = vpop.permute.xlu0 %1523  ;;  %v1639_v4 = vpop.permute.xlu2 %1638 }
 0x1b0   : > { %v1530_v56 = vsel %vm1527_vm7, %v1522_v52, %v1524_v54 }
 0x1b1   : > { %1550 = vmatpush.bf16.msra.mxu2 %v1530_v56  ;;  %v1413_v57 = vpop.permute.xlu1 %1412 }
 0x1b2   : > { %v1418_v34 = vsel %vm1414_vm8, %v1411_v42, %v1413_v57  ;;  %1475 = vmatpush.bf16.msra.mxu0 %v1413_v57 }
 0x1b3   : > { %1456 = vmatpush.bf16.msrb.mxu3 %v1418_v34 }
 0x1b4   : > { %2214 = vmatmul.msk.bf16.gmra.mxu3 %vm853_vm3, %v2395_v41 }
 0x1b6   : > { %2212 = vmatmul.msk.bf16.gmra.mxu1 %vm853_vm3, %v2395_v41  ;;  %2230 = vmatmul.msk.bf16.gmra.mxu2 %vm853_vm3, %v2397_v58 }
 0x1b7   : > { %v1409_v62 = vpop.permute.xlu0 %1408  ;;  %1476 = vmatpush.bf16.msra.mxu0 %v1407_v48  ;;  %1457 = vmatpush.bf16.msrb.mxu3 %v1416_v61  ;;  %v1633_v11 = vpop.permute.xlu2 %1632  ;;  %v2410_v61 = vld [vmem:[%s3051_s3 + $0x70] sm:$0xff] }
 0x1b8   : > { %v1417_v40 = vsel %vm1414_vm8, %v1409_v62, %v1411_v42  ;;  %2228 = vmatmul.msk.bf16.gmra.mxu0 %vm853_vm3, %v2397_v58  ;;  %v2895_v42 = vpop.f32.mrf.mxu1 }
 0x1b9   : > { %1437 = vmatpush.bf16.msrb.mxu1 %v1417_v40  ;;  %v1516_v0 = vpop.permute.xlu1 %1515  ;;  %3059 = vst [vmem:[#allocation6_spill] sm:$0xff] %v2895_v42 }
 0x1ba   : > { %v1528_v1 = vsel %vm1527_vm7, %v1516_v0, %v1518_v60 }
 0x1bb   : > { %1551 = vmatpush.bf16.msra.mxu2 %v1528_v1 }
 0x1bf   : > { %v1403_v2 = vpop.permute.xlu0 %1402  ;;  %v1629_v22 = vpop.permute.xlu2 %1628 }
 0x1c0   : > { %v1415_v5 = vsel %vm1414_vm8, %v1403_v2, %v1405_v30  ;;  %v2409_v30 = vld [vmem:[%s3051_s3 + $0x68] sm:$0xff]  ;;  %v2904_v57 = vpop.f32.mrf.mxu1 }
 0x1c1   : > { %1438 = vmatpush.bf16.msrb.mxu1 %v1415_v5  ;;  %v1637_v6 = vpop.permute.xlu1 %1636  ;;  %3060 = vst [vmem:[#allocation7_spill] sm:$0xff] %v2904_v57 }
 0x1c2   : > { %v1644_v7 = vsel %vm1640_vm9, %v1637_v6, %v1639_v4 }
 0x1c4   : > { %2269 = vmatmul.msk.bf16.vlgmr.msra.gmra.mxu3 %vm853_vm3, %v2404_v47 }
 0x1c6   : > { %2231 = vmatmul.msk.bf16.vlgmr.msra.gmra.mxu1 %vm853_vm3, %v2396_v39  ;;  %2273 = vmatmul.msk.bf16.vlgmr.msrb.gmra.mxu2 %vm853_vm3, %v2404_v47  ;;  %v2407_v39 = vld [vmem:[%s3051_s3 + $0x58] sm:$0xff] }
 0x1c7   : > { %v1526_v8 = vpop.permute.xlu0 %1525  ;;  %1682 = vmatpush.bf16.msrb.mxu2 %v1644_v7  ;;  %v1752_v31 = vpop.permute.xlu2 %1751 }
 0x1c8   : > { %v1531_v9 = vsel %vm1527_vm7, %v1524_v54, %v1526_v8  ;;  %1588 = vmatpush.bf16.msra.mxu3 %v1526_v8  ;;  %2271 = vmatmul.msk.bf16.vlgmr.msrb.gmra.mxu0 %vm853_vm3, %v2404_v47 }
 0x1c9   : > { %1569 = vmatpush.bf16.msra.mxu1 %v1531_v9  ;;  %v1631_v12 = vpop.permute.xlu1 %1630 }
 0x1ca   : > { %v1642_v13 = vsel %vm1640_vm9, %v1631_v12, %v1633_v11  ;;  %v1641_v24 = vsel %vm1640_vm9, %v1629_v22, %v1631_v12 }
 0x1cb   : > { %1683 = vmatpush.bf16.msrb.mxu2 %v1642_v13 }
 0x1cf   : > { %v1520_v14 = vpop.permute.xlu0 %1519  ;;  %v1746_v51 = vpop.permute.xlu2 %1745 }
 0x1d0   : > { %1589 = vmatpush.bf16.msra.mxu3 %v1520_v14  ;;  %v1529_v16 = vsel %vm1527_vm7, %v1518_v60, %v1520_v14 }
 0x1d1   : > { %1570 = vmatpush.bf16.msra.mxu1 %v1529_v16  ;;  %v1635_v18 = vpop.permute.xlu1 %1634  ;;  %v2411_v16 = vld [vmem:[%s3051_s3 + $0x78] sm:$0xff] }
 0x1d2   : > { %v1643_v20 = vsel %vm1640_vm9, %v1635_v18, %v1637_v6 }
 0x1d3   : > { %1663 = vmatpush.bf16.msrb.mxu0 %v1643_v20 }
 0x1d4   : > { %2270 = vmatmul.msk.bf16.gmra.mxu3 %vm853_vm3, %v2405_v17 }
 0x1d6   : > { %2232 = vmatmul.msk.bf16.gmra.mxu1 %vm853_vm3, %v2397_v58  ;;  %2274 = vmatmul.msk.bf16.gmra.mxu2 %vm853_vm3, %v2405_v17 }
 0x1d7   : > { %1664 = vmatpush.bf16.msrb.mxu0 %v1641_v24  ;;  %v1748_v63 = vpop.permute.xlu0 %1747 }
 0x1d8   : > { %2272 = vmatmul.msk.bf16.gmra.mxu0 %vm853_vm3, %v2405_v17 }
 0x1d9   : > { %v1750_v26 = vpop.permute.xlu1 %1749 }
 0x1da   : > { %v1756_v37 = vsel %vm1753_vm10, %v1748_v63, %v1750_v26  ;;  %v1757_v45 = vsel %vm1753_vm10, %v1750_v26, %v1752_v31 }
 0x1df   : > { %v1742_v38 = vpop.permute.xlu0 %1741 }
 0x1e1   : > { %v1744_v41 = vpop.permute.xlu1 %1743 }
 0x1e2   : > { %v1754_v49 = vsel %vm1753_vm10, %v1742_v38, %v1744_v41  ;;  %v1755_v53 = vsel %vm1753_vm10, %v1744_v41, %v1746_v51 }
 0x1e3   : > { %v888_v36 = vpop.f32.mrf.mxu0 }
 0x1e4   : > { %2289 = vmatmul.msk.bf16.vlgmr.msrb.gmra.mxu3 %vm853_vm3, %v2406_v32 }
 0x1e5   : > { %1776 = vmatpush.bf16.msrb.mxu3 %v1756_v37 }
 0x1e6   : > { %2287 = vmatmul.msk.bf16.vlgmr.msrb.gmra.mxu1 %vm853_vm3, %v2406_v32  ;;  %2305 = vmatmul.msk.bf16.vlgmr.msra.gmra.mxu2 %vm853_vm3, %v2408_v35 }
 0x1e7   : > { %1701 = vmatpush.bf16.msrb.mxu1 %v1639_v4  ;;  %1814 = vmatpush.bf16.msra.mxu2 %v1752_v31  ;;  %v869_v44 = vpop.f32.mrf.mxu3 }
 0x1e8   : > { %2291 = vmatmul.msk.bf16.vlgmr.msra.gmra.mxu0 %vm853_vm3, %v2406_v32 }
 0x1e9   : > { %1777 = vmatpush.bf16.msrb.mxu3 %v1754_v49  ;;  %1795 = vmatpush.bf16.msra.mxu0 %v1757_v45  ;;  %v907_v50 = vpop.f32.mrf.mxu2 }
 0x1eb   : > { %1702 = vmatpush.bf16.msrb.mxu1 %v1633_v11  ;;  %1815 = vmatpush.bf16.msra.mxu2 %v1746_v51  ;;  %v890_v52 = vpop.f32.mrf.mxu0 }
 0x1ed   : > { %1796 = vmatpush.bf16.msra.mxu0 %v1755_v53 }
 0x1ef   : > { %v871_v29 = vpop.f32.mrf.mxu3 }
 0x1f1   : > { %v909_v15 = vpop.f32.mrf.mxu2 }
 0x1f3   : > { %v893_v48 = vpop.f32.mrf.mxu0 }
 0x1f4   : > { %2290 = vmatmul.msk.bf16.gmra.mxu3 %vm853_vm3, %v2407_v39 }
 0x1f6   : > { %2288 = vmatmul.msk.bf16.gmra.mxu1 %vm853_vm3, %v2407_v39  ;;  %2306 = vmatmul.msk.bf16.gmra.mxu2 %vm853_vm3, %v2409_v30 }
 0x1f7   : > { %v874_v54 = vpop.f32.mrf.mxu3 }
 0x1f8   : > { %2292 = vmatmul.msk.bf16.gmra.mxu0 %vm853_vm3, %v2407_v39 }
 0x1f9   : > { %v912_v56 = vpop.f32.mrf.mxu2 }
 0x1fb   : > { %v895_v34 = vpop.f32.mrf.mxu0 }
 0x1ff   : > { %v876_v58 = vpop.f32.mrf.mxu3 }
 0x201   : > { %v914_v60 = vpop.f32.mrf.mxu2 }
 0x203   : > { %v971_v62 = vpop.f32.mrf.mxu1 }
 0x204   : > { %v972_v40 = vadd.f32 %v971_v62, %v869_v44  ;;  %2309 = vmatmul.msk.bf16.vlgmr.msra.gmra.mxu3 %vm853_vm3, %v2408_v35  ;;  %v2412_v44 = vld [vmem:[%s3051_s3 + $0x80] sm:$0xff]  ;;  %v2413_v62 = vld [vmem:[%s3051_s3 + $0x88] sm:$0xff] }
 0x205   : > { %v1009_v0 = vpop.f32.mrf.mxu0 }
 0x206   : > { %v1010_v1 = vadd.f32 %v1009_v0, %v907_v50  ;;  %2307 = vmatmul.msk.bf16.vlgmr.msra.gmra.mxu1 %vm853_vm3, %v2408_v35  ;;  %2325 = vmatmul.msk.bf16.vlgmr.msrb.gmra.mxu2 %vm853_vm3, %v2410_v61 }
 0x207   : > { %v990_v2 = vpop.f32.mrf.mxu3 }
 0x208   : > { %v991_v4 = vadd.f32 %v990_v2, %v888_v36  ;;  %2323 = vmatmul.msk.bf16.vlgmr.msrb.gmra.mxu0 %vm853_vm3, %v2410_v61 }
 0x209   : > { %v1078_v5 = vpop.f32.mrf.mxu2 }
 0x20a   : > { %v1126_v47 = vadd.f32 %v1078_v5, %v972_v40 }
 0x20b   : > { %v973_v6 = vpop.f32.mrf.mxu1 }
 0x20c   : > { %v974_v7 = vadd.f32 %v973_v6, %v871_v29 }
 0x20d   : > { %v1011_v8 = vpop.f32.mrf.mxu0 }
 0x20e   : > { %v1012_v9 = vadd.f32 %v1011_v8, %v909_v15 }
 0x20f   : > { %v992_v11 = vpop.f32.mrf.mxu3 }
 0x210   : > { %v993_v12 = vadd.f32 %v992_v11, %v890_v52 }
 0x211   : > { %v1080_v13 = vpop.f32.mrf.mxu2 }
 0x212   : > { %v1129_v14 = vadd.f32 %v1080_v13, %v974_v7  ;;  %v1853_v13 = vld [vmem:[%s3052_s4 + $0x10] sm:$0xff] }
 0x213   : > { %v976_v17 = vpop.f32.mrf.mxu1  ;;  %1867 = vperm.xlu2 %2437, %v1853_v13  }
 0x214   : > { %v977_v18 = vadd.f32 %v976_v17, %v874_v54  ;;  %2310 = vmatmul.msk.bf16.gmra.mxu3 %vm853_vm3, %v2409_v30 }
 0x215   : > { %v1014_v20 = vpop.f32.mrf.mxu0 }
 0x216   : > { %v1015_v22 = vadd.f32 %v1014_v20, %v912_v56  ;;  %2308 = vmatmul.msk.bf16.gmra.mxu1 %vm853_vm3, %v2409_v30  ;;  %2326 = vmatmul.msk.bf16.gmra.mxu2 %vm853_vm3, %v2411_v16 }
 0x217   : > { %v995_v24 = vpop.f32.mrf.mxu3 }
 0x218   : > { %v996_v26 = vadd.f32 %v995_v24, %v893_v48  ;;  %2324 = vmatmul.msk.bf16.gmra.mxu0 %vm853_vm3, %v2411_v16 }
 0x219   : > { %v1083_v63 = vpop.f32.mrf.mxu2 }
 0x21a   : > { %v1132_v31 = vadd.f32 %v1083_v63, %v977_v18 }
 0x21b   : > { %v978_v32 = vpop.f32.mrf.mxu1 }
 0x21c   : > { %v979_v35 = vadd.f32 %v978_v32, %v876_v58 }
 0x21d   : > { %v1016_v36 = vpop.f32.mrf.mxu0 }
 0x21e   : > { %v1017_v37 = vadd.f32 %v1016_v36, %v914_v60 }
 0x21f   : > { %v997_v41 = vpop.f32.mrf.mxu3 }
 0x220   : > { %v998_v38 = vadd.f32 %v997_v41, %v895_v34 }
 0x221   : > { %v1085_v45 = vpop.f32.mrf.mxu2 }
 0x222   : > { %v1135_v49 = vadd.f32 %v1085_v45, %v979_v35 }
 0x223   : > { %v1097_v50 = vpop.f32.mrf.mxu1 }
 0x224   : > { %v1127_v51 = vadd.f32 %v1097_v50, %v991_v4  ;;  %2341 = vmatmul.msk.bf16.vlgmr.msrb.gmra.mxu3 %vm853_vm3, %v2412_v44 }
 0x225   : > { %v1197_v52 = vpop.f32.mrf.mxu0 }
 0x226   : > { %v1245_v53 = vadd.f32 %v1197_v52, %v1126_v47  ;;  %2327 = vmatmul.msk.bf16.vlgmr.msrb.gmra.mxu1 %vm853_vm3, %v2410_v61  ;;  %2345 = vmatmul.msk.bf16.vlgmr.msra.gmra.mxu2 %vm853_vm3, %v2412_v44 }
 0x227   : > { %v1116_v29 = vpop.f32.mrf.mxu3 }
 0x228   : > { %v1128_v39 = vadd.f32 %v1116_v29, %v1010_v1  ;;  %2343 = vmatmul.msk.bf16.vlgmr.msra.gmra.mxu0 %vm853_vm3, %v2412_v44 }
 0x229   : > { %v1216_v15 = vpop.f32.mrf.mxu2 }
 0x22a   : > { %v1246_v30 = vadd.f32 %v1216_v15, %v1127_v51 }
 0x22b   : > { %v1099_v48 = vpop.f32.mrf.mxu1 }
 0x22c   : > { %v1130_v54 = vadd.f32 %v1099_v48, %v993_v12 }
 0x22d   : > { %v1199_v56 = vpop.f32.mrf.mxu0 }
 0x22e   : > { %v1248_v34 = vadd.f32 %v1199_v56, %v1129_v14 }
 0x22f   : > { %v1118_v58 = vpop.f32.mrf.mxu3 }
 0x230   : > { %v1131_v60 = vadd.f32 %v1118_v58, %v1012_v9 }
 0x231   : > { %v1218_v40 = vpop.f32.mrf.mxu2 }
 0x232   : > { %v1249_v61 = vadd.f32 %v1218_v40, %v1130_v54 }
 0x233   : > { %v1102_v0 = vpop.f32.mrf.mxu1 }
 0x234   : > { %v1133_v2 = vadd.f32 %v1102_v0, %v996_v26  ;;  %2342 = vmatmul.msk.bf16.gmra.mxu3 %vm853_vm3, %v2413_v62 }
 0x235   : > { %v1202_v1 = vpop.f32.mrf.mxu0 }
 0x236   : > { %v1251_v4 = vadd.f32 %v1202_v1, %v1132_v31  ;;  %2328 = vmatmul.msk.bf16.gmra.mxu1 %vm853_vm3, %v2411_v16  ;;  %2346 = vmatmul.msk.bf16.gmra.mxu2 %vm853_vm3, %v2413_v62 }
 0x237   : > { %v1121_v5 = vpop.f32.mrf.mxu3 }
 0x238   : > { %v1134_v47 = vadd.f32 %v1121_v5, %v1015_v22  ;;  %2344 = vmatmul.msk.bf16.gmra.mxu0 %vm853_vm3, %v2413_v62 }
 0x239   : > { %v1221_v6 = vpop.f32.mrf.mxu2 }
 0x23a   : > { %v1252_v7 = vadd.f32 %v1221_v6, %v1133_v2 }
 0x23b   : > { %v1104_v8 = vpop.f32.mrf.mxu1 }
 0x23c   : > { %v1136_v9 = vadd.f32 %v1104_v8, %v998_v38 }
 0x23d   : > { %v1204_v11 = vpop.f32.mrf.mxu0 }
 0x23e   : > { %v1254_v12 = vadd.f32 %v1204_v11, %v1135_v49 }
 0x23f   : > { %v1123_v14 = vpop.f32.mrf.mxu3 }
 0x240   : > { %v1137_v17 = vadd.f32 %v1123_v14, %v1017_v37 }
 0x241   : > { %v1223_v16 = vpop.f32.mrf.mxu2 }
 0x242   : > { %v1255_v18 = vadd.f32 %v1223_v16, %v1136_v9 }
 0x243   : > { %v1235_v20 = vpop.f32.mrf.mxu1 }
 0x244   : > { %v1247_v24 = vadd.f32 %v1235_v20, %v1128_v39 }
 0x245   : > { %v1346_v22 = vpop.f32.mrf.mxu0 }
 0x246   : > { %v1376_v26 = vadd.f32 %v1346_v22, %v1246_v30 }
 0x247   : > { %v1327_v63 = vpop.f32.mrf.mxu3 }
 0x248   : > { %v1375_v31 = vadd.f32 %v1327_v63, %v1245_v53 }
 0x249   : > { %v1365_v32 = vpop.f32.mrf.mxu2 }
 0x24a   : > { %v1377_v35 = vadd.f32 %v1365_v32, %v1247_v24 }
 0x24b   : > { %v1237_v36 = vpop.f32.mrf.mxu1 }
 0x24c   : > { %v1250_v41 = vadd.f32 %v1237_v36, %v1131_v60 }
 0x24d   : > { %v1348_v38 = vpop.f32.mrf.mxu0 }
 0x24e   : > { %v2937_v44 = vadd.f32 %v1348_v38, %v1249_v61 }
 0x24f   : > { %v1329_v45 = vpop.f32.mrf.mxu3 }
 0x250   : > { %v2939_v49 = vadd.f32 %v1329_v45, %v1248_v34 }
 0x251   : > { %v1367_v50 = vpop.f32.mrf.mxu2 }
 0x252   : > { %v2941_v37 = vadd.f32 %v1367_v50, %v1250_v41 }
 0x253   : > { %v1240_v51 = vpop.f32.mrf.mxu1 }
 0x254   : > { %v1253_v52 = vadd.f32 %v1240_v51, %v1134_v47 }
 0x255   : > { %v1351_v29 = vpop.f32.mrf.mxu0 }
 0x256   : > { %v2943_v39 = vadd.f32 %v1351_v29, %v1252_v7 }
 0x257   : > { %v1332_v15 = vpop.f32.mrf.mxu3 }
 0x258   : > { %v2945_v53 = vadd.f32 %v1332_v15, %v1251_v4 }
 0x259   : > { %v1370_v30 = vpop.f32.mrf.mxu2 }
 0x25a   : > { %v2947_v48 = vadd.f32 %v1370_v30, %v1253_v52 }
 0x25b   : > { %v1242_v54 = vpop.f32.mrf.mxu1 }
 0x25c   : > { %v1256_v56 = vadd.f32 %v1242_v54, %v1137_v17 }
 0x25d   : > { %v1353_v58 = vpop.f32.mrf.mxu0 }
 0x25e   : > { %v2949_v60 = vadd.f32 %v1353_v58, %v1255_v18 }
 0x25f   : > { %v1334_v34 = vpop.f32.mrf.mxu3 }
 0x260   : > { %v2951_v62 = vadd.f32 %v1334_v34, %v1254_v12 }
 0x261   : > { %v1372_v40 = vpop.f32.mrf.mxu2 }
 0x262   : > { %v2953_v61 = vadd.f32 %v1372_v40, %v1256_v56 }
 0x263   : > { %v1440_v0 = vpop.f32.mrf.mxu1 }
 0x264   : > { %3061 = vst [vmem:[#allocation8_spill] sm:$0xff] %v2953_v61  ;;  %v1488_v56 = vadd.f32 %v1440_v0, %v1375_v31 }
 0x265   : > { %v1478_v2 = vpop.f32.mrf.mxu0 }
 0x266   : > { %v1490_v40 = vadd.f32 %v1478_v2, %v1377_v35 }
 0x267   : > { %v1459_v1 = vpop.f32.mrf.mxu3 }
 0x268   : > { %v1489_v30 = vadd.f32 %v1459_v1, %v1376_v26  ;;  %v1858_v1 = vpop.permute.xlu0 %1857 }
 0x269   : > { %v1553_v5 = vpop.f32.mrf.mxu2 }
 0x26a   : > { %v1601_v57 = vadd.f32 %v1553_v5, %v1488_v56 }
 0x26b   : > { %v1442_v4 = vpop.f32.mrf.mxu1 }
 0x26c   : > { %v1491_v31 = vadd.f32 %v1442_v4, %v2939_v49 }
 0x26d   : > { %v1480_v47 = vpop.f32.mrf.mxu0 }
 0x26f   : > { %v1461_v6 = vpop.f32.mrf.mxu3 }
 0x270   : > { %v1492_v10 = vadd.f32 %v1461_v6, %v2937_v44 }
 0x271   : > { %v1555_v7 = vpop.f32.mrf.mxu2 }
 0x273   : > { %v2955_v8 = vpop.f32.mrf.mxu1 }
 0x275   : > { %v2957_v9 = vpop.f32.mrf.mxu0 }
 0x277   : > { %v1464_v11 = vpop.f32.mrf.mxu3 }
 0x279   : > { %v2959_v13 = vpop.f32.mrf.mxu2 }
 0x27b   : > { %v2961_v12 = vpop.f32.mrf.mxu1 }
 0x27d   : > { %v2963_v14 = vpop.f32.mrf.mxu0 }
 0x27e   : > { %3062 = vst [vmem:[#allocation9_spill] sm:$0xff] %v2963_v14 }
 0x27f   : > { %v2965_v17 = vpop.f32.mrf.mxu3 }
 0x281   : > { %v2967_v16 = vpop.f32.mrf.mxu2 }
 0x282   : > { %3063 = vst [vmem:[#allocation10_spill] sm:$0xff] %v2967_v16 }
 0x283   : > { %v1572_v18 = vpop.f32.mrf.mxu1 }
 0x284   : > { %v1602_v58 = vadd.f32 %v1572_v18, %v1489_v30 }
 0x285   : > { %v1666_v20 = vpop.f32.mrf.mxu0 }
 0x286   : > { %v1714_v14 = vadd.f32 %v1666_v20, %v1601_v57  ;;  %v1604_v57 = vadd.f32 %v1555_v7, %v1491_v31 }
 0x287   : > { %v1591_v24 = vpop.f32.mrf.mxu3 }
 0x288   : > { %v1603_v61 = vadd.f32 %v1591_v24, %v1490_v40 }
 0x289   : > { %v1685_v22 = vpop.f32.mrf.mxu2 }
 0x28a   : > { %v1715_v21 = vadd.f32 %v1685_v22, %v1602_v58 }
 0x28b   : > { %v1574_v63 = vpop.f32.mrf.mxu1 }
 0x28c   : > { %v1605_v18 = vadd.f32 %v1574_v63, %v1492_v10  ;;  %v1495_v10 = vadd.f32 %v1464_v11, %v2943_v39 }
 0x28d   : > { %v1668_v32 = vpop.f32.mrf.mxu0 }
 0x28f   : > { %v1593_v36 = vpop.f32.mrf.mxu3 }
 0x291   : > { %v1687_v41 = vpop.f32.mrf.mxu2 }
 0x293   : > { %v1577_v38 = vpop.f32.mrf.mxu1 }
 0x295   : > { %v2969_v45 = vpop.f32.mrf.mxu0 }
 0x297   : > { %v2971_v50 = vpop.f32.mrf.mxu3 }
 0x299   : > { %v1690_v51 = vpop.f32.mrf.mxu2 }
 0x29b   : > { %v2973_v52 = vpop.f32.mrf.mxu1 }
 0x29c   : > { %3064 = vst [vmem:[#allocation11_spill] sm:$0xff] %v2973_v52 }
 0x29d   : > { %v2975_v29 = vpop.f32.mrf.mxu0 }
 0x29e   : > { %3065 = vst [vmem:[#allocation12_spill] sm:$0xff] %v2975_v29 }
 0x29f   : > { %v2977_v15 = vpop.f32.mrf.mxu3 }
 0x2a1   : > { %v2979_v54 = vpop.f32.mrf.mxu2 }
 0x2a3   : > { %v1704_v34 = vpop.f32.mrf.mxu1 }
 0x2a4   : > { %v1716_v52 = vadd.f32 %v1704_v34, %v1603_v61  ;;  %v1717_v61 = vadd.f32 %v1668_v32, %v1604_v57 }
 0x2a5   : > { %v1798_v28 = vpop.f32.mrf.mxu0 }
 0x2a6   : > { %v1828_v42 = vadd.f32 %v1798_v28, %v1715_v21  ;;  %v1718_v21 = vadd.f32 %v1687_v41, %v1605_v18  ;;  %v1863_v41 = vpop.permute.xlu1 %1862  ;;  %v1868_v18 = vpop.permute.xlu2 %1867 }
 0x2a7   : > { %v1779_v16 = vpop.f32.mrf.mxu3 }
 0x2a8   : > { %v1840_v29 = vadd.f32 %v1828_v42, %v2865_v25  ;;  %v1827_v26 = vadd.f32 %v1779_v16, %v1714_v14  ;;  %v1493_v25 = vadd.f32 %v1480_v47, %v2941_v37  ;;  %v1494_v37 = vadd.f32 %v2955_v8, %v2945_v53 }
 0x2a9   : > { %v1817_v0 = vpop.f32.mrf.mxu2  ;;  %v1608_v47 = vadd.f32 %v1577_v38, %v1495_v10  ;;  %v3071_v10 = vld [vmem:[#allocation9_spill] sm:$0xff] }
 0x2aa   : > { %v1876_v35 = vadd.f32 %v1858_v1, %v1840_v29  ;;  %v1839_v2 = vadd.f32 %v1827_v26, %v2854_v19  ;;  %v1829_v5 = vadd.f32 %v1817_v0, %v1716_v52  ;;  %v1606_v14 = vadd.f32 %v1593_v36, %v1493_v25  ;;  %v3068_v25 = vld [vmem:[#allocation10_spill] sm:$0xff] }
 0x2ab   : > { %v1706_v20 = vpop.f32.mrf.mxu1  ;;  %v1496_v29 = vadd.f32 %v2957_v9, %v2947_v48  ;;  %v1607_v53 = vadd.f32 %v2959_v13, %v1494_v37  ;;  %v1721_v38 = vadd.f32 %v1690_v51, %v1608_v47  ;;  %v1498_v9 = vadd.f32 %v2965_v17, %v2949_v60  ;;  %v3067_v17 = vld [vmem:[#allocation3_spill] sm:$0xff] }
 0x2ac   : > { %v1888_v28 = vmax.f32 %v1876_v35, 0.0  ;;  %v1875_v24 = vadd.f32 %v1858_v1, %v1839_v2  ;;  %v1841_v44 = vadd.f32 %v1829_v5, %v2870_v27  ;;  %v1719_v39 = vadd.f32 %v1706_v20, %v1606_v14  ;;  %v3066_v5 = vld [vmem:[#allocation11_spill] sm:$0xff] }
 0x2ad   : > { %v1800_v42 = vpop.f32.mrf.mxu0  ;;  %v1609_v40 = vadd.f32 %v2971_v50, %v1496_v29  ;;  %v1720_v31 = vadd.f32 %v2969_v45, %v1607_v53  ;;  %v1497_v45 = vadd.f32 %v2961_v12, %v2951_v62  ;;  %v1611_v57 = vadd.f32 %v3066_v5, %v1498_v9  ;;  %v3069_v62 = vld [vmem:[#allocation6_spill] sm:$0xff]  ;;  %v1873_v29 = vpop.permute.xlu0 %1872 }
 0x2ae   : > { %v1887_v6 = vmax.f32 %v1875_v24, 0.0  ;;  %v1877_v49 = vadd.f32 %v1858_v1, %v1841_v44  ;;  %v1831_v4 = vadd.f32 %v1800_v42, %v1718_v21  ;;  %v1900_v19 = vmul.f32 %v1888_v28, %v2646_v59 }
 0x2af   : > { %v1781_v7 = vpop.f32.mrf.mxu3  ;;  %v1610_v42 = vadd.f32 %v3068_v25, %v1497_v45 }
 0x2b0   : > { %v1899_v16 = vmul.f32 %v1887_v6, %v2644_v55  ;;  %v1889_v22 = vmax.f32 %v1877_v49, 0.0  ;;  %v1843_v63 = vadd.f32 %v1831_v4, %v2877_v33  ;;  %v1830_v27 = vadd.f32 %v1781_v7, %v1717_v61  ;;  %v3070_v4 = vld [vmem:[#allocation8_spill] sm:$0xff] }
 0x2b1   : > { %v1819_v11 = vpop.f32.mrf.mxu2  ;;  %v1499_v14 = vadd.f32 %v3071_v10, %v3070_v4 }
 0x2b2   : > { %v1911_v32 = vpack.c.bf16 %v1900_v19, %v1899_v16  ;;  %v1901_v36 = vmul.f32 %v1889_v22, %v2650_v3  ;;  %v1879_v52 = vadd.f32 %v1863_v41, %v1843_v63  ;;  %v1842_v33 = vadd.f32 %v1830_v27, %v2868_v46  ;;  %v3072_v16 = vld [vmem:[#allocation12_spill] sm:$0xff] }
 0x2b3   : > { %v1832_v8 = vadd.f32 %v1819_v11, %v1719_v39  ;;  %v1709_v34 = vpop.f32.mrf.mxu1  ;;  %v1723_v22 = vadd.f32 %v3072_v16, %v1610_v42  ;;  %v1612_v47 = vadd.f32 %v2977_v15, %v1499_v14 }
 0x2b4   : > { %1919 = vst [vmem:[%s2997_s30] sm:$0xff] %v1911_v32  ;;  %v1912_v30 = vpack.c.bf16 %v1901_v36, %v1901_v36  ;;  %v1891_v56 = vmax.f32 %v1879_v52, 0.0  ;;  %v1878_v58 = vadd.f32 %v1863_v41, %v1842_v33  ;;  %v1722_v51 = vadd.f32 %v1709_v34, %v1609_v40  ;;  %v3073_v36 = vld [vmem:[#allocation5_spill] sm:$0xff] }
 0x2b5   : > { %v1844_v26 = vadd.f32 %v1832_v8, %v2886_v43  ;;  %v1803_v1 = vpop.f32.mrf.mxu0 }
 0x2b6   : > { %1920 = vst.msk [vmem:[%s2997_s30 + $0x8] sm:$0xf] %vm283_vm1, %v1912_v30  ;;  %v1890_v46 = vmax.f32 %v1878_v58, 0.0  ;;  %v1834_v48 = vadd.f32 %v1803_v1, %v1721_v38  ;;  %v1903_v35 = vmul.f32 %v1891_v56, %v2646_v59  ;;  %v3074_v56 = vld [vmem:[#allocation4_spill] sm:$0xff] }
 0x2b7   : > { %v1880_v13 = vadd.f32 %v1863_v41, %v1844_v26  ;;  %v1784_v0 = vpop.f32.mrf.mxu3 }
 0x2b8   : > { %v1902_v50 = vmul.f32 %v1890_v46, %v2644_v55  ;;  %v1846_v43 = vadd.f32 %v1834_v48, %v2860_v23  ;;  %v1833_v2 = vadd.f32 %v1784_v0, %v1720_v31  ;;  %v1724_v23 = vadd.f32 %v2979_v54, %v1611_v57  ;;  %v3075_v31 = vld [vmem:[#allocation7_spill] sm:$0xff] }
 0x2b9   : > { %v1892_v20 = vmax.f32 %v1880_v13, 0.0  ;;  %v1822_v21 = vpop.f32.mrf.mxu2 }
 0x2ba   : > { %v1913_v60 = vpack.c.bf16 %v1903_v35, %v1902_v50  ;;  %v1845_v28 = vadd.f32 %v1833_v2, %v3067_v17  ;;  %v1882_v24 = vadd.f32 %v1868_v18, %v1846_v43  ;;  %v1835_v44 = vadd.f32 %v1822_v21, %v1722_v51 }
 0x2bb   : > { %v1904_v61 = vmul.f32 %v1892_v20, %v2650_v3  ;;  %v1711_v41 = vpop.f32.mrf.mxu1 }
 0x2bc   : > { %1921 = vst [vmem:[%s2997_s30 + $0xc] sm:$0xff] %v1913_v60  ;;  %v1881_v6 = vadd.f32 %v1868_v18, %v1845_v28  ;;  %v1894_v49 = vmax.f32 %v1882_v24, 0.0  ;;  %v1847_v12 = vadd.f32 %v1835_v44, %v3069_v62  ;;  %v1725_v53 = vadd.f32 %v1711_v41, %v1612_v47 }
 0x2bd   : > { %v1914_v19 = vpack.c.bf16 %v1904_v61, %v1904_v61  ;;  %v1805_v7 = vpop.f32.mrf.mxu0 }
 0x2be   : > { %v1893_v63 = vmax.f32 %v1881_v6, 0.0  ;;  %v1883_v27 = vadd.f32 %v1868_v18, %v1847_v12  ;;  %v1837_v37 = vadd.f32 %v1805_v7, %v1724_v23  ;;  %v1906_v54 = vmul.f32 %v1894_v49, %v2646_v59 }
 0x2bf   : > { %1922 = vst.msk [vmem:[%s2997_s30 + $0x14] sm:$0xf] %vm283_vm1, %v1914_v19  ;;  %v1786_v39 = vpop.f32.mrf.mxu3 }
 0x2c0   : > { %v1905_v11 = vmul.f32 %v1893_v63, %v2644_v55  ;;  %v1895_v32 = vmax.f32 %v1883_v27, 0.0  ;;  %v1849_v52 = vadd.f32 %v1837_v37, %v3073_v36  ;;  %v1836_v33 = vadd.f32 %v1786_v39, %v1723_v22 }
 0x2c1   : > { %v1824_v8 = vpop.f32.mrf.mxu2 }
 0x2c2   : > { %v1915_v38 = vpack.c.bf16 %v1906_v54, %v1905_v11  ;;  %v1907_v30 = vmul.f32 %v1895_v32, %v2650_v3  ;;  %v1885_v15 = vadd.f32 %v1873_v29, %v1849_v52  ;;  %v1848_v58 = vadd.f32 %v1836_v33, %v3074_v56 }
 0x2c3   : > { %v1838_v34 = vadd.f32 %v1824_v8, %v1725_v53 }
 0x2c4   : > { %1923 = vst [vmem:[%s2997_s30 + $0x18] sm:$0xff] %v1915_v38  ;;  %v1916_v40 = vpack.c.bf16 %v1907_v30, %v1907_v30  ;;  %v1897_v26 = vmax.f32 %v1885_v15, 0.0  ;;  %v1884_v1 = vadd.f32 %v1873_v29, %v1848_v58 }
 0x2c5   : > { %v1850_v46 = vadd.f32 %v1838_v34, %v3075_v31 }
 0x2c6   : > { %1924 = vst.msk [vmem:[%s2997_s30 + $0x20] sm:$0xf] %vm283_vm1, %v1916_v40  ;;  %v1896_v48 = vmax.f32 %v1884_v1, 0.0  ;;  %v1909_v13 = vmul.f32 %v1897_v26, %v2646_v59 }
 0x2c7   : > { %v1886_v9 = vadd.f32 %v1873_v29, %v1850_v46 }
 0x2c8   : > { %v1908_v51 = vmul.f32 %v1896_v48, %v2644_v55 }
 0x2c9   : > { %v1898_v0 = vmax.f32 %v1886_v9, 0.0 }
 0x2ca   : > { %v1917_v18 = vpack.c.bf16 %v1909_v13, %v1908_v51 }
 0x2cb   : > { %v1910_v35 = vmul.f32 %v1898_v0, %v2650_v3 }
 0x2cc   : > { %1925 = vst [vmem:[%s2997_s30 + $0x24] sm:$0xff] %v1917_v18 }
 0x2cd   : > { %v1918_v50 = vpack.c.bf16 %v1910_v35, %v1910_v35 }
 0x2cf   : > { %1926 = vst.msk [vmem:[%s2997_s30 + $0x2c] sm:$0xf] %vm283_vm1, %v1918_v50 }
 0x2d0 PF: > { %s17_s24 = sadd.s32 1, %s2444_s24  }
 0x2d1   : > { %p14_p4 = scmp.ge.s32.totalorder %s17_s24, 4  }
 0x2d3   :  { %16 = sbr.rel (!%p14_p4) target bundleno = 1 (0x1), region = 86 }

// kernel: _resnet_forward.5
= control target key start
LH: loop header
LB: loop body
LE: loop exit
PB: predicated region body
PF: predicated region fallthrough
CT: control target
= control target key end

     0   :  { %s2558_s30 = smov 0   ;;  %s3131_s0 = inlined_call_operand.vmem [shape: bf16[2,288,100], index: 0, kind: input, shape index: {}]   ;;  %s3132_s1 = inlined_call_operand.vmem [shape: bf16[64,288], index: 1, kind: input, shape index: {}]   ;;  %s3133_s2 = inlined_call_operand.vmem [shape: f32[64,1], index: 2, kind: input, shape index: {}]   ;;  %s3134_s3 = inlined_call_operand.vmem [shape: bf16[9,64,64], index: 3, kind: input, shape index: {}]   ;;  %s3135_s4 = inlined_call_operand.vmem [shape: f32[64,1], index: 4, kind: input, shape index: {}]   ;;  %s3136_s5 = inlined_call_operand.vmem [shape: bf16[64,32], index: 5, kind: input, shape index: {}]   ;;  %s3137_s6 = inlined_call_operand.vmem [shape: f32[1,100], index: 6, kind: input, shape index: {}]   ;;  %s3138_s7 = inlined_call_operand.vmem [shape: f32[10,64], index: 7, kind: input, shape index: {}]   ;;  %s3139_s8 = inlined_call_operand.vmem [shape: f32[10,1], index: 8, kind: input, shape index: {}]   ;;  %s3140_s9 = inlined_call_operand.vmem [shape: f32[2,10,1], index: 9, kind: output, shape index: {}]  }
   0x1 LB: > { %s1935_s10 = sadd.s32 4294967295, %s2497_s30   ;;  %p1939_p0 = scmp.ge.s32.totalorder %s2497_s30, 1  ;;  %s2497_s30 = sphi %s2558_s30, %s19_s30  }
   0x2   : > { %p287_p1 = scmp.lt.s32.totalorder %s2497_s30, 3 }
   0x4   : > { %p288_p2 = pnand %p1939_p0, %p287_p1 }
   0x5   : > { %p323_p3 = scmp.lt.s32.totalorder (!%p288_p2), %s1935_s10, 1  ;;  %s2500_s23 = smov (!%p288_p2), 10  }
   0x6   : > { %291 = sbr.rel (%p288_p2) target bundleno = 992 (0x3e0), region = 56  ;;  %s2502_s26 = smov (!%p288_p2), 9  }
   0x7   : > { %s2503_s27 = smov (!%p288_p2), 1   ;;  %s2504_s28 = smov (!%p288_p2), 127  }
   0x8   : > { %s2505_s29 = smov (!%p288_p2), 117   ;;  %s2506_s11 = smov (!%p288_p2), 118  }
   0x9   : > { %s2507_s12 = smov (!%p288_p2), 119  }
   0xb   : > { %v410_v0 = vld [vmem:[%s3133_s2 + $0x30] sm:$0xff]  ;;  %s3142_s10 = smov (!%p323_p3, %s1935_s10), 1  ;;  %v2499_v1 = vmov 0   ;;  %v408_v6 = vld [vmem:[%s3133_s2 + $0x20] sm:$0xff]  ;;  %v411_v7 = vld [vmem:[%s3133_s2 + $0x38] sm:$0xff]  ;;  %vm620_vm0 = vcmask 261120  }
   0xc   : > { %2488 = vset.pattern.permute.xlu0 %v2499_v1  ;;  %335 = vst [vmem:[#allocation2] sm:$0xff] %v2499_v1  ;;  %2489 = vset.pattern.permute.xlu1 %v2499_v1  ;;  %s2470_s13 = smul.u32 144, %s3142_s10  ;;  %v1965_v12 = vld [vmem:[%s3132_s1 + $0x20] sm:$0xf]  ;;  %v2407_v13 = vld [vmem:[%s3132_s1 + $0x28] sm:$0xf0] }
   0xd   : > { %338 = vst [vmem:[#allocation2 + $0xc] sm:$0xff] %v2499_v1  ;;  %444 = vperm.xlu0 %2488, %v410_v0   ;;  %2490 = vset.pattern.permute.xlu2 %v2499_v1  ;;  %v409_v17 = vld [vmem:[%s3133_s2 + $0x28] sm:$0xff]  ;;  %v404_v18 = vld [vmem:[%s3133_s2] sm:$0xff]  ;;  %v1966_v19 = vor.u32 %v2407_v13, %v1965_v12  ;;  %v1977_v29 = vld [vmem:[%s3132_s1 + $0x38] sm:$0xf]  ;;  %vm336_vm1 = vcmask 814080  }
   0xe   : > { %340 = vst [vmem:[#allocation2 + $0x18] sm:$0xff] %v2499_v1  ;;  %s2575_s16 = scalar_lea.vmem %s3131_s0, %s2470_s13  ;;  %434 = vperm.xlu1 %2489, %v408_v6   ;;  %v405_v25 = vld [vmem:[%s3133_s2 + $0x8] sm:$0xff]  ;;  %v1945_v27 = vld [vmem:[%s3132_s1] sm:$0xf]  ;;  %v2410_v30 = vld [vmem:[%s3132_s1 + $0x40] sm:$0xf0] }
   0xf   : > { %342 = vst [vmem:[#allocation2 + $0x24] sm:$0xff] %v2499_v1  ;;  %v2391_v2 = vld [vmem:[%s2575_s16 + $0x38] sm:$0xff]  ;;  %v2390_v4 = vld [vmem:[%s2575_s16 + $0x30] sm:$0xff]  ;;  %v2389_v8 = vld [vmem:[%s2575_s16 + $0x28] sm:$0xff]  ;;  %v1978_v34 = vor.u32 %v2410_v30, %v1977_v29  ;;  %vm1004_vm2 = vcmask 89088   ;;  %vm1099_vm3 = vcmask 72704  }
  0x10   : > { %344 = vst [vmem:[#allocation2 + $0x30] sm:$0xff] %v2499_v1  ;;  %v2399_v3 = vld [vmem:[%s2575_s16 + $0x78] sm:$0xff]  ;;  %633 = vmatpush.bf16.msra.mxu0 %v2391_v2  ;;  %v2398_v5 = vld [vmem:[%s2575_s16 + $0x70] sm:$0xff]  ;;  %v2397_v9 = vld [vmem:[%s2575_s16 + $0x68] sm:$0xff]  ;;  %vm917_vm4 = vcmask 80896   ;;  %vm926_vm5 = vcmask 523264  }
  0x11   : > { %346 = vst [vmem:[#allocation2 + $0x3c] sm:$0xff] %v2499_v1  ;;  %662 = vmatpush.bf16.msra.mxu1 %v2399_v3  ;;  %v2401_v10 = vld [vmem:[%s2575_s16 + $0x88] sm:$0xff]  ;;  %v2400_v11 = vld [vmem:[%s2575_s16 + $0x80] sm:$0xff]  ;;  %v2387_v20 = vld [vmem:[%s2575_s16 + $0x18] sm:$0xff]  ;;  %vm1202_vm6 = vcmask 7168   ;;  %vm1810_vm7 = vcmask 818176  }
  0x12   : > { %348 = vst [vmem:[#allocation2 + $0x48] sm:$0xff] %v2499_v1  ;;  %2466 = vmatpush.bf16.msra.mxu2 %v2401_v10  ;;  %2467 = vmatpush.bf16.msra.mxu3 %v2401_v10  ;;  %v2388_v14 = vld [vmem:[%s2575_s16 + $0x20] sm:$0xff]  ;;  %v2393_v16 = vld [vmem:[%s2575_s16 + $0x48] sm:$0xff]  ;;  %v2395_v21 = vld [vmem:[%s2575_s16 + $0x58] sm:$0xff]  ;;  %s2383_s19 = sshll.u32 %s3142_s10, 4  ;;  %vm1878_vm8 = vcmask 1024  }
  0x13   : > { %350 = vst [vmem:[#allocation2 + $0x54] sm:$0xff] %v2499_v1  ;;  %v2396_v15 = vld [vmem:[%s2575_s16 + $0x60] sm:$0xff]  ;;  %v2386_v23 = vld [vmem:[%s2575_s16 + $0x10] sm:$0xff]  ;;  %v2385_v26 = vld [vmem:[%s2575_s16 + $0x8] sm:$0xff]  ;;  %s332_s24 = scalar_lea.vmem %s3140_s9, %s2383_s19 }
  0x14   : > { %634 = vmatpush.bf16.msra.mxu0 %v2390_v4  ;;  %v2392_v22 = vld [vmem:[%s2575_s16 + $0x40] sm:$0xff]  ;;  %v2394_v24 = vld [vmem:[%s2575_s16 + $0x50] sm:$0xff]  ;;  %v2403_v28 = vld [vmem:[%s3132_s1 + $0x8] sm:$0xf0] }
  0x15   : > { %663 = vmatpush.bf16.msra.mxu1 %v2398_v5  ;;  %449 = vperm.xlu0 %2488, %v411_v7   ;;  %v2384_v31 = vld [vmem:[%s2575_s16] sm:$0xff]  ;;  %v1947_v33 = vld [vmem:[%s3132_s1 + $0xc] sm:$0xf0]  ;;  %v1946_v35 = vor.u32 %v2403_v28, %v1945_v27  ;;  %v2413_v38 = vld [vmem:[%s3132_s1 + $0x58] sm:$0xf0]  ;;  %s2501_s16 = smov 11  }
  0x16   : > { %2468 = vmatpush.bf16.msra.mxu2 %v2400_v11  ;;  %2469 = vmatpush.bf16.msra.mxu3 %v2400_v11  ;;  %v2402_v32 = vld [vmem:[%s3132_s1 + $0x4] sm:$0xf]  ;;  %v1989_v37 = vld [vmem:[%s3132_s1 + $0x50] sm:$0xf]  ;;  %v1957_v40 = vld [vmem:[%s3132_s1 + $0x18] sm:$0xf] }
  0x17   : > { %439 = vperm.xlu1 %2489, %v409_v17   ;;  %v1950_v36 = vor.u32 %v2402_v32, %v1947_v33  ;;  %v1990_v39 = vor.u32 %v2413_v38, %v1989_v37  ;;  %v2406_v41 = vld [vmem:[%s3132_s1 + $0x20] sm:$0xf0]  ;;  %v2405_v42 = vld [vmem:[%s3132_s1 + $0x1c] sm:$0xf]  ;;  %v1959_v43 = vld [vmem:[%s3132_s1 + $0x24] sm:$0xf0] }
  0x18   : > { %635 = vmatpush.bf16.msra.mxu0 %v2389_v8  ;;  %v1958_v44 = vor.u32 %v2406_v41, %v1957_v40  ;;  %v1962_v45 = vor.u32 %v2405_v42, %v1959_v43  ;;  %v406_v46 = vld [vmem:[%s3133_s2 + $0x10] sm:$0xff]  ;;  %v407_v47 = vld [vmem:[%s3133_s2 + $0x18] sm:$0xff]  ;;  %v1971_v51 = vld [vmem:[%s3132_s1 + $0x3c] sm:$0xf0] }
  0x19   : > { %664 = vmatpush.bf16.msra.mxu1 %v2397_v9  ;;  %2064 = vmatmul.msk.bf16.vlgmr.msra.gmra.mxu2 %vm620_vm0, %v1966_v19  ;;  %v1969_v48 = vld [vmem:[%s3132_s1 + $0x30] sm:$0xf]  ;;  %v2409_v49 = vld [vmem:[%s3132_s1 + $0x38] sm:$0xf0]  ;;  %v2408_v50 = vld [vmem:[%s3132_s1 + $0x34] sm:$0xf] }
  0x1a   : > { %785 = vmatpush.bf16.msrb.mxu3 %v2393_v16  ;;  %424 = vperm.xlu2 %2490, %v406_v46   ;;  %v1970_v52 = vor.u32 %v2409_v49, %v1969_v48  ;;  %v1974_v53 = vor.u32 %v2408_v50, %v1971_v51  ;;  %v1981_v54 = vld [vmem:[%s3132_s1 + $0x48] sm:$0xf]  ;;  %v2412_v55 = vld [vmem:[%s3132_s1 + $0x50] sm:$0xf0]  ;;  %v2411_v56 = vld [vmem:[%s3132_s1 + $0x4c] sm:$0xf] }
  0x1b   : > { %2066 = vmatmul.msk.bf16.vlgmr.msra.gmra.mxu3 %vm620_vm0, %v1990_v39  ;;  %v1983_v57 = vld [vmem:[%s3132_s1 + $0x54] sm:$0xf0]  ;;  %v1982_v58 = vor.u32 %v2412_v55, %v1981_v54  ;;  %v1953_v60 = vld [vmem:[%s3132_s1 + $0x8] sm:$0xf]  ;;  %v2404_v61 = vld [vmem:[%s3132_s1 + $0x10] sm:$0xf0] }
  0x1c   : > { %636 = vmatpush.bf16.msra.mxu0 %v2388_v14  ;;  %v1986_v59 = vor.u32 %v2411_v56, %v1983_v57  ;;  %v1954_v62 = vor.u32 %v2404_v61, %v1953_v60  ;;  %v2129_v1 = vld [vmem:[#allocation2 + $0x30] sm:$0xf]  ;;  %v2423_v2 = vld [vmem:[#allocation2 + $0x38] sm:$0xf0]  ;;  %v2137_v13 = vld [vmem:[#allocation2 + $0x48] sm:$0xf] }
  0x1d   : > { %665 = vmatpush.bf16.msra.mxu1 %v2396_v15  ;;  %414 = vperm.xlu0 %2488, %v404_v18   ;;  %v2696_v3 = vor.u32 %v2423_v2, %v2129_v1  ;;  %v2425_v14 = vld [vmem:[#allocation2 + $0x50] sm:$0xf0] }
  0x1e   : > { %786 = vmatpush.bf16.msrb.mxu3 %v2392_v22  ;;  %v2709_v18 = vor.u32 %v2425_v14, %v2137_v13 }
  0x1f   : > { %419 = vperm.xlu1 %2489, %v405_v25  }
  0x20   : > { %637 = vmatpush.bf16.msra.mxu0 %v2387_v20 }
  0x21   : > { %666 = vmatpush.bf16.msra.mxu1 %v2395_v21 }
  0x22   : > { %429 = vperm.xlu2 %2490, %v407_v47  }
  0x24   : > { %638 = vmatpush.bf16.msra.mxu0 %v2386_v23 }
  0x25   : > { %667 = vmatpush.bf16.msra.mxu1 %v2394_v24 }
  0x27   : > { %909 = vrot.lane.b32.xlu1 %v2696_v3, %s2500_s23 }
  0x28   : > { %639 = vmatpush.bf16.msra.mxu0 %v2385_v26 }
  0x29   : > { %668 = vmatpush.bf16.msra.mxu1 %v2393_v16  ;;  %2065 = vmatmul.msk.bf16.gmra.mxu2 %vm620_vm0, %v1978_v34 }
  0x2a   : > { %913 = vrot.lane.b32.xlu2 %v2709_v18, %s2500_s23 }
  0x2c   : > { %640 = vmatpush.bf16.msra.mxu0 %v2384_v31 }
  0x2d   : > { %669 = vmatpush.bf16.msra.mxu1 %v2392_v22 }
  0x2f   : > { %641 = vmatmul.bf16.vlgmr.msra.gmra.mxu0 %v1946_v35 }
  0x30   : > { %697 = vmatpush.bf16.msrb.mxu0 %v2401_v10  ;;  %670 = vmatmul.bf16.vlgmr.msra.gmra.mxu1 %v1950_v36 }
  0x34   : > { %698 = vmatpush.bf16.msrb.mxu0 %v2400_v11  ;;  %v334_v11 = vld [vmem:[%s3137_s6] sm:$0x1] }
  0x35   : > { %v2707_v16 = vperm.slane %v334_v11, 0 }
  0x3f   : > { %646 = vmatmul.bf16.gmra.mxu0 %v1958_v44 }
  0x40   : > { %675 = vmatmul.bf16.gmra.mxu1 %v1962_v45 }
  0x4f   : > { %651 = vmatmul.bf16.gmra.mxu0 %v1970_v52 }
  0x50   : > { %680 = vmatmul.bf16.gmra.mxu1 %v1974_v53 }
  0x5f   : > { %656 = vmatmul.bf16.gmra.mxu0 %v1982_v58 }
  0x60   : > { %685 = vmatmul.bf16.gmra.mxu1 %v1986_v59 }
  0x6f   : > { %2063 = vmatmul.msk.bf16.vlgmr.msrb.gmra.mxu0 %vm620_vm0, %v1954_v62 }
  0x74   : > { %v425_v7 = vpop.permute.xlu2 %424 }
  0x7c   : > { %v430_v19 = vpop.permute.xlu2 %429 }
  0x7f   : > { %v445_v37 = vpop.permute.xlu0 %444 }
  0x80   : > { %v435_v27 = vpop.permute.xlu1 %434 }
  0x87   : > { %v450_v52 = vpop.permute.xlu0 %449 }
  0x89   : > { %v440_v39 = vpop.permute.xlu1 %439 }
  0x8f   : > { %v415_v1 = vpop.permute.xlu0 %414 }
  0x9c   : > { %v705_v6 = vpop.f32.mrf.mxu2 }
  0x9e   : > { %v715_v58 = vpop.f32.mrf.mxu3 }
  0xa4   : > { %v707_v17 = vpop.f32.mrf.mxu2 }
  0xac   : > { %v2692_v63 = vpop.f32.mrf.mxu0  ;;  %v710_v30 = vpop.f32.mrf.mxu2 }
  0xad   : > { %v2694_v0 = vpop.f32.mrf.mxu1 }
  0xb4   : > { %v2700_v4 = vpop.f32.mrf.mxu0  ;;  %v712_v45 = vpop.f32.mrf.mxu2 }
  0xb5   : > { %v2702_v5 = vpop.f32.mrf.mxu1 }
  0xbc   : > { %v647_v8 = vpop.f32.mrf.mxu0 }
  0xbd   : > { %v676_v9 = vpop.f32.mrf.mxu1  ;;  %v648_v10 = vadd.f32 %v647_v8, %v425_v7 }
  0xbf   : > { %v677_v12 = vadd.f32 %v676_v9, %v648_v10  ;;  %v643_v9 = vadd.f32 %v2692_v63, %v415_v1  ;;  %v2419_v63 = vld [vmem:[#allocation2 + $0x8] sm:$0xf0] }
  0xc1   : > { %v706_v15 = vadd.f32 %v705_v6, %v677_v12  ;;  %v717_v12 = vpop.f32.mrf.mxu3 }
  0xc3   : > { %v722_v20 = vmax.f32 %v706_v15, 0.0 }
  0xc4   : > { %v649_v21 = vpop.f32.mrf.mxu0 }
  0xc5   : > { %v678_v22 = vpop.f32.mrf.mxu1  ;;  %v733_v23 = vmul.f32 %v2707_v16, %v722_v20  ;;  %v650_v24 = vadd.f32 %v649_v21, %v430_v19  ;;  %v672_v19 = vadd.f32 %v2694_v0, %v643_v9  ;;  %v420_v21 = vpop.permute.xlu1 %419  ;;  %v2415_v9 = vld [vmem:[%s3136_s5 + $0x8] sm:$0xff] }
  0xc7   : > { %v810_v25 = vpack.c.bf16 %v733_v23, %v733_v23  ;;  %v679_v26 = vadd.f32 %v678_v22, %v650_v24  ;;  %v2113_v23 = vld [vmem:[#allocation2] sm:$0xf] }
  0xc9   : > { %818 = vst.msk [vmem:[#allocation2 + $0x1c] sm:$0xf] %vm336_vm1, %v810_v25  ;;  %v708_v28 = vadd.f32 %v707_v17, %v679_v26  ;;  %v645_v26 = vadd.f32 %v2700_v4, %v420_v21  ;;  %v1739_v21 = vld [vmem:[%s3135_s4 + $0x8] sm:$0xff] }
  0xcb   : > { %v723_v29 = vmax.f32 %v708_v28, 0.0 }
  0xcc   : > { %v652_v31 = vpop.f32.mrf.mxu0 }
  0xcd   : > { %v681_v32 = vpop.f32.mrf.mxu1  ;;  %v734_v33 = vmul.f32 %v2707_v16, %v723_v29  ;;  %v653_v34 = vadd.f32 %v652_v31, %v435_v27  ;;  %v2735_v29 = vor.u32 %v2419_v63, %v2113_v23 }
  0xcf   : > { %v811_v35 = vpack.c.bf16 %v734_v33, %v734_v33  ;;  %v682_v36 = vadd.f32 %v681_v32, %v653_v34 }
  0xd0   : > { %v2420_v48 = vld [vmem:[#allocation2 + $0x1c] sm:$0xf] }
  0xd1   : > { %819 = vst.msk [vmem:[#allocation2 + $0x28] sm:$0xf] %vm336_vm1, %v811_v35  ;;  %v711_v38 = vadd.f32 %v710_v30, %v682_v36  ;;  %v674_v30 = vadd.f32 %v2702_v5, %v645_v26  ;;  %v2121_v5 = vld [vmem:[#allocation2 + $0x18] sm:$0xf] }
  0xd3   : > { %v724_v40 = vmax.f32 %v711_v38, 0.0 }
  0xd4   : > { %v654_v41 = vpop.f32.mrf.mxu0 }
  0xd5   : > { %v683_v42 = vpop.f32.mrf.mxu1  ;;  %v735_v43 = vmul.f32 %v2707_v16, %v724_v40  ;;  %v655_v44 = vadd.f32 %v654_v41, %v440_v39  ;;  %v2421_v39 = vld [vmem:[#allocation2 + $0x20] sm:$0xf0] }
  0xd6   : > { %v2122_v40 = vor.u32 %v2421_v39, %v2121_v5  ;;  %v2431_v5 = vld [vmem:[%s3134_s3 + $0x28] sm:$0xff] }
  0xd7   : > { %v812_v46 = vpack.c.bf16 %v735_v43, %v735_v43  ;;  %v684_v47 = vadd.f32 %v683_v42, %v655_v44 }
  0xd8   : > { %v2123_v49 = vld [vmem:[#allocation2 + $0x24] sm:$0xf0] }
  0xd9   : > { %820 = vst.msk [vmem:[#allocation2 + $0x34] sm:$0xf] %vm336_vm1, %v812_v46  ;;  %v713_v50 = vadd.f32 %v712_v45, %v684_v47  ;;  %v2719_v51 = vor.u32 %v2420_v48, %v2123_v49  ;;  %v2443_v47 = vld [vmem:[#allocation2 + $0x24] sm:$0xf0]  ;;  %v2253_v48 = vld [vmem:[#allocation2 + $0x1c] sm:$0xf] }
  0xda   : > { %v2773_v49 = vor.u32 %v2443_v47, %v2253_v48  ;;  %v2432_v47 = vld [vmem:[%s3134_s3 + $0x30] sm:$0xff] }
  0xdb   : > { %v725_v53 = vmax.f32 %v713_v50, 0.0  ;;  %907 = vrot.lane.b32.xlu1 %v2719_v51, %s2500_s23 }
  0xdc   : > { %v657_v54 = vpop.f32.mrf.mxu0 }
  0xdd   : > { %v686_v55 = vpop.f32.mrf.mxu1  ;;  %v736_v56 = vmul.f32 %v2707_v16, %v725_v53  ;;  %v658_v57 = vadd.f32 %v657_v54, %v445_v37 }
  0xdf   : > { %v813_v59 = vpack.c.bf16 %v736_v56, %v736_v56  ;;  %v687_v60 = vadd.f32 %v686_v55, %v658_v57 }
  0xe0   : > { %v2422_v13 = vld [vmem:[#allocation2 + $0x34] sm:$0xf] }
  0xe1   : > { %821 = vst.msk [vmem:[#allocation2 + $0x40] sm:$0xf] %vm336_vm1, %v813_v59  ;;  %v716_v61 = vadd.f32 %v715_v58, %v687_v60  ;;  %v2414_v59 = vld [vmem:[%s3136_s5] sm:$0xff]  ;;  %v1743_v60 = vld [vmem:[%s3135_s4 + $0x28] sm:$0xff] }
  0xe2   : > { %2083 = vmatmul.msk.bf16.vlgmr.msrb.gmra.mxu3 %vm620_vm0, %v2414_v59  ;;  %v2434_v59 = vld [vmem:[%s3134_s3 + $0x40] sm:$0xff] }
  0xe3   : > { %v726_v62 = vmax.f32 %v716_v61, 0.0  ;;  %1000 = vrot.lane.b32.xlu1 %v2709_v18, %s2501_s16 }
  0xe4   : > { %v659_v2 = vpop.f32.mrf.mxu0 }
  0xe5   : > { %v737_v6 = vmul.f32 %v2707_v16, %v726_v62  ;;  %v660_v7 = vadd.f32 %v659_v2, %v450_v52  ;;  %v688_v8 = vpop.f32.mrf.mxu1  ;;  %v2257_v52 = vld [vmem:[#allocation2 + $0x34] sm:$0xf] }
  0xe6   : > { %v1740_v2 = vld [vmem:[%s3135_s4 + $0x10] sm:$0xff] }
  0xe7   : > { %v814_v10 = vpack.c.bf16 %v737_v6, %v737_v6  ;;  %v689_v11 = vadd.f32 %v688_v8, %v660_v7  ;;  %v1745_v8 = vld [vmem:[%s3135_s4 + $0x38] sm:$0xff] }
  0xe8   : > { %v2131_v14 = vld [vmem:[#allocation2 + $0x3c] sm:$0xf0] }
  0xe9   : > { %822 = vst.msk [vmem:[#allocation2 + $0x4c] sm:$0xf] %vm336_vm1, %v814_v10  ;;  %v718_v15 = vadd.f32 %v717_v12, %v689_v11  ;;  %v2134_v17 = vor.u32 %v2422_v13, %v2131_v14  ;;  %v2444_v50 = vld [vmem:[#allocation2 + $0x3c] sm:$0xf0] }
  0xea   : > { %v1742_v13 = vld [vmem:[%s3135_s4 + $0x20] sm:$0xff] }
  0xeb   : > { %v727_v20 = vmax.f32 %v718_v15, 0.0  ;;  %911 = vrot.lane.b32.xlu2 %v2134_v17, %s2500_s23  ;;  %998 = vrot.lane.b32.xlu1 %v2134_v17, %s2501_s16 }
  0xec   : > { %v700_v22 = vpop.f32.mrf.mxu0 }
  0xed   : > { %v738_v24 = vmul.f32 %v2707_v16, %v727_v20  ;;  %v701_v25 = vadd.f32 %v700_v22, %v672_v19  ;;  %v2416_v20 = vld [vmem:[%s3136_s5 + $0x10] sm:$0xff] }
  0xef   : > { %v815_v27 = vpack.c.bf16 %v738_v24, %v738_v24  ;;  %v720_v28 = vmax.f32 %v701_v25, 0.0 }
  0xf0   : > { %v2424_v34 = vld [vmem:[#allocation2 + $0x4c] sm:$0xf] }
  0xf1   : > { %823 = vst.msk [vmem:[#allocation2 + $0x58] sm:$0xf] %vm336_vm1, %v815_v27  ;;  %v731_v0 = vmul.f32 %v2707_v16, %v720_v28  ;;  %v2261_v45 = vld [vmem:[#allocation2 + $0x4c] sm:$0xf]  ;;  %v1744_v27 = vld [vmem:[%s3135_s4 + $0x30] sm:$0xff] }
  0xf2   : > { %2084 = vmatmul.msk.bf16.gmra.mxu3 %vm620_vm0, %v2415_v9 }
  0xf3   : > { %v808_v31 = vpack.c.bf16 %v731_v0, %v731_v0  ;;  %901 = vrot.lane.b32.xlu2 %v2735_v29, %s2500_s23  ;;  %1095 = vrot.lane.b32.xlu1 %v2709_v18, %s2502_s26  ;;  %v2430_v0 = vld [vmem:[%s3134_s3 + $0x20] sm:$0xff] }
  0xf4   : > { %v702_v32 = vpop.f32.mrf.mxu0 }
  0xf5   : > { %816 = vst.msk [vmem:[#allocation2 + $0x4] sm:$0xf] %vm336_vm1, %v808_v31  ;;  %v703_v4 = vadd.f32 %v702_v32, %v674_v30  ;;  %v2417_v31 = vld [vmem:[%s3136_s5 + $0x18] sm:$0xff] }
  0xf6   : > { %v1741_v32 = vld [vmem:[%s3135_s4 + $0x18] sm:$0xff] }
  0xf7   : > { %v721_v33 = vmax.f32 %v703_v4, 0.0 }
  0xf8   : > { %v2139_v35 = vld [vmem:[#allocation2 + $0x54] sm:$0xf0] }
  0xf9   : > { %v732_v36 = vmul.f32 %v2707_v16, %v721_v33  ;;  %v2142_v37 = vor.u32 %v2424_v34, %v2139_v35  ;;  %v2445_v44 = vld [vmem:[#allocation2 + $0x54] sm:$0xf0]  ;;  %v1738_v35 = vld [vmem:[%s3135_s4] sm:$0xff] }
  0xfa   : > { %v2766_v46 = vor.u32 %v2445_v44, %v2261_v45 }
  0xfb   : > { %v809_v38 = vpack.c.bf16 %v732_v36, %v732_v36  ;;  %915 = vrot.lane.b32.xlu0 %v2142_v37, %s2500_s23  ;;  %1002 = vrot.lane.b32.xlu2 %v2142_v37, %s2501_s16 }
  0xfc   : > { %1200 = vrot.lane.b32.xlu1 %v2142_v37, %s2503_s27  ;;  %v2418_v42 = vld [vmem:[#allocation2 + $0x4] sm:$0xf] }
  0xfd   : > { %817 = vst.msk [vmem:[#allocation2 + $0x10] sm:$0xf] %vm336_vm1, %v809_v38  ;;  %v2249_v55 = vld [vmem:[#allocation2 + $0x4] sm:$0xf] }
 0x102   : > { %2085 = vmatmul.msk.bf16.gmra.mxu3 %vm620_vm0, %v2416_v20  ;;  %v2436_v20 = vld [vmem:[%s3134_s3 + $0x50] sm:$0xff] }
 0x103   : > { %905 = vrot.lane.b32.xlu0 %v2122_v40, %s2500_s23  ;;  %992 = vrot.lane.b32.xlu2 %v2122_v40, %s2501_s16 }
 0x104   : > { %1091 = vrot.lane.b32.xlu1 %v2696_v3, %s2502_s26  ;;  %v2115_v41 = vld [vmem:[#allocation2 + $0xc] sm:$0xf0] }
 0x105   : > { %v2118_v43 = vor.u32 %v2418_v42, %v2115_v41  ;;  %v2442_v54 = vld [vmem:[#allocation2 + $0xc] sm:$0xf0] }
 0x106   : > { %v2798_v56 = vor.u32 %v2442_v54, %v2249_v55  ;;  %v2426_v54 = vld [vmem:[%s3134_s3] sm:$0xff] }
 0x10b   : > { %1097 = vrot.lane.b32.xlu2 %v2142_v37, %s2502_s26  ;;  %903 = vrot.lane.b32.xlu0 %v2118_v43, %s2500_s23 }
 0x10c   : > { %1196 = vrot.lane.b32.xlu1 %v2134_v17, %s2503_s27 }
 0x112   : > { %2086 = vmatmul.msk.bf16.gmra.mxu3 %vm620_vm0, %v2417_v31  ;;  %v2454_v31 = vld [vmem:[%s3134_s3 + $0xc0] sm:$0xff] }
 0x113   : > { %988 = vrot.lane.b32.xlu2 %v2735_v29, %s2501_s16  ;;  %996 = vrot.lane.b32.xlu0 %v2696_v3, %s2501_s16 }
 0x114   : > { %1190 = vrot.lane.b32.xlu1 %v2122_v40, %s2503_s27 }
 0x11b   : > { %1093 = vrot.lane.b32.xlu2 %v2134_v17, %s2502_s26  ;;  %994 = vrot.lane.b32.xlu0 %v2719_v51, %s2501_s16 }
 0x11c   : > { %1085 = vrot.lane.b32.xlu1 %v2118_v43, %s2502_s26 }
 0x123   : > { %1087 = vrot.lane.b32.xlu2 %v2122_v40, %s2502_s26  ;;  %1198 = vrot.lane.b32.xlu0 %v2709_v18, %s2503_s27  ;;  %v2781_v18 = vor.u32 %v2444_v50, %v2257_v52 }
 0x124   : > { %1405 = vrot.lane.b32.xlu1 %v2766_v46, %s2504_s28 }
 0x12b   : > { %1192 = vrot.lane.b32.xlu2 %v2719_v51, %s2503_s27  ;;  %1194 = vrot.lane.b32.xlu0 %v2696_v3, %s2503_s27  ;;  %v914_v3 = vpop.permute.xlu2 %913 }
 0x12c   : > { %1401 = vrot.lane.b32.xlu1 %v2773_v49, %s2504_s28 }
 0x133   : > { %1186 = vrot.lane.b32.xlu2 %v2735_v29, %s2503_s27  ;;  %1089 = vrot.lane.b32.xlu0 %v2719_v51, %s2502_s26  ;;  %v910_v51 = vpop.permute.xlu1 %909 }
 0x134   : > { %1673 = vrot.lane.b32.xlu1 %v2781_v18, %s2505_s29 }
 0x13b   : > { %1403 = vrot.lane.b32.xlu2 %v2781_v18, %s2504_s28  ;;  %990 = vrot.lane.b32.xlu0 %v2118_v43, %s2501_s16 }
 0x13c   : > { %1583 = vrot.lane.b32.xlu1 %v2781_v18, %s2506_s11 }
 0x143   : > { %1495 = vrot.lane.b32.xlu2 %v2766_v46, %s2507_s12  ;;  %1083 = vrot.lane.b32.xlu0 %v2735_v29, %s2502_s26 }
 0x144   : > { %1581 = vrot.lane.b32.xlu1 %v2773_v49, %s2506_s11 }
 0x145   : > { %v912_v53 = vpop.permute.xlu2 %911 }
 0x146   : > { %v920_v22 = vsel %vm917_vm4, %v910_v51, %v912_v53  ;;  %v2433_v53 = vld [vmem:[%s3134_s3 + $0x38] sm:$0xff] }
 0x14b   : > { %1671 = vrot.lane.b32.xlu2 %v2773_v49, %s2505_s29  ;;  %1188 = vrot.lane.b32.xlu0 %v2118_v43, %s2503_s27 }
 0x14c   : > { %1579 = vrot.lane.b32.xlu1 %v2798_v56, %s2506_s11 }
 0x14d   : > { %v902_v57 = vpop.permute.xlu2 %901  ;;  %v908_v58 = vpop.permute.xlu1 %907 }
 0x153   : > { %1399 = vrot.lane.b32.xlu2 %v2798_v56, %s2504_s28  ;;  %1675 = vrot.lane.b32.xlu0 %v2766_v46, %s2505_s29 }
 0x154   : > { %1773 = vperm.xlu1 %2489, %v1743_v60  }
 0x155   : > { %v1003_v61 = vpop.permute.xlu2 %1002  ;;  %v1001_v62 = vpop.permute.xlu1 %1000 }
 0x156   : > { %v1008_v1 = vsel %vm1004_vm2, %v1001_v62, %v1003_v61 }
 0x157   : > { %1029 = vmatpush.bf16.msra.mxu3 %v1008_v1 }
 0x15b   : > { %1669 = vrot.lane.b32.xlu2 %v2798_v56, %s2505_s29  ;;  %1585 = vrot.lane.b32.xlu0 %v2766_v46, %s2506_s11 }
 0x15c   : > { %1758 = vperm.xlu1 %2489, %v1740_v2   ;;  %v2427_v2 = vld [vmem:[%s3134_s3 + $0x8] sm:$0xff] }
 0x15d   : > { %v993_v6 = vpop.permute.xlu2 %992  ;;  %v999_v7 = vpop.permute.xlu1 %998 }
 0x163   : > { %1783 = vperm.xlu2 %2490, %v1745_v8   ;;  %1493 = vrot.lane.b32.xlu0 %v2781_v18, %s2507_s12 }
 0x165   : > { %v1098_v10 = vpop.permute.xlu2 %1097  ;;  %v1096_v11 = vpop.permute.xlu1 %1095 }
 0x166   : > { %v1103_v12 = vsel %vm1099_vm3, %v1096_v11, %v1098_v10  ;;  %v2435_v10 = vld [vmem:[%s3134_s3 + $0x48] sm:$0xff] }
 0x167   : > { %1124 = vmatpush.bf16.msra.mxu0 %v1103_v12  ;;  %v2428_v12 = vld [vmem:[%s3134_s3 + $0x10] sm:$0xff] }
 0x16b   : > { %1768 = vperm.xlu2 %2490, %v1742_v13   ;;  %1491 = vrot.lane.b32.xlu0 %v2773_v49, %s2507_s12  ;;  %v2439_v13 = vld [vmem:[%s3134_s3 + $0x68] sm:$0xff] }
 0x16d   : > { %v916_v14 = vpop.permute.xlu0 %915  ;;  %v2837_v15 = vpop.permute.xlu2 %988 }
 0x16e   : > { %v1201_v17 = vpop.permute.xlu1 %1200  ;;  %v921_v19 = vsel %vm917_vm4, %v914_v3, %v916_v14  ;;  %v2447_v14 = vld [vmem:[%s3134_s3 + $0x88] sm:$0xff] }
 0x16f   : > { %943 = vmatpush.bf16.msrb.mxu2 %v921_v19 }
 0x173   : > { %944 = vmatpush.bf16.msrb.mxu2 %v920_v22  ;;  %1753 = vperm.xlu2 %2490, %v1739_v21  }
 0x174   : > { %1489 = vrot.lane.b32.xlu0 %v2798_v56, %s2507_s12 }
 0x175   : > { %v906_v23 = vpop.permute.xlu0 %905  ;;  %v1094_v63 = vpop.permute.xlu2 %1093 }
 0x176   : > { %v1092_v24 = vpop.permute.xlu1 %1091  ;;  %v919_v25 = vsel %vm917_vm4, %v906_v23, %v908_v58  ;;  %v2429_v23 = vld [vmem:[%s3134_s3 + $0x18] sm:$0xff] }
 0x177   : > { %945 = vmatpush.bf16.msrb.mxu2 %v919_v25  ;;  %v1102_v26 = vsel %vm1099_vm3, %v1092_v24, %v1094_v63  ;;  %v2440_v63 = vld [vmem:[%s3134_s3 + $0x70] sm:$0xff]  ;;  %v2948_v25 = vpop.f32.mrf.mxu3 }
 0x178   : > { %1125 = vmatpush.bf16.msra.mxu0 %v1102_v26  ;;  %v2448_v24 = vld [vmem:[%s3134_s3 + $0x90] sm:$0xff] }
 0x17c   : > { %1778 = vperm.xlu0 %2488, %v1744_v27   ;;  %v2437_v27 = vld [vmem:[%s3134_s3 + $0x58] sm:$0xff] }
 0x17d   : > { %v904_v28 = vpop.permute.xlu0 %903  ;;  %v1088_v30 = vpop.permute.xlu2 %1087 }
 0x17e   : > { %v918_v29 = vsel %vm917_vm4, %v902_v57, %v904_v28  ;;  %v1197_v36 = vpop.permute.xlu1 %1196  ;;  %v2441_v28 = vld [vmem:[%s3134_s3 + $0x78] sm:$0xff] }
 0x17f   : > { %946 = vmatpush.bf16.msrb.mxu2 %v918_v29  ;;  %v2450_v29 = vld [vmem:[%s3134_s3 + $0xa0] sm:$0xff] }
 0x182   : > { %2143 = vmatmul.msk.bf16.vlgmr.msrb.gmra.mxu2 %vm926_vm5, %v2430_v0  ;;  %v2449_v0 = vld [vmem:[%s3134_s3 + $0x98] sm:$0xff] }
 0x183   : > { %1337 = vmatpush.bf16.msra.mxu2 %v2766_v46 }
 0x184   : > { %1763 = vperm.xlu0 %2488, %v1741_v32  }
 0x185   : > { %v997_v4 = vpop.permute.xlu0 %996  ;;  %v1193_v34 = vpop.permute.xlu2 %1192 }
 0x186   : > { %v1007_v33 = vsel %vm1004_vm2, %v997_v4, %v999_v7  ;;  %v1191_v40 = vpop.permute.xlu1 %1190  ;;  %v2446_v7 = vld [vmem:[%s3134_s3 + $0x80] sm:$0xff]  ;;  %v2451_v4 = vld [vmem:[%s3134_s3 + $0xa8] sm:$0xff] }
 0x187   : > { %1338 = vmatpush.bf16.msra.mxu2 %v2781_v18  ;;  %1030 = vmatpush.bf16.msra.mxu3 %v1007_v33  ;;  %v1204_v48 = vsel %vm1202_vm6, %v1191_v40, %v1193_v34  ;;  %v2458_v33 = vld [vmem:[%s3134_s3 + $0xe0] sm:$0xff]  ;;  %v2459_v40 = vld [vmem:[%s3134_s3 + $0xe8] sm:$0xff] }
 0x188   : > { %v2462_v34 = vld [vmem:[%s3134_s3 + $0x100] sm:$0xff] }
 0x18b   : > { %1339 = vmatpush.bf16.msra.mxu2 %v2773_v49 }
 0x18c   : > { %1748 = vperm.xlu0 %2488, %v1738_v35  }
 0x18d   : > { %v995_v37 = vpop.permute.xlu0 %994  ;;  %v1187_v39 = vpop.permute.xlu2 %1186 }
 0x18e   : > { %v1006_v38 = vsel %vm1004_vm2, %v993_v6, %v995_v37  ;;  %v1086_v45 = vpop.permute.xlu1 %1085  ;;  %v2438_v6 = vld [vmem:[%s3134_s3 + $0x60] sm:$0xff]  ;;  %v2455_v37 = vld [vmem:[%s3134_s3 + $0xc8] sm:$0xff] }
 0x18f   : > { %1340 = vmatpush.bf16.msra.mxu2 %v2798_v56  ;;  %1031 = vmatpush.bf16.msra.mxu3 %v1006_v38 }
 0x192   : > { %2144 = vmatmul.msk.bf16.gmra.mxu2 %vm926_vm5, %v2431_v5 }
 0x195   : > { %v1199_v41 = vpop.permute.xlu0 %1198  ;;  %v1404_v43 = vpop.permute.xlu2 %1403 }
 0x196   : > { %v1206_v42 = vsel %vm1202_vm6, %v1199_v41, %v1201_v17  ;;  %v1406_v18 = vpop.permute.xlu1 %1405  ;;  %v2463_v41 = vld [vmem:[%s3134_s3 + $0x108] sm:$0xff] }
 0x197   : > { %1227 = vmatpush.bf16.msrb.mxu1 %v1206_v42 }
 0x19d   : > { %v1195_v44 = vpop.permute.xlu0 %1194  ;;  %v1496_v52 = vpop.permute.xlu2 %1495 }
 0x19e   : > { %v1205_v46 = vsel %vm1202_vm6, %v1195_v44, %v1197_v36  ;;  %v1402_v56 = vpop.permute.xlu1 %1401 }
 0x19f   : > { %1228 = vmatpush.bf16.msrb.mxu1 %v1205_v46  ;;  %v2453_v46 = vld [vmem:[%s3134_s3 + $0xb8] sm:$0xff] }
 0x1a2   : > { %2145 = vmatmul.msk.bf16.gmra.mxu2 %vm926_vm5, %v2432_v47  ;;  %v2460_v47 = vld [vmem:[%s3134_s3 + $0xf0] sm:$0xff] }
 0x1a3   : > { %1229 = vmatpush.bf16.msrb.mxu1 %v1204_v48  ;;  %v2464_v48 = vld [vmem:[%s3134_s3 + $0x110] sm:$0xff] }
 0x1a5   : > { %v1090_v49 = vpop.permute.xlu0 %1089  ;;  %v1672_v55 = vpop.permute.xlu2 %1671 }
 0x1a6   : > { %v1101_v50 = vsel %vm1099_vm3, %v1088_v30, %v1090_v49  ;;  %v1674_v61 = vpop.permute.xlu1 %1673  ;;  %v2963_v30 = vpop.f32.mrf.mxu3 }
 0x1a7   : > { %1126 = vmatpush.bf16.msra.mxu0 %v1101_v50 }
 0x1ad   : > { %v991_v3 = vpop.permute.xlu0 %990  ;;  %v1400_v60 = vpop.permute.xlu2 %1399 }
 0x1ae   : > { %v1005_v51 = vsel %vm1004_vm2, %v2837_v15, %v991_v3  ;;  %v1584_v9 = vpop.permute.xlu1 %1583  ;;  %v2971_v32 = vpop.f32.mrf.mxu3 }
 0x1af   : > { %1032 = vmatpush.bf16.msra.mxu3 %v1005_v51  ;;  %v2461_v51 = vld [vmem:[%s3134_s3 + $0xf8] sm:$0xff] }
 0x1b2   : > { %2146 = vmatmul.msk.bf16.gmra.mxu2 %vm926_vm5, %v2433_v53  ;;  %2163 = vmatmul.msk.bf16.vlgmr.msra.gmra.mxu3 %vm926_vm5, %v2426_v54  ;;  %v2465_v53 = vld [vmem:[%s3134_s3 + $0x118] sm:$0xff] }
 0x1b3   : > { %1427 = vmatpush.bf16.msrb.mxu3 %v1406_v18 }
 0x1b5   : > { %v1084_v57 = vpop.permute.xlu0 %1083  ;;  %v1670_v17 = vpop.permute.xlu2 %1669 }
 0x1b6   : > { %v1100_v58 = vsel %vm1099_vm3, %v1084_v57, %v1086_v45  ;;  %v1582_v15 = vpop.permute.xlu1 %1581  ;;  %v2986_v35 = vpop.f32.mrf.mxu3 }
 0x1b7   : > { %1428 = vmatpush.bf16.msrb.mxu3 %v1404_v43  ;;  %1127 = vmatpush.bf16.msra.mxu0 %v1100_v58  ;;  %v2456_v43 = vld [vmem:[%s3134_s3 + $0xd0] sm:$0xff] }
 0x1ba   : > { %2191 = vmatmul.msk.bf16.vlgmr.msra.gmra.mxu0 %vm926_vm5, %v2434_v59 }
 0x1bb   : > { %1429 = vmatpush.bf16.msrb.mxu3 %v1402_v56  ;;  %1517 = vmatpush.bf16.msrb.mxu0 %v1496_v52  ;;  %v2457_v52 = vld [vmem:[%s3134_s3 + $0xd8] sm:$0xff] }
 0x1bd   : > { %v1189_v62 = vpop.permute.xlu0 %1188 }
 0x1be   : > { %v1203_v1 = vsel %vm1202_vm6, %v1187_v39, %v1189_v62  ;;  %v1580_v21 = vpop.permute.xlu1 %1579  ;;  %v2992_v5 = vpop.f32.mrf.mxu3  ;;  %v2452_v39 = vld [vmem:[%s3134_s3 + $0xb0] sm:$0xff] }
 0x1bf   : > { %1430 = vmatpush.bf16.msrb.mxu3 %v1400_v60  ;;  %1230 = vmatpush.bf16.msrb.mxu1 %v1203_v1 }
 0x1c2   : > { %2164 = vmatmul.msk.bf16.gmra.mxu3 %vm926_vm5, %v2427_v2  ;;  %2219 = vmatmul.msk.bf16.vlgmr.msrb.gmra.mxu1 %vm926_vm5, %v2438_v6 }
 0x1c3   : > { %2263 = vmatmul.msk.bf16.vlgmr.msra.gmra.mxu2 %vm926_vm5, %v2446_v7 }
 0x1c5   : > { %v1676_v8 = vpop.permute.xlu0 %1675 }
 0x1c6   : > { %1697 = vmatpush.bf16.msrb.mxu2 %v1676_v8  ;;  %v3009_v44 = vpop.f32.mrf.mxu3 }
 0x1ca   : > { %2192 = vmatmul.msk.bf16.gmra.mxu0 %vm926_vm5, %v2435_v10  ;;  %1698 = vmatpush.bf16.msrb.mxu2 %v1674_v61 }
 0x1cd   : > { %v1586_v11 = vpop.permute.xlu0 %1585 }
 0x1ce   : > { %1607 = vmatpush.bf16.msra.mxu1 %v1586_v11  ;;  %1699 = vmatpush.bf16.msrb.mxu2 %v1672_v55  ;;  %v3021_v49 = vpop.f32.mrf.mxu3 }
 0x1d2   : > { %2165 = vmatmul.msk.bf16.gmra.mxu3 %vm926_vm5, %v2428_v12  ;;  %2220 = vmatmul.msk.bf16.gmra.mxu1 %vm926_vm5, %v2439_v13 }
 0x1d3   : > { %2264 = vmatmul.msk.bf16.gmra.mxu2 %vm926_vm5, %v2447_v14  ;;  %1608 = vmatpush.bf16.msra.mxu1 %v1584_v9 }
 0x1d4   : > { %1700 = vmatpush.bf16.msrb.mxu2 %v1670_v17 }
 0x1d5   : > { %v1494_v19 = vpop.permute.xlu0 %1493 }
 0x1d6   : > { %1518 = vmatpush.bf16.msrb.mxu0 %v1494_v19  ;;  %v3032_v18 = vpop.f32.mrf.mxu3 }
 0x1d7   : > { %1609 = vmatpush.bf16.msra.mxu1 %v1582_v15 }
 0x1da   : > { %2193 = vmatmul.msk.bf16.gmra.mxu0 %vm926_vm5, %v2436_v20 }
 0x1db   : > { %1610 = vmatpush.bf16.msra.mxu1 %v1580_v21 }
 0x1dd   : > { %v1492_v22 = vpop.permute.xlu0 %1491 }
 0x1de   : > { %1519 = vmatpush.bf16.msrb.mxu0 %v1492_v22 }
 0x1e2   : > { %2166 = vmatmul.msk.bf16.gmra.mxu3 %vm926_vm5, %v2429_v23  ;;  %2221 = vmatmul.msk.bf16.gmra.mxu1 %vm926_vm5, %v2440_v63 }
 0x1e3   : > { %2265 = vmatmul.msk.bf16.gmra.mxu2 %vm926_vm5, %v2448_v24 }
 0x1e6   : > { %v1490_v26 = vpop.permute.xlu0 %1489 }
 0x1e7   : > { %1520 = vmatpush.bf16.msrb.mxu0 %v1490_v26 }
 0x1ea   : > { %2194 = vmatmul.msk.bf16.gmra.mxu0 %vm926_vm5, %v2437_v27 }
 0x1f2   : > { %2222 = vmatmul.msk.bf16.gmra.mxu1 %vm926_vm5, %v2441_v28  ;;  %2291 = vmatmul.msk.bf16.vlgmr.msrb.gmra.mxu3 %vm926_vm5, %v2450_v29 }
 0x1f3   : > { %2266 = vmatmul.msk.bf16.gmra.mxu2 %vm926_vm5, %v2449_v0 }
 0x1fa   : > { %2319 = vmatmul.msk.bf16.vlgmr.msrb.gmra.mxu0 %vm926_vm5, %v2454_v31 }
 0x202   : > { %2292 = vmatmul.msk.bf16.gmra.mxu3 %vm926_vm5, %v2451_v4  ;;  %2347 = vmatmul.msk.bf16.vlgmr.msra.gmra.mxu1 %vm926_vm5, %v2458_v33 }
 0x203   : > { %2375 = vmatmul.msk.bf16.vlgmr.msrb.gmra.mxu2 %vm926_vm5, %v2462_v34 }
 0x205   : > { %v948_v36 = vpop.f32.mrf.mxu2 }
 0x20a   : > { %2320 = vmatmul.msk.bf16.gmra.mxu0 %vm926_vm5, %v2455_v37 }
 0x20d   : > { %v950_v38 = vpop.f32.mrf.mxu2 }
 0x212   : > { %2293 = vmatmul.msk.bf16.gmra.mxu3 %vm926_vm5, %v2452_v39  ;;  %2348 = vmatmul.msk.bf16.gmra.mxu1 %vm926_vm5, %v2459_v40 }
 0x213   : > { %2376 = vmatmul.msk.bf16.gmra.mxu2 %vm926_vm5, %v2463_v41 }
 0x215   : > { %v953_v42 = vpop.f32.mrf.mxu2 }
 0x21a   : > { %2321 = vmatmul.msk.bf16.gmra.mxu0 %vm926_vm5, %v2456_v43 }
 0x21d   : > { %v955_v45 = vpop.f32.mrf.mxu2 }
 0x222   : > { %2294 = vmatmul.msk.bf16.gmra.mxu3 %vm926_vm5, %v2453_v46  ;;  %2349 = vmatmul.msk.bf16.gmra.mxu1 %vm926_vm5, %v2460_v47 }
 0x223   : > { %2377 = vmatmul.msk.bf16.gmra.mxu2 %vm926_vm5, %v2464_v48 }
 0x225   : > { %v3026_v50 = vpop.f32.mrf.mxu2 }
 0x22a   : > { %2322 = vmatmul.msk.bf16.gmra.mxu0 %vm926_vm5, %v2457_v52 }
 0x22d   : > { %v3034_v3 = vpop.f32.mrf.mxu2 }
 0x232   : > { %2350 = vmatmul.msk.bf16.gmra.mxu1 %vm926_vm5, %v2461_v51 }
 0x233   : > { %2378 = vmatmul.msk.bf16.gmra.mxu2 %vm926_vm5, %v2465_v53 }
 0x235   : > { %v3044_v54 = vpop.f32.mrf.mxu2  ;;  %v1034_v55 = vpop.f32.mrf.mxu3 }
 0x236   : > { %v1035_v56 = vadd.f32 %v1034_v55, %v948_v36 }
 0x237   : > { %v1129_v57 = vpop.f32.mrf.mxu0 }
 0x238   : > { %v1149_v58 = vadd.f32 %v1129_v57, %v1035_v56 }
 0x23d   : > { %v3046_v59 = vpop.f32.mrf.mxu2  ;;  %v1036_v60 = vpop.f32.mrf.mxu3 }
 0x23e   : > { %v1037_v61 = vadd.f32 %v1036_v60, %v950_v38 }
 0x23f   : > { %v1131_v62 = vpop.f32.mrf.mxu0  ;;  %v1232_v1 = vpop.f32.mrf.mxu1 }
 0x240   : > { %v1150_v2 = vadd.f32 %v1131_v62, %v1037_v61  ;;  %v1252_v6 = vadd.f32 %v1232_v1, %v1149_v58 }
 0x245   : > { %v1039_v7 = vpop.f32.mrf.mxu3 }
 0x246   : > { %v1040_v8 = vadd.f32 %v1039_v7, %v953_v42  ;;  %v1342_v9 = vpop.f32.mrf.mxu2 }
 0x247   : > { %v1362_v10 = vadd.f32 %v1342_v9, %v1252_v6  ;;  %v1134_v11 = vpop.f32.mrf.mxu0  ;;  %v1234_v12 = vpop.f32.mrf.mxu1 }
 0x248   : > { %v1151_v13 = vadd.f32 %v1134_v11, %v1040_v8  ;;  %v1253_v14 = vadd.f32 %v1234_v12, %v1150_v2 }
 0x24d   : > { %v1041_v15 = vpop.f32.mrf.mxu3 }
 0x24e   : > { %v1042_v17 = vadd.f32 %v1041_v15, %v955_v45  ;;  %v1344_v19 = vpop.f32.mrf.mxu2 }
 0x24f   : > { %v1363_v20 = vadd.f32 %v1344_v19, %v1253_v14  ;;  %v1136_v21 = vpop.f32.mrf.mxu0  ;;  %v1237_v22 = vpop.f32.mrf.mxu1 }
 0x250   : > { %v1152_v23 = vadd.f32 %v1136_v21, %v1042_v17  ;;  %v1254_v63 = vadd.f32 %v1237_v22, %v1151_v13 }
 0x255   : > { %v1044_v24 = vpop.f32.mrf.mxu3 }
 0x256   : > { %v1347_v26 = vpop.f32.mrf.mxu2  ;;  %v1045_v11 = vadd.f32 %v1044_v24, %v3026_v50 }
 0x257   : > { %v3048_v27 = vadd.f32 %v1347_v26, %v1254_v63  ;;  %v1139_v28 = vpop.f32.mrf.mxu0  ;;  %v1239_v29 = vpop.f32.mrf.mxu1 }
 0x258   : > { %v1255_v0 = vadd.f32 %v1239_v29, %v1152_v23  ;;  %v1153_v15 = vadd.f32 %v1139_v28, %v1045_v11  ;;  %v3070_v63 = vpop.permute.xlu2 %1783 }
 0x25d   : > { %v1046_v31 = vpop.f32.mrf.mxu3 }
 0x25e   : > { %v1349_v4 = vpop.f32.mrf.mxu2  ;;  %v1047_v21 = vadd.f32 %v1046_v31, %v3034_v3 }
 0x25f   : > { %v3050_v33 = vadd.f32 %v1349_v4, %v1255_v0  ;;  %v1141_v34 = vpop.f32.mrf.mxu0  ;;  %v1242_v36 = vpop.f32.mrf.mxu1 }
 0x260   : > { %v1256_v19 = vadd.f32 %v1242_v36, %v1153_v15  ;;  %v1154_v4 = vadd.f32 %v1141_v34, %v1047_v21 }
 0x265   : > { %v1049_v37 = vpop.f32.mrf.mxu3 }
 0x266   : > { %v1352_v38 = vpop.f32.mrf.mxu2 }
 0x267   : > { %v1144_v39 = vpop.f32.mrf.mxu0  ;;  %v1244_v40 = vpop.f32.mrf.mxu1  ;;  %v1366_v22 = vadd.f32 %v1352_v38, %v1256_v19 }
 0x26d   : > { %v1051_v41 = vpop.f32.mrf.mxu3 }
 0x26e   : > { %v1354_v42 = vpop.f32.mrf.mxu2 }
 0x26f   : > { %v3052_v43 = vpop.f32.mrf.mxu0  ;;  %v1247_v45 = vpop.f32.mrf.mxu1 }
 0x275   : > { %v1432_v46 = vpop.f32.mrf.mxu3 }
 0x276   : > { %v1357_v47 = vpop.f32.mrf.mxu2  ;;  %v1452_v48 = vadd.f32 %v1432_v46, %v1362_v10  ;;  %v1257_v46 = vadd.f32 %v1244_v40, %v1154_v4 }
 0x277   : > { %v3054_v52 = vpop.f32.mrf.mxu1  ;;  %v1522_v51 = vpop.f32.mrf.mxu0 }
 0x278   : > { %v1542_v53 = vadd.f32 %v1522_v51, %v1452_v48  ;;  %v1050_v51 = vadd.f32 %v1049_v37, %v3044_v54  ;;  %v1367_v28 = vadd.f32 %v1354_v42, %v1257_v46 }
 0x27d   : > { %v1434_v55 = vpop.f32.mrf.mxu3 }
 0x27e   : > { %v3056_v56 = vpop.f32.mrf.mxu2  ;;  %v1453_v24 = vadd.f32 %v1434_v55, %v1363_v20  ;;  %v1052_v20 = vadd.f32 %v1051_v41, %v3046_v59 }
 0x27f   : > { %v1524_v57 = vpop.f32.mrf.mxu0  ;;  %v1612_v58 = vpop.f32.mrf.mxu1 }
 0x280   : > { %v1632_v60 = vadd.f32 %v1612_v58, %v1542_v53  ;;  %v1543_v38 = vadd.f32 %v1524_v57, %v1453_v24 }
 0x285   : > { %v1437_v61 = vpop.f32.mrf.mxu3 }
 0x286   : > { %v1702_v62 = vpop.f32.mrf.mxu2  ;;  %v1454_v37 = vadd.f32 %v1437_v61, %v3048_v27  ;;  %v1774_v27 = vpop.permute.xlu1 %1773 }
 0x287   : > { %v3058_v1 = vadd.f32 %v1702_v62, %v1632_v60  ;;  %v1527_v2 = vpop.f32.mrf.mxu0  ;;  %v1614_v6 = vpop.f32.mrf.mxu1  ;;  %v1155_v62 = vadd.f32 %v1144_v39, %v1050_v51 }
 0x288   : > { %v1769_v60 = vpop.permute.xlu2 %1768 }
 0x289   : > { %v1258_v34 = vadd.f32 %v1247_v45, %v1155_v62 }
 0x28b   : > { %v1368_v54 = vadd.f32 %v1357_v47, %v1258_v34 }
 0x28d   : > { %v3060_v7 = vpop.f32.mrf.mxu3 }
 0x28e   : > { %v1704_v8 = vpop.f32.mrf.mxu2 }
 0x28f   : > { %v1617_v9 = vpop.f32.mrf.mxu1  ;;  %v3062_v10 = vpop.f32.mrf.mxu0 }
 0x290   : > { %v1754_v61 = vpop.permute.xlu2 %1753 }
 0x295   : > { %v1442_v12 = vpop.f32.mrf.mxu3 }
 0x296   : > { %v1707_v13 = vpop.f32.mrf.mxu2  ;;  %v1456_v26 = vadd.f32 %v1442_v12, %v1366_v22  ;;  %v1633_v12 = vadd.f32 %v1614_v6, %v1543_v38 }
 0x297   : > { %v3065_v14 = vpop.f32.mrf.mxu1  ;;  %v1532_v17 = vpop.f32.mrf.mxu0 }
 0x298   : > { %v1546_v50 = vadd.f32 %v1532_v17, %v1456_v26  ;;  %v1723_v55 = vadd.f32 %v1704_v8, %v1633_v12 }
 0x29a   : > { %v1731_v45 = vadd.f32 %v1723_v55, %v2963_v30  ;;  %v1455_v30 = vadd.f32 %v3060_v7, %v3050_v33 }
 0x29d   : > { %v1444_v0 = vpop.f32.mrf.mxu3 }
 0x29e   : > { %v3068_v23 = vpop.f32.mrf.mxu2  ;;  %v1457_v58 = vadd.f32 %v1444_v0, %v1367_v28 }
 0x29f   : > { %v1622_v29 = vpop.f32.mrf.mxu1  ;;  %v1534_v48 = vpop.f32.mrf.mxu0 }
 0x2a0   : > { %v1636_v53 = vadd.f32 %v1622_v29, %v1546_v50  ;;  %v1547_v40 = vadd.f32 %v1534_v48, %v1457_v58  ;;  %v1544_v29 = vadd.f32 %v1527_v2, %v1454_v37  ;;  %v1545_v58 = vadd.f32 %v3062_v10, %v1455_v30 }
 0x2a2   : > { %v1634_v8 = vadd.f32 %v1617_v9, %v1544_v29  ;;  %v1635_v7 = vadd.f32 %v3065_v14, %v1545_v58 }
 0x2a4   : > { %v1724_v2 = vadd.f32 %v1707_v13, %v1634_v8  ;;  %v1725_v12 = vadd.f32 %v3068_v23, %v1635_v7 }
 0x2a5   : > { %v1447_v15 = vpop.f32.mrf.mxu3 }
 0x2a6   : > { %v1712_v36 = vpop.f32.mrf.mxu2  ;;  %v1458_v57 = vadd.f32 %v1447_v15, %v1368_v54 }
 0x2a7   : > { %v1726_v3 = vadd.f32 %v1712_v36, %v1636_v53  ;;  %v1624_v31 = vpop.f32.mrf.mxu1  ;;  %v1537_v21 = vpop.f32.mrf.mxu0 }
 0x2a8   : > { %v1637_v42 = vadd.f32 %v1624_v31, %v1547_v40  ;;  %v1548_v0 = vadd.f32 %v1537_v21, %v1458_v57  ;;  %v1779_v53 = vpop.permute.xlu0 %1778 }
 0x2a9   : > { %v1734_v11 = vadd.f32 %v1726_v3, %v2992_v5  ;;  %v1156_v5 = vadd.f32 %v3052_v43, %v1052_v20  ;;  %v1787_v43 = vadd.f32 %v1754_v61, %v1731_v45 }
 0x2ab   : > { %v1790_v17 = vadd.f32 %v1769_v60, %v1734_v11  ;;  %v1259_v47 = vadd.f32 %v3054_v52, %v1156_v5  ;;  %v1795_v9 = vmax.f32 %v1787_v43, 0.0  ;;  %v1759_v60 = vpop.permute.xlu1 %1758 }
 0x2ad   : > { %v1798_v19 = vmax.f32 %v1790_v17, 0.0  ;;  %v1369_v46 = vadd.f32 %v3056_v56, %v1259_v47  ;;  %v1449_v50 = vpop.f32.mrf.mxu3  ;;  %v1732_v56 = vadd.f32 %v1724_v2, %v2971_v32  ;;  %v1803_v62 = vmul.f32 %v1795_v9, %v2707_v16 }
 0x2ae   : > { %v1714_v22 = vpop.f32.mrf.mxu2  ;;  %v1733_v17 = vadd.f32 %v1725_v12, %v2986_v35 }
 0x2af   : > { %v1727_v26 = vadd.f32 %v1714_v22, %v1637_v42  ;;  %v1806_v39 = vmul.f32 %v1798_v19, %v2707_v16  ;;  %v1627_v6 = vpop.f32.mrf.mxu1  ;;  %v1459_v51 = vadd.f32 %v1449_v50, %v1369_v46  ;;  %v1539_v36 = vpop.f32.mrf.mxu0  ;;  %v1788_v11 = vadd.f32 %v1759_v60, %v1732_v56 }
 0x2b0   : > { %v1638_v24 = vadd.f32 %v1627_v6, %v1548_v0  ;;  %v1814_v40 = vsel %vm1810_vm7, %v1803_v62, 0.0  ;;  %v1764_v54 = vpop.permute.xlu0 %1763  ;;  %v1730_v22 = vadd.f32 %v3058_v1, %v2948_v25 }
 0x2b1   : > { %v1735_v59 = vadd.f32 %v1727_v26, %v3009_v44  ;;  %v1823_v41 = vsel %vm1810_vm7, %v1806_v39, 0.0  ;;  %v1549_v13 = vadd.f32 %v1539_v36, %v1459_v51  ;;  %v1796_v55 = vmax.f32 %v1788_v11, 0.0 }
 0x2b2   : > { %1824 = vadd.xlane.f32.xlu2 %v1823_v41  ;;  %v1789_v37 = vadd.f32 %v1764_v54, %v1733_v17 }
 0x2b3   : > { %v1791_v4 = vadd.f32 %v1774_v27, %v1735_v59  ;;  %v1804_v19 = vmul.f32 %v1796_v55, %v2707_v16 }
 0x2b4   : > { %v1797_v57 = vmax.f32 %v1789_v37, 0.0 }
 0x2b5   : > { %v1799_v44 = vmax.f32 %v1791_v4, 0.0 }
 0x2b6   : > { %v1717_v48 = vpop.f32.mrf.mxu2 }
 0x2b7   : > { %v1728_v28 = vadd.f32 %v1717_v48, %v1638_v24  ;;  %v1807_v52 = vmul.f32 %v1799_v44, %v2707_v16  ;;  %v1629_v33 = vpop.f32.mrf.mxu1  ;;  %v1843_v24 = vld [vmem:[%s3138_s7] sm:$0xff]  ;;  %v1844_v44 = vld [vmem:[%s3138_s7 + $0x8] sm:$0x3] }
 0x2b8   : > { %v1639_v15 = vadd.f32 %v1629_v33, %v1549_v13  ;;  %v1749_v26 = vpop.permute.xlu0 %1748  ;;  %v1845_v48 = vld [vmem:[%s3139_s8] sm:$0xff] }
 0x2b9   : > { %v1736_v3 = vadd.f32 %v1728_v28, %v3021_v49  ;;  %v1826_v31 = vsel %vm1810_vm7, %v1807_v52, 0.0  ;;  %v1786_v39 = vadd.f32 %v1749_v26, %v1730_v22  ;;  %v1846_v52 = vld [vmem:[%s3139_s8 + $0x8] sm:$0x3] }
 0x2ba   : > { %1827 = vadd.xlane.f32.xlu0 %v1826_v31 }
 0x2bb   : > { %v1792_v38 = vadd.f32 %v1779_v53, %v1736_v3  ;;  %v1794_v45 = vmax.f32 %v1786_v39, 0.0 }
 0x2bd   : > { %v1800_v10 = vmax.f32 %v1792_v38, 0.0  ;;  %v1802_v6 = vmul.f32 %v1794_v45, %v2707_v16 }
 0x2be   : > { %v1719_v34 = vpop.f32.mrf.mxu2 }
 0x2bf   : > { %v1729_v32 = vadd.f32 %v1719_v34, %v1639_v15  ;;  %v1808_v49 = vmul.f32 %v1800_v10, %v2707_v16  ;;  %v1811_v29 = vsel %vm1810_vm7, %v1802_v6, 0.0 }
 0x2c1   : > { %v1737_v14 = vadd.f32 %v1729_v32, %v3032_v18  ;;  %v1829_v20 = vsel %vm1810_vm7, %v1808_v49, 0.0  ;;  %v1817_v18 = vsel %vm1810_vm7, %v1804_v19, 0.0 }
 0x2c2   : > { %1815 = vadd.xlane.f32.xlu0 %v1814_v40  ;;  %1830 = vadd.xlane.f32.xlu2 %v1829_v20 }
 0x2c3   : > { %v1793_v23 = vadd.f32 %v3070_v63, %v1737_v14  ;;  %v1805_v63 = vmul.f32 %v1797_v57, %v2707_v16 }
 0x2c5   : > { %v1801_v42 = vmax.f32 %v1793_v23, 0.0  ;;  %v1820_v5 = vsel %vm1810_vm7, %v1805_v63, 0.0 }
 0x2c7   : > { %v1809_v21 = vmul.f32 %v1801_v42, %v2707_v16 }
 0x2c9   : > { %v1832_v35 = vsel %vm1810_vm7, %v1809_v21, 0.0 }
 0x2ca   : > { %1833 = vadd.xlane.f32.xlu1 %v1832_v35  ;;  %1818 = vadd.xlane.f32.xlu2 %v1817_v18 }
 0x2d2   : > { %1821 = vadd.xlane.f32.xlu1 %v1820_v5 }
 0x2da   : > { %1812 = vadd.xlane.f32.xlu1 %v1811_v29 }
 0x325   : > { %v1825_v25 = vpop.xlane.xlu2 %1824 }
 0x326   : > { %v1839_v8 = vmul.f32 0.015625, %v1825_v25 }
 0x32d   : > { %v1828_v59 = vpop.xlane.xlu0 %1827 }
 0x32e   : > { %v1840_v61 = vmul.f32 0.015625, %v1828_v59 }
 0x335   : > { %v1831_v1 = vpop.xlane.xlu2 %1830  ;;  %v1816_v16 = vpop.xlane.xlu0 %1815 }
 0x336   : > { %v1841_v47 = vmul.f32 0.015625, %v1831_v1  ;;  %v1836_v50 = vmul.f32 0.015625, %v1816_v16 }
 0x33d   : > { %v1834_v41 = vpop.xlane.xlu1 %1833  ;;  %v1819_v0 = vpop.xlane.xlu2 %1818 }
 0x33e   : > { %v1842_v27 = vmul.f32 0.015625, %v1834_v41  ;;  %v1837_v43 = vmul.f32 0.015625, %v1819_v0 }
 0x340   : > { %1861 = vmatpush.msra.mxu3 %v1842_v27 }
 0x342   : > { %1862 = vmatpush.msra.mxu3 %v1841_v47 }
 0x344   : > { %1863 = vmatpush.msra.mxu3 %v1840_v61 }
 0x345   : > { %v1822_v4 = vpop.xlane.xlu1 %1821 }
 0x346   : > { %v1838_v46 = vmul.f32 0.015625, %v1822_v4  ;;  %1864 = vmatpush.msra.mxu3 %v1839_v8 }
 0x348   : > { %1865 = vmatpush.msra.mxu3 %v1838_v46 }
 0x34a   : > { %1866 = vmatpush.msra.mxu3 %v1837_v43 }
 0x34c   : > { %1867 = vmatpush.msra.mxu3 %v1836_v50 }
 0x34d   : > { %v1813_v30 = vpop.xlane.xlu1 %1812 }
 0x34e   : > { %v1835_v2 = vmul.f32 0.015625, %v1813_v30 }
 0x350   : > { %1868 = vmatpush.msra.mxu3 %v1835_v2 }
 0x351   : > { %2379 = vmatmul.msk.f32.vlgmr.msra.gmra.mxu3 %vm926_vm5, %v1843_v24 }
 0x359   : > { %2380 = vmatmul.msk.f32.gmra.mxu3 %vm926_vm5, %v1844_v44 }
 0x3d4   : > { %v1870_v51 = vpop.f32.mrf.mxu3 }
 0x3d5   : > { %v1871_v28 = vadd.f32 %v1870_v51, %v1845_v48 }
 0x3d7   : > { %1877 = vst.msk [vmem:[%s332_s24] sm:$0xff] %vm1202_vm6, %v1871_v28 }
 0x3dc   : > { %v1873_v53 = vpop.f32.mrf.mxu3 }
 0x3dd   : > { %v1874_v36 = vadd.f32 %v1873_v53, %v1846_v52 }
 0x3df   : > { %1879 = vst.msk [vmem:[%s332_s24 + $0x8] sm:$0x3] %vm1878_vm8, %v1874_v36 }
 0x3e0 PF: > { %s19_s30 = sadd.s32 1, %s2497_s30  }
 0x3e1   : > { %p16_p4 = scmp.ge.s32.totalorder %s19_s30, 4  }
 0x3e3   :  { %18 = sbr.rel (!%p16_p4) target bundleno = 1 (0x1), region = 94 }

</bundles_post_ra>
